<compile_context>
chip_gen: v5e
topology: v5e:2x2
jax: 0.10.0
libtpu: 0.0.40
codegen_flags: <defaults>
</compile_context>

<pallas_src>
import functools

import jax
import jax.numpy as jnp
from jax.experimental import pallas as pl
from jax.experimental.pallas import tpu as pltpu


# ----------------------------------------------------------------------------
# Pallas kernel: 4-layer LSTM (streamed next-layer projection) + mean + linear
# ----------------------------------------------------------------------------
def _lstm_kernel(x_ref,      # (T*Bp, d_in)  f32  layer-0 input (time-major, batch-padded)
                 wih0_ref,   # (d_in, 4H)    f32  layer-0 input weights (i,f,o,g order)
                 wih_ref,    # (L-1, H, 4H)  bf16 layers 1.. input weights
                 whh_ref,    # (L, H, 4H)    bf16 hidden weights
                 b_ref,      # (L, 1, 4H)    f32  b_ih + b_hh
                 wreg_ref,   # (H, DOp)      bf16 regressor weight (transposed, lane-padded)
                 breg_ref,   # (1, DOp)      f32  regressor bias (lane-padded)
                 out_ref,    # (Bp, DOp)     f32  full padded output tile
                 pre_a_ref,  # scratch (T*Bp, 4H) f32  ping-pong input projection
                 pre_b_ref,  # scratch (T*Bp, 4H) f32
                 *, T, Bp, d_in):
    L, H, H4 = whh_ref.shape
    H3 = 3 * H

    # ---- layer-0 input projection ------------------------------------------
    if d_in <= 8:
        # Tiny d_in (default d_in=1): VPU broadcast outer product; the MXU
        # matmul would be >90% padding and force a padded lane-sparse x copy.
        acc = jnp.zeros((T * Bp, H4), jnp.float32)
        for k in range(d_in):
            acc = acc + x_ref[:, k:k + 1] * wih0_ref[k:k + 1, :]
        pre_a_ref[...] = acc + b_ref[0]
    else:
        pre_a_ref[...] = (
            jnp.dot(x_ref[...].astype(jnp.bfloat16),
                    wih0_ref[...].astype(jnp.bfloat16),
                    preferred_element_type=jnp.float32) + b_ref[0])

    bufs = (pre_a_ref, pre_b_ref)
    hsum = None

    for l in range(L):                                    # static unroll over layers
        cur = bufs[l % 2]                                 # this layer's pre-projection
        nxt = bufs[(l + 1) % 2]                           # next layer's pre-projection
        is_last = (l == L - 1)

        whh = whh_ref[l]                                  # (H, 4H) bf16, hoisted
        if not is_last:
            wih_next = wih_ref[l]                         # (H, 4H) bf16 = layer l+1 W_ih
            # Hoist the bias broadcast out of the unrolled time loop.
            b_next = jnp.broadcast_to(b_ref[l + 1], (Bp, H4))

        h_bf = jnp.zeros((Bp, H), jnp.bfloat16)
        c = jnp.zeros((Bp, H), jnp.float32)
        if is_last:
            hsum = jnp.zeros((Bp, H), jnp.float32)

        for t in range(T):                                # static unroll over time
            r0 = t * Bp
            pre_t = cur[r0:r0 + Bp, :]                    # (Bp, 4H)
            if t == 0:
                gates = pre_t                             # h == 0: skip the matmul
            else:
                gates = pre_t + jnp.dot(h_bf, whh,
                                        preferred_element_type=jnp.float32)
            ifo = jax.nn.sigmoid(gates[:, :H3])           # one sigmoid over i|f|o
            g_g = jnp.tanh(gates[:, H3:])                 # one tanh over g
            c = ifo[:, H:2 * H] * c + ifo[:, :H] * g_g    # f*c + i*g   (f32)
            h_f32 = ifo[:, 2 * H:H3] * jnp.tanh(c)        # o*tanh(c)   (f32)
            h_bf = h_f32.astype(jnp.bfloat16)             # single cast, reused below
            if is_last:
                hsum = hsum + h_f32                       # running time-sum for mean
            else:
                # Stream layer (l+1)'s input projection for step t right here —
                # independent MXU work interleaved with the serial cell chain.
                nxt[r0:r0 + Bp, :] = (
                    jnp.dot(h_bf, wih_next,
                            preferred_element_type=jnp.float32) + b_next)

    # ---- mean over time (torch: x.mean(dim=1)), then regressor --------------
    mean_h = hsum * (1.0 / T)                             # (Bp, H) f32
    out_ref[...] = (
        jnp.dot(mean_h.astype(jnp.bfloat16), wreg_ref[...],
                preferred_element_type=jnp.float32) + breg_ref[...])


# ----------------------------------------------------------------------------
# Parameter construction (deterministic, PyTorch-style uniform init)
# ----------------------------------------------------------------------------
def init_params(key, d_in=1, d_hidden=128, d_out=3, num_layers=4):
    k = 1.0 / jnp.sqrt(jnp.float32(d_hidden))
    layers = []
    for l in range(num_layers):
        in_dim = d_in if l == 0 else d_hidden
        key, k1, k2, k3, k4 = jax.random.split(key, 5)
        layers.append({
            "w_ih": jax.random.uniform(k1, (4 * d_hidden, in_dim), jnp.float32, -k, k),
            "w_hh": jax.random.uniform(k2, (4 * d_hidden, d_hidden), jnp.float32, -k, k),
            "b_ih": jax.random.uniform(k3, (4 * d_hidden,), jnp.float32, -k, k),
            "b_hh": jax.random.uniform(k4, (4 * d_hidden,), jnp.float32, -k, k),
        })
    key, k1, k2 = jax.random.split(key, 3)
    return {
        "layers": layers,
        "w_reg": jax.random.uniform(k1, (d_out, d_hidden), jnp.float32, -k, k),
        "b_reg": jax.random.uniform(k2, (d_out,), jnp.float32, -k, k),
    }


# ----------------------------------------------------------------------------
# One-time weight prepacking (hoisted OUT of the per-call forward path):
# gate reorder (i,f,g,o) -> (i,f,o,g), transpose, stack, bf16 cast, lane-pad.
# ----------------------------------------------------------------------------
def prepack_params(params):
    layers = params["layers"]
    H = layers[0]["w_hh"].shape[1]
    d_out = params["w_reg"].shape[0]
    DOp = ((d_out + 127) // 128) * 128
    gate_perm = jnp.array([0, 1, 3, 2])

    def reorder(w):
        w4 = w.reshape(4, H, *w.shape[1:])
        return w4[gate_perm].reshape(w.shape)

    wih0 = reorder(layers[0]["w_ih"]).T.astype(jnp.float32)                  # (d_in, 4H)
    wih_rest = jnp.stack(
        [reorder(l["w_ih"]).T for l in layers[1:]]).astype(jnp.bfloat16)     # (L-1, H, 4H)
    whh = jnp.stack(
        [reorder(l["w_hh"]).T for l in layers]).astype(jnp.bfloat16)         # (L, H, 4H)
    bias = jnp.stack(
        [reorder(l["b_ih"] + l["b_hh"])[None, :] for l in layers])           # (L, 1, 4H)
    w_reg = (jnp.zeros((H, DOp), jnp.bfloat16)
             .at[:, :d_out].set(params["w_reg"].T.astype(jnp.bfloat16)))     # (H, DOp)
    b_reg = (jnp.zeros((1, DOp), jnp.float32)
             .at[:, :d_out].set(params["b_reg"][None, :]))                   # (1, DOp)
    return {"wih0": wih0, "wih_rest": wih_rest, "whh": whh, "bias": bias,
            "w_reg": w_reg, "b_reg": b_reg}


# ----------------------------------------------------------------------------
# Jitted forward: only x layout plumbing + pallas_call (weights are prepacked)
# ----------------------------------------------------------------------------
@functools.partial(jax.jit, static_argnames=("d_out",))
def lstm_model_forward(x, tau, packed, *, d_out):
    del tau                                   # use_tau=False path
    if x.ndim == 2:
        x = x[..., None]                      # (B, T, d_in)
    x = x.astype(jnp.float32)
    B, T, d_in = x.shape                      # static under jit

    whh = packed["whh"]
    L, H, H4 = whh.shape
    DOp = packed["w_reg"].shape[1]
    Bp = max(8, ((B + 7) // 8) * 8)           # pad batch to sublane multiple

    # Layer-0 input: time-major, batch-padded, flattened to (T*Bp, d_in).
    x_tm = jnp.transpose(x, (1, 0, 2))                                   # (T, B, d_in)
    x_flat = (jnp.zeros((T, Bp, d_in), jnp.float32)
              .at[:, :B, :].set(x_tm)
              .reshape(T * Bp, d_in))

    kernel = functools.partial(_lstm_kernel, T=T, Bp=Bp, d_in=d_in)

    out = pl.pallas_call(
        kernel,
        out_shape=jax.ShapeDtypeStruct((Bp, DOp), jnp.float32),
        grid=(1,),
        in_specs=[
            pl.BlockSpec((T * Bp, d_in), lambda i: (0, 0)),
            pl.BlockSpec((d_in, H4), lambda i: (0, 0)),
            pl.BlockSpec((L - 1, H, H4), lambda i: (0, 0, 0)),
            pl.BlockSpec((L, H, H4), lambda i: (0, 0, 0)),
            pl.BlockSpec((L, 1, H4), lambda i: (0, 0, 0)),
            pl.BlockSpec((H, DOp), lambda i: (0, 0)),
            pl.BlockSpec((1, DOp), lambda i: (0, 0)),
        ],
        out_specs=pl.BlockSpec((Bp, DOp), lambda i: (0, 0)),
        scratch_shapes=[
            pltpu.VMEM((T * Bp, H4), jnp.float32),   # pre buffer A (ping)
            pltpu.VMEM((T * Bp, H4), jnp.float32),   # pre buffer B (pong)
        ],
        compiler_params=pltpu.CompilerParams(
            dimension_semantics=("arbitrary",),
        ),
    )(x_flat, packed["wih0"], packed["wih_rest"], packed["whh"],
      packed["bias"], packed["w_reg"], packed["b_reg"])

    return out[:B, :d_out]


# ----------------------------------------------------------------------------
# Pure-JAX f32 reference (mirrors torch.nn.LSTM gate equations)
# ----------------------------------------------------------------------------
def lstm_model_reference(x, params):
    if x.ndim == 2:
        x = x[..., None]
    x = x.astype(jnp.float32)
    B, T, _ = x.shape
    H = params["layers"][0]["w_hh"].shape[1]
    seq = x
    for lyr in params["layers"]:
        w_ih, w_hh = lyr["w_ih"], lyr["w_hh"]
        b = lyr["b_ih"] + lyr["b_hh"]
        h = jnp.zeros((B, H), jnp.float32)
        c = jnp.zeros((B, H), jnp.float32)
        outs = []
        for t in range(T):
            g = seq[:, t, :] @ w_ih.T + h @ w_hh.T + b
            i_g = jax.nn.sigmoid(g[:, 0 * H:1 * H])
            f_g = jax.nn.sigmoid(g[:, 1 * H:2 * H])
            g_g = jnp.tanh(g[:, 2 * H:3 * H])
            o_g = jax.nn.sigmoid(g[:, 3 * H:4 * H])
            c = f_g * c + i_g * g_g
            h = o_g * jnp.tanh(c)
            outs.append(h)
        seq = jnp.stack(outs, axis=1)
    feat = seq.mean(axis=1)
    return feat @ params["w_reg"].T + params["b_reg"]


if __name__ == "__main__":
    key = jax.random.PRNGKey(0)
    kp, kx, kt = jax.random.split(key, 3)

    B, T = 2, 8
    D_HIDDEN, D_OUT, N_LAYERS = 128, 3, 4
    params = init_params(kp, d_in=1, d_hidden=D_HIDDEN, d_out=D_OUT,
                         num_layers=N_LAYERS)

    # One-time weight prepack (cached against params; NOT on the forward path).
    packed = jax.block_until_ready(prepack_params(params))

    x = jax.random.normal(kx, (B, T), jnp.float32)      # (B, T) -> unsqueezed inside
    tau = jax.random.normal(kt, (B, T), jnp.float32)    # unused (use_tau=False)

    out = lstm_model_forward(x, tau, packed, d_out=D_OUT)
    out = jax.block_until_ready(out)

    ref = lstm_model_reference(x, params)
    assert out.shape == (B, D_OUT), out.shape
    # bf16 matmul operands (f32 accumulation / f32 cell state) -> looser tol
    assert jnp.allclose(out, ref, rtol=2e-2, atol=2e-2), (out, ref)

    print("KERNEL_OK")
</pallas_src>

<mosaic_0001>
module attributes {stable_mosaic.version = 11 : i64} {
  func.func @_lstm_kernel(%arg0: i32, %arg1: memref<64x1xf32, #tpu.memory_space<vmem>>, %arg2: memref<1x512xf32, #tpu.memory_space<vmem>>, %arg3: memref<3x128x512xbf16, #tpu.memory_space<vmem>>, %arg4: memref<4x128x512xbf16, #tpu.memory_space<vmem>>, %arg5: memref<4x1x512xf32, #tpu.memory_space<vmem>>, %arg6: memref<128x128xbf16, #tpu.memory_space<vmem>>, %arg7: memref<1x128xf32, #tpu.memory_space<vmem>>, %arg8: memref<8x128xf32, #tpu.memory_space<vmem>>, %arg9: memref<64x512xf32, #tpu.memory_space<vmem>>, %arg10: memref<64x512xf32, #tpu.memory_space<vmem>>) attributes {dimension_semantics = [#tpu.dimension_semantics<arbitrary>], iteration_bounds = array<i64: 1>, scalar_prefetch = 0 : i64, scratch_operands = 2 : i64, tpu.core_type = #tpu.core_type<tc>, window_params = [{pipeline_mode = #tpu.pipeline_mode<synchronous>, transform_indices = @transform_0, window_bounds = array<i64: 64, 1>}, {pipeline_mode = #tpu.pipeline_mode<synchronous>, transform_indices = @transform_1, window_bounds = array<i64: 1, 512>}, {pipeline_mode = #tpu.pipeline_mode<synchronous>, transform_indices = @transform_2, window_bounds = array<i64: 3, 128, 512>}, {pipeline_mode = #tpu.pipeline_mode<synchronous>, transform_indices = @transform_3, window_bounds = array<i64: 4, 128, 512>}, {pipeline_mode = #tpu.pipeline_mode<synchronous>, transform_indices = @transform_4, window_bounds = array<i64: 4, 1, 512>}, {pipeline_mode = #tpu.pipeline_mode<synchronous>, transform_indices = @transform_5, window_bounds = array<i64: 128, 128>}, {pipeline_mode = #tpu.pipeline_mode<synchronous>, transform_indices = @transform_6, window_bounds = array<i64: 1, 128>}, {pipeline_mode = #tpu.pipeline_mode<synchronous>, transform_indices = @transform_7, window_bounds = array<i64: 8, 128>}]} {
    %cst = arith.constant 0.000000e+00 : f32
    %0 = vector.broadcast %cst : f32 to vector<64x512xf32>
    %c0 = arith.constant 0 : index
    %c0_0 = arith.constant 0 : index
    %1 = vector.load %arg1[%c0, %c0_0] : memref<64x1xf32, #tpu.memory_space<vmem>>, vector<64x1xf32>
    %c0_1 = arith.constant 0 : index
    %c0_2 = arith.constant 0 : index
    %2 = vector.load %arg2[%c0_1, %c0_2] : memref<1x512xf32, #tpu.memory_space<vmem>>, vector<1x512xf32>
    %3 = vector.broadcast %1 : vector<64x1xf32> to vector<64x512xf32>
    %4 = vector.broadcast %2 : vector<1x512xf32> to vector<64x512xf32>
    %5 = arith.mulf %3, %4 : vector<64x512xf32>
    %6 = arith.addf %0, %5 : vector<64x512xf32>
    %c0_3 = arith.constant 0 : index
    %c0_4 = arith.constant 0 : index
    %c0_5 = arith.constant 0 : index
    %7 = vector.load %arg5[%c0_3, %c0_4, %c0_5] : memref<4x1x512xf32, #tpu.memory_space<vmem>>, vector<1x1x512xf32>
    %8 = vector.shape_cast %7 : vector<1x1x512xf32> to vector<1x512xf32>
    %9 = vector.broadcast %8 : vector<1x512xf32> to vector<64x512xf32>
    %10 = arith.addf %6, %9 : vector<64x512xf32>
    %c0_6 = arith.constant 0 : index
    %c0_7 = arith.constant 0 : index
    %11 = vector.load %arg9[%c0_6, %c0_7] : memref<64x512xf32, #tpu.memory_space<vmem>>, vector<64x512xf32>
    tpu.vector_store %arg9[%c0_6, %c0_7], %10 {strides = array<i32>} : memref<64x512xf32, #tpu.memory_space<vmem>>, vector<64x512xf32>,
    %c0_8 = arith.constant 0 : index
    %c0_9 = arith.constant 0 : index
    %c0_10 = arith.constant 0 : index
    %12 = vector.load %arg4[%c0_8, %c0_9, %c0_10] : memref<4x128x512xbf16, #tpu.memory_space<vmem>>, vector<1x128x512xbf16>
    %13 = vector.shape_cast %12 : vector<1x128x512xbf16> to vector<128x512xbf16>
    %c0_11 = arith.constant 0 : index
    %c0_12 = arith.constant 0 : index
    %c0_13 = arith.constant 0 : index
    %14 = vector.load %arg3[%c0_11, %c0_12, %c0_13] : memref<3x128x512xbf16, #tpu.memory_space<vmem>>, vector<1x128x512xbf16>
    %15 = vector.shape_cast %14 : vector<1x128x512xbf16> to vector<128x512xbf16>
    %c1 = arith.constant 1 : index
    %c0_14 = arith.constant 0 : index
    %c0_15 = arith.constant 0 : index
    %16 = vector.load %arg5[%c1, %c0_14, %c0_15] : memref<4x1x512xf32, #tpu.memory_space<vmem>>, vector<1x1x512xf32>
    %17 = vector.shape_cast %16 : vector<1x1x512xf32> to vector<1x512xf32>
    %18 = vector.shape_cast %17 : vector<1x512xf32> to vector<1x512xf32>
    %19 = vector.broadcast %18 : vector<1x512xf32> to vector<8x512xf32>
    %cst_16 = arith.constant 0.000000e+00 : f32
    %20 = vector.broadcast %cst_16 : f32 to vector<8x128xf32>
    %c0_17 = arith.constant 0 : index
    %c0_18 = arith.constant 0 : index
    %21 = vector.load %arg9[%c0_17, %c0_18] : memref<64x512xf32, #tpu.memory_space<vmem>>, vector<8x512xf32>
    %22 = vector.extract_strided_slice %21 {offsets = [0, 0], sizes = [8, 384], strides = [1, 1]} : vector<8x512xf32> to vector<8x384xf32>
    %23 = arith.negf %22 : vector<8x384xf32>
    %24 = math.exp %23 : vector<8x384xf32>
    %cst_19 = arith.constant 1.000000e+00 : f32
    %25 = vector.broadcast %cst_19 : f32 to vector<8x384xf32>
    %26 = arith.addf %25, %24 : vector<8x384xf32>
    %27 = arith.divf %25, %26 : vector<8x384xf32>
    %28 = vector.extract_strided_slice %21 {offsets = [0, 384], sizes = [8, 128], strides = [1, 1]} : vector<8x512xf32> to vector<8x128xf32>
    %29 = math.tanh %28 : vector<8x128xf32>
    %30 = vector.extract_strided_slice %27 {offsets = [0, 128], sizes = [8, 128], strides = [1, 1]} : vector<8x384xf32> to vector<8x128xf32>
    %31 = arith.mulf %30, %20 : vector<8x128xf32>
    %32 = vector.extract_strided_slice %27 {offsets = [0, 0], sizes = [8, 128], strides = [1, 1]} : vector<8x384xf32> to vector<8x128xf32>
    %33 = arith.mulf %32, %29 : vector<8x128xf32>
    %34 = arith.addf %31, %33 : vector<8x128xf32>
    %35 = vector.extract_strided_slice %27 {offsets = [0, 256], sizes = [8, 128], strides = [1, 1]} : vector<8x384xf32> to vector<8x128xf32>
    %36 = math.tanh %34 : vector<8x128xf32>
    %37 = arith.mulf %35, %36 : vector<8x128xf32>
    %38 = arith.truncf %37 : vector<8x128xf32> to vector<8x128xbf16>
    %cst_20 = arith.constant dense<0.000000e+00> : vector<8x512xf32>
    %39 = tpu.matmul %38, %15, %cst_20 {dimension_numbers = #tpu.dot_dimension_numbers<[1], [0], [0], [1], [0, 0, 1, 1], [], []>} : vector<8x128xbf16>, vector<128x512xbf16>, vector<8x512xf32> -> vector<8x512xf32>
    %40 = arith.addf %39, %19 : vector<8x512xf32>
    %c0_21 = arith.constant 0 : index
    %c0_22 = arith.constant 0 : index
    %41 = vector.load %arg10[%c0_21, %c0_22] : memref<64x512xf32, #tpu.memory_space<vmem>>, vector<8x512xf32>
    tpu.vector_store %arg10[%c0_21, %c0_22], %40 {strides = array<i32>} : memref<64x512xf32, #tpu.memory_space<vmem>>, vector<8x512xf32>,
    %c8 = arith.constant 8 : index
    %c0_23 = arith.constant 0 : index
    %42 = vector.load %arg9[%c8, %c0_23] : memref<64x512xf32, #tpu.memory_space<vmem>>, vector<8x512xf32>
    %cst_24 = arith.constant dense<0.000000e+00> : vector<8x512xf32>
    %43 = tpu.matmul %38, %13, %cst_24 {dimension_numbers = #tpu.dot_dimension_numbers<[1], [0], [0], [1], [0, 0, 1, 1], [], []>} : vector<8x128xbf16>, vector<128x512xbf16>, vector<8x512xf32> -> vector<8x512xf32>
    %44 = arith.addf %42, %43 : vector<8x512xf32>
    %45 = vector.extract_strided_slice %44 {offsets = [0, 0], sizes = [8, 384], strides = [1, 1]} : vector<8x512xf32> to vector<8x384xf32>
    %46 = arith.negf %45 : vector<8x384xf32>
    %47 = math.exp %46 : vector<8x384xf32>
    %cst_25 = arith.constant 1.000000e+00 : f32
    %48 = vector.broadcast %cst_25 : f32 to vector<8x384xf32>
    %49 = arith.addf %48, %47 : vector<8x384xf32>
    %50 = arith.divf %48, %49 : vector<8x384xf32>
    %51 = vector.extract_strided_slice %44 {offsets = [0, 384], sizes = [8, 128], strides = [1, 1]} : vector<8x512xf32> to vector<8x128xf32>
    %52 = math.tanh %51 : vector<8x128xf32>
    %53 = vector.extract_strided_slice %50 {offsets = [0, 128], sizes = [8, 128], strides = [1, 1]} : vector<8x384xf32> to vector<8x128xf32>
    %54 = arith.mulf %53, %34 : vector<8x128xf32>
    %55 = vector.extract_strided_slice %50 {offsets = [0, 0], sizes = [8, 128], strides = [1, 1]} : vector<8x384xf32> to vector<8x128xf32>
    %56 = arith.mulf %55, %52 : vector<8x128xf32>
    %57 = arith.addf %54, %56 : vector<8x128xf32>
    %58 = vector.extract_strided_slice %50 {offsets = [0, 256], sizes = [8, 128], strides = [1, 1]} : vector<8x384xf32> to vector<8x128xf32>
    %59 = math.tanh %57 : vector<8x128xf32>
    %60 = arith.mulf %58, %59 : vector<8x128xf32>
    %61 = arith.truncf %60 : vector<8x128xf32> to vector<8x128xbf16>
    %cst_26 = arith.constant dense<0.000000e+00> : vector<8x512xf32>
    %62 = tpu.matmul %61, %15, %cst_26 {dimension_numbers = #tpu.dot_dimension_numbers<[1], [0], [0], [1], [0, 0, 1, 1], [], []>} : vector<8x128xbf16>, vector<128x512xbf16>, vector<8x512xf32> -> vector<8x512xf32>
    %63 = arith.addf %62, %19 : vector<8x512xf32>
    %c8_27 = arith.constant 8 : index
    %c0_28 = arith.constant 0 : index
    %64 = vector.load %arg10[%c8_27, %c0_28] : memref<64x512xf32, #tpu.memory_space<vmem>>, vector<8x512xf32>
    tpu.vector_store %arg10[%c8_27, %c0_28], %63 {strides = array<i32>} : memref<64x512xf32, #tpu.memory_space<vmem>>, vector<8x512xf32>,
    %c16 = arith.constant 16 : index
    %c0_29 = arith.constant 0 : index
    %65 = vector.load %arg9[%c16, %c0_29] : memref<64x512xf32, #tpu.memory_space<vmem>>, vector<8x512xf32>
    %cst_30 = arith.constant dense<0.000000e+00> : vector<8x512xf32>
    %66 = tpu.matmul %61, %13, %cst_30 {dimension_numbers = #tpu.dot_dimension_numbers<[1], [0], [0], [1], [0, 0, 1, 1], [], []>} : vector<8x128xbf16>, vector<128x512xbf16>, vector<8x512xf32> -> vector<8x512xf32>
    %67 = arith.addf %65, %66 : vector<8x512xf32>
    %68 = vector.extract_strided_slice %67 {offsets = [0, 0], sizes = [8, 384], strides = [1, 1]} : vector<8x512xf32> to vector<8x384xf32>
    %69 = arith.negf %68 : vector<8x384xf32>
    %70 = math.exp %69 : vector<8x384xf32>
    %cst_31 = arith.constant 1.000000e+00 : f32
    %71 = vector.broadcast %cst_31 : f32 to vector<8x384xf32>
    %72 = arith.addf %71, %70 : vector<8x384xf32>
    %73 = arith.divf %71, %72 : vector<8x384xf32>
    %74 = vector.extract_strided_slice %67 {offsets = [0, 384], sizes = [8, 128], strides = [1, 1]} : vector<8x512xf32> to vector<8x128xf32>
    %75 = math.tanh %74 : vector<8x128xf32>
    %76 = vector.extract_strided_slice %73 {offsets = [0, 128], sizes = [8, 128], strides = [1, 1]} : vector<8x384xf32> to vector<8x128xf32>
    %77 = arith.mulf %76, %57 : vector<8x128xf32>
    %78 = vector.extract_strided_slice %73 {offsets = [0, 0], sizes = [8, 128], strides = [1, 1]} : vector<8x384xf32> to vector<8x128xf32>
    %79 = arith.mulf %78, %75 : vector<8x128xf32>
    %80 = arith.addf %77, %79 : vector<8x128xf32>
    %81 = vector.extract_strided_slice %73 {offsets = [0, 256], sizes = [8, 128], strides = [1, 1]} : vector<8x384xf32> to vector<8x128xf32>
    %82 = math.tanh %80 : vector<8x128xf32>
    %83 = arith.mulf %81, %82 : vector<8x128xf32>
    %84 = arith.truncf %83 : vector<8x128xf32> to vector<8x128xbf16>
    %cst_32 = arith.constant dense<0.000000e+00> : vector<8x512xf32>
    %85 = tpu.matmul %84, %15, %cst_32 {dimension_numbers = #tpu.dot_dimension_numbers<[1], [0], [0], [1], [0, 0, 1, 1], [], []>} : vector<8x128xbf16>, vector<128x512xbf16>, vector<8x512xf32> -> vector<8x512xf32>
    %86 = arith.addf %85, %19 : vector<8x512xf32>
    %c16_33 = arith.constant 16 : index
    %c0_34 = arith.constant 0 : index
    %87 = vector.load %arg10[%c16_33, %c0_34] : memref<64x512xf32, #tpu.memory_space<vmem>>, vector<8x512xf32>
    tpu.vector_store %arg10[%c16_33, %c0_34], %86 {strides = array<i32>} : memref<64x512xf32, #tpu.memory_space<vmem>>, vector<8x512xf32>,
    %c24 = arith.constant 24 : index
    %c0_35 = arith.constant 0 : index
    %88 = vector.load %arg9[%c24, %c0_35] : memref<64x512xf32, #tpu.memory_space<vmem>>, vector<8x512xf32>
    %cst_36 = arith.constant dense<0.000000e+00> : vector<8x512xf32>
    %89 = tpu.matmul %84, %13, %cst_36 {dimension_numbers = #tpu.dot_dimension_numbers<[1], [0], [0], [1], [0, 0, 1, 1], [], []>} : vector<8x128xbf16>, vector<128x512xbf16>, vector<8x512xf32> -> vector<8x512xf32>
    %90 = arith.addf %88, %89 : vector<8x512xf32>
    %91 = vector.extract_strided_slice %90 {offsets = [0, 0], sizes = [8, 384], strides = [1, 1]} : vector<8x512xf32> to vector<8x384xf32>
    %92 = arith.negf %91 : vector<8x384xf32>
    %93 = math.exp %92 : vector<8x384xf32>
    %cst_37 = arith.constant 1.000000e+00 : f32
    %94 = vector.broadcast %cst_37 : f32 to vector<8x384xf32>
    %95 = arith.addf %94, %93 : vector<8x384xf32>
    %96 = arith.divf %94, %95 : vector<8x384xf32>
    %97 = vector.extract_strided_slice %90 {offsets = [0, 384], sizes = [8, 128], strides = [1, 1]} : vector<8x512xf32> to vector<8x128xf32>
    %98 = math.tanh %97 : vector<8x128xf32>
    %99 = vector.extract_strided_slice %96 {offsets = [0, 128], sizes = [8, 128], strides = [1, 1]} : vector<8x384xf32> to vector<8x128xf32>
    %100 = arith.mulf %99, %80 : vector<8x128xf32>
    %101 = vector.extract_strided_slice %96 {offsets = [0, 0], sizes = [8, 128], strides = [1, 1]} : vector<8x384xf32> to vector<8x128xf32>
    %102 = arith.mulf %101, %98 : vector<8x128xf32>
    %103 = arith.addf %100, %102 : vector<8x128xf32>
    %104 = vector.extract_strided_slice %96 {offsets = [0, 256], sizes = [8, 128], strides = [1, 1]} : vector<8x384xf32> to vector<8x128xf32>
    %105 = math.tanh %103 : vector<8x128xf32>
    %106 = arith.mulf %104, %105 : vector<8x128xf32>
    %107 = arith.truncf %106 : vector<8x128xf32> to vector<8x128xbf16>
    %cst_38 = arith.constant dense<0.000000e+00> : vector<8x512xf32>
    %108 = tpu.matmul %107, %15, %cst_38 {dimension_numbers = #tpu.dot_dimension_numbers<[1], [0], [0], [1], [0, 0, 1, 1], [], []>} : vector<8x128xbf16>, vector<128x512xbf16>, vector<8x512xf32> -> vector<8x512xf32>
    %109 = arith.addf %108, %19 : vector<8x512xf32>
    %c24_39 = arith.constant 24 : index
    %c0_40 = arith.constant 0 : index
    %110 = vector.load %arg10[%c24_39, %c0_40] : memref<64x512xf32, #tpu.memory_space<vmem>>, vector<8x512xf32>
    tpu.vector_store %arg10[%c24_39, %c0_40], %109 {strides = array<i32>} : memref<64x512xf32, #tpu.memory_space<vmem>>, vector<8x512xf32>,
    %c32 = arith.constant 32 : index
    %c0_41 = arith.constant 0 : index
    %111 = vector.load %arg9[%c32, %c0_41] : memref<64x512xf32, #tpu.memory_space<vmem>>, vector<8x512xf32>
    %cst_42 = arith.constant dense<0.000000e+00> : vector<8x512xf32>
    %112 = tpu.matmul %107, %13, %cst_42 {dimension_numbers = #tpu.dot_dimension_numbers<[1], [0], [0], [1], [0, 0, 1, 1], [], []>} : vector<8x128xbf16>, vector<128x512xbf16>, vector<8x512xf32> -> vector<8x512xf32>
    %113 = arith.addf %111, %112 : vector<8x512xf32>
    %114 = vector.extract_strided_slice %113 {offsets = [0, 0], sizes = [8, 384], strides = [1, 1]} : vector<8x512xf32> to vector<8x384xf32>
    %115 = arith.negf %114 : vector<8x384xf32>
    %116 = math.exp %115 : vector<8x384xf32>
    %cst_43 = arith.constant 1.000000e+00 : f32
    %117 = vector.broadcast %cst_43 : f32 to vector<8x384xf32>
    %118 = arith.addf %117, %116 : vector<8x384xf32>
    %119 = arith.divf %117, %118 : vector<8x384xf32>
    %120 = vector.extract_strided_slice %113 {offsets = [0, 384], sizes = [8, 128], strides = [1, 1]} : vector<8x512xf32> to vector<8x128xf32>
    %121 = math.tanh %120 : vector<8x128xf32>
    %122 = vector.extract_strided_slice %119 {offsets = [0, 128], sizes = [8, 128], strides = [1, 1]} : vector<8x384xf32> to vector<8x128xf32>
    %123 = arith.mulf %122, %103 : vector<8x128xf32>
    %124 = vector.extract_strided_slice %119 {offsets = [0, 0], sizes = [8, 128], strides = [1, 1]} : vector<8x384xf32> to vector<8x128xf32>
    %125 = arith.mulf %124, %121 : vector<8x128xf32>
    %126 = arith.addf %123, %125 : vector<8x128xf32>
    %127 = vector.extract_strided_slice %119 {offsets = [0, 256], sizes = [8, 128], strides = [1, 1]} : vector<8x384xf32> to vector<8x128xf32>
    %128 = math.tanh %126 : vector<8x128xf32>
    %129 = arith.mulf %127, %128 : vector<8x128xf32>
    %130 = arith.truncf %129 : vector<8x128xf32> to vector<8x128xbf16>
    %cst_44 = arith.constant dense<0.000000e+00> : vector<8x512xf32>
    %131 = tpu.matmul %130, %15, %cst_44 {dimension_numbers = #tpu.dot_dimension_numbers<[1], [0], [0], [1], [0, 0, 1, 1], [], []>} : vector<8x128xbf16>, vector<128x512xbf16>, vector<8x512xf32> -> vector<8x512xf32>
    %132 = arith.addf %131, %19 : vector<8x512xf32>
    %c32_45 = arith.constant 32 : index
    %c0_46 = arith.constant 0 : index
    %133 = vector.load %arg10[%c32_45, %c0_46] : memref<64x512xf32, #tpu.memory_space<vmem>>, vector<8x512xf32>
    tpu.vector_store %arg10[%c32_45, %c0_46], %132 {strides = array<i32>} : memref<64x512xf32, #tpu.memory_space<vmem>>, vector<8x512xf32>,
    %c40 = arith.constant 40 : index
    %c0_47 = arith.constant 0 : index
    %134 = vector.load %arg9[%c40, %c0_47] : memref<64x512xf32, #tpu.memory_space<vmem>>, vector<8x512xf32>
    %cst_48 = arith.constant dense<0.000000e+00> : vector<8x512xf32>
    %135 = tpu.matmul %130, %13, %cst_48 {dimension_numbers = #tpu.dot_dimension_numbers<[1], [0], [0], [1], [0, 0, 1, 1], [], []>} : vector<8x128xbf16>, vector<128x512xbf16>, vector<8x512xf32> -> vector<8x512xf32>
    %136 = arith.addf %134, %135 : vector<8x512xf32>
    %137 = vector.extract_strided_slice %136 {offsets = [0, 0], sizes = [8, 384], strides = [1, 1]} : vector<8x512xf32> to vector<8x384xf32>
    %138 = arith.negf %137 : vector<8x384xf32>
    %139 = math.exp %138 : vector<8x384xf32>
    %cst_49 = arith.constant 1.000000e+00 : f32
    %140 = vector.broadcast %cst_49 : f32 to vector<8x384xf32>
    %141 = arith.addf %140, %139 : vector<8x384xf32>
    %142 = arith.divf %140, %141 : vector<8x384xf32>
    %143 = vector.extract_strided_slice %136 {offsets = [0, 384], sizes = [8, 128], strides = [1, 1]} : vector<8x512xf32> to vector<8x128xf32>
    %144 = math.tanh %143 : vector<8x128xf32>
    %145 = vector.extract_strided_slice %142 {offsets = [0, 128], sizes = [8, 128], strides = [1, 1]} : vector<8x384xf32> to vector<8x128xf32>
    %146 = arith.mulf %145, %126 : vector<8x128xf32>
    %147 = vector.extract_strided_slice %142 {offsets = [0, 0], sizes = [8, 128], strides = [1, 1]} : vector<8x384xf32> to vector<8x128xf32>
    %148 = arith.mulf %147, %144 : vector<8x128xf32>
    %149 = arith.addf %146, %148 : vector<8x128xf32>
    %150 = vector.extract_strided_slice %142 {offsets = [0, 256], sizes = [8, 128], strides = [1, 1]} : vector<8x384xf32> to vector<8x128xf32>
    %151 = math.tanh %149 : vector<8x128xf32>
    %152 = arith.mulf %150, %151 : vector<8x128xf32>
    %153 = arith.truncf %152 : vector<8x128xf32> to vector<8x128xbf16>
    %cst_50 = arith.constant dense<0.000000e+00> : vector<8x512xf32>
    %154 = tpu.matmul %153, %15, %cst_50 {dimension_numbers = #tpu.dot_dimension_numbers<[1], [0], [0], [1], [0, 0, 1, 1], [], []>} : vector<8x128xbf16>, vector<128x512xbf16>, vector<8x512xf32> -> vector<8x512xf32>
    %155 = arith.addf %154, %19 : vector<8x512xf32>
    %c40_51 = arith.constant 40 : index
    %c0_52 = arith.constant 0 : index
    %156 = vector.load %arg10[%c40_51, %c0_52] : memref<64x512xf32, #tpu.memory_space<vmem>>, vector<8x512xf32>
    tpu.vector_store %arg10[%c40_51, %c0_52], %155 {strides = array<i32>} : memref<64x512xf32, #tpu.memory_space<vmem>>, vector<8x512xf32>,
    %c48 = arith.constant 48 : index
    %c0_53 = arith.constant 0 : index
    %157 = vector.load %arg9[%c48, %c0_53] : memref<64x512xf32, #tpu.memory_space<vmem>>, vector<8x512xf32>
    %cst_54 = arith.constant dense<0.000000e+00> : vector<8x512xf32>
    %158 = tpu.matmul %153, %13, %cst_54 {dimension_numbers = #tpu.dot_dimension_numbers<[1], [0], [0], [1], [0, 0, 1, 1], [], []>} : vector<8x128xbf16>, vector<128x512xbf16>, vector<8x512xf32> -> vector<8x512xf32>
    %159 = arith.addf %157, %158 : vector<8x512xf32>
    %160 = vector.extract_strided_slice %159 {offsets = [0, 0], sizes = [8, 384], strides = [1, 1]} : vector<8x512xf32> to vector<8x384xf32>
    %161 = arith.negf %160 : vector<8x384xf32>
    %162 = math.exp %161 : vector<8x384xf32>
    %cst_55 = arith.constant 1.000000e+00 : f32
    %163 = vector.broadcast %cst_55 : f32 to vector<8x384xf32>
    %164 = arith.addf %163, %162 : vector<8x384xf32>
    %165 = arith.divf %163, %164 : vector<8x384xf32>
    %166 = vector.extract_strided_slice %159 {offsets = [0, 384], sizes = [8, 128], strides = [1, 1]} : vector<8x512xf32> to vector<8x128xf32>
    %167 = math.tanh %166 : vector<8x128xf32>
    %168 = vector.extract_strided_slice %165 {offsets = [0, 128], sizes = [8, 128], strides = [1, 1]} : vector<8x384xf32> to vector<8x128xf32>
    %169 = arith.mulf %168, %149 : vector<8x128xf32>
    %170 = vector.extract_strided_slice %165 {offsets = [0, 0], sizes = [8, 128], strides = [1, 1]} : vector<8x384xf32> to vector<8x128xf32>
    %171 = arith.mulf %170, %167 : vector<8x128xf32>
    %172 = arith.addf %169, %171 : vector<8x128xf32>
    %173 = vector.extract_strided_slice %165 {offsets = [0, 256], sizes = [8, 128], strides = [1, 1]} : vector<8x384xf32> to vector<8x128xf32>
    %174 = math.tanh %172 : vector<8x128xf32>
    %175 = arith.mulf %173, %174 : vector<8x128xf32>
    %176 = arith.truncf %175 : vector<8x128xf32> to vector<8x128xbf16>
    %cst_56 = arith.constant dense<0.000000e+00> : vector<8x512xf32>
    %177 = tpu.matmul %176, %15, %cst_56 {dimension_numbers = #tpu.dot_dimension_numbers<[1], [0], [0], [1], [0, 0, 1, 1], [], []>} : vector<8x128xbf16>, vector<128x512xbf16>, vector<8x512xf32> -> vector<8x512xf32>
    %178 = arith.addf %177, %19 : vector<8x512xf32>
    %c48_57 = arith.constant 48 : index
    %c0_58 = arith.constant 0 : index
    %179 = vector.load %arg10[%c48_57, %c0_58] : memref<64x512xf32, #tpu.memory_space<vmem>>, vector<8x512xf32>
    tpu.vector_store %arg10[%c48_57, %c0_58], %178 {strides = array<i32>} : memref<64x512xf32, #tpu.memory_space<vmem>>, vector<8x512xf32>,
    %c56 = arith.constant 56 : index
    %c0_59 = arith.constant 0 : index
    %180 = vector.load %arg9[%c56, %c0_59] : memref<64x512xf32, #tpu.memory_space<vmem>>, vector<8x512xf32>
    %cst_60 = arith.constant dense<0.000000e+00> : vector<8x512xf32>
    %181 = tpu.matmul %176, %13, %cst_60 {dimension_numbers = #tpu.dot_dimension_numbers<[1], [0], [0], [1], [0, 0, 1, 1], [], []>} : vector<8x128xbf16>, vector<128x512xbf16>, vector<8x512xf32> -> vector<8x512xf32>
    %182 = arith.addf %180, %181 : vector<8x512xf32>
    %183 = vector.extract_strided_slice %182 {offsets = [0, 0], sizes = [8, 384], strides = [1, 1]} : vector<8x512xf32> to vector<8x384xf32>
    %184 = arith.negf %183 : vector<8x384xf32>
    %185 = math.exp %184 : vector<8x384xf32>
    %cst_61 = arith.constant 1.000000e+00 : f32
    %186 = vector.broadcast %cst_61 : f32 to vector<8x384xf32>
    %187 = arith.addf %186, %185 : vector<8x384xf32>
    %188 = arith.divf %186, %187 : vector<8x384xf32>
    %189 = vector.extract_strided_slice %182 {offsets = [0, 384], sizes = [8, 128], strides = [1, 1]} : vector<8x512xf32> to vector<8x128xf32>
    %190 = math.tanh %189 : vector<8x128xf32>
    %191 = vector.extract_strided_slice %188 {offsets = [0, 128], sizes = [8, 128], strides = [1, 1]} : vector<8x384xf32> to vector<8x128xf32>
    %192 = arith.mulf %191, %172 : vector<8x128xf32>
    %193 = vector.extract_strided_slice %188 {offsets = [0, 0], sizes = [8, 128], strides = [1, 1]} : vector<8x384xf32> to vector<8x128xf32>
    %194 = arith.mulf %193, %190 : vector<8x128xf32>
    %195 = arith.addf %192, %194 : vector<8x128xf32>
    %196 = vector.extract_strided_slice %188 {offsets = [0, 256], sizes = [8, 128], strides = [1, 1]} : vector<8x384xf32> to vector<8x128xf32>
    %197 = math.tanh %195 : vector<8x128xf32>
    %198 = arith.mulf %196, %197 : vector<8x128xf32>
    %199 = arith.truncf %198 : vector<8x128xf32> to vector<8x128xbf16>
    %cst_62 = arith.constant dense<0.000000e+00> : vector<8x512xf32>
    %200 = tpu.matmul %199, %15, %cst_62 {dimension_numbers = #tpu.dot_dimension_numbers<[1], [0], [0], [1], [0, 0, 1, 1], [], []>} : vector<8x128xbf16>, vector<128x512xbf16>, vector<8x512xf32> -> vector<8x512xf32>
    %201 = arith.addf %200, %19 : vector<8x512xf32>
    %c56_63 = arith.constant 56 : index
    %c0_64 = arith.constant 0 : index
    %202 = vector.load %arg10[%c56_63, %c0_64] : memref<64x512xf32, #tpu.memory_space<vmem>>, vector<8x512xf32>
    tpu.vector_store %arg10[%c56_63, %c0_64], %201 {strides = array<i32>} : memref<64x512xf32, #tpu.memory_space<vmem>>, vector<8x512xf32>,
    %c1_65 = arith.constant 1 : index
    %c0_66 = arith.constant 0 : index
    %c0_67 = arith.constant 0 : index
    %203 = vector.load %arg4[%c1_65, %c0_66, %c0_67] : memref<4x128x512xbf16, #tpu.memory_space<vmem>>, vector<1x128x512xbf16>
    %204 = vector.shape_cast %203 : vector<1x128x512xbf16> to vector<128x512xbf16>
    %c1_68 = arith.constant 1 : index
    %c0_69 = arith.constant 0 : index
    %c0_70 = arith.constant 0 : index
    %205 = vector.load %arg3[%c1_68, %c0_69, %c0_70] : memref<3x128x512xbf16, #tpu.memory_space<vmem>>, vector<1x128x512xbf16>
    %206 = vector.shape_cast %205 : vector<1x128x512xbf16> to vector<128x512xbf16>
    %c2 = arith.constant 2 : index
    %c0_71 = arith.constant 0 : index
    %c0_72 = arith.constant 0 : index
    %207 = vector.load %arg5[%c2, %c0_71, %c0_72] : memref<4x1x512xf32, #tpu.memory_space<vmem>>, vector<1x1x512xf32>
    %208 = vector.shape_cast %207 : vector<1x1x512xf32> to vector<1x512xf32>
    %209 = vector.shape_cast %208 : vector<1x512xf32> to vector<1x512xf32>
    %210 = vector.broadcast %209 : vector<1x512xf32> to vector<8x512xf32>
    %cst_73 = arith.constant 0.000000e+00 : f32
    %211 = vector.broadcast %cst_73 : f32 to vector<8x128xf32>
    %c0_74 = arith.constant 0 : index
    %c0_75 = arith.constant 0 : index
    %212 = vector.load %arg10[%c0_74, %c0_75] : memref<64x512xf32, #tpu.memory_space<vmem>>, vector<8x512xf32>
    %213 = vector.extract_strided_slice %212 {offsets = [0, 0], sizes = [8, 384], strides = [1, 1]} : vector<8x512xf32> to vector<8x384xf32>
    %214 = arith.negf %213 : vector<8x384xf32>
    %215 = math.exp %214 : vector<8x384xf32>
    %cst_76 = arith.constant 1.000000e+00 : f32
    %216 = vector.broadcast %cst_76 : f32 to vector<8x384xf32>
    %217 = arith.addf %216, %215 : vector<8x384xf32>
    %218 = arith.divf %216, %217 : vector<8x384xf32>
    %219 = vector.extract_strided_slice %212 {offsets = [0, 384], sizes = [8, 128], strides = [1, 1]} : vector<8x512xf32> to vector<8x128xf32>
    %220 = math.tanh %219 : vector<8x128xf32>
    %221 = vector.extract_strided_slice %218 {offsets = [0, 128], sizes = [8, 128], strides = [1, 1]} : vector<8x384xf32> to vector<8x128xf32>
    %222 = arith.mulf %221, %211 : vector<8x128xf32>
    %223 = vector.extract_strided_slice %218 {offsets = [0, 0], sizes = [8, 128], strides = [1, 1]} : vector<8x384xf32> to vector<8x128xf32>
    %224 = arith.mulf %223, %220 : vector<8x128xf32>
    %225 = arith.addf %222, %224 : vector<8x128xf32>
    %226 = vector.extract_strided_slice %218 {offsets = [0, 256], sizes = [8, 128], strides = [1, 1]} : vector<8x384xf32> to vector<8x128xf32>
    %227 = math.tanh %225 : vector<8x128xf32>
    %228 = arith.mulf %226, %227 : vector<8x128xf32>
    %229 = arith.truncf %228 : vector<8x128xf32> to vector<8x128xbf16>
    %cst_77 = arith.constant dense<0.000000e+00> : vector<8x512xf32>
    %230 = tpu.matmul %229, %206, %cst_77 {dimension_numbers = #tpu.dot_dimension_numbers<[1], [0], [0], [1], [0, 0, 1, 1], [], []>} : vector<8x128xbf16>, vector<128x512xbf16>, vector<8x512xf32> -> vector<8x512xf32>
    %231 = arith.addf %230, %210 : vector<8x512xf32>
    %c0_78 = arith.constant 0 : index
    %c0_79 = arith.constant 0 : index
    %232 = vector.load %arg9[%c0_78, %c0_79] : memref<64x512xf32, #tpu.memory_space<vmem>>, vector<8x512xf32>
    tpu.vector_store %arg9[%c0_78, %c0_79], %231 {strides = array<i32>} : memref<64x512xf32, #tpu.memory_space<vmem>>, vector<8x512xf32>,
    %c8_80 = arith.constant 8 : index
    %c0_81 = arith.constant 0 : index
    %233 = vector.load %arg10[%c8_80, %c0_81] : memref<64x512xf32, #tpu.memory_space<vmem>>, vector<8x512xf32>
    %cst_82 = arith.constant dense<0.000000e+00> : vector<8x512xf32>
    %234 = tpu.matmul %229, %204, %cst_82 {dimension_numbers = #tpu.dot_dimension_numbers<[1], [0], [0], [1], [0, 0, 1, 1], [], []>} : vector<8x128xbf16>, vector<128x512xbf16>, vector<8x512xf32> -> vector<8x512xf32>
    %235 = arith.addf %233, %234 : vector<8x512xf32>
    %236 = vector.extract_strided_slice %235 {offsets = [0, 0], sizes = [8, 384], strides = [1, 1]} : vector<8x512xf32> to vector<8x384xf32>
    %237 = arith.negf %236 : vector<8x384xf32>
    %238 = math.exp %237 : vector<8x384xf32>
    %cst_83 = arith.constant 1.000000e+00 : f32
    %239 = vector.broadcast %cst_83 : f32 to vector<8x384xf32>
    %240 = arith.addf %239, %238 : vector<8x384xf32>
    %241 = arith.divf %239, %240 : vector<8x384xf32>
    %242 = vector.extract_strided_slice %235 {offsets = [0, 384], sizes = [8, 128], strides = [1, 1]} : vector<8x512xf32> to vector<8x128xf32>
    %243 = math.tanh %242 : vector<8x128xf32>
    %244 = vector.extract_strided_slice %241 {offsets = [0, 128], sizes = [8, 128], strides = [1, 1]} : vector<8x384xf32> to vector<8x128xf32>
    %245 = arith.mulf %244, %225 : vector<8x128xf32>
    %246 = vector.extract_strided_slice %241 {offsets = [0, 0], sizes = [8, 128], strides = [1, 1]} : vector<8x384xf32> to vector<8x128xf32>
    %247 = arith.mulf %246, %243 : vector<8x128xf32>
    %248 = arith.addf %245, %247 : vector<8x128xf32>
    %249 = vector.extract_strided_slice %241 {offsets = [0, 256], sizes = [8, 128], strides = [1, 1]} : vector<8x384xf32> to vector<8x128xf32>
    %250 = math.tanh %248 : vector<8x128xf32>
    %251 = arith.mulf %249, %250 : vector<8x128xf32>
    %252 = arith.truncf %251 : vector<8x128xf32> to vector<8x128xbf16>
    %cst_84 = arith.constant dense<0.000000e+00> : vector<8x512xf32>
    %253 = tpu.matmul %252, %206, %cst_84 {dimension_numbers = #tpu.dot_dimension_numbers<[1], [0], [0], [1], [0, 0, 1, 1], [], []>} : vector<8x128xbf16>, vector<128x512xbf16>, vector<8x512xf32> -> vector<8x512xf32>
    %254 = arith.addf %253, %210 : vector<8x512xf32>
    %c8_85 = arith.constant 8 : index
    %c0_86 = arith.constant 0 : index
    %255 = vector.load %arg9[%c8_85, %c0_86] : memref<64x512xf32, #tpu.memory_space<vmem>>, vector<8x512xf32>
    tpu.vector_store %arg9[%c8_85, %c0_86], %254 {strides = array<i32>} : memref<64x512xf32, #tpu.memory_space<vmem>>, vector<8x512xf32>,
    %c16_87 = arith.constant 16 : index
    %c0_88 = arith.constant 0 : index
    %256 = vector.load %arg10[%c16_87, %c0_88] : memref<64x512xf32, #tpu.memory_space<vmem>>, vector<8x512xf32>
    %cst_89 = arith.constant dense<0.000000e+00> : vector<8x512xf32>
    %257 = tpu.matmul %252, %204, %cst_89 {dimension_numbers = #tpu.dot_dimension_numbers<[1], [0], [0], [1], [0, 0, 1, 1], [], []>} : vector<8x128xbf16>, vector<128x512xbf16>, vector<8x512xf32> -> vector<8x512xf32>
    %258 = arith.addf %256, %257 : vector<8x512xf32>
    %259 = vector.extract_strided_slice %258 {offsets = [0, 0], sizes = [8, 384], strides = [1, 1]} : vector<8x512xf32> to vector<8x384xf32>
    %260 = arith.negf %259 : vector<8x384xf32>
    %261 = math.exp %260 : vector<8x384xf32>
    %cst_90 = arith.constant 1.000000e+00 : f32
    %262 = vector.broadcast %cst_90 : f32 to vector<8x384xf32>
    %263 = arith.addf %262, %261 : vector<8x384xf32>
    %264 = arith.divf %262, %263 : vector<8x384xf32>
    %265 = vector.extract_strided_slice %258 {offsets = [0, 384], sizes = [8, 128], strides = [1, 1]} : vector<8x512xf32> to vector<8x128xf32>
    %266 = math.tanh %265 : vector<8x128xf32>
    %267 = vector.extract_strided_slice %264 {offsets = [0, 128], sizes = [8, 128], strides = [1, 1]} : vector<8x384xf32> to vector<8x128xf32>
    %268 = arith.mulf %267, %248 : vector<8x128xf32>
    %269 = vector.extract_strided_slice %264 {offsets = [0, 0], sizes = [8, 128], strides = [1, 1]} : vector<8x384xf32> to vector<8x128xf32>
    %270 = arith.mulf %269, %266 : vector<8x128xf32>
    %271 = arith.addf %268, %270 : vector<8x128xf32>
    %272 = vector.extract_strided_slice %264 {offsets = [0, 256], sizes = [8, 128], strides = [1, 1]} : vector<8x384xf32> to vector<8x128xf32>
    %273 = math.tanh %271 : vector<8x128xf32>
    %274 = arith.mulf %272, %273 : vector<8x128xf32>
    %275 = arith.truncf %274 : vector<8x128xf32> to vector<8x128xbf16>
    %cst_91 = arith.constant dense<0.000000e+00> : vector<8x512xf32>
    %276 = tpu.matmul %275, %206, %cst_91 {dimension_numbers = #tpu.dot_dimension_numbers<[1], [0], [0], [1], [0, 0, 1, 1], [], []>} : vector<8x128xbf16>, vector<128x512xbf16>, vector<8x512xf32> -> vector<8x512xf32>
    %277 = arith.addf %276, %210 : vector<8x512xf32>
    %c16_92 = arith.constant 16 : index
    %c0_93 = arith.constant 0 : index
    %278 = vector.load %arg9[%c16_92, %c0_93] : memref<64x512xf32, #tpu.memory_space<vmem>>, vector<8x512xf32>
    tpu.vector_store %arg9[%c16_92, %c0_93], %277 {strides = array<i32>} : memref<64x512xf32, #tpu.memory_space<vmem>>, vector<8x512xf32>,
    %c24_94 = arith.constant 24 : index
    %c0_95 = arith.constant 0 : index
    %279 = vector.load %arg10[%c24_94, %c0_95] : memref<64x512xf32, #tpu.memory_space<vmem>>, vector<8x512xf32>
    %cst_96 = arith.constant dense<0.000000e+00> : vector<8x512xf32>
    %280 = tpu.matmul %275, %204, %cst_96 {dimension_numbers = #tpu.dot_dimension_numbers<[1], [0], [0], [1], [0, 0, 1, 1], [], []>} : vector<8x128xbf16>, vector<128x512xbf16>, vector<8x512xf32> -> vector<8x512xf32>
    %281 = arith.addf %279, %280 : vector<8x512xf32>
    %282 = vector.extract_strided_slice %281 {offsets = [0, 0], sizes = [8, 384], strides = [1, 1]} : vector<8x512xf32> to vector<8x384xf32>
    %283 = arith.negf %282 : vector<8x384xf32>
    %284 = math.exp %283 : vector<8x384xf32>
    %cst_97 = arith.constant 1.000000e+00 : f32
    %285 = vector.broadcast %cst_97 : f32 to vector<8x384xf32>
    %286 = arith.addf %285, %284 : vector<8x384xf32>
    %287 = arith.divf %285, %286 : vector<8x384xf32>
    %288 = vector.extract_strided_slice %281 {offsets = [0, 384], sizes = [8, 128], strides = [1, 1]} : vector<8x512xf32> to vector<8x128xf32>
    %289 = math.tanh %288 : vector<8x128xf32>
    %290 = vector.extract_strided_slice %287 {offsets = [0, 128], sizes = [8, 128], strides = [1, 1]} : vector<8x384xf32> to vector<8x128xf32>
    %291 = arith.mulf %290, %271 : vector<8x128xf32>
    %292 = vector.extract_strided_slice %287 {offsets = [0, 0], sizes = [8, 128], strides = [1, 1]} : vector<8x384xf32> to vector<8x128xf32>
    %293 = arith.mulf %292, %289 : vector<8x128xf32>
    %294 = arith.addf %291, %293 : vector<8x128xf32>
    %295 = vector.extract_strided_slice %287 {offsets = [0, 256], sizes = [8, 128], strides = [1, 1]} : vector<8x384xf32> to vector<8x128xf32>
    %296 = math.tanh %294 : vector<8x128xf32>
    %297 = arith.mulf %295, %296 : vector<8x128xf32>
    %298 = arith.truncf %297 : vector<8x128xf32> to vector<8x128xbf16>
    %cst_98 = arith.constant dense<0.000000e+00> : vector<8x512xf32>
    %299 = tpu.matmul %298, %206, %cst_98 {dimension_numbers = #tpu.dot_dimension_numbers<[1], [0], [0], [1], [0, 0, 1, 1], [], []>} : vector<8x128xbf16>, vector<128x512xbf16>, vector<8x512xf32> -> vector<8x512xf32>
    %300 = arith.addf %299, %210 : vector<8x512xf32>
    %c24_99 = arith.constant 24 : index
    %c0_100 = arith.constant 0 : index
    %301 = vector.load %arg9[%c24_99, %c0_100] : memref<64x512xf32, #tpu.memory_space<vmem>>, vector<8x512xf32>
    tpu.vector_store %arg9[%c24_99, %c0_100], %300 {strides = array<i32>} : memref<64x512xf32, #tpu.memory_space<vmem>>, vector<8x512xf32>,
    %c32_101 = arith.constant 32 : index
    %c0_102 = arith.constant 0 : index
    %302 = vector.load %arg10[%c32_101, %c0_102] : memref<64x512xf32, #tpu.memory_space<vmem>>, vector<8x512xf32>
    %cst_103 = arith.constant dense<0.000000e+00> : vector<8x512xf32>
    %303 = tpu.matmul %298, %204, %cst_103 {dimension_numbers = #tpu.dot_dimension_numbers<[1], [0], [0], [1], [0, 0, 1, 1], [], []>} : vector<8x128xbf16>, vector<128x512xbf16>, vector<8x512xf32> -> vector<8x512xf32>
    %304 = arith.addf %302, %303 : vector<8x512xf32>
    %305 = vector.extract_strided_slice %304 {offsets = [0, 0], sizes = [8, 384], strides = [1, 1]} : vector<8x512xf32> to vector<8x384xf32>
    %306 = arith.negf %305 : vector<8x384xf32>
    %307 = math.exp %306 : vector<8x384xf32>
    %cst_104 = arith.constant 1.000000e+00 : f32
    %308 = vector.broadcast %cst_104 : f32 to vector<8x384xf32>
    %309 = arith.addf %308, %307 : vector<8x384xf32>
    %310 = arith.divf %308, %309 : vector<8x384xf32>
    %311 = vector.extract_strided_slice %304 {offsets = [0, 384], sizes = [8, 128], strides = [1, 1]} : vector<8x512xf32> to vector<8x128xf32>
    %312 = math.tanh %311 : vector<8x128xf32>
    %313 = vector.extract_strided_slice %310 {offsets = [0, 128], sizes = [8, 128], strides = [1, 1]} : vector<8x384xf32> to vector<8x128xf32>
    %314 = arith.mulf %313, %294 : vector<8x128xf32>
    %315 = vector.extract_strided_slice %310 {offsets = [0, 0], sizes = [8, 128], strides = [1, 1]} : vector<8x384xf32> to vector<8x128xf32>
    %316 = arith.mulf %315, %312 : vector<8x128xf32>
    %317 = arith.addf %314, %316 : vector<8x128xf32>
    %318 = vector.extract_strided_slice %310 {offsets = [0, 256], sizes = [8, 128], strides = [1, 1]} : vector<8x384xf32> to vector<8x128xf32>
    %319 = math.tanh %317 : vector<8x128xf32>
    %320 = arith.mulf %318, %319 : vector<8x128xf32>
    %321 = arith.truncf %320 : vector<8x128xf32> to vector<8x128xbf16>
    %cst_105 = arith.constant dense<0.000000e+00> : vector<8x512xf32>
    %322 = tpu.matmul %321, %206, %cst_105 {dimension_numbers = #tpu.dot_dimension_numbers<[1], [0], [0], [1], [0, 0, 1, 1], [], []>} : vector<8x128xbf16>, vector<128x512xbf16>, vector<8x512xf32> -> vector<8x512xf32>
    %323 = arith.addf %322, %210 : vector<8x512xf32>
    %c32_106 = arith.constant 32 : index
    %c0_107 = arith.constant 0 : index
    %324 = vector.load %arg9[%c32_106, %c0_107] : memref<64x512xf32, #tpu.memory_space<vmem>>, vector<8x512xf32>
    tpu.vector_store %arg9[%c32_106, %c0_107], %323 {strides = array<i32>} : memref<64x512xf32, #tpu.memory_space<vmem>>, vector<8x512xf32>,
    %c40_108 = arith.constant 40 : index
    %c0_109 = arith.constant 0 : index
    %325 = vector.load %arg10[%c40_108, %c0_109] : memref<64x512xf32, #tpu.memory_space<vmem>>, vector<8x512xf32>
    %cst_110 = arith.constant dense<0.000000e+00> : vector<8x512xf32>
    %326 = tpu.matmul %321, %204, %cst_110 {dimension_numbers = #tpu.dot_dimension_numbers<[1], [0], [0], [1], [0, 0, 1, 1], [], []>} : vector<8x128xbf16>, vector<128x512xbf16>, vector<8x512xf32> -> vector<8x512xf32>
    %327 = arith.addf %325, %326 : vector<8x512xf32>
    %328 = vector.extract_strided_slice %327 {offsets = [0, 0], sizes = [8, 384], strides = [1, 1]} : vector<8x512xf32> to vector<8x384xf32>
    %329 = arith.negf %328 : vector<8x384xf32>
    %330 = math.exp %329 : vector<8x384xf32>
    %cst_111 = arith.constant 1.000000e+00 : f32
    %331 = vector.broadcast %cst_111 : f32 to vector<8x384xf32>
    %332 = arith.addf %331, %330 : vector<8x384xf32>
    %333 = arith.divf %331, %332 : vector<8x384xf32>
    %334 = vector.extract_strided_slice %327 {offsets = [0, 384], sizes = [8, 128], strides = [1, 1]} : vector<8x512xf32> to vector<8x128xf32>
    %335 = math.tanh %334 : vector<8x128xf32>
    %336 = vector.extract_strided_slice %333 {offsets = [0, 128], sizes = [8, 128], strides = [1, 1]} : vector<8x384xf32> to vector<8x128xf32>
    %337 = arith.mulf %336, %317 : vector<8x128xf32>
    %338 = vector.extract_strided_slice %333 {offsets = [0, 0], sizes = [8, 128], strides = [1, 1]} : vector<8x384xf32> to vector<8x128xf32>
    %339 = arith.mulf %338, %335 : vector<8x128xf32>
    %340 = arith.addf %337, %339 : vector<8x128xf32>
    %341 = vector.extract_strided_slice %333 {offsets = [0, 256], sizes = [8, 128], strides = [1, 1]} : vector<8x384xf32> to vector<8x128xf32>
    %342 = math.tanh %340 : vector<8x128xf32>
    %343 = arith.mulf %341, %342 : vector<8x128xf32>
    %344 = arith.truncf %343 : vector<8x128xf32> to vector<8x128xbf16>
    %cst_112 = arith.constant dense<0.000000e+00> : vector<8x512xf32>
    %345 = tpu.matmul %344, %206, %cst_112 {dimension_numbers = #tpu.dot_dimension_numbers<[1], [0], [0], [1], [0, 0, 1, 1], [], []>} : vector<8x128xbf16>, vector<128x512xbf16>, vector<8x512xf32> -> vector<8x512xf32>
    %346 = arith.addf %345, %210 : vector<8x512xf32>
    %c40_113 = arith.constant 40 : index
    %c0_114 = arith.constant 0 : index
    %347 = vector.load %arg9[%c40_113, %c0_114] : memref<64x512xf32, #tpu.memory_space<vmem>>, vector<8x512xf32>
    tpu.vector_store %arg9[%c40_113, %c0_114], %346 {strides = array<i32>} : memref<64x512xf32, #tpu.memory_space<vmem>>, vector<8x512xf32>,
    %c48_115 = arith.constant 48 : index
    %c0_116 = arith.constant 0 : index
    %348 = vector.load %arg10[%c48_115, %c0_116] : memref<64x512xf32, #tpu.memory_space<vmem>>, vector<8x512xf32>
    %cst_117 = arith.constant dense<0.000000e+00> : vector<8x512xf32>
    %349 = tpu.matmul %344, %204, %cst_117 {dimension_numbers = #tpu.dot_dimension_numbers<[1], [0], [0], [1], [0, 0, 1, 1], [], []>} : vector<8x128xbf16>, vector<128x512xbf16>, vector<8x512xf32> -> vector<8x512xf32>
    %350 = arith.addf %348, %349 : vector<8x512xf32>
    %351 = vector.extract_strided_slice %350 {offsets = [0, 0], sizes = [8, 384], strides = [1, 1]} : vector<8x512xf32> to vector<8x384xf32>
    %352 = arith.negf %351 : vector<8x384xf32>
    %353 = math.exp %352 : vector<8x384xf32>
    %cst_118 = arith.constant 1.000000e+00 : f32
    %354 = vector.broadcast %cst_118 : f32 to vector<8x384xf32>
    %355 = arith.addf %354, %353 : vector<8x384xf32>
    %356 = arith.divf %354, %355 : vector<8x384xf32>
    %357 = vector.extract_strided_slice %350 {offsets = [0, 384], sizes = [8, 128], strides = [1, 1]} : vector<8x512xf32> to vector<8x128xf32>
    %358 = math.tanh %357 : vector<8x128xf32>
    %359 = vector.extract_strided_slice %356 {offsets = [0, 128], sizes = [8, 128], strides = [1, 1]} : vector<8x384xf32> to vector<8x128xf32>
    %360 = arith.mulf %359, %340 : vector<8x128xf32>
    %361 = vector.extract_strided_slice %356 {offsets = [0, 0], sizes = [8, 128], strides = [1, 1]} : vector<8x384xf32> to vector<8x128xf32>
    %362 = arith.mulf %361, %358 : vector<8x128xf32>
    %363 = arith.addf %360, %362 : vector<8x128xf32>
    %364 = vector.extract_strided_slice %356 {offsets = [0, 256], sizes = [8, 128], strides = [1, 1]} : vector<8x384xf32> to vector<8x128xf32>
    %365 = math.tanh %363 : vector<8x128xf32>
    %366 = arith.mulf %364, %365 : vector<8x128xf32>
    %367 = arith.truncf %366 : vector<8x128xf32> to vector<8x128xbf16>
    %cst_119 = arith.constant dense<0.000000e+00> : vector<8x512xf32>
    %368 = tpu.matmul %367, %206, %cst_119 {dimension_numbers = #tpu.dot_dimension_numbers<[1], [0], [0], [1], [0, 0, 1, 1], [], []>} : vector<8x128xbf16>, vector<128x512xbf16>, vector<8x512xf32> -> vector<8x512xf32>
    %369 = arith.addf %368, %210 : vector<8x512xf32>
    %c48_120 = arith.constant 48 : index
    %c0_121 = arith.constant 0 : index
    %370 = vector.load %arg9[%c48_120, %c0_121] : memref<64x512xf32, #tpu.memory_space<vmem>>, vector<8x512xf32>
    tpu.vector_store %arg9[%c48_120, %c0_121], %369 {strides = array<i32>} : memref<64x512xf32, #tpu.memory_space<vmem>>, vector<8x512xf32>,
    %c56_122 = arith.constant 56 : index
    %c0_123 = arith.constant 0 : index
    %371 = vector.load %arg10[%c56_122, %c0_123] : memref<64x512xf32, #tpu.memory_space<vmem>>, vector<8x512xf32>
    %cst_124 = arith.constant dense<0.000000e+00> : vector<8x512xf32>
    %372 = tpu.matmul %367, %204, %cst_124 {dimension_numbers = #tpu.dot_dimension_numbers<[1], [0], [0], [1], [0, 0, 1, 1], [], []>} : vector<8x128xbf16>, vector<128x512xbf16>, vector<8x512xf32> -> vector<8x512xf32>
    %373 = arith.addf %371, %372 : vector<8x512xf32>
    %374 = vector.extract_strided_slice %373 {offsets = [0, 0], sizes = [8, 384], strides = [1, 1]} : vector<8x512xf32> to vector<8x384xf32>
    %375 = arith.negf %374 : vector<8x384xf32>
    %376 = math.exp %375 : vector<8x384xf32>
    %cst_125 = arith.constant 1.000000e+00 : f32
    %377 = vector.broadcast %cst_125 : f32 to vector<8x384xf32>
    %378 = arith.addf %377, %376 : vector<8x384xf32>
    %379 = arith.divf %377, %378 : vector<8x384xf32>
    %380 = vector.extract_strided_slice %373 {offsets = [0, 384], sizes = [8, 128], strides = [1, 1]} : vector<8x512xf32> to vector<8x128xf32>
    %381 = math.tanh %380 : vector<8x128xf32>
    %382 = vector.extract_strided_slice %379 {offsets = [0, 128], sizes = [8, 128], strides = [1, 1]} : vector<8x384xf32> to vector<8x128xf32>
    %383 = arith.mulf %382, %363 : vector<8x128xf32>
    %384 = vector.extract_strided_slice %379 {offsets = [0, 0], sizes = [8, 128], strides = [1, 1]} : vector<8x384xf32> to vector<8x128xf32>
    %385 = arith.mulf %384, %381 : vector<8x128xf32>
    %386 = arith.addf %383, %385 : vector<8x128xf32>
    %387 = vector.extract_strided_slice %379 {offsets = [0, 256], sizes = [8, 128], strides = [1, 1]} : vector<8x384xf32> to vector<8x128xf32>
    %388 = math.tanh %386 : vector<8x128xf32>
    %389 = arith.mulf %387, %388 : vector<8x128xf32>
    %390 = arith.truncf %389 : vector<8x128xf32> to vector<8x128xbf16>
    %cst_126 = arith.constant dense<0.000000e+00> : vector<8x512xf32>
    %391 = tpu.matmul %390, %206, %cst_126 {dimension_numbers = #tpu.dot_dimension_numbers<[1], [0], [0], [1], [0, 0, 1, 1], [], []>} : vector<8x128xbf16>, vector<128x512xbf16>, vector<8x512xf32> -> vector<8x512xf32>
    %392 = arith.addf %391, %210 : vector<8x512xf32>
    %c56_127 = arith.constant 56 : index
    %c0_128 = arith.constant 0 : index
    %393 = vector.load %arg9[%c56_127, %c0_128] : memref<64x512xf32, #tpu.memory_space<vmem>>, vector<8x512xf32>
    tpu.vector_store %arg9[%c56_127, %c0_128], %392 {strides = array<i32>} : memref<64x512xf32, #tpu.memory_space<vmem>>, vector<8x512xf32>,
    %c2_129 = arith.constant 2 : index
    %c0_130 = arith.constant 0 : index
    %c0_131 = arith.constant 0 : index
    %394 = vector.load %arg4[%c2_129, %c0_130, %c0_131] : memref<4x128x512xbf16, #tpu.memory_space<vmem>>, vector<1x128x512xbf16>
    %395 = vector.shape_cast %394 : vector<1x128x512xbf16> to vector<128x512xbf16>
    %c2_132 = arith.constant 2 : index
    %c0_133 = arith.constant 0 : index
    %c0_134 = arith.constant 0 : index
    %396 = vector.load %arg3[%c2_132, %c0_133, %c0_134] : memref<3x128x512xbf16, #tpu.memory_space<vmem>>, vector<1x128x512xbf16>
    %397 = vector.shape_cast %396 : vector<1x128x512xbf16> to vector<128x512xbf16>
    %c3 = arith.constant 3 : index
    %c0_135 = arith.constant 0 : index
    %c0_136 = arith.constant 0 : index
    %398 = vector.load %arg5[%c3, %c0_135, %c0_136] : memref<4x1x512xf32, #tpu.memory_space<vmem>>, vector<1x1x512xf32>
    %399 = vector.shape_cast %398 : vector<1x1x512xf32> to vector<1x512xf32>
    %400 = vector.shape_cast %399 : vector<1x512xf32> to vector<1x512xf32>
    %401 = vector.broadcast %400 : vector<1x512xf32> to vector<8x512xf32>
    %cst_137 = arith.constant 0.000000e+00 : f32
    %402 = vector.broadcast %cst_137 : f32 to vector<8x128xf32>
    %c0_138 = arith.constant 0 : index
    %c0_139 = arith.constant 0 : index
    %403 = vector.load %arg9[%c0_138, %c0_139] : memref<64x512xf32, #tpu.memory_space<vmem>>, vector<8x512xf32>
    %404 = vector.extract_strided_slice %403 {offsets = [0, 0], sizes = [8, 384], strides = [1, 1]} : vector<8x512xf32> to vector<8x384xf32>
    %405 = arith.negf %404 : vector<8x384xf32>
    %406 = math.exp %405 : vector<8x384xf32>
    %cst_140 = arith.constant 1.000000e+00 : f32
    %407 = vector.broadcast %cst_140 : f32 to vector<8x384xf32>
    %408 = arith.addf %407, %406 : vector<8x384xf32>
    %409 = arith.divf %407, %408 : vector<8x384xf32>
    %410 = vector.extract_strided_slice %403 {offsets = [0, 384], sizes = [8, 128], strides = [1, 1]} : vector<8x512xf32> to vector<8x128xf32>
    %411 = math.tanh %410 : vector<8x128xf32>
    %412 = vector.extract_strided_slice %409 {offsets = [0, 128], sizes = [8, 128], strides = [1, 1]} : vector<8x384xf32> to vector<8x128xf32>
    %413 = arith.mulf %412, %402 : vector<8x128xf32>
    %414 = vector.extract_strided_slice %409 {offsets = [0, 0], sizes = [8, 128], strides = [1, 1]} : vector<8x384xf32> to vector<8x128xf32>
    %415 = arith.mulf %414, %411 : vector<8x128xf32>
    %416 = arith.addf %413, %415 : vector<8x128xf32>
    %417 = vector.extract_strided_slice %409 {offsets = [0, 256], sizes = [8, 128], strides = [1, 1]} : vector<8x384xf32> to vector<8x128xf32>
    %418 = math.tanh %416 : vector<8x128xf32>
    %419 = arith.mulf %417, %418 : vector<8x128xf32>
    %420 = arith.truncf %419 : vector<8x128xf32> to vector<8x128xbf16>
    %cst_141 = arith.constant dense<0.000000e+00> : vector<8x512xf32>
    %421 = tpu.matmul %420, %397, %cst_141 {dimension_numbers = #tpu.dot_dimension_numbers<[1], [0], [0], [1], [0, 0, 1, 1], [], []>} : vector<8x128xbf16>, vector<128x512xbf16>, vector<8x512xf32> -> vector<8x512xf32>
    %422 = arith.addf %421, %401 : vector<8x512xf32>
    %c0_142 = arith.constant 0 : index
    %c0_143 = arith.constant 0 : index
    %423 = vector.load %arg10[%c0_142, %c0_143] : memref<64x512xf32, #tpu.memory_space<vmem>>, vector<8x512xf32>
    tpu.vector_store %arg10[%c0_142, %c0_143], %422 {strides = array<i32>} : memref<64x512xf32, #tpu.memory_space<vmem>>, vector<8x512xf32>,
    %c8_144 = arith.constant 8 : index
    %c0_145 = arith.constant 0 : index
    %424 = vector.load %arg9[%c8_144, %c0_145] : memref<64x512xf32, #tpu.memory_space<vmem>>, vector<8x512xf32>
    %cst_146 = arith.constant dense<0.000000e+00> : vector<8x512xf32>
    %425 = tpu.matmul %420, %395, %cst_146 {dimension_numbers = #tpu.dot_dimension_numbers<[1], [0], [0], [1], [0, 0, 1, 1], [], []>} : vector<8x128xbf16>, vector<128x512xbf16>, vector<8x512xf32> -> vector<8x512xf32>
    %426 = arith.addf %424, %425 : vector<8x512xf32>
    %427 = vector.extract_strided_slice %426 {offsets = [0, 0], sizes = [8, 384], strides = [1, 1]} : vector<8x512xf32> to vector<8x384xf32>
    %428 = arith.negf %427 : vector<8x384xf32>
    %429 = math.exp %428 : vector<8x384xf32>
    %cst_147 = arith.constant 1.000000e+00 : f32
    %430 = vector.broadcast %cst_147 : f32 to vector<8x384xf32>
    %431 = arith.addf %430, %429 : vector<8x384xf32>
    %432 = arith.divf %430, %431 : vector<8x384xf32>
    %433 = vector.extract_strided_slice %426 {offsets = [0, 384], sizes = [8, 128], strides = [1, 1]} : vector<8x512xf32> to vector<8x128xf32>
    %434 = math.tanh %433 : vector<8x128xf32>
    %435 = vector.extract_strided_slice %432 {offsets = [0, 128], sizes = [8, 128], strides = [1, 1]} : vector<8x384xf32> to vector<8x128xf32>
    %436 = arith.mulf %435, %416 : vector<8x128xf32>
    %437 = vector.extract_strided_slice %432 {offsets = [0, 0], sizes = [8, 128], strides = [1, 1]} : vector<8x384xf32> to vector<8x128xf32>
    %438 = arith.mulf %437, %434 : vector<8x128xf32>
    %439 = arith.addf %436, %438 : vector<8x128xf32>
    %440 = vector.extract_strided_slice %432 {offsets = [0, 256], sizes = [8, 128], strides = [1, 1]} : vector<8x384xf32> to vector<8x128xf32>
    %441 = math.tanh %439 : vector<8x128xf32>
    %442 = arith.mulf %440, %441 : vector<8x128xf32>
    %443 = arith.truncf %442 : vector<8x128xf32> to vector<8x128xbf16>
    %cst_148 = arith.constant dense<0.000000e+00> : vector<8x512xf32>
    %444 = tpu.matmul %443, %397, %cst_148 {dimension_numbers = #tpu.dot_dimension_numbers<[1], [0], [0], [1], [0, 0, 1, 1], [], []>} : vector<8x128xbf16>, vector<128x512xbf16>, vector<8x512xf32> -> vector<8x512xf32>
    %445 = arith.addf %444, %401 : vector<8x512xf32>
    %c8_149 = arith.constant 8 : index
    %c0_150 = arith.constant 0 : index
    %446 = vector.load %arg10[%c8_149, %c0_150] : memref<64x512xf32, #tpu.memory_space<vmem>>, vector<8x512xf32>
    tpu.vector_store %arg10[%c8_149, %c0_150], %445 {strides = array<i32>} : memref<64x512xf32, #tpu.memory_space<vmem>>, vector<8x512xf32>,
    %c16_151 = arith.constant 16 : index
    %c0_152 = arith.constant 0 : index
    %447 = vector.load %arg9[%c16_151, %c0_152] : memref<64x512xf32, #tpu.memory_space<vmem>>, vector<8x512xf32>
    %cst_153 = arith.constant dense<0.000000e+00> : vector<8x512xf32>
    %448 = tpu.matmul %443, %395, %cst_153 {dimension_numbers = #tpu.dot_dimension_numbers<[1], [0], [0], [1], [0, 0, 1, 1], [], []>} : vector<8x128xbf16>, vector<128x512xbf16>, vector<8x512xf32> -> vector<8x512xf32>
    %449 = arith.addf %447, %448 : vector<8x512xf32>
    %450 = vector.extract_strided_slice %449 {offsets = [0, 0], sizes = [8, 384], strides = [1, 1]} : vector<8x512xf32> to vector<8x384xf32>
    %451 = arith.negf %450 : vector<8x384xf32>
    %452 = math.exp %451 : vector<8x384xf32>
    %cst_154 = arith.constant 1.000000e+00 : f32
    %453 = vector.broadcast %cst_154 : f32 to vector<8x384xf32>
    %454 = arith.addf %453, %452 : vector<8x384xf32>
    %455 = arith.divf %453, %454 : vector<8x384xf32>
    %456 = vector.extract_strided_slice %449 {offsets = [0, 384], sizes = [8, 128], strides = [1, 1]} : vector<8x512xf32> to vector<8x128xf32>
    %457 = math.tanh %456 : vector<8x128xf32>
    %458 = vector.extract_strided_slice %455 {offsets = [0, 128], sizes = [8, 128], strides = [1, 1]} : vector<8x384xf32> to vector<8x128xf32>
    %459 = arith.mulf %458, %439 : vector<8x128xf32>
    %460 = vector.extract_strided_slice %455 {offsets = [0, 0], sizes = [8, 128], strides = [1, 1]} : vector<8x384xf32> to vector<8x128xf32>
    %461 = arith.mulf %460, %457 : vector<8x128xf32>
    %462 = arith.addf %459, %461 : vector<8x128xf32>
    %463 = vector.extract_strided_slice %455 {offsets = [0, 256], sizes = [8, 128], strides = [1, 1]} : vector<8x384xf32> to vector<8x128xf32>
    %464 = math.tanh %462 : vector<8x128xf32>
    %465 = arith.mulf %463, %464 : vector<8x128xf32>
    %466 = arith.truncf %465 : vector<8x128xf32> to vector<8x128xbf16>
    %cst_155 = arith.constant dense<0.000000e+00> : vector<8x512xf32>
    %467 = tpu.matmul %466, %397, %cst_155 {dimension_numbers = #tpu.dot_dimension_numbers<[1], [0], [0], [1], [0, 0, 1, 1], [], []>} : vector<8x128xbf16>, vector<128x512xbf16>, vector<8x512xf32> -> vector<8x512xf32>
    %468 = arith.addf %467, %401 : vector<8x512xf32>
    %c16_156 = arith.constant 16 : index
    %c0_157 = arith.constant 0 : index
    %469 = vector.load %arg10[%c16_156, %c0_157] : memref<64x512xf32, #tpu.memory_space<vmem>>, vector<8x512xf32>
    tpu.vector_store %arg10[%c16_156, %c0_157], %468 {strides = array<i32>} : memref<64x512xf32, #tpu.memory_space<vmem>>, vector<8x512xf32>,
    %c24_158 = arith.constant 24 : index
    %c0_159 = arith.constant 0 : index
    %470 = vector.load %arg9[%c24_158, %c0_159] : memref<64x512xf32, #tpu.memory_space<vmem>>, vector<8x512xf32>
    %cst_160 = arith.constant dense<0.000000e+00> : vector<8x512xf32>
    %471 = tpu.matmul %466, %395, %cst_160 {dimension_numbers = #tpu.dot_dimension_numbers<[1], [0], [0], [1], [0, 0, 1, 1], [], []>} : vector<8x128xbf16>, vector<128x512xbf16>, vector<8x512xf32> -> vector<8x512xf32>
    %472 = arith.addf %470, %471 : vector<8x512xf32>
    %473 = vector.extract_strided_slice %472 {offsets = [0, 0], sizes = [8, 384], strides = [1, 1]} : vector<8x512xf32> to vector<8x384xf32>
    %474 = arith.negf %473 : vector<8x384xf32>
    %475 = math.exp %474 : vector<8x384xf32>
    %cst_161 = arith.constant 1.000000e+00 : f32
    %476 = vector.broadcast %cst_161 : f32 to vector<8x384xf32>
    %477 = arith.addf %476, %475 : vector<8x384xf32>
    %478 = arith.divf %476, %477 : vector<8x384xf32>
    %479 = vector.extract_strided_slice %472 {offsets = [0, 384], sizes = [8, 128], strides = [1, 1]} : vector<8x512xf32> to vector<8x128xf32>
    %480 = math.tanh %479 : vector<8x128xf32>
    %481 = vector.extract_strided_slice %478 {offsets = [0, 128], sizes = [8, 128], strides = [1, 1]} : vector<8x384xf32> to vector<8x128xf32>
    %482 = arith.mulf %481, %462 : vector<8x128xf32>
    %483 = vector.extract_strided_slice %478 {offsets = [0, 0], sizes = [8, 128], strides = [1, 1]} : vector<8x384xf32> to vector<8x128xf32>
    %484 = arith.mulf %483, %480 : vector<8x128xf32>
    %485 = arith.addf %482, %484 : vector<8x128xf32>
    %486 = vector.extract_strided_slice %478 {offsets = [0, 256], sizes = [8, 128], strides = [1, 1]} : vector<8x384xf32> to vector<8x128xf32>
    %487 = math.tanh %485 : vector<8x128xf32>
    %488 = arith.mulf %486, %487 : vector<8x128xf32>
    %489 = arith.truncf %488 : vector<8x128xf32> to vector<8x128xbf16>
    %cst_162 = arith.constant dense<0.000000e+00> : vector<8x512xf32>
    %490 = tpu.matmul %489, %397, %cst_162 {dimension_numbers = #tpu.dot_dimension_numbers<[1], [0], [0], [1], [0, 0, 1, 1], [], []>} : vector<8x128xbf16>, vector<128x512xbf16>, vector<8x512xf32> -> vector<8x512xf32>
    %491 = arith.addf %490, %401 : vector<8x512xf32>
    %c24_163 = arith.constant 24 : index
    %c0_164 = arith.constant 0 : index
    %492 = vector.load %arg10[%c24_163, %c0_164] : memref<64x512xf32, #tpu.memory_space<vmem>>, vector<8x512xf32>
    tpu.vector_store %arg10[%c24_163, %c0_164], %491 {strides = array<i32>} : memref<64x512xf32, #tpu.memory_space<vmem>>, vector<8x512xf32>,
    %c32_165 = arith.constant 32 : index
    %c0_166 = arith.constant 0 : index
    %493 = vector.load %arg9[%c32_165, %c0_166] : memref<64x512xf32, #tpu.memory_space<vmem>>, vector<8x512xf32>
    %cst_167 = arith.constant dense<0.000000e+00> : vector<8x512xf32>
    %494 = tpu.matmul %489, %395, %cst_167 {dimension_numbers = #tpu.dot_dimension_numbers<[1], [0], [0], [1], [0, 0, 1, 1], [], []>} : vector<8x128xbf16>, vector<128x512xbf16>, vector<8x512xf32> -> vector<8x512xf32>
    %495 = arith.addf %493, %494 : vector<8x512xf32>
    %496 = vector.extract_strided_slice %495 {offsets = [0, 0], sizes = [8, 384], strides = [1, 1]} : vector<8x512xf32> to vector<8x384xf32>
    %497 = arith.negf %496 : vector<8x384xf32>
    %498 = math.exp %497 : vector<8x384xf32>
    %cst_168 = arith.constant 1.000000e+00 : f32
    %499 = vector.broadcast %cst_168 : f32 to vector<8x384xf32>
    %500 = arith.addf %499, %498 : vector<8x384xf32>
    %501 = arith.divf %499, %500 : vector<8x384xf32>
    %502 = vector.extract_strided_slice %495 {offsets = [0, 384], sizes = [8, 128], strides = [1, 1]} : vector<8x512xf32> to vector<8x128xf32>
    %503 = math.tanh %502 : vector<8x128xf32>
    %504 = vector.extract_strided_slice %501 {offsets = [0, 128], sizes = [8, 128], strides = [1, 1]} : vector<8x384xf32> to vector<8x128xf32>
    %505 = arith.mulf %504, %485 : vector<8x128xf32>
    %506 = vector.extract_strided_slice %501 {offsets = [0, 0], sizes = [8, 128], strides = [1, 1]} : vector<8x384xf32> to vector<8x128xf32>
    %507 = arith.mulf %506, %503 : vector<8x128xf32>
    %508 = arith.addf %505, %507 : vector<8x128xf32>
    %509 = vector.extract_strided_slice %501 {offsets = [0, 256], sizes = [8, 128], strides = [1, 1]} : vector<8x384xf32> to vector<8x128xf32>
    %510 = math.tanh %508 : vector<8x128xf32>
    %511 = arith.mulf %509, %510 : vector<8x128xf32>
    %512 = arith.truncf %511 : vector<8x128xf32> to vector<8x128xbf16>
    %cst_169 = arith.constant dense<0.000000e+00> : vector<8x512xf32>
    %513 = tpu.matmul %512, %397, %cst_169 {dimension_numbers = #tpu.dot_dimension_numbers<[1], [0], [0], [1], [0, 0, 1, 1], [], []>} : vector<8x128xbf16>, vector<128x512xbf16>, vector<8x512xf32> -> vector<8x512xf32>
    %514 = arith.addf %513, %401 : vector<8x512xf32>
    %c32_170 = arith.constant 32 : index
    %c0_171 = arith.constant 0 : index
    %515 = vector.load %arg10[%c32_170, %c0_171] : memref<64x512xf32, #tpu.memory_space<vmem>>, vector<8x512xf32>
    tpu.vector_store %arg10[%c32_170, %c0_171], %514 {strides = array<i32>} : memref<64x512xf32, #tpu.memory_space<vmem>>, vector<8x512xf32>,
    %c40_172 = arith.constant 40 : index
    %c0_173 = arith.constant 0 : index
    %516 = vector.load %arg9[%c40_172, %c0_173] : memref<64x512xf32, #tpu.memory_space<vmem>>, vector<8x512xf32>
    %cst_174 = arith.constant dense<0.000000e+00> : vector<8x512xf32>
    %517 = tpu.matmul %512, %395, %cst_174 {dimension_numbers = #tpu.dot_dimension_numbers<[1], [0], [0], [1], [0, 0, 1, 1], [], []>} : vector<8x128xbf16>, vector<128x512xbf16>, vector<8x512xf32> -> vector<8x512xf32>
    %518 = arith.addf %516, %517 : vector<8x512xf32>
    %519 = vector.extract_strided_slice %518 {offsets = [0, 0], sizes = [8, 384], strides = [1, 1]} : vector<8x512xf32> to vector<8x384xf32>
    %520 = arith.negf %519 : vector<8x384xf32>
    %521 = math.exp %520 : vector<8x384xf32>
    %cst_175 = arith.constant 1.000000e+00 : f32
    %522 = vector.broadcast %cst_175 : f32 to vector<8x384xf32>
    %523 = arith.addf %522, %521 : vector<8x384xf32>
    %524 = arith.divf %522, %523 : vector<8x384xf32>
    %525 = vector.extract_strided_slice %518 {offsets = [0, 384], sizes = [8, 128], strides = [1, 1]} : vector<8x512xf32> to vector<8x128xf32>
    %526 = math.tanh %525 : vector<8x128xf32>
    %527 = vector.extract_strided_slice %524 {offsets = [0, 128], sizes = [8, 128], strides = [1, 1]} : vector<8x384xf32> to vector<8x128xf32>
    %528 = arith.mulf %527, %508 : vector<8x128xf32>
    %529 = vector.extract_strided_slice %524 {offsets = [0, 0], sizes = [8, 128], strides = [1, 1]} : vector<8x384xf32> to vector<8x128xf32>
    %530 = arith.mulf %529, %526 : vector<8x128xf32>
    %531 = arith.addf %528, %530 : vector<8x128xf32>
    %532 = vector.extract_strided_slice %524 {offsets = [0, 256], sizes = [8, 128], strides = [1, 1]} : vector<8x384xf32> to vector<8x128xf32>
    %533 = math.tanh %531 : vector<8x128xf32>
    %534 = arith.mulf %532, %533 : vector<8x128xf32>
    %535 = arith.truncf %534 : vector<8x128xf32> to vector<8x128xbf16>
    %cst_176 = arith.constant dense<0.000000e+00> : vector<8x512xf32>
    %536 = tpu.matmul %535, %397, %cst_176 {dimension_numbers = #tpu.dot_dimension_numbers<[1], [0], [0], [1], [0, 0, 1, 1], [], []>} : vector<8x128xbf16>, vector<128x512xbf16>, vector<8x512xf32> -> vector<8x512xf32>
    %537 = arith.addf %536, %401 : vector<8x512xf32>
    %c40_177 = arith.constant 40 : index
    %c0_178 = arith.constant 0 : index
    %538 = vector.load %arg10[%c40_177, %c0_178] : memref<64x512xf32, #tpu.memory_space<vmem>>, vector<8x512xf32>
    tpu.vector_store %arg10[%c40_177, %c0_178], %537 {strides = array<i32>} : memref<64x512xf32, #tpu.memory_space<vmem>>, vector<8x512xf32>,
    %c48_179 = arith.constant 48 : index
    %c0_180 = arith.constant 0 : index
    %539 = vector.load %arg9[%c48_179, %c0_180] : memref<64x512xf32, #tpu.memory_space<vmem>>, vector<8x512xf32>
    %cst_181 = arith.constant dense<0.000000e+00> : vector<8x512xf32>
    %540 = tpu.matmul %535, %395, %cst_181 {dimension_numbers = #tpu.dot_dimension_numbers<[1], [0], [0], [1], [0, 0, 1, 1], [], []>} : vector<8x128xbf16>, vector<128x512xbf16>, vector<8x512xf32> -> vector<8x512xf32>
    %541 = arith.addf %539, %540 : vector<8x512xf32>
    %542 = vector.extract_strided_slice %541 {offsets = [0, 0], sizes = [8, 384], strides = [1, 1]} : vector<8x512xf32> to vector<8x384xf32>
    %543 = arith.negf %542 : vector<8x384xf32>
    %544 = math.exp %543 : vector<8x384xf32>
    %cst_182 = arith.constant 1.000000e+00 : f32
    %545 = vector.broadcast %cst_182 : f32 to vector<8x384xf32>
    %546 = arith.addf %545, %544 : vector<8x384xf32>
    %547 = arith.divf %545, %546 : vector<8x384xf32>
    %548 = vector.extract_strided_slice %541 {offsets = [0, 384], sizes = [8, 128], strides = [1, 1]} : vector<8x512xf32> to vector<8x128xf32>
    %549 = math.tanh %548 : vector<8x128xf32>
    %550 = vector.extract_strided_slice %547 {offsets = [0, 128], sizes = [8, 128], strides = [1, 1]} : vector<8x384xf32> to vector<8x128xf32>
    %551 = arith.mulf %550, %531 : vector<8x128xf32>
    %552 = vector.extract_strided_slice %547 {offsets = [0, 0], sizes = [8, 128], strides = [1, 1]} : vector<8x384xf32> to vector<8x128xf32>
    %553 = arith.mulf %552, %549 : vector<8x128xf32>
    %554 = arith.addf %551, %553 : vector<8x128xf32>
    %555 = vector.extract_strided_slice %547 {offsets = [0, 256], sizes = [8, 128], strides = [1, 1]} : vector<8x384xf32> to vector<8x128xf32>
    %556 = math.tanh %554 : vector<8x128xf32>
    %557 = arith.mulf %555, %556 : vector<8x128xf32>
    %558 = arith.truncf %557 : vector<8x128xf32> to vector<8x128xbf16>
    %cst_183 = arith.constant dense<0.000000e+00> : vector<8x512xf32>
    %559 = tpu.matmul %558, %397, %cst_183 {dimension_numbers = #tpu.dot_dimension_numbers<[1], [0], [0], [1], [0, 0, 1, 1], [], []>} : vector<8x128xbf16>, vector<128x512xbf16>, vector<8x512xf32> -> vector<8x512xf32>
    %560 = arith.addf %559, %401 : vector<8x512xf32>
    %c48_184 = arith.constant 48 : index
    %c0_185 = arith.constant 0 : index
    %561 = vector.load %arg10[%c48_184, %c0_185] : memref<64x512xf32, #tpu.memory_space<vmem>>, vector<8x512xf32>
    tpu.vector_store %arg10[%c48_184, %c0_185], %560 {strides = array<i32>} : memref<64x512xf32, #tpu.memory_space<vmem>>, vector<8x512xf32>,
    %c56_186 = arith.constant 56 : index
    %c0_187 = arith.constant 0 : index
    %562 = vector.load %arg9[%c56_186, %c0_187] : memref<64x512xf32, #tpu.memory_space<vmem>>, vector<8x512xf32>
    %cst_188 = arith.constant dense<0.000000e+00> : vector<8x512xf32>
    %563 = tpu.matmul %558, %395, %cst_188 {dimension_numbers = #tpu.dot_dimension_numbers<[1], [0], [0], [1], [0, 0, 1, 1], [], []>} : vector<8x128xbf16>, vector<128x512xbf16>, vector<8x512xf32> -> vector<8x512xf32>
    %564 = arith.addf %562, %563 : vector<8x512xf32>
    %565 = vector.extract_strided_slice %564 {offsets = [0, 0], sizes = [8, 384], strides = [1, 1]} : vector<8x512xf32> to vector<8x384xf32>
    %566 = arith.negf %565 : vector<8x384xf32>
    %567 = math.exp %566 : vector<8x384xf32>
    %cst_189 = arith.constant 1.000000e+00 : f32
    %568 = vector.broadcast %cst_189 : f32 to vector<8x384xf32>
    %569 = arith.addf %568, %567 : vector<8x384xf32>
    %570 = arith.divf %568, %569 : vector<8x384xf32>
    %571 = vector.extract_strided_slice %564 {offsets = [0, 384], sizes = [8, 128], strides = [1, 1]} : vector<8x512xf32> to vector<8x128xf32>
    %572 = math.tanh %571 : vector<8x128xf32>
    %573 = vector.extract_strided_slice %570 {offsets = [0, 128], sizes = [8, 128], strides = [1, 1]} : vector<8x384xf32> to vector<8x128xf32>
    %574 = arith.mulf %573, %554 : vector<8x128xf32>
    %575 = vector.extract_strided_slice %570 {offsets = [0, 0], sizes = [8, 128], strides = [1, 1]} : vector<8x384xf32> to vector<8x128xf32>
    %576 = arith.mulf %575, %572 : vector<8x128xf32>
    %577 = arith.addf %574, %576 : vector<8x128xf32>
    %578 = vector.extract_strided_slice %570 {offsets = [0, 256], sizes = [8, 128], strides = [1, 1]} : vector<8x384xf32> to vector<8x128xf32>
    %579 = math.tanh %577 : vector<8x128xf32>
    %580 = arith.mulf %578, %579 : vector<8x128xf32>
    %581 = arith.truncf %580 : vector<8x128xf32> to vector<8x128xbf16>
    %cst_190 = arith.constant dense<0.000000e+00> : vector<8x512xf32>
    %582 = tpu.matmul %581, %397, %cst_190 {dimension_numbers = #tpu.dot_dimension_numbers<[1], [0], [0], [1], [0, 0, 1, 1], [], []>} : vector<8x128xbf16>, vector<128x512xbf16>, vector<8x512xf32> -> vector<8x512xf32>
    %583 = arith.addf %582, %401 : vector<8x512xf32>
    %c56_191 = arith.constant 56 : index
    %c0_192 = arith.constant 0 : index
    %584 = vector.load %arg10[%c56_191, %c0_192] : memref<64x512xf32, #tpu.memory_space<vmem>>, vector<8x512xf32>
    tpu.vector_store %arg10[%c56_191, %c0_192], %583 {strides = array<i32>} : memref<64x512xf32, #tpu.memory_space<vmem>>, vector<8x512xf32>,
    %c3_193 = arith.constant 3 : index
    %c0_194 = arith.constant 0 : index
    %c0_195 = arith.constant 0 : index
    %585 = vector.load %arg4[%c3_193, %c0_194, %c0_195] : memref<4x128x512xbf16, #tpu.memory_space<vmem>>, vector<1x128x512xbf16>
    %586 = vector.shape_cast %585 : vector<1x128x512xbf16> to vector<128x512xbf16>
    %cst_196 = arith.constant 0.000000e+00 : f32
    %587 = vector.broadcast %cst_196 : f32 to vector<8x128xf32>
    %cst_197 = arith.constant 0.000000e+00 : f32
    %588 = vector.broadcast %cst_197 : f32 to vector<8x128xf32>
    %c0_198 = arith.constant 0 : index
    %c0_199 = arith.constant 0 : index
    %589 = vector.load %arg10[%c0_198, %c0_199] : memref<64x512xf32, #tpu.memory_space<vmem>>, vector<8x512xf32>
    %590 = vector.extract_strided_slice %589 {offsets = [0, 0], sizes = [8, 384], strides = [1, 1]} : vector<8x512xf32> to vector<8x384xf32>
    %591 = arith.negf %590 : vector<8x384xf32>
    %592 = math.exp %591 : vector<8x384xf32>
    %cst_200 = arith.constant 1.000000e+00 : f32
    %593 = vector.broadcast %cst_200 : f32 to vector<8x384xf32>
    %594 = arith.addf %593, %592 : vector<8x384xf32>
    %595 = arith.divf %593, %594 : vector<8x384xf32>
    %596 = vector.extract_strided_slice %589 {offsets = [0, 384], sizes = [8, 128], strides = [1, 1]} : vector<8x512xf32> to vector<8x128xf32>
    %597 = math.tanh %596 : vector<8x128xf32>
    %598 = vector.extract_strided_slice %595 {offsets = [0, 128], sizes = [8, 128], strides = [1, 1]} : vector<8x384xf32> to vector<8x128xf32>
    %599 = arith.mulf %598, %587 : vector<8x128xf32>
    %600 = vector.extract_strided_slice %595 {offsets = [0, 0], sizes = [8, 128], strides = [1, 1]} : vector<8x384xf32> to vector<8x128xf32>
    %601 = arith.mulf %600, %597 : vector<8x128xf32>
    %602 = arith.addf %599, %601 : vector<8x128xf32>
    %603 = vector.extract_strided_slice %595 {offsets = [0, 256], sizes = [8, 128], strides = [1, 1]} : vector<8x384xf32> to vector<8x128xf32>
    %604 = math.tanh %602 : vector<8x128xf32>
    %605 = arith.mulf %603, %604 : vector<8x128xf32>
    %606 = arith.truncf %605 : vector<8x128xf32> to vector<8x128xbf16>
    %607 = arith.addf %588, %605 : vector<8x128xf32>
    %c8_201 = arith.constant 8 : index
    %c0_202 = arith.constant 0 : index
    %608 = vector.load %arg10[%c8_201, %c0_202] : memref<64x512xf32, #tpu.memory_space<vmem>>, vector<8x512xf32>
    %cst_203 = arith.constant dense<0.000000e+00> : vector<8x512xf32>
    %609 = tpu.matmul %606, %586, %cst_203 {dimension_numbers = #tpu.dot_dimension_numbers<[1], [0], [0], [1], [0, 0, 1, 1], [], []>} : vector<8x128xbf16>, vector<128x512xbf16>, vector<8x512xf32> -> vector<8x512xf32>
    %610 = arith.addf %608, %609 : vector<8x512xf32>
    %611 = vector.extract_strided_slice %610 {offsets = [0, 0], sizes = [8, 384], strides = [1, 1]} : vector<8x512xf32> to vector<8x384xf32>
    %612 = arith.negf %611 : vector<8x384xf32>
    %613 = math.exp %612 : vector<8x384xf32>
    %cst_204 = arith.constant 1.000000e+00 : f32
    %614 = vector.broadcast %cst_204 : f32 to vector<8x384xf32>
    %615 = arith.addf %614, %613 : vector<8x384xf32>
    %616 = arith.divf %614, %615 : vector<8x384xf32>
    %617 = vector.extract_strided_slice %610 {offsets = [0, 384], sizes = [8, 128], strides = [1, 1]} : vector<8x512xf32> to vector<8x128xf32>
    %618 = math.tanh %617 : vector<8x128xf32>
    %619 = vector.extract_strided_slice %616 {offsets = [0, 128], sizes = [8, 128], strides = [1, 1]} : vector<8x384xf32> to vector<8x128xf32>
    %620 = arith.mulf %619, %602 : vector<8x128xf32>
    %621 = vector.extract_strided_slice %616 {offsets = [0, 0], sizes = [8, 128], strides = [1, 1]} : vector<8x384xf32> to vector<8x128xf32>
    %622 = arith.mulf %621, %618 : vector<8x128xf32>
    %623 = arith.addf %620, %622 : vector<8x128xf32>
    %624 = vector.extract_strided_slice %616 {offsets = [0, 256], sizes = [8, 128], strides = [1, 1]} : vector<8x384xf32> to vector<8x128xf32>
    %625 = math.tanh %623 : vector<8x128xf32>
    %626 = arith.mulf %624, %625 : vector<8x128xf32>
    %627 = arith.truncf %626 : vector<8x128xf32> to vector<8x128xbf16>
    %628 = arith.addf %607, %626 : vector<8x128xf32>
    %c16_205 = arith.constant 16 : index
    %c0_206 = arith.constant 0 : index
    %629 = vector.load %arg10[%c16_205, %c0_206] : memref<64x512xf32, #tpu.memory_space<vmem>>, vector<8x512xf32>
    %cst_207 = arith.constant dense<0.000000e+00> : vector<8x512xf32>
    %630 = tpu.matmul %627, %586, %cst_207 {dimension_numbers = #tpu.dot_dimension_numbers<[1], [0], [0], [1], [0, 0, 1, 1], [], []>} : vector<8x128xbf16>, vector<128x512xbf16>, vector<8x512xf32> -> vector<8x512xf32>
    %631 = arith.addf %629, %630 : vector<8x512xf32>
    %632 = vector.extract_strided_slice %631 {offsets = [0, 0], sizes = [8, 384], strides = [1, 1]} : vector<8x512xf32> to vector<8x384xf32>
    %633 = arith.negf %632 : vector<8x384xf32>
    %634 = math.exp %633 : vector<8x384xf32>
    %cst_208 = arith.constant 1.000000e+00 : f32
    %635 = vector.broadcast %cst_208 : f32 to vector<8x384xf32>
    %636 = arith.addf %635, %634 : vector<8x384xf32>
    %637 = arith.divf %635, %636 : vector<8x384xf32>
    %638 = vector.extract_strided_slice %631 {offsets = [0, 384], sizes = [8, 128], strides = [1, 1]} : vector<8x512xf32> to vector<8x128xf32>
    %639 = math.tanh %638 : vector<8x128xf32>
    %640 = vector.extract_strided_slice %637 {offsets = [0, 128], sizes = [8, 128], strides = [1, 1]} : vector<8x384xf32> to vector<8x128xf32>
    %641 = arith.mulf %640, %623 : vector<8x128xf32>
    %642 = vector.extract_strided_slice %637 {offsets = [0, 0], sizes = [8, 128], strides = [1, 1]} : vector<8x384xf32> to vector<8x128xf32>
    %643 = arith.mulf %642, %639 : vector<8x128xf32>
    %644 = arith.addf %641, %643 : vector<8x128xf32>
    %645 = vector.extract_strided_slice %637 {offsets = [0, 256], sizes = [8, 128], strides = [1, 1]} : vector<8x384xf32> to vector<8x128xf32>
    %646 = math.tanh %644 : vector<8x128xf32>
    %647 = arith.mulf %645, %646 : vector<8x128xf32>
    %648 = arith.truncf %647 : vector<8x128xf32> to vector<8x128xbf16>
    %649 = arith.addf %628, %647 : vector<8x128xf32>
    %c24_209 = arith.constant 24 : index
    %c0_210 = arith.constant 0 : index
    %650 = vector.load %arg10[%c24_209, %c0_210] : memref<64x512xf32, #tpu.memory_space<vmem>>, vector<8x512xf32>
    %cst_211 = arith.constant dense<0.000000e+00> : vector<8x512xf32>
    %651 = tpu.matmul %648, %586, %cst_211 {dimension_numbers = #tpu.dot_dimension_numbers<[1], [0], [0], [1], [0, 0, 1, 1], [], []>} : vector<8x128xbf16>, vector<128x512xbf16>, vector<8x512xf32> -> vector<8x512xf32>
    %652 = arith.addf %650, %651 : vector<8x512xf32>
    %653 = vector.extract_strided_slice %652 {offsets = [0, 0], sizes = [8, 384], strides = [1, 1]} : vector<8x512xf32> to vector<8x384xf32>
    %654 = arith.negf %653 : vector<8x384xf32>
    %655 = math.exp %654 : vector<8x384xf32>
    %cst_212 = arith.constant 1.000000e+00 : f32
    %656 = vector.broadcast %cst_212 : f32 to vector<8x384xf32>
    %657 = arith.addf %656, %655 : vector<8x384xf32>
    %658 = arith.divf %656, %657 : vector<8x384xf32>
    %659 = vector.extract_strided_slice %652 {offsets = [0, 384], sizes = [8, 128], strides = [1, 1]} : vector<8x512xf32> to vector<8x128xf32>
    %660 = math.tanh %659 : vector<8x128xf32>
    %661 = vector.extract_strided_slice %658 {offsets = [0, 128], sizes = [8, 128], strides = [1, 1]} : vector<8x384xf32> to vector<8x128xf32>
    %662 = arith.mulf %661, %644 : vector<8x128xf32>
    %663 = vector.extract_strided_slice %658 {offsets = [0, 0], sizes = [8, 128], strides = [1, 1]} : vector<8x384xf32> to vector<8x128xf32>
    %664 = arith.mulf %663, %660 : vector<8x128xf32>
    %665 = arith.addf %662, %664 : vector<8x128xf32>
    %666 = vector.extract_strided_slice %658 {offsets = [0, 256], sizes = [8, 128], strides = [1, 1]} : vector<8x384xf32> to vector<8x128xf32>
    %667 = math.tanh %665 : vector<8x128xf32>
    %668 = arith.mulf %666, %667 : vector<8x128xf32>
    %669 = arith.truncf %668 : vector<8x128xf32> to vector<8x128xbf16>
    %670 = arith.addf %649, %668 : vector<8x128xf32>
    %c32_213 = arith.constant 32 : index
    %c0_214 = arith.constant 0 : index
    %671 = vector.load %arg10[%c32_213, %c0_214] : memref<64x512xf32, #tpu.memory_space<vmem>>, vector<8x512xf32>
    %cst_215 = arith.constant dense<0.000000e+00> : vector<8x512xf32>
    %672 = tpu.matmul %669, %586, %cst_215 {dimension_numbers = #tpu.dot_dimension_numbers<[1], [0], [0], [1], [0, 0, 1, 1], [], []>} : vector<8x128xbf16>, vector<128x512xbf16>, vector<8x512xf32> -> vector<8x512xf32>
    %673 = arith.addf %671, %672 : vector<8x512xf32>
    %674 = vector.extract_strided_slice %673 {offsets = [0, 0], sizes = [8, 384], strides = [1, 1]} : vector<8x512xf32> to vector<8x384xf32>
    %675 = arith.negf %674 : vector<8x384xf32>
    %676 = math.exp %675 : vector<8x384xf32>
    %cst_216 = arith.constant 1.000000e+00 : f32
    %677 = vector.broadcast %cst_216 : f32 to vector<8x384xf32>
    %678 = arith.addf %677, %676 : vector<8x384xf32>
    %679 = arith.divf %677, %678 : vector<8x384xf32>
    %680 = vector.extract_strided_slice %673 {offsets = [0, 384], sizes = [8, 128], strides = [1, 1]} : vector<8x512xf32> to vector<8x128xf32>
    %681 = math.tanh %680 : vector<8x128xf32>
    %682 = vector.extract_strided_slice %679 {offsets = [0, 128], sizes = [8, 128], strides = [1, 1]} : vector<8x384xf32> to vector<8x128xf32>
    %683 = arith.mulf %682, %665 : vector<8x128xf32>
    %684 = vector.extract_strided_slice %679 {offsets = [0, 0], sizes = [8, 128], strides = [1, 1]} : vector<8x384xf32> to vector<8x128xf32>
    %685 = arith.mulf %684, %681 : vector<8x128xf32>
    %686 = arith.addf %683, %685 : vector<8x128xf32>
    %687 = vector.extract_strided_slice %679 {offsets = [0, 256], sizes = [8, 128], strides = [1, 1]} : vector<8x384xf32> to vector<8x128xf32>
    %688 = math.tanh %686 : vector<8x128xf32>
    %689 = arith.mulf %687, %688 : vector<8x128xf32>
    %690 = arith.truncf %689 : vector<8x128xf32> to vector<8x128xbf16>
    %691 = arith.addf %670, %689 : vector<8x128xf32>
    %c40_217 = arith.constant 40 : index
    %c0_218 = arith.constant 0 : index
    %692 = vector.load %arg10[%c40_217, %c0_218] : memref<64x512xf32, #tpu.memory_space<vmem>>, vector<8x512xf32>
    %cst_219 = arith.constant dense<0.000000e+00> : vector<8x512xf32>
    %693 = tpu.matmul %690, %586, %cst_219 {dimension_numbers = #tpu.dot_dimension_numbers<[1], [0], [0], [1], [0, 0, 1, 1], [], []>} : vector<8x128xbf16>, vector<128x512xbf16>, vector<8x512xf32> -> vector<8x512xf32>
    %694 = arith.addf %692, %693 : vector<8x512xf32>
    %695 = vector.extract_strided_slice %694 {offsets = [0, 0], sizes = [8, 384], strides = [1, 1]} : vector<8x512xf32> to vector<8x384xf32>
    %696 = arith.negf %695 : vector<8x384xf32>
    %697 = math.exp %696 : vector<8x384xf32>
    %cst_220 = arith.constant 1.000000e+00 : f32
    %698 = vector.broadcast %cst_220 : f32 to vector<8x384xf32>
    %699 = arith.addf %698, %697 : vector<8x384xf32>
    %700 = arith.divf %698, %699 : vector<8x384xf32>
    %701 = vector.extract_strided_slice %694 {offsets = [0, 384], sizes = [8, 128], strides = [1, 1]} : vector<8x512xf32> to vector<8x128xf32>
    %702 = math.tanh %701 : vector<8x128xf32>
    %703 = vector.extract_strided_slice %700 {offsets = [0, 128], sizes = [8, 128], strides = [1, 1]} : vector<8x384xf32> to vector<8x128xf32>
    %704 = arith.mulf %703, %686 : vector<8x128xf32>
    %705 = vector.extract_strided_slice %700 {offsets = [0, 0], sizes = [8, 128], strides = [1, 1]} : vector<8x384xf32> to vector<8x128xf32>
    %706 = arith.mulf %705, %702 : vector<8x128xf32>
    %707 = arith.addf %704, %706 : vector<8x128xf32>
    %708 = vector.extract_strided_slice %700 {offsets = [0, 256], sizes = [8, 128], strides = [1, 1]} : vector<8x384xf32> to vector<8x128xf32>
    %709 = math.tanh %707 : vector<8x128xf32>
    %710 = arith.mulf %708, %709 : vector<8x128xf32>
    %711 = arith.truncf %710 : vector<8x128xf32> to vector<8x128xbf16>
    %712 = arith.addf %691, %710 : vector<8x128xf32>
    %c48_221 = arith.constant 48 : index
    %c0_222 = arith.constant 0 : index
    %713 = vector.load %arg10[%c48_221, %c0_222] : memref<64x512xf32, #tpu.memory_space<vmem>>, vector<8x512xf32>
    %cst_223 = arith.constant dense<0.000000e+00> : vector<8x512xf32>
    %714 = tpu.matmul %711, %586, %cst_223 {dimension_numbers = #tpu.dot_dimension_numbers<[1], [0], [0], [1], [0, 0, 1, 1], [], []>} : vector<8x128xbf16>, vector<128x512xbf16>, vector<8x512xf32> -> vector<8x512xf32>
    %715 = arith.addf %713, %714 : vector<8x512xf32>
    %716 = vector.extract_strided_slice %715 {offsets = [0, 0], sizes = [8, 384], strides = [1, 1]} : vector<8x512xf32> to vector<8x384xf32>
    %717 = arith.negf %716 : vector<8x384xf32>
    %718 = math.exp %717 : vector<8x384xf32>
    %cst_224 = arith.constant 1.000000e+00 : f32
    %719 = vector.broadcast %cst_224 : f32 to vector<8x384xf32>
    %720 = arith.addf %719, %718 : vector<8x384xf32>
    %721 = arith.divf %719, %720 : vector<8x384xf32>
    %722 = vector.extract_strided_slice %715 {offsets = [0, 384], sizes = [8, 128], strides = [1, 1]} : vector<8x512xf32> to vector<8x128xf32>
    %723 = math.tanh %722 : vector<8x128xf32>
    %724 = vector.extract_strided_slice %721 {offsets = [0, 128], sizes = [8, 128], strides = [1, 1]} : vector<8x384xf32> to vector<8x128xf32>
    %725 = arith.mulf %724, %707 : vector<8x128xf32>
    %726 = vector.extract_strided_slice %721 {offsets = [0, 0], sizes = [8, 128], strides = [1, 1]} : vector<8x384xf32> to vector<8x128xf32>
    %727 = arith.mulf %726, %723 : vector<8x128xf32>
    %728 = arith.addf %725, %727 : vector<8x128xf32>
    %729 = vector.extract_strided_slice %721 {offsets = [0, 256], sizes = [8, 128], strides = [1, 1]} : vector<8x384xf32> to vector<8x128xf32>
    %730 = math.tanh %728 : vector<8x128xf32>
    %731 = arith.mulf %729, %730 : vector<8x128xf32>
    %732 = arith.truncf %731 : vector<8x128xf32> to vector<8x128xbf16>
    %733 = arith.addf %712, %731 : vector<8x128xf32>
    %c56_225 = arith.constant 56 : index
    %c0_226 = arith.constant 0 : index
    %734 = vector.load %arg10[%c56_225, %c0_226] : memref<64x512xf32, #tpu.memory_space<vmem>>, vector<8x512xf32>
    %cst_227 = arith.constant dense<0.000000e+00> : vector<8x512xf32>
    %735 = tpu.matmul %732, %586, %cst_227 {dimension_numbers = #tpu.dot_dimension_numbers<[1], [0], [0], [1], [0, 0, 1, 1], [], []>} : vector<8x128xbf16>, vector<128x512xbf16>, vector<8x512xf32> -> vector<8x512xf32>
    %736 = arith.addf %734, %735 : vector<8x512xf32>
    %737 = vector.extract_strided_slice %736 {offsets = [0, 0], sizes = [8, 384], strides = [1, 1]} : vector<8x512xf32> to vector<8x384xf32>
    %738 = arith.negf %737 : vector<8x384xf32>
    %739 = math.exp %738 : vector<8x384xf32>
    %cst_228 = arith.constant 1.000000e+00 : f32
    %740 = vector.broadcast %cst_228 : f32 to vector<8x384xf32>
    %741 = arith.addf %740, %739 : vector<8x384xf32>
    %742 = arith.divf %740, %741 : vector<8x384xf32>
    %743 = vector.extract_strided_slice %736 {offsets = [0, 384], sizes = [8, 128], strides = [1, 1]} : vector<8x512xf32> to vector<8x128xf32>
    %744 = math.tanh %743 : vector<8x128xf32>
    %745 = vector.extract_strided_slice %742 {offsets = [0, 128], sizes = [8, 128], strides = [1, 1]} : vector<8x384xf32> to vector<8x128xf32>
    %746 = arith.mulf %745, %728 : vector<8x128xf32>
    %747 = vector.extract_strided_slice %742 {offsets = [0, 0], sizes = [8, 128], strides = [1, 1]} : vector<8x384xf32> to vector<8x128xf32>
    %748 = arith.mulf %747, %744 : vector<8x128xf32>
    %749 = arith.addf %746, %748 : vector<8x128xf32>
    %750 = vector.extract_strided_slice %742 {offsets = [0, 256], sizes = [8, 128], strides = [1, 1]} : vector<8x384xf32> to vector<8x128xf32>
    %751 = math.tanh %749 : vector<8x128xf32>
    %752 = arith.mulf %750, %751 : vector<8x128xf32>
    %753 = arith.addf %733, %752 : vector<8x128xf32>
    %cst_229 = arith.constant 1.250000e-01 : f32
    %754 = vector.broadcast %cst_229 : f32 to vector<8x128xf32>
    %755 = arith.mulf %753, %754 : vector<8x128xf32>
    %756 = arith.truncf %755 : vector<8x128xf32> to vector<8x128xbf16>
    %c0_230 = arith.constant 0 : index
    %c0_231 = arith.constant 0 : index
    %757 = vector.load %arg6[%c0_230, %c0_231] : memref<128x128xbf16, #tpu.memory_space<vmem>>, vector<128x128xbf16>
    %cst_232 = arith.constant dense<0.000000e+00> : vector<8x128xf32>
    %758 = tpu.matmul %756, %757, %cst_232 {dimension_numbers = #tpu.dot_dimension_numbers<[1], [0], [0], [1], [0, 0, 1, 1], [], []>} : vector<8x128xbf16>, vector<128x128xbf16>, vector<8x128xf32> -> vector<8x128xf32>
    %c0_233 = arith.constant 0 : index
    %c0_234 = arith.constant 0 : index
    %759 = vector.load %arg7[%c0_233, %c0_234] : memref<1x128xf32, #tpu.memory_space<vmem>>, vector<1x128xf32>
    %760 = vector.broadcast %759 : vector<1x128xf32> to vector<8x128xf32>
    %761 = arith.addf %758, %760 : vector<8x128xf32>
    %c0_235 = arith.constant 0 : index
    %c0_236 = arith.constant 0 : index
    %762 = vector.load %arg8[%c0_235, %c0_236] : memref<8x128xf32, #tpu.memory_space<vmem>>, vector<8x128xf32>
    tpu.vector_store %arg8[%c0_235, %c0_236], %761 {strides = array<i32>} : memref<8x128xf32, #tpu.memory_space<vmem>>, vector<8x128xf32>,
    return
  }
  func.func @transform_0(%arg0: i32) -> (i32, i32) {
    %c0_i32 = arith.constant 0 : i32
    %c0_i32_0 = arith.constant 0 : i32
    %c0_i32_1 = arith.constant 0 : i32
    return %c0_i32, %c0_i32_0 : i32, i32
  }
  func.func @transform_1(%arg0: i32) -> (i32, i32) {
    %c0_i32 = arith.constant 0 : i32
    %c0_i32_0 = arith.constant 0 : i32
    %c0_i32_1 = arith.constant 0 : i32
    return %c0_i32, %c0_i32_0 : i32, i32
  }
  func.func @transform_2(%arg0: i32) -> (i32, i32, i32) {
    %c0_i32 = arith.constant 0 : i32
    %c0_i32_0 = arith.constant 0 : i32
    %c0_i32_1 = arith.constant 0 : i32
    %c0_i32_2 = arith.constant 0 : i32
    return %c0_i32, %c0_i32_0, %c0_i32_1 : i32, i32, i32
  }
  func.func @transform_3(%arg0: i32) -> (i32, i32, i32) {
    %c0_i32 = arith.constant 0 : i32
    %c0_i32_0 = arith.constant 0 : i32
    %c0_i32_1 = arith.constant 0 : i32
    %c0_i32_2 = arith.constant 0 : i32
    return %c0_i32, %c0_i32_0, %c0_i32_1 : i32, i32, i32
  }
  func.func @transform_4(%arg0: i32) -> (i32, i32, i32) {
    %c0_i32 = arith.constant 0 : i32
    %c0_i32_0 = arith.constant 0 : i32
    %c0_i32_1 = arith.constant 0 : i32
    %c0_i32_2 = arith.constant 0 : i32
    return %c0_i32, %c0_i32_0, %c0_i32_1 : i32, i32, i32
  }
  func.func @transform_5(%arg0: i32) -> (i32, i32) {
    %c0_i32 = arith.constant 0 : i32
    %c0_i32_0 = arith.constant 0 : i32
    %c0_i32_1 = arith.constant 0 : i32
    return %c0_i32, %c0_i32_0 : i32, i32
  }
  func.func @transform_6(%arg0: i32) -> (i32, i32) {
    %c0_i32 = arith.constant 0 : i32
    %c0_i32_0 = arith.constant 0 : i32
    %c0_i32_1 = arith.constant 0 : i32
    return %c0_i32, %c0_i32_0 : i32, i32
  }
  func.func @transform_7(%arg0: i32) -> (i32, i32) {
    %c0_i32 = arith.constant 0 : i32
    %c0_i32_0 = arith.constant 0 : i32
    %c0_i32_1 = arith.constant 0 : i32
    return %c0_i32, %c0_i32_0 : i32, i32
  }
}

</mosaic_0001>

<bundles_post_ra>
// kernel: lstm_model_forward.1
= control target key start
LH: loop header
LB: loop body
LE: loop exit
PB: predicated region body
PF: predicated region fallthrough
CT: control target
= control target key end

     0   :  { %12 = vsyncpa [#allocation5], 0  ;;  %s11742_s0 = inlined_call_operand.vmem [shape: f32[64,1], index: 0, kind: input, shape index: {}]   ;;  %s11743_s1 = inlined_call_operand.vmem [shape: f32[1,512], index: 1, kind: input, shape index: {}]   ;;  %s11744_s2 = inlined_call_operand.hbm [shape: bf16[3,128,512], index: 2, kind: input, shape index: {}]   ;;  %s11745_s3 = inlined_call_operand.hbm [shape: bf16[4,128,512], index: 3, kind: input, shape index: {}]   ;;  %s11746_s4 = inlined_call_operand.vmem [shape: f32[4,1,512], index: 4, kind: input, shape index: {}]   ;;  %s11747_s5 = inlined_call_operand.vmem [shape: bf16[128,128], index: 5, kind: input, shape index: {}]   ;;  %s11748_s6 = inlined_call_operand.vmem [shape: f32[1,128], index: 6, kind: input, shape index: {}]   ;;  %s11749_s7 = inlined_call_operand.vmem [shape: f32[8,128], index: 7, kind: output, shape index: {}]  }
   0x1   :  { %s22_s26 = sshll.u32 %s11744_s2, 4  ;;  %s23_s26 = int_to_ptr.hbm [resolvable:$true] %s22_s26 }
   0x2   :  { %13 = vsyncpa [#allocation7], 0  ;;  %s8656_s27 = smov [#allocation4]   ;;  %s35_s8 = sshll.u32 %s11745_s3, 4  ;;  %s36_s8 = int_to_ptr.hbm [resolvable:$true] %s35_s8 }
   0x3   :  { %s24_s28 = sshll.u32 %s8656_s27, 4  ;;  %s8657_s9 = smov 256   ;;  %s25_s28 = int_to_ptr.vmem [resolvable:$true] %s24_s28 }
   0x4   :  { %s8658_s10 = smov 16   ;;  %s8659_s11 = smov [#allocation6]  }
   0x5   :  { %30 = dma.hbm_to_vmem [thread:$0]  %s23_s26, 12288, %s25_s28, [#allocation5], %s8657_s9, %s8657_s9, %s8658_s10  }
   0x6   :  { %s37_s12 = sshll.u32 %s8659_s11, 4  ;;  %s38_s12 = int_to_ptr.vmem [resolvable:$true] %s37_s12 }
   0x7   :  { %43 = dma.hbm_to_vmem [thread:$0]  %s36_s8, 16384, %s38_s12, [#allocation7], %s8657_s9, %s8657_s9, %s8658_s10  }
   0x8   :  { %8652 = dma.done.wait [#allocation5], 12288  }
   0x9   :  { %8653 = vsyncadd [#allocation5], 4294955008 }
   0xa   :  { %8654 = dma.done.wait [#allocation7], 16384  }
   0xb   :  { %8655 = vsyncadd [#allocation7], 4294950912  ;;  %v8660_v0 = vmov 0   ;;  %v58_v1 = vld [vmem:[%s11742_s0] sm:$0xff]  ;;  %v59_v2 = vld [vmem:[%s11742_s0 + $0x8] sm:$0xff] }
   0xc   :  { %8085 = vset.pattern.permute.xlu0 %v8660_v0  ;;  %8086 = vset.pattern.permute.xlu1 %v8660_v0  ;;  %v64_v3 = vld [vmem:[%s11742_s0 + $0x30] sm:$0xff]  ;;  %v6939_v4 = vld [vmem:[#allocation4 + $0xe0] sm:$0xf]  ;;  %v7908_v6 = vld [vmem:[#allocation4 + $0xe4] sm:$0xf] }
   0xd   :  { %8087 = vset.pattern.permute.xlu2 %v8660_v0  ;;  %69 = vperm.xlu0 %8085, %v58_v1   ;;  %v7910_v5 = vld [vmem:[#allocation4 + $0xec] sm:$0xf0]  ;;  %v6941_v8 = vld [vmem:[#allocation4 + $0xf0] sm:$0xf0]  ;;  %v6947_v9 = vld [vmem:[#allocation4 + $0xe8] sm:$0xf] }
   0xe   :  { %v8716_v7 = vor.u32 %v7910_v5, %v6939_v4  ;;  %v7911_v10 = vld [vmem:[#allocation4 + $0xf4] sm:$0xf0]  ;;  %v8718_v11 = vor.u32 %v7908_v6, %v6941_v8  ;;  %v7909_v13 = vld [vmem:[#allocation4 + $0xec] sm:$0xf]  ;;  %v6949_v14 = vld [vmem:[#allocation4 + $0xf8] sm:$0xf0] }
   0xf   :  { %v8720_v12 = vor.u32 %v7911_v10, %v6947_v9  ;;  %v8723_v15 = vor.u32 %v7909_v13, %v6949_v14  ;;  %v6923_v16 = vld [vmem:[#allocation4 + $0xc0] sm:$0xf]  ;;  %v7906_v17 = vld [vmem:[#allocation4 + $0xcc] sm:$0xf0]  ;;  %v7904_v18 = vld [vmem:[#allocation4 + $0xc4] sm:$0xf] }
  0x10   :  { %557 = vmatpush.bf16.msra.mxu0 %v8716_v7  ;;  %570 = vmatpush.bf16.msra.mxu1 %v8718_v11  ;;  %v8728_v19 = vor.u32 %v7906_v17, %v6923_v16  ;;  %v6925_v20 = vld [vmem:[#allocation4 + $0xd0] sm:$0xf0]  ;;  %v6931_v21 = vld [vmem:[#allocation4 + $0xc8] sm:$0xf]  ;;  %v7907_v22 = vld [vmem:[#allocation4 + $0xd4] sm:$0xf0] }
  0x11   :  { %583 = vmatpush.bf16.msra.mxu2 %v8720_v12  ;;  %596 = vmatpush.bf16.msra.mxu3 %v8723_v15  ;;  %v8730_v23 = vor.u32 %v7904_v18, %v6925_v20  ;;  %v8732_v24 = vor.u32 %v7907_v22, %v6931_v21  ;;  %v7905_v25 = vld [vmem:[#allocation4 + $0xcc] sm:$0xf]  ;;  %v6933_v26 = vld [vmem:[#allocation4 + $0xd8] sm:$0xf0]  ;;  %v6907_v28 = vld [vmem:[#allocation4 + $0xa0] sm:$0xf] }
  0x12   :  { %v8735_v27 = vor.u32 %v7905_v25, %v6933_v26  ;;  %v7902_v29 = vld [vmem:[#allocation4 + $0xac] sm:$0xf0]  ;;  %v7900_v30 = vld [vmem:[#allocation4 + $0xa4] sm:$0xf]  ;;  %v6909_v32 = vld [vmem:[#allocation4 + $0xb0] sm:$0xf0] }
  0x13   :  { %v8740_v31 = vor.u32 %v7902_v29, %v6907_v28  ;;  %v6915_v33 = vld [vmem:[#allocation4 + $0xa8] sm:$0xf]  ;;  %v7903_v34 = vld [vmem:[#allocation4 + $0xb4] sm:$0xf0]  ;;  %v8742_v35 = vor.u32 %v7900_v30, %v6909_v32  ;;  %v7901_v37 = vld [vmem:[#allocation4 + $0xac] sm:$0xf] }
  0x14   :  { %558 = vmatpush.bf16.msra.mxu0 %v8728_v19  ;;  %571 = vmatpush.bf16.msra.mxu1 %v8730_v23  ;;  %v8744_v36 = vor.u32 %v7903_v34, %v6915_v33  ;;  %v6917_v38 = vld [vmem:[#allocation4 + $0xb8] sm:$0xf0]  ;;  %v6891_v40 = vld [vmem:[#allocation4 + $0x80] sm:$0xf]  ;;  %v7898_v41 = vld [vmem:[#allocation4 + $0x8c] sm:$0xf0] }
  0x15   :  { %74 = vperm.xlu0 %8085, %v59_v2   ;;  %584 = vmatpush.bf16.msra.mxu2 %v8732_v24  ;;  %v8747_v39 = vor.u32 %v7901_v37, %v6917_v38  ;;  %v7896_v42 = vld [vmem:[#allocation4 + $0x84] sm:$0xf]  ;;  %v8752_v43 = vor.u32 %v7898_v41, %v6891_v40  ;;  %v6893_v44 = vld [vmem:[#allocation4 + $0x90] sm:$0xf0]  ;;  %v6899_v45 = vld [vmem:[#allocation4 + $0x88] sm:$0xf] }
  0x16   :  { %597 = vmatpush.bf16.msra.mxu3 %v8735_v27  ;;  %v7899_v46 = vld [vmem:[#allocation4 + $0x94] sm:$0xf0]  ;;  %v8754_v47 = vor.u32 %v7896_v42, %v6893_v44  ;;  %v7897_v49 = vld [vmem:[#allocation4 + $0x8c] sm:$0xf]  ;;  %v6901_v50 = vld [vmem:[#allocation4 + $0x98] sm:$0xf0] }
  0x17   :  { %v8756_v48 = vor.u32 %v7899_v46, %v6899_v45  ;;  %v8759_v51 = vor.u32 %v7897_v49, %v6901_v50  ;;  %v6875_v52 = vld [vmem:[#allocation4 + $0x60] sm:$0xf]  ;;  %v7894_v53 = vld [vmem:[#allocation4 + $0x6c] sm:$0xf0]  ;;  %v7892_v54 = vld [vmem:[#allocation4 + $0x64] sm:$0xf] }
  0x18   :  { %559 = vmatpush.bf16.msra.mxu0 %v8740_v31  ;;  %572 = vmatpush.bf16.msra.mxu1 %v8742_v35  ;;  %v8764_v55 = vor.u32 %v7894_v53, %v6875_v52  ;;  %v6877_v56 = vld [vmem:[#allocation4 + $0x70] sm:$0xf0]  ;;  %v6883_v57 = vld [vmem:[#allocation4 + $0x68] sm:$0xf]  ;;  %v7895_v58 = vld [vmem:[#allocation4 + $0x74] sm:$0xf0] }
  0x19   :  { %585 = vmatpush.bf16.msra.mxu2 %v8744_v36  ;;  %v8766_v59 = vor.u32 %v7892_v54, %v6877_v56  ;;  %v8768_v60 = vor.u32 %v7895_v58, %v6883_v57  ;;  %v7893_v61 = vld [vmem:[#allocation4 + $0x6c] sm:$0xf]  ;;  %v6885_v62 = vld [vmem:[#allocation4 + $0x78] sm:$0xf0]  ;;  %v8773_v63 = vld [vmem:[%s11743_s1] sm:$0xf] }
  0x1a   :  { %598 = vmatpush.bf16.msra.mxu3 %v8747_v39  ;;  %v8778_v0 = vld [vmem:[%s11746_s4] sm:$0xf]  ;;  %v8781_v1 = vor.u32 %v7893_v61, %v6885_v62  ;;  %v7888_v4 = vld [vmem:[#allocation4 + $0x44] sm:$0xf]  ;;  %v6861_v6 = vld [vmem:[#allocation4 + $0x50] sm:$0xf0] }
  0x1b   :  { %v6859_v2 = vld [vmem:[#allocation4 + $0x40] sm:$0xf]  ;;  %v6867_v8 = vld [vmem:[#allocation4 + $0x48] sm:$0xf]  ;;  %v7891_v9 = vld [vmem:[#allocation4 + $0x54] sm:$0xf0]  ;;  %v8791_v13 = vor.u32 %v7888_v4, %v6861_v6 }
  0x1c   :  { %560 = vmatpush.bf16.msra.mxu0 %v8752_v43  ;;  %573 = vmatpush.bf16.msra.mxu1 %v8754_v47  ;;  %v8789_v10 = vperm.slane %v8773_v63, 0  ;;  %v8793_v14 = vor.u32 %v7891_v9, %v6867_v8  ;;  %v7889_v16 = vld [vmem:[#allocation4 + $0x4c] sm:$0xf]  ;;  %v6869_v17 = vld [vmem:[#allocation4 + $0x58] sm:$0xf0]  ;;  %v8796_v18 = vperm.slane %v8773_v63, 1 }
  0x1d   :  { %99 = vperm.xlu0 %8085, %v64_v3   ;;  %586 = vmatpush.bf16.msra.mxu2 %v8756_v48  ;;  %v7890_v3 = vld [vmem:[#allocation4 + $0x4c] sm:$0xf0]  ;;  %v8799_v20 = vperm.slane %v8773_v63, 2  ;;  %v8802_v21 = vperm.slane %v8778_v0, 0  ;;  %v8805_v22 = vor.u32 %v7889_v16, %v6869_v17  ;;  %v6843_v25 = vld [vmem:[#allocation4 + $0x20] sm:$0xf] }
  0x1e   :  { %599 = vmatpush.bf16.msra.mxu3 %v8759_v51  ;;  %v8786_v5 = vor.u32 %v7890_v3, %v6859_v2  ;;  %11962 = vst [vmem:[#allocation10_spill] sm:$0xff] %v8789_v10  ;;  %v7886_v26 = vld [vmem:[#allocation4 + $0x2c] sm:$0xf0]  ;;  %v7884_v28 = vld [vmem:[#allocation4 + $0x24] sm:$0xf]  ;;  %v8813_v34 = vperm.slane %v8778_v0, 1 }
  0x1f   :  { %11963 = vst [vmem:[#allocation11_spill] sm:$0xff] %v8796_v18  ;;  %v8810_v29 = vor.u32 %v7886_v26, %v6843_v25  ;;  %v6845_v30 = vld [vmem:[#allocation4 + $0x30] sm:$0xf0]  ;;  %v6851_v32 = vld [vmem:[#allocation4 + $0x28] sm:$0xf]  ;;  %v8816_v37 = vperm.slane %v8778_v0, 2 }
  0x20   :  { %561 = vmatpush.bf16.msra.mxu0 %v8764_v55  ;;  %574 = vmatpush.bf16.msra.mxu1 %v8766_v59  ;;  %11964 = vst [vmem:[#allocation12_spill] sm:$0xff] %v8799_v20  ;;  %v7887_v33 = vld [vmem:[#allocation4 + $0x34] sm:$0xf0]  ;;  %v8818_v38 = vor.u32 %v7884_v28, %v6845_v30  ;;  %v7885_v41 = vld [vmem:[#allocation4 + $0x2c] sm:$0xf] }
  0x21   :  { %587 = vmatpush.bf16.msra.mxu2 %v8768_v60  ;;  %11965 = vst [vmem:[#allocation13_spill] sm:$0xff] %v8802_v21  ;;  %v8820_v40 = vor.u32 %v7887_v33, %v6851_v32  ;;  %v6853_v42 = vld [vmem:[#allocation4 + $0x38] sm:$0xf0]  ;;  %v6827_v52 = vld [vmem:[#allocation4] sm:$0xf] }
  0x22   :  { %600 = vmatpush.bf16.msra.mxu3 %v8781_v1  ;;  %11966 = vst [vmem:[#allocation14_spill] sm:$0xff] %v8813_v34  ;;  %v8825_v45 = vor.u32 %v7885_v41, %v6853_v42  ;;  %v7882_v53 = vld [vmem:[#allocation4 + $0xc] sm:$0xf0]  ;;  %v7880_v54 = vld [vmem:[#allocation4 + $0x4] sm:$0xf] }
  0x23   :  { %11967 = vst [vmem:[#allocation15_spill] sm:$0xff] %v8816_v37  ;;  %v8836_v56 = vor.u32 %v7882_v53, %v6827_v52  ;;  %v6829_v57 = vld [vmem:[#allocation4 + $0x10] sm:$0xf0]  ;;  %v6835_v58 = vld [vmem:[#allocation4 + $0x8] sm:$0xf] }
  0x24   :  { %562 = vmatpush.bf16.msra.mxu0 %v8786_v5  ;;  %575 = vmatpush.bf16.msra.mxu1 %v8791_v13  ;;  %v7883_v61 = vld [vmem:[#allocation4 + $0x14] sm:$0xf0]  ;;  %v7881_v4 = vld [vmem:[#allocation4 + $0xc] sm:$0xf]  ;;  %v6837_v6 = vld [vmem:[#allocation4 + $0x18] sm:$0xf0]  ;;  %v8842_v9 = vor.u32 %v7880_v54, %v6829_v57 }
  0x25   :  { %588 = vmatpush.bf16.msra.mxu2 %v8793_v14  ;;  %v7067_v8 = vld [vmem:[#allocation6 + $0xe0] sm:$0xf]  ;;  %v8844_v16 = vor.u32 %v7883_v61, %v6835_v58  ;;  %v8846_v17 = vor.u32 %v7881_v4, %v6837_v6  ;;  %v7878_v25 = vld [vmem:[#allocation6 + $0xec] sm:$0xf0]  ;;  %v7876_v26 = vld [vmem:[#allocation6 + $0xe4] sm:$0xf] }
  0x26   :  { %601 = vmatpush.bf16.msra.mxu3 %v8805_v22  ;;  %v7069_v28 = vld [vmem:[#allocation6 + $0xf0] sm:$0xf0]  ;;  %v8850_v41 = vor.u32 %v7878_v25, %v7067_v8  ;;  %v7077_v53 = vld [vmem:[#allocation6 + $0xf8] sm:$0xf0]  ;;  %v7051_v54 = vld [vmem:[#allocation6 + $0xc0] sm:$0xf] }
  0x27   :  { %v8852_v42 = vor.u32 %v7876_v26, %v7069_v28  ;;  %v7874_v57 = vld [vmem:[#allocation6 + $0xcc] sm:$0xf0]  ;;  %v7875_v6 = vld [vmem:[#allocation6 + $0xd4] sm:$0xf0]  ;;  %v7873_v8 = vld [vmem:[#allocation6 + $0xcc] sm:$0xf] }
  0x28   :  { %563 = vmatpush.bf16.msra.mxu0 %v8810_v29  ;;  %576 = vmatpush.bf16.msra.mxu1 %v8818_v38  ;;  %v8861_v61 = vor.u32 %v7874_v57, %v7051_v54  ;;  %v7061_v25 = vld [vmem:[#allocation6 + $0xd8] sm:$0xf0]  ;;  %v7869_v57 = vld [vmem:[#allocation6 + $0xac] sm:$0xf] }
  0x29   :  { %589 = vmatpush.bf16.msra.mxu2 %v8820_v40  ;;  %11968 = vst [vmem:[#allocation16_spill] sm:$0xff] %v8852_v42  ;;  %v8869_v28 = vor.u32 %v7873_v8, %v7061_v25  ;;  %v8881_v8 = vperm.slane %v8773_v63, 3 }
  0x2a   :  { %602 = vmatpush.bf16.msra.mxu3 %v8825_v45  ;;  %11971 = vst [vmem:[#allocation19_spill] sm:$0xff] %v8861_v61 }
  0x2b   :  { %11974 = vst [vmem:[#allocation22_spill] sm:$0xff] %v8869_v28 }
  0x2c   :  { %564 = vmatpush.bf16.msra.mxu0 %v8836_v56  ;;  %577 = vmatpush.bf16.msra.mxu1 %v8842_v9  ;;  %11978 = vst [vmem:[#allocation26_spill] sm:$0xff] %v8881_v8 }
  0x2d   :  { %590 = vmatpush.bf16.msra.mxu2 %v8844_v16 }
  0x2e   :  { %603 = vmatpush.bf16.msra.mxu3 %v8846_v17 }
  0x30   :  { %777 = vmatpush.bf16.msrb.mxu0 %v8850_v41  ;;  %790 = vmatpush.bf16.msrb.mxu1 %v8852_v42  ;;  %v6979_v42 = vld [vmem:[#allocation6 + $0x28] sm:$0xf] }
  0x34   :  { %778 = vmatpush.bf16.msrb.mxu0 %v8861_v61 }
  0x7f   :  { %v8822_v44 = vpop.permute.xlu0 %69 }
  0x80   :  { %v116_v46 = vmul.f32 %v8789_v10, %v8822_v44  ;;  %v117_v49 = vmul.f32 %v8796_v18, %v8822_v44  ;;  %v118_v50 = vmul.f32 %v8799_v20, %v8822_v44 }
  0x82   :  { %v190_v62 = vadd.f32 %v8802_v21, %v116_v46  ;;  %v191_v2 = vadd.f32 %v8813_v34, %v117_v49  ;;  %v192_v3 = vadd.f32 %v8816_v37, %v118_v50  ;;  %v7075_v46 = vld [vmem:[#allocation6 + $0xe8] sm:$0xf]  ;;  %v7879_v49 = vld [vmem:[#allocation6 + $0xf4] sm:$0xf0]  ;;  %v7877_v50 = vld [vmem:[#allocation6 + $0xec] sm:$0xf] }
  0x83   :  { %v8855_v52 = vor.u32 %v7879_v49, %v7075_v46  ;;  %v8859_v58 = vor.u32 %v7877_v50, %v7077_v53  ;;  %v7868_v46 = vld [vmem:[#allocation6 + $0xa4] sm:$0xf]  ;;  %v7037_v49 = vld [vmem:[#allocation6 + $0xb0] sm:$0xf0]  ;;  %v7043_v50 = vld [vmem:[#allocation6 + $0xa8] sm:$0xf] }
  0x84   :  { %v6822_v30 = vmul.f32 -1.442695, %v190_v62  ;;  %v6823_v32 = vmul.f32 -1.442695, %v191_v2  ;;  %v6824_v33 = vmul.f32 -1.442695, %v192_v3  ;;  %v8875_v54 = vor.u32 %v7868_v46, %v7037_v49 }
  0x85   :  { %11969 = vst [vmem:[#allocation17_spill] sm:$0xff] %v8855_v52  ;;  %v7872_v62 = vld [vmem:[#allocation6 + $0xc4] sm:$0xf]  ;;  %v7053_v2 = vld [vmem:[#allocation6 + $0xd0] sm:$0xf0]  ;;  %803 = vmatpush.bf16.msrb.mxu2 %v8855_v52  ;;  %816 = vmatpush.bf16.msrb.mxu3 %v8859_v58 }
  0x86   :  { %8089 = vpow2.f32 %v6822_v30  ;;  %11970 = vst [vmem:[#allocation18_spill] sm:$0xff] %v8859_v58  ;;  %v7059_v3 = vld [vmem:[#allocation6 + $0xc8] sm:$0xf]  ;;  %v8864_v4 = vor.u32 %v7872_v62, %v7053_v2  ;;  %v7035_v30 = vld [vmem:[#allocation6 + $0xa0] sm:$0xf] }
  0x87   :  { %8091 = vpow2.f32 %v6823_v32  ;;  %v8867_v26 = vor.u32 %v7875_v6, %v7059_v3  ;;  %v7870_v32 = vld [vmem:[#allocation6 + $0xac] sm:$0xf0]  ;;  %v7871_v53 = vld [vmem:[#allocation6 + $0xb4] sm:$0xf0]  ;;  %11976 = vst [vmem:[#allocation24_spill] sm:$0xff] %v8875_v54 }
  0x88   :  { %8093 = vpow2.f32 %v6824_v33  ;;  %11972 = vst [vmem:[#allocation20_spill] sm:$0xff] %v8864_v4  ;;  %791 = vmatpush.bf16.msrb.mxu1 %v8864_v4  ;;  %v8873_v33 = vor.u32 %v7870_v32, %v7035_v30  ;;  %v7045_v62 = vld [vmem:[#allocation6 + $0xb8] sm:$0xf0]  ;;  %v8878_v3 = vor.u32 %v7871_v53, %v7043_v50  ;;  %v7019_v30 = vld [vmem:[#allocation6 + $0x80] sm:$0xf]  ;;  %v8898_v50 = vperm.slane %v8778_v0, 3 }
  0x89   :  { %11973 = vst [vmem:[#allocation21_spill] sm:$0xff] %v8867_v26  ;;  %804 = vmatpush.bf16.msrb.mxu2 %v8867_v26  ;;  %817 = vmatpush.bf16.msrb.mxu3 %v8869_v28  ;;  %v8886_v37 = vor.u32 %v7869_v57, %v7045_v62  ;;  %v7866_v32 = vld [vmem:[#allocation6 + $0x8c] sm:$0xf0]  ;;  %v119_v53 = vmul.f32 %v8881_v8, %v8822_v44  ;;  %v7864_v57 = vld [vmem:[#allocation6 + $0x84] sm:$0xf] }
  0x8a   :  { %11975 = vst [vmem:[#allocation23_spill] sm:$0xff] %v8873_v33  ;;  %779 = vmatpush.bf16.msrb.mxu0 %v8873_v33  ;;  %v8895_v63 = vor.u32 %v7866_v32, %v7019_v30  ;;  %v7021_v62 = vld [vmem:[#allocation6 + $0x90] sm:$0xf0]  ;;  %v7865_v30 = vld [vmem:[#allocation6 + $0x8c] sm:$0xf] }
  0x8b   :  { %11977 = vst [vmem:[#allocation25_spill] sm:$0xff] %v8878_v3  ;;  %v7029_v32 = vld [vmem:[#allocation6 + $0x98] sm:$0xf0]  ;;  %v7862_v34 = vld [vmem:[#allocation6 + $0x6c] sm:$0xf0]  ;;  %v8909_v18 = vor.u32 %v7864_v57, %v7021_v62 }
  0x8c   :  { %v8090_v2 = vpop.eup %8089  ;;  %11979 = vst [vmem:[#allocation27_spill] sm:$0xff] %v8886_v37  ;;  %792 = vmatpush.bf16.msrb.mxu1 %v8875_v54  ;;  %v7860_v44 = vld [vmem:[#allocation6 + $0x64] sm:$0xf]  ;;  %v7005_v8 = vld [vmem:[#allocation6 + $0x70] sm:$0xf0]  ;;  %v8916_v54 = vor.u32 %v7865_v30, %v7029_v32 }
  0x8d   :  { %v8092_v6 = vpop.eup %8091  ;;  %v8883_v25 = vadd.f32 1.0, %v8090_v2  ;;  %11980 = vst [vmem:[#allocation28_spill] sm:$0xff] %v8895_v63  ;;  %805 = vmatpush.bf16.msrb.mxu2 %v8878_v3  ;;  %818 = vmatpush.bf16.msrb.mxu3 %v8886_v37  ;;  %v7027_v2 = vld [vmem:[#allocation6 + $0x88] sm:$0xf]  ;;  %v193_v37 = vadd.f32 %v8898_v50, %v119_v53  ;;  %v7861_v26 = vld [vmem:[#allocation6 + $0x6c] sm:$0xf]  ;;  %v8925_v62 = vor.u32 %v7860_v44, %v7005_v8 }
  0x8e   :  { %v8094_v46 = vpop.eup %8093  ;;  %v8888_v49 = vadd.f32 1.0, %v8092_v6  ;;  %11981 = vst [vmem:[#allocation29_spill] sm:$0xff] %v8898_v50  ;;  %v7867_v6 = vld [vmem:[#allocation6 + $0x94] sm:$0xf0]  ;;  %780 = vmatpush.bf16.msrb.mxu0 %v8895_v63  ;;  %v7011_v28 = vld [vmem:[#allocation6 + $0x68] sm:$0xf] }
  0x8f   :  { %v8890_v20 = vadd.f32 1.0, %v8094_v46  ;;  %8095 = vrcp.f32 %v8883_v25  ;;  %v354_v0 = vand.u32 2147483647, %v8883_v25  ;;  %v7003_v46 = vld [vmem:[#allocation6 + $0x60] sm:$0xf]  ;;  %11982 = vst [vmem:[#allocation30_spill] sm:$0xff] %v8909_v18  ;;  %v8914_v3 = vor.u32 %v7867_v6, %v7027_v2 }
  0x90   :  { %8097 = vrcp.f32 %v8888_v49  ;;  %11984 = vst [vmem:[#allocation32_spill] sm:$0xff] %v8916_v54  ;;  %v8918_v33 = vor.u32 %v7862_v34, %v7003_v46  ;;  %v7863_v63 = vld [vmem:[#allocation6 + $0x74] sm:$0xf0]  ;;  %793 = vmatpush.bf16.msrb.mxu1 %v8909_v18  ;;  %v7013_v21 = vld [vmem:[#allocation6 + $0x78] sm:$0xf0]  ;;  %vm350_vm3 = vweird.f32 %v8883_v25  ;;  %vm365_vm5 = vweird.f32 %v8888_v49 }
  0x91   :  { %8099 = vrcp.f32 %v8890_v20  ;;  %11983 = vst [vmem:[#allocation31_spill] sm:$0xff] %v8914_v3  ;;  %v6987_v53 = vld [vmem:[#allocation6 + $0x40] sm:$0xf]  ;;  %v7858_v2 = vld [vmem:[#allocation6 + $0x4c] sm:$0xf0]  ;;  %806 = vmatpush.bf16.msrb.mxu2 %v8914_v3  ;;  %819 = vmatpush.bf16.msrb.mxu3 %v8916_v54  ;;  %v8934_v32 = vor.u32 %v7863_v63, %v7011_v28  ;;  %v8936_v46 = vor.u32 %v7861_v26, %v7013_v21  ;;  %vm8938_vm0 = vcmp.eq.f32.partialorder %v354_v0, 8.507059e+37 }
  0x92   :  { %11985 = vst [vmem:[#allocation33_spill] sm:$0xff] %v8918_v33  ;;  %v369_v30 = vand.u32 2147483647, %v8888_v49  ;;  %v7856_v8 = vld [vmem:[#allocation6 + $0x44] sm:$0xf]  ;;  %781 = vmatpush.bf16.msrb.mxu0 %v8918_v33  ;;  %v8945_v58 = vor.u32 %v7858_v2, %v6987_v53  ;;  %v371_v21 = vand.u32 2147483648, %v8888_v49  ;;  %8101 = vtanh.f32 %v193_v37 }
  0x93   :  { %11986 = vst [vmem:[#allocation34_spill] sm:$0xff] %v8925_v62  ;;  %v6989_v44 = vld [vmem:[#allocation6 + $0x50] sm:$0xf0]  ;;  %v6995_v3 = vld [vmem:[#allocation6 + $0x48] sm:$0xf]  ;;  %vm380_vm9 = vweird.f32 %v8890_v20 }
  0x94   :  { %11987 = vst [vmem:[#allocation35_spill] sm:$0xff] %v8934_v32  ;;  %v7859_v54 = vld [vmem:[#allocation6 + $0x54] sm:$0xf0]  ;;  %v7857_v26 = vld [vmem:[#allocation6 + $0x4c] sm:$0xf]  ;;  %794 = vmatpush.bf16.msrb.mxu1 %v8925_v62  ;;  %v8951_v52 = vor.u32 %v7856_v8, %v6989_v44  ;;  %vm8972_vm6 = vcmp.eq.f32.partialorder %v369_v30, 8.507059e+37 }
  0x95   :  { %v8911_v10 = vpop.eup %8095  ;;  %11988 = vst [vmem:[#allocation36_spill] sm:$0xff] %v8936_v46  ;;  %v6997_v63 = vld [vmem:[#allocation6 + $0x58] sm:$0xf0]  ;;  %v6971_v33 = vld [vmem:[#allocation6 + $0x20] sm:$0xf]  ;;  %807 = vmatpush.bf16.msrb.mxu2 %v8934_v32  ;;  %820 = vmatpush.bf16.msrb.mxu3 %v8936_v46  ;;  %v8957_v37 = vor.u32 %v7859_v54, %v6995_v3  ;;  %v11996_v54 = vand.u32 2147483648, %v8883_v25 }
  0x96   :  { %v8920_v4 = vpop.eup %8097  ;;  %v346_v57 = vmul.f32 %v8911_v10, %v8883_v25  ;;  %11991 = vst [vmem:[#allocation37_spill] sm:$0xff] %v8945_v58  ;;  %vm351_vm1 = vweird.f32 %v8911_v10  ;;  %v7854_v53 = vld [vmem:[#allocation6 + $0x2c] sm:$0xf0]  ;;  %782 = vmatpush.bf16.msrb.mxu0 %v8945_v58  ;;  %v7853_v62 = vld [vmem:[#allocation6 + $0x2c] sm:$0xf]  ;;  %v372_v58 = vor.u32 1.1754944e-38, %v371_v21 }
  0x97   :  { %v8927_v6 = vpop.eup %8099  ;;  %v361_v34 = vmul.f32 %v8920_v4, %v8888_v49  ;;  %11992 = vst [vmem:[#allocation38_spill] sm:$0xff] %v8951_v52  ;;  %vm366_vm2 = vweird.f32 %v8920_v4  ;;  %v8964_v44 = vor.u32 %v7854_v53, %v6971_v33  ;;  %v6981_v32 = vld [vmem:[#allocation6 + $0x38] sm:$0xf0]  ;;  %vm352_vm4 = vmor %vm350_vm3, %vm351_vm1  ;;  %v357_v3 = vor.u32 1.1754944e-38, %v11996_v54  ;;  %v7850_v33 = vld [vmem:[#allocation6 + $0xc] sm:$0xf0] }
  0x98   :  { %v347_v50 = vsub.f32 1.0, %v346_v57  ;;  %v376_v61 = vmul.f32 %v8927_v6, %v8890_v20  ;;  %11993 = vst [vmem:[#allocation39_spill] sm:$0xff] %v8957_v37  ;;  %vm367_vm7 = vmor %vm365_vm5, %vm366_vm2  ;;  %795 = vmatpush.bf16.msrb.mxu1 %v8951_v52  ;;  %v6957_v21 = vld [vmem:[#allocation6 + $0x10] sm:$0xf0]  ;;  %v6963_v46 = vld [vmem:[#allocation6 + $0x8] sm:$0xf]  ;;  %vm381_vm8 = vweird.f32 %v8927_v6 }
  0x99   :  { %v362_v28 = vsub.f32 1.0, %v361_v34  ;;  %v7852_v34 = vld [vmem:[#allocation6 + $0x24] sm:$0xf]  ;;  %11995 = vst [vmem:[#allocation41_spill] sm:$0xff] %v8964_v44  ;;  %808 = vmatpush.bf16.msrb.mxu2 %v8957_v37  ;;  %vm382_vm10 = vmor %vm380_vm9, %vm381_vm8 }
  0x9a   :  { %v348_v0 = vmul.f32 %v8911_v10, %v347_v50  ;;  %v377_v57 = vsub.f32 1.0, %v376_v61  ;;  %v8959_v50 = vor.u32 %v7857_v26, %v6997_v63  ;;  %v6973_v61 = vld [vmem:[#allocation6 + $0x30] sm:$0xf0]  ;;  %783 = vmatpush.bf16.msrb.mxu0 %v8964_v44 }
  0x9b   :  { %v363_v2 = vmul.f32 %v8920_v4, %v362_v28  ;;  %v7855_v28 = vld [vmem:[#allocation6 + $0x34] sm:$0xf0]  ;;  %v8980_v25 = vor.u32 %v7852_v34, %v6973_v61 }
  0x9c   :  { %11994 = vst [vmem:[#allocation40_spill] sm:$0xff] %v8959_v50  ;;  %v349_v8 = vadd.f32 %v8911_v10, %v348_v0  ;;  %v6955_v0 = vld [vmem:[#allocation6] sm:$0xf]  ;;  %v8982_v54 = vor.u32 %v7855_v28, %v6979_v42  ;;  %821 = vmatpush.bf16.msrb.mxu3 %v8959_v50  ;;  %v378_v42 = vmul.f32 %v8927_v6, %v377_v57  ;;  %v7849_v28 = vld [vmem:[#allocation6 + $0xc] sm:$0xf] }
  0x9d   :  { %v364_v26 = vadd.f32 %v8920_v4, %v363_v2  ;;  %11999 = vst [vmem:[#allocation42_spill] sm:$0xff] %v8980_v25  ;;  %v8102_v2 = vpop.eup %8101  ;;  %v8995_v18 = vor.u32 %v7850_v33, %v6955_v0  ;;  %796 = vmatpush.bf16.msrb.mxu1 %v8980_v25  ;;  %v386_v0 = vand.u32 2147483648, %v8890_v20  ;;  %v384_v33 = vand.u32 2147483647, %v8890_v20  ;;  %v12006_v20 = vld [vmem:[#allocation16_spill] sm:$0xff] }
  0x9e   :  { %v353_v53 = vsel %vm352_vm4, %v8911_v10, %v349_v8  ;;  %12000 = vst [vmem:[#allocation43_spill] sm:$0xff] %v8982_v54  ;;  %v8989_v10 = vor.u32 %v7853_v62, %v6981_v32  ;;  %v7848_v8 = vld [vmem:[#allocation6 + $0x4] sm:$0xf]  ;;  %809 = vmatpush.bf16.msrb.mxu2 %v8982_v54  ;;  %v379_v63 = vadd.f32 %v8927_v6, %v378_v42  ;;  %v12010_v42 = vld [vmem:[#allocation20_spill] sm:$0xff] }
  0x9f   :  { %v358_v49 = vsel %vm8938_vm0, %v357_v3, %v353_v53  ;;  %v368_v30 = vsel %vm367_vm7, %v8920_v4, %v364_v26  ;;  %12002 = vst [vmem:[#allocation45_spill] sm:$0xff] %v8995_v18  ;;  %v7851_v4 = vld [vmem:[#allocation6 + $0x14] sm:$0xf0]  ;;  %v6965_v3 = vld [vmem:[#allocation6 + $0x18] sm:$0xf0]  ;;  %v8998_v62 = vor.u32 %v7848_v8, %v6957_v21  ;;  %784 = vmatpush.bf16.msrb.mxu0 %v8995_v18  ;;  %v387_v53 = vor.u32 1.1754944e-38, %v386_v0 }
  0xa0   :  { %12001 = vst [vmem:[#allocation44_spill] sm:$0xff] %v8989_v10  ;;  %v373_v34 = vsel %vm8972_vm6, %v372_v58, %v368_v30  ;;  %v392_v61 = vmul.f32 %v8102_v2, %v358_v49  ;;  %822 = vmatpush.bf16.msrb.mxu3 %v8989_v10  ;;  %v9004_v58 = vor.u32 %v7851_v4, %v6963_v46  ;;  %vm385_vm11 = vcmp.eq.f32.partialorder %v384_v33, 8.507059e+37  ;;  %v12008_v21 = vld [vmem:[#allocation18_spill] sm:$0xff]  ;;  %v12017_v0 = vld [vmem:[#allocation28_spill] sm:$0xff] }
  0xa1   :  { %v391_v26 = vmul.f32 0.0, %v373_v34  ;;  %12003 = vst [vmem:[#allocation46_spill] sm:$0xff] %v8998_v62  ;;  %v9006_v57 = vor.u32 %v7849_v28, %v6965_v3  ;;  %797 = vmatpush.bf16.msrb.mxu1 %v8998_v62  ;;  %v383_v46 = vsel %vm382_vm10, %v8927_v6, %v379_v63  ;;  %v12007_v6 = vld [vmem:[#allocation17_spill] sm:$0xff]  ;;  %v12009_v34 = vld [vmem:[#allocation19_spill] sm:$0xff]  ;;  %v12012_v4 = vld [vmem:[#allocation22_spill] sm:$0xff] }
  0xa2   :  { %12004 = vst [vmem:[#allocation47_spill] sm:$0xff] %v9004_v58  ;;  %810 = vmatpush.bf16.msrb.mxu2 %v9004_v58  ;;  %v388_v49 = vsel %vm385_vm11, %v387_v53, %v383_v46  ;;  %v12013_v28 = vld [vmem:[#allocation23_spill] sm:$0xff]  ;;  %v12014_v3 = vld [vmem:[#allocation24_spill] sm:$0xff]  ;;  %v12018_v33 = vld [vmem:[#allocation30_spill] sm:$0xff] }
  0xa3   :  { %v9000_v32 = vadd.f32 %v392_v61, %v391_v26  ;;  %12005 = vst [vmem:[#allocation48_spill] sm:$0xff] %v9006_v57  ;;  %v12011_v61 = vld [vmem:[#allocation21_spill] sm:$0xff]  ;;  %v12016_v63 = vld [vmem:[#allocation27_spill] sm:$0xff]  ;;  %v12020_v53 = vld [vmem:[#allocation32_spill] sm:$0xff] }
  0xa4   :  { %823 = vmatpush.bf16.msrb.mxu3 %v9006_v57  ;;  %v12015_v26 = vld [vmem:[#allocation25_spill] sm:$0xff]  ;;  %v12019_v46 = vld [vmem:[#allocation31_spill] sm:$0xff] }
  0xa5   :  { %8103 = vtanh.f32 %v9000_v32 }
  0xab   :  { %v8104_v2 = vpop.eup %8103 }
  0xac   :  { %v395_v30 = vmul.f32 %v8104_v2, %v388_v49  ;;  %v12021_v2 = vld [vmem:[#allocation33_spill] sm:$0xff]  ;;  %v12022_v49 = vld [vmem:[#allocation34_spill] sm:$0xff] }
  0xae   :  { %v396_v8 = vpack.c.bf16 %v395_v30, %v395_v30  ;;  %v12023_v30 = vld [vmem:[#allocation35_spill] sm:$0xff] }
  0xb0   :  { %565 = vmatmul.bf16.vlgmr.msra.gmra.mxu0 %v396_v8  ;;  %578 = vmatmul.bf16.vlgmr.msra.gmra.mxu1 %v396_v8 }
  0xb1   :  { %591 = vmatmul.bf16.vlgmr.msra.gmra.mxu2 %v396_v8  ;;  %604 = vmatmul.bf16.vlgmr.msra.gmra.mxu3 %v396_v8 }
  0xb2   :  { %897 = vmatpush.bf16.msra.mxu0 %v8716_v7  ;;  %910 = vmatpush.bf16.msra.mxu1 %v8718_v11 }
  0xb3   :  { %923 = vmatpush.bf16.msra.mxu2 %v8720_v12  ;;  %936 = vmatpush.bf16.msra.mxu3 %v8723_v15 }
  0xb6   :  { %898 = vmatpush.bf16.msra.mxu0 %v8728_v19  ;;  %911 = vmatpush.bf16.msra.mxu1 %v8730_v23 }
  0xb7   :  { %924 = vmatpush.bf16.msra.mxu2 %v8732_v24  ;;  %937 = vmatpush.bf16.msra.mxu3 %v8735_v27 }
  0xba   :  { %899 = vmatpush.bf16.msra.mxu0 %v8740_v31  ;;  %912 = vmatpush.bf16.msra.mxu1 %v8742_v35 }
  0xbb   :  { %925 = vmatpush.bf16.msra.mxu2 %v8744_v36  ;;  %938 = vmatpush.bf16.msra.mxu3 %v8747_v39 }
  0xbe   :  { %900 = vmatpush.bf16.msra.mxu0 %v8752_v43  ;;  %913 = vmatpush.bf16.msra.mxu1 %v8754_v47 }
  0xbf   :  { %926 = vmatpush.bf16.msra.mxu2 %v8756_v48  ;;  %939 = vmatpush.bf16.msra.mxu3 %v8759_v51 }
  0xc0   :  { %785 = vmatmul.bf16.vlgmr.msrb.gmra.mxu0 %v396_v8  ;;  %798 = vmatmul.bf16.vlgmr.msrb.gmra.mxu1 %v396_v8 }
  0xc1   :  { %811 = vmatmul.bf16.vlgmr.msrb.gmra.mxu2 %v396_v8  ;;  %824 = vmatmul.bf16.vlgmr.msrb.gmra.mxu3 %v396_v8  ;;  %v12024_v8 = vld [vmem:[#allocation36_spill] sm:$0xff] }
  0xc2   :  { %901 = vmatpush.bf16.msra.mxu0 %v8764_v55  ;;  %914 = vmatpush.bf16.msra.mxu1 %v8766_v59 }
  0xc3   :  { %927 = vmatpush.bf16.msra.mxu2 %v8768_v60  ;;  %940 = vmatpush.bf16.msra.mxu3 %v8781_v1 }
  0xc6   :  { %902 = vmatpush.bf16.msra.mxu0 %v8786_v5  ;;  %915 = vmatpush.bf16.msra.mxu1 %v8791_v13 }
  0xc7   :  { %928 = vmatpush.bf16.msra.mxu2 %v8793_v14  ;;  %941 = vmatpush.bf16.msra.mxu3 %v8805_v22 }
  0xca   :  { %903 = vmatpush.bf16.msra.mxu0 %v8810_v29  ;;  %916 = vmatpush.bf16.msra.mxu1 %v8818_v38 }
  0xcb   :  { %929 = vmatpush.bf16.msra.mxu2 %v8820_v40  ;;  %942 = vmatpush.bf16.msra.mxu3 %v8825_v45 }
  0xce   :  { %904 = vmatpush.bf16.msra.mxu0 %v8836_v56  ;;  %917 = vmatpush.bf16.msra.mxu1 %v8842_v9 }
  0xcf   :  { %930 = vmatpush.bf16.msra.mxu2 %v8844_v16  ;;  %943 = vmatpush.bf16.msra.mxu3 %v8846_v17 }
  0xd2   :  { %957 = vmatpush.bf16.msrb.mxu0 %v8850_v41  ;;  %970 = vmatpush.bf16.msrb.mxu1 %v12006_v20 }
  0xd3   :  { %983 = vmatpush.bf16.msrb.mxu2 %v12007_v6  ;;  %996 = vmatpush.bf16.msrb.mxu3 %v12008_v21 }
  0xd6   :  { %958 = vmatpush.bf16.msrb.mxu0 %v12009_v34  ;;  %971 = vmatpush.bf16.msrb.mxu1 %v12010_v42 }
  0xd7   :  { %984 = vmatpush.bf16.msrb.mxu2 %v12011_v61  ;;  %997 = vmatpush.bf16.msrb.mxu3 %v12012_v4 }
  0xda   :  { %959 = vmatpush.bf16.msrb.mxu0 %v12013_v28  ;;  %972 = vmatpush.bf16.msrb.mxu1 %v12014_v3  ;;  %v12025_v3 = vld [vmem:[#allocation37_spill] sm:$0xff] }
  0xdb   :  { %985 = vmatpush.bf16.msrb.mxu2 %v12015_v26  ;;  %998 = vmatpush.bf16.msrb.mxu3 %v12016_v63 }
  0xde   :  { %960 = vmatpush.bf16.msrb.mxu0 %v12017_v0  ;;  %973 = vmatpush.bf16.msrb.mxu1 %v12018_v33 }
  0xdf   :  { %986 = vmatpush.bf16.msrb.mxu2 %v12019_v46  ;;  %999 = vmatpush.bf16.msrb.mxu3 %v12020_v53  ;;  %v12030_v46 = vld [vmem:[#allocation11_spill] sm:$0xff] }
  0xe2   :  { %961 = vmatpush.bf16.msrb.mxu0 %v12021_v2  ;;  %974 = vmatpush.bf16.msrb.mxu1 %v12022_v49  ;;  %v12029_v2 = vld [vmem:[#allocation10_spill] sm:$0xff] }
  0xe3   :  { %987 = vmatpush.bf16.msrb.mxu2 %v12023_v30  ;;  %1000 = vmatpush.bf16.msrb.mxu3 %v12024_v8 }
  0xe6   :  { %962 = vmatpush.bf16.msrb.mxu0 %v12025_v3  ;;  %975 = vmatpush.bf16.msrb.mxu1 %v8951_v52 }
  0xe7   :  { %988 = vmatpush.bf16.msrb.mxu2 %v8957_v37  ;;  %1001 = vmatpush.bf16.msrb.mxu3 %v8959_v50  ;;  %v6821_v50 = vld [vmem:[%s11746_s4 + $0x4] sm:$0xf] }
  0xe8   :  { %v9086_v37 = vperm.slane %v6821_v50, 0 }
  0xea   :  { %963 = vmatpush.bf16.msrb.mxu0 %v8964_v44  ;;  %976 = vmatpush.bf16.msrb.mxu1 %v8980_v25  ;;  %12026 = vst [vmem:[#allocation16_spill] sm:$0xff] %v9086_v37  ;;  %v9088_v44 = vperm.slane %v6821_v50, 1 }
  0xeb   :  { %989 = vmatpush.bf16.msrb.mxu2 %v8982_v54  ;;  %1002 = vmatpush.bf16.msrb.mxu3 %v8989_v10 }
  0xec   :  { %12027 = vst [vmem:[#allocation17_spill] sm:$0xff] %v9088_v44 }
  0xee   :  { %964 = vmatpush.bf16.msrb.mxu0 %v8995_v18  ;;  %977 = vmatpush.bf16.msrb.mxu1 %v8998_v62 }
  0xef   :  { %990 = vmatpush.bf16.msrb.mxu2 %v9004_v58  ;;  %1003 = vmatpush.bf16.msrb.mxu3 %v9006_v57  ;;  %v9092_v58 = vpop.permute.xlu0 %74 }
  0xf0   :  { %v120_v53 = vmul.f32 %v12029_v2, %v9092_v58 }
 0x12d   :  { %v566_v25 = vpop.f32.mrf.mxu0  ;;  %v579_v54 = vpop.f32.mrf.mxu1 }
 0x12e   :  { %v567_v10 = vadd.f32 %v566_v25, %v9086_v37  ;;  %v580_v18 = vadd.f32 %v579_v54, %v9088_v44  ;;  %v121_v25 = vmul.f32 %v12030_v46, %v9092_v58  ;;  %v12032_v44 = vld [vmem:[#allocation13_spill] sm:$0xff]  ;;  %v12034_v46 = vld [vmem:[#allocation12_spill] sm:$0xff] }
 0x130   :  { %v7103_v52 = vmul.f32 -1.442695, %v567_v10  ;;  %v7104_v62 = vmul.f32 -1.442695, %v580_v18 }
 0x132   :  { %8105 = vpow2.f32 %v7103_v52  ;;  %v9100_v52 = vperm.slane %v6821_v50, 3 }
 0x133   :  { %8107 = vpow2.f32 %v7104_v62 }
 0x134   :  { %v9094_v57 = vpop.f32.mrf.mxu2  ;;  %v605_v3 = vpop.f32.mrf.mxu3  ;;  %12031 = vst [vmem:[#allocation49_spill] sm:$0xff] %v9100_v52 }
 0x135   :  { %12028 = vst [vmem:[#allocation18_spill] sm:$0xff] %v9094_v57  ;;  %v568_v8 = vpop.f32.mrf.mxu0  ;;  %v581_v30 = vpop.f32.mrf.mxu1  ;;  %v194_v57 = vadd.f32 %v12032_v44, %v120_v53  ;;  %v606_v26 = vadd.f32 %v605_v3, %v9100_v52 }
 0x136   :  { %v12033_v8 = vld [vmem:[#allocation14_spill] sm:$0xff] }
 0x137   :  { %v195_v30 = vadd.f32 %v12033_v8, %v121_v25 }
 0x138   :  { %v8106_v49 = vpop.eup %8105 }
 0x139   :  { %v8108_v37 = vpop.eup %8107  ;;  %v2123_v54 = vadd.f32 1.0, %v8106_v49  ;;  %v122_v49 = vmul.f32 %v12034_v46, %v9092_v58 }
 0x13a   :  { %v2124_v10 = vadd.f32 1.0, %v8108_v37 }
 0x13b   :  { %8109 = vrcp.f32 %v2123_v54  ;;  %vm2131_vm14 = vweird.f32 %v2123_v54 }
 0x13c   :  { %8111 = vrcp.f32 %v2124_v10  ;;  %v594_v18 = vpop.f32.mrf.mxu2  ;;  %v607_v62 = vpop.f32.mrf.mxu3  ;;  %v2152_v52 = vand.u32 2147483648, %v2124_v10  ;;  %v2150_v42 = vand.u32 2147483647, %v2124_v10  ;;  %vm2146_vm15 = vweird.f32 %v2124_v10 }
 0x13d   :  { %v786_v33 = vpop.f32.mrf.mxu0  ;;  %v799_v0 = vpop.f32.mrf.mxu1  ;;  %8113 = vtanh.f32 %v606_v26  ;;  %v12035_v62 = vld [vmem:[#allocation15_spill] sm:$0xff] }
 0x13e   :  { %v829_v63 = vadd.f32 %v786_v33, %v194_v57  ;;  %v830_v2 = vadd.f32 %v799_v0, %v195_v30  ;;  %v196_v53 = vadd.f32 %v12035_v62, %v122_v49  ;;  %v2137_v0 = vand.u32 2147483648, %v2123_v54 }
 0x13f   :  { %vm2151_vm3 = vcmp.eq.f32.partialorder %v2150_v42, 8.507059e+37 }
 0x140   :  { %v7081_v37 = vmul.f32 -1.442695, %v829_v63  ;;  %v7082_v50 = vmul.f32 -1.442695, %v830_v2  ;;  %v2135_v2 = vand.u32 2147483647, %v2123_v54 }
 0x141   :  { %v8110_v28 = vpop.eup %8109  ;;  %v2138_v49 = vor.u32 1.1754944e-38, %v2137_v0 }
 0x142   :  { %v8112_v4 = vpop.eup %8111  ;;  %v2127_v61 = vmul.f32 %v8110_v28, %v2123_v54  ;;  %8115 = vpow2.f32 %v7081_v37  ;;  %vm2132_vm12 = vweird.f32 %v8110_v28  ;;  %vm2136_vm1 = vcmp.eq.f32.partialorder %v2135_v2, 8.507059e+37 }
 0x143   :  { %v2142_v18 = vmul.f32 %v8112_v4, %v2124_v10  ;;  %8117 = vpow2.f32 %v7082_v50  ;;  %vm2147_vm13 = vweird.f32 %v8112_v4  ;;  %vm2133_vm0 = vmor %vm2131_vm14, %vm2132_vm12 }
 0x144   :  { %v2128_v44 = vsub.f32 1.0, %v2127_v61  ;;  %v812_v25 = vpop.f32.mrf.mxu2  ;;  %v825_v8 = vpop.f32.mrf.mxu3  ;;  %vm2148_vm2 = vmor %vm2146_vm15, %vm2147_vm13 }
 0x145   :  { %v2143_v57 = vsub.f32 1.0, %v2142_v18  ;;  %v831_v3 = vadd.f32 %v812_v25, %v196_v53  ;;  %v788_v33 = vpop.f32.mrf.mxu0  ;;  %v801_v30 = vpop.f32.mrf.mxu1  ;;  %v2153_v18 = vor.u32 1.1754944e-38, %v2152_v52  ;;  %v12038_v52 = vld [vmem:[#allocation29_spill] sm:$0xff] }
 0x146   :  { %v2129_v63 = vmul.f32 %v8110_v28, %v2128_v44  ;;  %v8114_v61 = vpop.eup %8113 }
 0x147   :  { %v2144_v46 = vmul.f32 %v8112_v4, %v2143_v57  ;;  %v7083_v26 = vmul.f32 -1.442695, %v831_v3 }
 0x148   :  { %v2130_v34 = vadd.f32 %v8110_v28, %v2129_v63  ;;  %v8116_v50 = vpop.eup %8115 }
 0x149   :  { %v2145_v37 = vadd.f32 %v8112_v4, %v2144_v46  ;;  %8119 = vpow2.f32 %v7083_v26  ;;  %v8118_v44 = vpop.eup %8117  ;;  %v842_v33 = vadd.f32 1.0, %v8116_v50  ;;  %v12036_v46 = vld [vmem:[#allocation26_spill] sm:$0xff] }
 0x14a   :  { %v2134_v53 = vsel %vm2133_vm0, %v8110_v28, %v2130_v34  ;;  %v843_v54 = vadd.f32 1.0, %v8118_v44  ;;  %v123_v0 = vmul.f32 %v12036_v46, %v9092_v58  ;;  %v61_v58 = vld [vmem:[%s11742_s0 + $0x18] sm:$0xff] }
 0x14b   :  { %v2139_v25 = vsel %vm2136_vm1, %v2138_v49, %v2134_v53  ;;  %v2149_v57 = vsel %vm2148_vm2, %v8112_v4, %v2145_v37  ;;  %8121 = vrcp.f32 %v842_v33  ;;  %v60_v4 = vld [vmem:[%s11742_s0 + $0x10] sm:$0xff]  ;;  %v856_v53 = vand.u32 2147483648, %v842_v33 }
 0x14c   :  { %v2154_v3 = vsel %vm2151_vm3, %v2153_v18, %v2149_v57  ;;  %v2173_v30 = vmul.f32 %v8114_v61, %v2139_v25  ;;  %v814_v63 = vpop.f32.mrf.mxu2  ;;  %v827_v10 = vpop.f32.mrf.mxu3  ;;  %8123 = vrcp.f32 %v843_v54  ;;  %79 = vperm.xlu1 %8086, %v60_v4   ;;  %v197_v2 = vadd.f32 %v12038_v52, %v123_v0 }
 0x14d   :  { %v2172_v62 = vmul.f32 0.0, %v2154_v3  ;;  %v871_v25 = vand.u32 2147483648, %v843_v54  ;;  %v854_v3 = vand.u32 2147483647, %v842_v33  ;;  %v869_v63 = vand.u32 2147483647, %v843_v54 }
 0x14e   :  { %v832_v61 = vadd.f32 %v825_v8, %v197_v2  ;;  %vm850_vm6 = vweird.f32 %v842_v33  ;;  %vm865_vm7 = vweird.f32 %v843_v54 }
 0x14f   :  { %v8120_v34 = vpop.eup %8119  ;;  %v9111_v28 = vadd.f32 %v2173_v30, %v2172_v62  ;;  %v872_v2 = vor.u32 1.1754944e-38, %v871_v25  ;;  %vm855_vm10 = vcmp.eq.f32.partialorder %v854_v3, 8.507059e+37  ;;  %vm870_vm11 = vcmp.eq.f32.partialorder %v869_v63, 8.507059e+37  ;;  %v12043_v63 = vld [vmem:[#allocation23_spill] sm:$0xff] }
 0x150   :  { %v844_v42 = vadd.f32 1.0, %v8120_v34  ;;  %v857_v34 = vor.u32 1.1754944e-38, %v856_v53 }
 0x151   :  { %12037 = vst [vmem:[#allocation50_spill] sm:$0xff] %v9111_v28  ;;  %v8122_v26 = vpop.eup %8121 }
 0x152   :  { %8125 = vrcp.f32 %v844_v42  ;;  %v8124_v49 = vpop.eup %8123  ;;  %v846_v37 = vmul.f32 %v8122_v26, %v842_v33  ;;  %vm851_vm4 = vweird.f32 %v8122_v26  ;;  %v65_v33 = vld [vmem:[%s11742_s0 + $0x38] sm:$0xff]  ;;  %vm880_vm13 = vweird.f32 %v844_v42 }
 0x153   :  { %v861_v50 = vmul.f32 %v8124_v49, %v843_v54  ;;  %8127 = vtanh.f32 %v832_v61  ;;  %vm866_vm5 = vweird.f32 %v8124_v49  ;;  %vm852_vm8 = vmor %vm850_vm6, %vm851_vm4 }
 0x154   :  { %v847_v62 = vsub.f32 1.0, %v846_v37  ;;  %84 = vperm.xlu1 %8086, %v61_v58   ;;  %vm867_vm9 = vmor %vm865_vm7, %vm866_vm5 }
 0x155   :  { %v862_v18 = vsub.f32 1.0, %v861_v50 }
 0x156   :  { %v848_v57 = vmul.f32 %v8122_v26, %v847_v62 }
 0x157   :  { %v863_v30 = vmul.f32 %v8124_v49, %v862_v18 }
 0x158   :  { %v8126_v44 = vpop.eup %8125  ;;  %v849_v10 = vadd.f32 %v8122_v26, %v848_v57 }
 0x159   :  { %v876_v8 = vmul.f32 %v8126_v44, %v844_v42  ;;  %v864_v4 = vadd.f32 %v8124_v49, %v863_v30  ;;  %v8128_v37 = vpop.eup %8127  ;;  %vm881_vm12 = vweird.f32 %v8126_v44 }
 0x15a   :  { %v853_v61 = vsel %vm852_vm8, %v8122_v26, %v849_v10  ;;  %v886_v26 = vand.u32 2147483648, %v844_v42  ;;  %vm882_vm14 = vmor %vm880_vm13, %vm881_vm12  ;;  %v12044_v10 = vld [vmem:[#allocation24_spill] sm:$0xff] }
 0x15b   :  { %v877_v0 = vsub.f32 1.0, %v876_v8  ;;  %v858_v50 = vsel %vm855_vm10, %v857_v34, %v853_v61  ;;  %v868_v62 = vsel %vm867_vm9, %v8124_v49, %v864_v4  ;;  %v884_v49 = vand.u32 2147483647, %v844_v42  ;;  %v12040_v42 = vld [vmem:[#allocation20_spill] sm:$0xff]  ;;  %v12046_v34 = vld [vmem:[#allocation27_spill] sm:$0xff] }
 0x15c   :  { %v873_v18 = vsel %vm870_vm11, %v872_v2, %v868_v62  ;;  %v892_v28 = vmul.f32 %v8128_v37, %v858_v50  ;;  %104 = vperm.xlu1 %8086, %v65_v33   ;;  %v887_v57 = vor.u32 1.1754944e-38, %v886_v26  ;;  %v12047_v4 = vld [vmem:[#allocation28_spill] sm:$0xff]  ;;  %v12048_v2 = vld [vmem:[#allocation30_spill] sm:$0xff]  ;;  %v12049_v61 = vld [vmem:[#allocation31_spill] sm:$0xff] }
 0x15d   :  { %v878_v58 = vmul.f32 %v8126_v44, %v877_v0  ;;  %v891_v52 = vmul.f32 %v873_v18, %v9000_v32  ;;  %vm885_vm15 = vcmp.eq.f32.partialorder %v884_v49, 8.507059e+37  ;;  %v12045_v0 = vld [vmem:[#allocation25_spill] sm:$0xff]  ;;  %v12050_v37 = vld [vmem:[#allocation32_spill] sm:$0xff]  ;;  %v12052_v62 = vld [vmem:[#allocation34_spill] sm:$0xff] }
 0x15e   :  { %v12051_v50 = vld [vmem:[#allocation33_spill] sm:$0xff]  ;;  %v12054_v18 = vld [vmem:[#allocation36_spill] sm:$0xff]  ;;  %v12057_v26 = vld [vmem:[#allocation39_spill] sm:$0xff] }
 0x15f   :  { %v9124_v54 = vadd.f32 %v892_v28, %v891_v52  ;;  %v879_v53 = vadd.f32 %v8126_v44, %v878_v58  ;;  %v12039_v28 = vld [vmem:[#allocation19_spill] sm:$0xff]  ;;  %v12041_v52 = vld [vmem:[#allocation21_spill] sm:$0xff]  ;;  %v12058_v49 = vld [vmem:[#allocation40_spill] sm:$0xff] }
 0x160   :  { %v12053_v58 = vld [vmem:[#allocation35_spill] sm:$0xff]  ;;  %v12055_v33 = vld [vmem:[#allocation37_spill] sm:$0xff] }
 0x161   :  { %8129 = vtanh.f32 %v9124_v54  ;;  %v883_v25 = vsel %vm882_vm14, %v8126_v44, %v879_v53  ;;  %v12042_v44 = vld [vmem:[#allocation22_spill] sm:$0xff] }
 0x162   :  { %v888_v32 = vsel %vm885_vm15, %v887_v57, %v883_v25  ;;  %v12056_v53 = vld [vmem:[#allocation38_spill] sm:$0xff]  ;;  %v12059_v25 = vld [vmem:[#allocation41_spill] sm:$0xff] }
 0x163   :  { %v12060_v57 = vld [vmem:[#allocation42_spill] sm:$0xff] }
 0x167   :  { %v8130_v3 = vpop.eup %8129 }
 0x168   :  { %v895_v30 = vmul.f32 %v8130_v3, %v888_v32  ;;  %v12061_v3 = vld [vmem:[#allocation43_spill] sm:$0xff]  ;;  %v12062_v32 = vld [vmem:[#allocation44_spill] sm:$0xff] }
 0x16a   :  { %v896_v8 = vpack.c.bf16 %v895_v30, %v895_v30  ;;  %v12063_v30 = vld [vmem:[#allocation45_spill] sm:$0xff] }
 0x16c   :  { %905 = vmatmul.bf16.vlgmr.msra.gmra.mxu0 %v896_v8  ;;  %918 = vmatmul.bf16.vlgmr.msra.gmra.mxu1 %v896_v8 }
 0x16d   :  { %931 = vmatmul.bf16.vlgmr.msra.gmra.mxu2 %v896_v8  ;;  %944 = vmatmul.bf16.vlgmr.msra.gmra.mxu3 %v896_v8 }
 0x16e   :  { %1077 = vmatpush.bf16.msra.mxu0 %v8716_v7  ;;  %1090 = vmatpush.bf16.msra.mxu1 %v8718_v11 }
 0x16f   :  { %1103 = vmatpush.bf16.msra.mxu2 %v8720_v12  ;;  %1116 = vmatpush.bf16.msra.mxu3 %v8723_v15 }
 0x172   :  { %1078 = vmatpush.bf16.msra.mxu0 %v8728_v19  ;;  %1091 = vmatpush.bf16.msra.mxu1 %v8730_v23 }
 0x173   :  { %1104 = vmatpush.bf16.msra.mxu2 %v8732_v24  ;;  %1117 = vmatpush.bf16.msra.mxu3 %v8735_v27 }
 0x176   :  { %1079 = vmatpush.bf16.msra.mxu0 %v8740_v31  ;;  %1092 = vmatpush.bf16.msra.mxu1 %v8742_v35 }
 0x177   :  { %1105 = vmatpush.bf16.msra.mxu2 %v8744_v36  ;;  %1118 = vmatpush.bf16.msra.mxu3 %v8747_v39 }
 0x17a   :  { %1080 = vmatpush.bf16.msra.mxu0 %v8752_v43  ;;  %1093 = vmatpush.bf16.msra.mxu1 %v8754_v47 }
 0x17b   :  { %1106 = vmatpush.bf16.msra.mxu2 %v8756_v48  ;;  %1119 = vmatpush.bf16.msra.mxu3 %v8759_v51 }
 0x17c   :  { %965 = vmatmul.bf16.vlgmr.msrb.gmra.mxu0 %v896_v8  ;;  %978 = vmatmul.bf16.vlgmr.msrb.gmra.mxu1 %v896_v8 }
 0x17d   :  { %991 = vmatmul.bf16.vlgmr.msrb.gmra.mxu2 %v896_v8  ;;  %1004 = vmatmul.bf16.vlgmr.msrb.gmra.mxu3 %v896_v8  ;;  %v12064_v8 = vld [vmem:[#allocation46_spill] sm:$0xff] }
 0x17e   :  { %1081 = vmatpush.bf16.msra.mxu0 %v8764_v55  ;;  %1094 = vmatpush.bf16.msra.mxu1 %v8766_v59 }
 0x17f   :  { %1107 = vmatpush.bf16.msra.mxu2 %v8768_v60  ;;  %1120 = vmatpush.bf16.msra.mxu3 %v8781_v1 }
 0x182   :  { %1082 = vmatpush.bf16.msra.mxu0 %v8786_v5  ;;  %1095 = vmatpush.bf16.msra.mxu1 %v8791_v13 }
 0x183   :  { %1108 = vmatpush.bf16.msra.mxu2 %v8793_v14  ;;  %1121 = vmatpush.bf16.msra.mxu3 %v8805_v22 }
 0x186   :  { %1083 = vmatpush.bf16.msra.mxu0 %v8810_v29  ;;  %1096 = vmatpush.bf16.msra.mxu1 %v8818_v38 }
 0x187   :  { %1109 = vmatpush.bf16.msra.mxu2 %v8820_v40  ;;  %1122 = vmatpush.bf16.msra.mxu3 %v8825_v45 }
 0x18a   :  { %1084 = vmatpush.bf16.msra.mxu0 %v8836_v56  ;;  %1097 = vmatpush.bf16.msra.mxu1 %v8842_v9 }
 0x18b   :  { %1110 = vmatpush.bf16.msra.mxu2 %v8844_v16  ;;  %1123 = vmatpush.bf16.msra.mxu3 %v8846_v17 }
 0x18e   :  { %1137 = vmatpush.bf16.msrb.mxu0 %v8850_v41  ;;  %1150 = vmatpush.bf16.msrb.mxu1 %v12006_v20 }
 0x18f   :  { %1163 = vmatpush.bf16.msrb.mxu2 %v12007_v6  ;;  %1176 = vmatpush.bf16.msrb.mxu3 %v12008_v21 }
 0x192   :  { %1138 = vmatpush.bf16.msrb.mxu0 %v12039_v28  ;;  %1151 = vmatpush.bf16.msrb.mxu1 %v12040_v42 }
 0x193   :  { %1164 = vmatpush.bf16.msrb.mxu2 %v12041_v52  ;;  %1177 = vmatpush.bf16.msrb.mxu3 %v12042_v44 }
 0x196   :  { %1139 = vmatpush.bf16.msrb.mxu0 %v12043_v63  ;;  %1152 = vmatpush.bf16.msrb.mxu1 %v12044_v10 }
 0x197   :  { %1165 = vmatpush.bf16.msrb.mxu2 %v12045_v0  ;;  %1178 = vmatpush.bf16.msrb.mxu3 %v12046_v34  ;;  %v12075_v0 = vld [vmem:[#allocation12_spill] sm:$0xff] }
 0x19a   :  { %1140 = vmatpush.bf16.msrb.mxu0 %v12047_v4  ;;  %1153 = vmatpush.bf16.msrb.mxu1 %v12048_v2 }
 0x19b   :  { %1166 = vmatpush.bf16.msrb.mxu2 %v12049_v61  ;;  %1179 = vmatpush.bf16.msrb.mxu3 %v12050_v37 }
 0x19e   :  { %1141 = vmatpush.bf16.msrb.mxu0 %v12051_v50  ;;  %1154 = vmatpush.bf16.msrb.mxu1 %v12052_v62 }
 0x19f   :  { %1167 = vmatpush.bf16.msrb.mxu2 %v12053_v58  ;;  %1180 = vmatpush.bf16.msrb.mxu3 %v12054_v18  ;;  %v12065_v18 = vld [vmem:[#allocation47_spill] sm:$0xff] }
 0x1a2   :  { %1142 = vmatpush.bf16.msrb.mxu0 %v12055_v33  ;;  %1155 = vmatpush.bf16.msrb.mxu1 %v12056_v53  ;;  %v12066_v33 = vld [vmem:[#allocation48_spill] sm:$0xff] }
 0x1a3   :  { %1168 = vmatpush.bf16.msrb.mxu2 %v12057_v26  ;;  %1181 = vmatpush.bf16.msrb.mxu3 %v12058_v49 }
 0x1a6   :  { %1143 = vmatpush.bf16.msrb.mxu0 %v12059_v25  ;;  %1156 = vmatpush.bf16.msrb.mxu1 %v12060_v57 }
 0x1a7   :  { %1169 = vmatpush.bf16.msrb.mxu2 %v12061_v3  ;;  %1182 = vmatpush.bf16.msrb.mxu3 %v12062_v32  ;;  %v12071_v32 = vld [vmem:[#allocation10_spill] sm:$0xff] }
 0x1aa   :  { %1144 = vmatpush.bf16.msrb.mxu0 %v12063_v30  ;;  %1157 = vmatpush.bf16.msrb.mxu1 %v12064_v8  ;;  %v12072_v30 = vld [vmem:[#allocation11_spill] sm:$0xff]  ;;  %v12073_v8 = vld [vmem:[#allocation13_spill] sm:$0xff] }
 0x1ab   :  { %1170 = vmatpush.bf16.msrb.mxu2 %v12065_v18  ;;  %1183 = vmatpush.bf16.msrb.mxu3 %v12066_v33  ;;  %v12074_v18 = vld [vmem:[#allocation14_spill] sm:$0xff] }
 0x1be   :  { %v80_v49 = vpop.permute.xlu1 %79 }
 0x1bf   :  { %v124_v62 = vmul.f32 %v12071_v32, %v80_v49  ;;  %v125_v50 = vmul.f32 %v12072_v30, %v80_v49 }
 0x1c1   :  { %v198_v37 = vadd.f32 %v12073_v8, %v124_v62  ;;  %v199_v61 = vadd.f32 %v12074_v18, %v125_v50 }
 0x1e9   :  { %v9191_v53 = vpop.f32.mrf.mxu0  ;;  %v9193_v26 = vpop.f32.mrf.mxu1 }
 0x1ea   :  { %12067 = vst [vmem:[#allocation19_spill] sm:$0xff] %v9191_v53 }
 0x1eb   :  { %12068 = vst [vmem:[#allocation20_spill] sm:$0xff] %v9193_v26 }
 0x1f0   :  { %v9195_v25 = vpop.f32.mrf.mxu2  ;;  %v9197_v57 = vpop.f32.mrf.mxu3 }
 0x1f1   :  { %12069 = vst [vmem:[#allocation51_spill] sm:$0xff] %v9195_v25  ;;  %v908_v3 = vpop.f32.mrf.mxu0  ;;  %v921_v58 = vpop.f32.mrf.mxu1  ;;  %v126_v25 = vmul.f32 %v12075_v0, %v80_v49 }
 0x1f2   :  { %12070 = vst [vmem:[#allocation52_spill] sm:$0xff] %v9197_v57  ;;  %v12076_v58 = vld [vmem:[#allocation15_spill] sm:$0xff] }
 0x1f3   :  { %v200_v3 = vadd.f32 %v12076_v58, %v126_v25 }
 0x1f8   :  { %v934_v33 = vpop.f32.mrf.mxu2  ;;  %v947_v2 = vpop.f32.mrf.mxu3 }
 0x1f9   :  { %v966_v53 = vpop.f32.mrf.mxu0  ;;  %v979_v4 = vpop.f32.mrf.mxu1 }
 0x1fa   :  { %v1009_v26 = vadd.f32 %v966_v53, %v198_v37  ;;  %v1010_v34 = vadd.f32 %v979_v4, %v199_v61  ;;  %v127_v4 = vmul.f32 %v12036_v46, %v80_v49  ;;  %v12077_v53 = vld [vmem:[#allocation29_spill] sm:$0xff] }
 0x1fc   :  { %v7084_v10 = vmul.f32 -1.442695, %v1009_v26  ;;  %v7085_v57 = vmul.f32 -1.442695, %v1010_v34  ;;  %v201_v26 = vadd.f32 %v12077_v53, %v127_v4 }
 0x1fe   :  { %8131 = vpow2.f32 %v7084_v10 }
 0x1ff   :  { %8133 = vpow2.f32 %v7085_v57 }
 0x200   :  { %v992_v32 = vpop.f32.mrf.mxu2  ;;  %v1005_v30 = vpop.f32.mrf.mxu3 }
 0x201   :  { %v1011_v63 = vadd.f32 %v992_v32, %v200_v3  ;;  %v968_v62 = vpop.f32.mrf.mxu0  ;;  %v981_v8 = vpop.f32.mrf.mxu1  ;;  %v1012_v32 = vadd.f32 %v1005_v30, %v201_v26 }
 0x203   :  { %v7086_v50 = vmul.f32 -1.442695, %v1011_v63 }
 0x204   :  { %v8132_v33 = vpop.eup %8131 }
 0x205   :  { %v8134_v2 = vpop.eup %8133  ;;  %v1022_v18 = vadd.f32 1.0, %v8132_v33  ;;  %8135 = vpow2.f32 %v7086_v50 }
 0x206   :  { %v1023_v37 = vadd.f32 1.0, %v8134_v2 }
 0x207   :  { %8137 = vrcp.f32 %v1022_v18  ;;  %v1036_v50 = vand.u32 2147483648, %v1022_v18  ;;  %v1034_v49 = vand.u32 2147483647, %v1022_v18  ;;  %vm1030_vm2 = vweird.f32 %v1022_v18 }
 0x208   :  { %8139 = vrcp.f32 %v1023_v37  ;;  %v994_v34 = vpop.f32.mrf.mxu2  ;;  %v1007_v10 = vpop.f32.mrf.mxu3  ;;  %v1051_v2 = vand.u32 2147483648, %v1023_v37  ;;  %vm1045_vm3 = vweird.f32 %v1023_v37 }
 0x209   :  { %v1049_v10 = vand.u32 2147483647, %v1023_v37  ;;  %vm1035_vm6 = vcmp.eq.f32.partialorder %v1034_v49, 8.507059e+37 }
 0x20b   :  { %v8136_v61 = vpop.eup %8135  ;;  %vm1050_vm7 = vcmp.eq.f32.partialorder %v1049_v10, 8.507059e+37 }
 0x20c   :  { %v1024_v25 = vadd.f32 1.0, %v8136_v61  ;;  %v1037_v61 = vor.u32 1.1754944e-38, %v1036_v50 }
 0x20d   :  { %v8138_v57 = vpop.eup %8137 }
 0x20e   :  { %v8140_v3 = vpop.eup %8139  ;;  %v1026_v8 = vmul.f32 %v8138_v57, %v1022_v18  ;;  %8141 = vrcp.f32 %v1024_v25  ;;  %vm1031_vm0 = vweird.f32 %v8138_v57  ;;  %v1066_v50 = vand.u32 2147483648, %v1024_v25 }
 0x20f   :  { %v1041_v63 = vmul.f32 %v8140_v3, %v1023_v37  ;;  %8143 = vtanh.f32 %v1012_v32  ;;  %vm1046_vm1 = vweird.f32 %v8140_v3  ;;  %vm1032_vm4 = vmor %vm1030_vm2, %vm1031_vm0  ;;  %vm1060_vm9 = vweird.f32 %v1024_v25 }
 0x210   :  { %v1027_v62 = vsub.f32 1.0, %v1026_v8  ;;  %vm1047_vm5 = vmor %vm1045_vm3, %vm1046_vm1  ;;  %v1052_v8 = vor.u32 1.1754944e-38, %v1051_v2  ;;  %v1067_v49 = vor.u32 1.1754944e-38, %v1066_v50  ;;  %v12095_v50 = vld [vmem:[#allocation40_spill] sm:$0xff] }
 0x211   :  { %v1042_v33 = vsub.f32 1.0, %v1041_v63 }
 0x212   :  { %v1028_v58 = vmul.f32 %v8138_v57, %v1027_v62 }
 0x213   :  { %v1043_v34 = vmul.f32 %v8140_v3, %v1042_v33 }
 0x214   :  { %v8142_v46 = vpop.eup %8141  ;;  %v1029_v4 = vadd.f32 %v8138_v57, %v1028_v58 }
 0x215   :  { %v1056_v30 = vmul.f32 %v8142_v46, %v1024_v25  ;;  %v1044_v26 = vadd.f32 %v8140_v3, %v1043_v34  ;;  %v8144_v32 = vpop.eup %8143  ;;  %vm1061_vm8 = vweird.f32 %v8142_v46 }
 0x216   :  { %v1033_v63 = vsel %vm1032_vm4, %v8138_v57, %v1029_v4  ;;  %v1064_v57 = vand.u32 2147483647, %v1024_v25  ;;  %vm1062_vm10 = vmor %vm1060_vm9, %vm1061_vm8  ;;  %v12083_v25 = vld [vmem:[#allocation27_spill] sm:$0xff]  ;;  %v12084_v4 = vld [vmem:[#allocation28_spill] sm:$0xff] }
 0x217   :  { %v1057_v53 = vsub.f32 1.0, %v1056_v30  ;;  %v1038_v62 = vsel %vm1035_vm6, %v1037_v61, %v1033_v63  ;;  %v1048_v0 = vsel %vm1047_vm5, %v8140_v3, %v1044_v26  ;;  %v12085_v30 = vld [vmem:[#allocation30_spill] sm:$0xff]  ;;  %v12086_v61 = vld [vmem:[#allocation31_spill] sm:$0xff]  ;;  %v12087_v26 = vld [vmem:[#allocation32_spill] sm:$0xff] }
 0x218   :  { %v1053_v33 = vsel %vm1050_vm7, %v1052_v8, %v1048_v0  ;;  %v1072_v44 = vmul.f32 %v8144_v32, %v1038_v62  ;;  %vm1065_vm11 = vcmp.eq.f32.partialorder %v1064_v57, 8.507059e+37  ;;  %v12088_v8 = vld [vmem:[#allocation33_spill] sm:$0xff]  ;;  %v12089_v63 = vld [vmem:[#allocation34_spill] sm:$0xff]  ;;  %v12090_v32 = vld [vmem:[#allocation35_spill] sm:$0xff] }
 0x219   :  { %v1058_v52 = vmul.f32 %v8142_v46, %v1057_v53  ;;  %v1071_v58 = vmul.f32 %v1053_v33, %v9124_v54  ;;  %v12079_v54 = vld [vmem:[#allocation22_spill] sm:$0xff]  ;;  %v12082_v53 = vld [vmem:[#allocation25_spill] sm:$0xff]  ;;  %v12091_v62 = vld [vmem:[#allocation36_spill] sm:$0xff] }
 0x21a   :  { %v12092_v33 = vld [vmem:[#allocation37_spill] sm:$0xff] }
 0x21b   :  { %v9208_v18 = vadd.f32 %v1072_v44, %v1071_v58  ;;  %v1059_v37 = vadd.f32 %v8142_v46, %v1058_v52  ;;  %v12080_v52 = vld [vmem:[#allocation23_spill] sm:$0xff]  ;;  %v12081_v44 = vld [vmem:[#allocation24_spill] sm:$0xff]  ;;  %v12093_v58 = vld [vmem:[#allocation38_spill] sm:$0xff] }
 0x21c   :  { %v12096_v57 = vld [vmem:[#allocation41_spill] sm:$0xff] }
 0x21d   :  { %8145 = vtanh.f32 %v9208_v18  ;;  %v1063_v2 = vsel %vm1062_vm10, %v8142_v46, %v1059_v37  ;;  %v12078_v46 = vld [vmem:[#allocation21_spill] sm:$0xff]  ;;  %v12094_v37 = vld [vmem:[#allocation39_spill] sm:$0xff] }
 0x21e   :  { %v1068_v34 = vsel %vm1065_vm11, %v1067_v49, %v1063_v2  ;;  %v12097_v2 = vld [vmem:[#allocation42_spill] sm:$0xff]  ;;  %v12098_v49 = vld [vmem:[#allocation43_spill] sm:$0xff] }
 0x223   :  { %v8146_v3 = vpop.eup %8145 }
 0x224   :  { %v1075_v0 = vmul.f32 %v8146_v3, %v1068_v34  ;;  %v12099_v3 = vld [vmem:[#allocation44_spill] sm:$0xff]  ;;  %v12100_v34 = vld [vmem:[#allocation45_spill] sm:$0xff] }
 0x226   :  { %v1076_v10 = vpack.c.bf16 %v1075_v0, %v1075_v0  ;;  %v12101_v0 = vld [vmem:[#allocation46_spill] sm:$0xff] }
 0x228   :  { %1085 = vmatmul.bf16.vlgmr.msra.gmra.mxu0 %v1076_v10  ;;  %1098 = vmatmul.bf16.vlgmr.msra.gmra.mxu1 %v1076_v10 }
 0x229   :  { %1111 = vmatmul.bf16.vlgmr.msra.gmra.mxu2 %v1076_v10  ;;  %1124 = vmatmul.bf16.vlgmr.msra.gmra.mxu3 %v1076_v10 }
 0x22a   :  { %1257 = vmatpush.bf16.msra.mxu0 %v8716_v7  ;;  %1270 = vmatpush.bf16.msra.mxu1 %v8718_v11 }
 0x22b   :  { %1283 = vmatpush.bf16.msra.mxu2 %v8720_v12  ;;  %1296 = vmatpush.bf16.msra.mxu3 %v8723_v15 }
 0x22e   :  { %1258 = vmatpush.bf16.msra.mxu0 %v8728_v19  ;;  %1271 = vmatpush.bf16.msra.mxu1 %v8730_v23 }
 0x22f   :  { %1284 = vmatpush.bf16.msra.mxu2 %v8732_v24  ;;  %1297 = vmatpush.bf16.msra.mxu3 %v8735_v27 }
 0x232   :  { %1259 = vmatpush.bf16.msra.mxu0 %v8740_v31  ;;  %1272 = vmatpush.bf16.msra.mxu1 %v8742_v35 }
 0x233   :  { %1285 = vmatpush.bf16.msra.mxu2 %v8744_v36  ;;  %1298 = vmatpush.bf16.msra.mxu3 %v8747_v39 }
 0x236   :  { %1260 = vmatpush.bf16.msra.mxu0 %v8752_v43  ;;  %1273 = vmatpush.bf16.msra.mxu1 %v8754_v47 }
 0x237   :  { %1286 = vmatpush.bf16.msra.mxu2 %v8756_v48  ;;  %1299 = vmatpush.bf16.msra.mxu3 %v8759_v51 }
 0x238   :  { %1145 = vmatmul.bf16.vlgmr.msrb.gmra.mxu0 %v1076_v10  ;;  %1158 = vmatmul.bf16.vlgmr.msrb.gmra.mxu1 %v1076_v10 }
 0x239   :  { %1171 = vmatmul.bf16.vlgmr.msrb.gmra.mxu2 %v1076_v10  ;;  %1184 = vmatmul.bf16.vlgmr.msrb.gmra.mxu3 %v1076_v10  ;;  %v12102_v10 = vld [vmem:[#allocation47_spill] sm:$0xff] }
 0x23a   :  { %1261 = vmatpush.bf16.msra.mxu0 %v8764_v55  ;;  %1274 = vmatpush.bf16.msra.mxu1 %v8766_v59 }
 0x23b   :  { %1287 = vmatpush.bf16.msra.mxu2 %v8768_v60  ;;  %1300 = vmatpush.bf16.msra.mxu3 %v8781_v1 }
 0x23e   :  { %1262 = vmatpush.bf16.msra.mxu0 %v8786_v5  ;;  %1275 = vmatpush.bf16.msra.mxu1 %v8791_v13 }
 0x23f   :  { %1288 = vmatpush.bf16.msra.mxu2 %v8793_v14  ;;  %1301 = vmatpush.bf16.msra.mxu3 %v8805_v22 }
 0x242   :  { %1263 = vmatpush.bf16.msra.mxu0 %v8810_v29  ;;  %1276 = vmatpush.bf16.msra.mxu1 %v8818_v38 }
 0x243   :  { %1289 = vmatpush.bf16.msra.mxu2 %v8820_v40  ;;  %1302 = vmatpush.bf16.msra.mxu3 %v8825_v45 }
 0x246   :  { %1264 = vmatpush.bf16.msra.mxu0 %v8836_v56  ;;  %1277 = vmatpush.bf16.msra.mxu1 %v8842_v9 }
 0x247   :  { %1290 = vmatpush.bf16.msra.mxu2 %v8844_v16  ;;  %1303 = vmatpush.bf16.msra.mxu3 %v8846_v17 }
 0x24a   :  { %1317 = vmatpush.bf16.msrb.mxu0 %v8850_v41  ;;  %1330 = vmatpush.bf16.msrb.mxu1 %v12006_v20 }
 0x24b   :  { %1343 = vmatpush.bf16.msrb.mxu2 %v12007_v6  ;;  %1356 = vmatpush.bf16.msrb.mxu3 %v12008_v21 }
 0x24e   :  { %1318 = vmatpush.bf16.msrb.mxu0 %v12039_v28  ;;  %1331 = vmatpush.bf16.msrb.mxu1 %v12040_v42 }
 0x24f   :  { %1344 = vmatpush.bf16.msrb.mxu2 %v12078_v46  ;;  %1357 = vmatpush.bf16.msrb.mxu3 %v12079_v54 }
 0x252   :  { %1319 = vmatpush.bf16.msrb.mxu0 %v12080_v52  ;;  %1332 = vmatpush.bf16.msrb.mxu1 %v12081_v44 }
 0x253   :  { %1345 = vmatpush.bf16.msrb.mxu2 %v12082_v53  ;;  %1358 = vmatpush.bf16.msrb.mxu3 %v12083_v25 }
 0x256   :  { %1320 = vmatpush.bf16.msrb.mxu0 %v12084_v4  ;;  %1333 = vmatpush.bf16.msrb.mxu1 %v12085_v30 }
 0x257   :  { %1346 = vmatpush.bf16.msrb.mxu2 %v12086_v61  ;;  %1359 = vmatpush.bf16.msrb.mxu3 %v12087_v26 }
 0x25a   :  { %1321 = vmatpush.bf16.msrb.mxu0 %v12088_v8  ;;  %1334 = vmatpush.bf16.msrb.mxu1 %v12089_v63 }
 0x25b   :  { %1347 = vmatpush.bf16.msrb.mxu2 %v12090_v32  ;;  %1360 = vmatpush.bf16.msrb.mxu3 %v12091_v62  ;;  %v85_v62 = vpop.permute.xlu1 %84 }
 0x25e   :  { %1322 = vmatpush.bf16.msrb.mxu0 %v12092_v33  ;;  %1335 = vmatpush.bf16.msrb.mxu1 %v12093_v58  ;;  %v12103_v33 = vld [vmem:[#allocation48_spill] sm:$0xff] }
 0x25f   :  { %1348 = vmatpush.bf16.msrb.mxu2 %v12094_v37  ;;  %1361 = vmatpush.bf16.msrb.mxu3 %v12095_v50 }
 0x262   :  { %1323 = vmatpush.bf16.msrb.mxu0 %v12096_v57  ;;  %1336 = vmatpush.bf16.msrb.mxu1 %v12097_v2 }
 0x263   :  { %1349 = vmatpush.bf16.msrb.mxu2 %v12098_v49  ;;  %1362 = vmatpush.bf16.msrb.mxu3 %v12099_v3  ;;  %v12108_v3 = vld [vmem:[#allocation10_spill] sm:$0xff] }
 0x264   :  { %v128_v32 = vmul.f32 %v12108_v3, %v85_v62 }
 0x266   :  { %1324 = vmatpush.bf16.msrb.mxu0 %v12100_v34  ;;  %1337 = vmatpush.bf16.msrb.mxu1 %v12101_v0  ;;  %v12109_v34 = vld [vmem:[#allocation11_spill] sm:$0xff] }
 0x267   :  { %1350 = vmatpush.bf16.msrb.mxu2 %v12102_v10  ;;  %1363 = vmatpush.bf16.msrb.mxu3 %v12103_v33  ;;  %v129_v63 = vmul.f32 %v12109_v34, %v85_v62  ;;  %v12110_v10 = vld [vmem:[#allocation13_spill] sm:$0xff]  ;;  %v12111_v33 = vld [vmem:[#allocation14_spill] sm:$0xff] }
 0x268   :  { %v202_v26 = vadd.f32 %v12110_v10, %v128_v32 }
 0x269   :  { %v203_v61 = vadd.f32 %v12111_v33, %v129_v63 }
 0x2a5   :  { %v9275_v58 = vpop.f32.mrf.mxu0  ;;  %v9277_v37 = vpop.f32.mrf.mxu1 }
 0x2a6   :  { %12104 = vst [vmem:[#allocation53_spill] sm:$0xff] %v9275_v58 }
 0x2a7   :  { %12105 = vst [vmem:[#allocation54_spill] sm:$0xff] %v9277_v37 }
 0x2ac   :  { %v9279_v50 = vpop.f32.mrf.mxu2  ;;  %v9281_v57 = vpop.f32.mrf.mxu3 }
 0x2ad   :  { %12106 = vst [vmem:[#allocation55_spill] sm:$0xff] %v9279_v50  ;;  %v1088_v2 = vpop.f32.mrf.mxu0  ;;  %v1101_v49 = vpop.f32.mrf.mxu1  ;;  %v12112_v50 = vld [vmem:[#allocation12_spill] sm:$0xff] }
 0x2ae   :  { %12107 = vst [vmem:[#allocation56_spill] sm:$0xff] %v9281_v57  ;;  %v130_v25 = vmul.f32 %v12112_v50, %v85_v62  ;;  %v12113_v49 = vld [vmem:[#allocation15_spill] sm:$0xff] }
 0x2b0   :  { %v204_v3 = vadd.f32 %v12113_v49, %v130_v25 }
 0x2b4   :  { %v1114_v0 = vpop.f32.mrf.mxu2  ;;  %v1127_v8 = vpop.f32.mrf.mxu3 }
 0x2b5   :  { %v1146_v58 = vpop.f32.mrf.mxu0  ;;  %v1159_v30 = vpop.f32.mrf.mxu1 }
 0x2b6   :  { %v1189_v37 = vadd.f32 %v1146_v58, %v202_v26  ;;  %v1190_v4 = vadd.f32 %v1159_v30, %v203_v61  ;;  %v12114_v30 = vld [vmem:[#allocation26_spill] sm:$0xff] }
 0x2b7   :  { %v131_v61 = vmul.f32 %v12114_v30, %v85_v62 }
 0x2b8   :  { %v7087_v57 = vmul.f32 -1.442695, %v1189_v37  ;;  %v7088_v2 = vmul.f32 -1.442695, %v1190_v4 }
 0x2ba   :  { %8147 = vpow2.f32 %v7087_v57  ;;  %v12115_v57 = vld [vmem:[#allocation29_spill] sm:$0xff] }
 0x2bb   :  { %8149 = vpow2.f32 %v7088_v2  ;;  %v205_v25 = vadd.f32 %v12115_v57, %v131_v61 }
 0x2bc   :  { %v1172_v53 = vpop.f32.mrf.mxu2  ;;  %v1185_v34 = vpop.f32.mrf.mxu3 }
 0x2bd   :  { %v1191_v0 = vadd.f32 %v1172_v53, %v204_v3  ;;  %v1148_v8 = vpop.f32.mrf.mxu0  ;;  %v1161_v44 = vpop.f32.mrf.mxu1  ;;  %v1192_v53 = vadd.f32 %v1185_v34, %v205_v25 }
 0x2bf   :  { %v7089_v32 = vmul.f32 -1.442695, %v1191_v0 }
 0x2c0   :  { %v8148_v10 = vpop.eup %8147 }
 0x2c1   :  { %v8150_v63 = vpop.eup %8149  ;;  %v1202_v33 = vadd.f32 1.0, %v8148_v10  ;;  %8151 = vpow2.f32 %v7089_v32 }
 0x2c2   :  { %v1203_v26 = vadd.f32 1.0, %v8150_v63 }
 0x2c3   :  { %8153 = vrcp.f32 %v1202_v33  ;;  %v1216_v32 = vand.u32 2147483648, %v1202_v33  ;;  %v1214_v62 = vand.u32 2147483647, %v1202_v33  ;;  %vm1210_vm14 = vweird.f32 %v1202_v33 }
 0x2c4   :  { %8155 = vrcp.f32 %v1203_v26  ;;  %v1174_v4 = vpop.f32.mrf.mxu2  ;;  %v1187_v58 = vpop.f32.mrf.mxu3  ;;  %v1231_v63 = vand.u32 2147483648, %v1203_v26  ;;  %vm1225_vm15 = vweird.f32 %v1203_v26 }
 0x2c5   :  { %v1229_v58 = vand.u32 2147483647, %v1203_v26  ;;  %vm1215_vm2 = vcmp.eq.f32.partialorder %v1214_v62, 8.507059e+37 }
 0x2c7   :  { %v8152_v37 = vpop.eup %8151  ;;  %vm1230_vm3 = vcmp.eq.f32.partialorder %v1229_v58, 8.507059e+37  ;;  %v12119_v58 = vld [vmem:[#allocation24_spill] sm:$0xff] }
 0x2c8   :  { %v1204_v2 = vadd.f32 1.0, %v8152_v37  ;;  %v1217_v37 = vor.u32 1.1754944e-38, %v1216_v32 }
 0x2c9   :  { %v8154_v49 = vpop.eup %8153 }
 0x2ca   :  { %v8156_v3 = vpop.eup %8155  ;;  %v1206_v44 = vmul.f32 %v8154_v49, %v1202_v33  ;;  %8157 = vrcp.f32 %v1204_v2  ;;  %vm1211_vm12 = vweird.f32 %v8154_v49  ;;  %v62_v33 = vld [vmem:[%s11742_s0 + $0x20] sm:$0xff]  ;;  %vm1240_vm5 = vweird.f32 %v1204_v2 }
 0x2cb   :  { %v1221_v0 = vmul.f32 %v8156_v3, %v1203_v26  ;;  %8159 = vtanh.f32 %v1192_v53  ;;  %vm1226_vm13 = vweird.f32 %v8156_v3  ;;  %vm1212_vm0 = vmor %vm1210_vm14, %vm1211_vm12  ;;  %89 = vperm.xlu2 %8087, %v62_v33   ;;  %v12130_v33 = vld [vmem:[#allocation37_spill] sm:$0xff] }
 0x2cc   :  { %v1207_v8 = vsub.f32 1.0, %v1206_v44  ;;  %vm1227_vm1 = vmor %vm1225_vm15, %vm1226_vm13  ;;  %v1232_v44 = vor.u32 1.1754944e-38, %v1231_v63 }
 0x2cd   :  { %v1222_v10 = vsub.f32 1.0, %v1221_v0 }
 0x2ce   :  { %v1208_v50 = vmul.f32 %v8154_v49, %v1207_v8 }
 0x2cf   :  { %v1223_v4 = vmul.f32 %v8156_v3, %v1222_v10 }
 0x2d0   :  { %v8158_v30 = vpop.eup %8157  ;;  %v1209_v61 = vadd.f32 %v8154_v49, %v1208_v50 }
 0x2d1   :  { %v1236_v34 = vmul.f32 %v8158_v30, %v1204_v2  ;;  %v1224_v25 = vadd.f32 %v8156_v3, %v1223_v4  ;;  %v8160_v53 = vpop.eup %8159  ;;  %vm1241_vm4 = vweird.f32 %v8158_v30 }
 0x2d2   :  { %v1213_v0 = vsel %vm1212_vm0, %v8154_v49, %v1209_v61  ;;  %v1246_v49 = vand.u32 2147483648, %v1204_v2  ;;  %vm1242_vm6 = vmor %vm1240_vm5, %vm1241_vm4  ;;  %v12120_v61 = vld [vmem:[#allocation25_spill] sm:$0xff] }
 0x2d3   :  { %v1237_v57 = vsub.f32 1.0, %v1236_v34  ;;  %v1218_v8 = vsel %vm1215_vm2, %v1217_v37, %v1213_v0  ;;  %v1228_v52 = vsel %vm1227_vm1, %v8156_v3, %v1224_v25  ;;  %v1244_v3 = vand.u32 2147483647, %v1204_v2  ;;  %v12118_v2 = vld [vmem:[#allocation23_spill] sm:$0xff]  ;;  %v12122_v37 = vld [vmem:[#allocation28_spill] sm:$0xff]  ;;  %v12123_v25 = vld [vmem:[#allocation30_spill] sm:$0xff] }
 0x2d4   :  { %v1233_v10 = vsel %vm1230_vm3, %v1232_v44, %v1228_v52  ;;  %v1252_v54 = vmul.f32 %v8160_v53, %v1218_v8  ;;  %v63_v52 = vld [vmem:[%s11742_s0 + $0x28] sm:$0xff]  ;;  %v12125_v0 = vld [vmem:[#allocation32_spill] sm:$0xff]  ;;  %v12126_v53 = vld [vmem:[#allocation33_spill] sm:$0xff] }
 0x2d5   :  { %v1238_v46 = vmul.f32 %v8158_v30, %v1237_v57  ;;  %v1251_v50 = vmul.f32 %v1233_v10, %v9208_v18  ;;  %v1247_v57 = vor.u32 1.1754944e-38, %v1246_v49  ;;  %vm1245_vm7 = vcmp.eq.f32.partialorder %v1244_v3, 8.507059e+37  ;;  %94 = vperm.xlu2 %8087, %v63_v52   ;;  %v12121_v34 = vld [vmem:[#allocation27_spill] sm:$0xff]  ;;  %v12127_v8 = vld [vmem:[#allocation34_spill] sm:$0xff]  ;;  %v12133_v3 = vld [vmem:[#allocation40_spill] sm:$0xff] }
 0x2d6   :  { %v12124_v44 = vld [vmem:[#allocation31_spill] sm:$0xff]  ;;  %v12134_v52 = vld [vmem:[#allocation41_spill] sm:$0xff] }
 0x2d7   :  { %v9295_v26 = vadd.f32 %v1252_v54, %v1251_v50  ;;  %v1239_v32 = vadd.f32 %v8158_v30, %v1238_v46  ;;  %v12116_v46 = vld [vmem:[#allocation21_spill] sm:$0xff]  ;;  %v12128_v10 = vld [vmem:[#allocation35_spill] sm:$0xff]  ;;  %v12129_v50 = vld [vmem:[#allocation36_spill] sm:$0xff] }
 0x2d8   :  { %v12132_v49 = vld [vmem:[#allocation39_spill] sm:$0xff] }
 0x2d9   :  { %8161 = vtanh.f32 %v9295_v26  ;;  %v1243_v18 = vsel %vm1242_vm6, %v8158_v30, %v1239_v32  ;;  %v12117_v30 = vld [vmem:[#allocation22_spill] sm:$0xff] }
 0x2da   :  { %v1248_v62 = vsel %vm1245_vm7, %v1247_v57, %v1243_v18  ;;  %v12131_v32 = vld [vmem:[#allocation38_spill] sm:$0xff]  ;;  %v12136_v57 = vld [vmem:[#allocation43_spill] sm:$0xff] }
 0x2db   :  { %v12135_v18 = vld [vmem:[#allocation42_spill] sm:$0xff] }
 0x2df   :  { %v8162_v63 = vpop.eup %8161 }
 0x2e0   :  { %v1255_v54 = vmul.f32 %v8162_v63, %v1248_v62  ;;  %v12137_v63 = vld [vmem:[#allocation44_spill] sm:$0xff]  ;;  %v12138_v62 = vld [vmem:[#allocation45_spill] sm:$0xff] }
 0x2e2   :  { %v1256_v4 = vpack.c.bf16 %v1255_v54, %v1255_v54  ;;  %v12139_v54 = vld [vmem:[#allocation46_spill] sm:$0xff] }
 0x2e4   :  { %1265 = vmatmul.bf16.vlgmr.msra.gmra.mxu0 %v1256_v4  ;;  %1278 = vmatmul.bf16.vlgmr.msra.gmra.mxu1 %v1256_v4 }
 0x2e5   :  { %1291 = vmatmul.bf16.vlgmr.msra.gmra.mxu2 %v1256_v4  ;;  %1304 = vmatmul.bf16.vlgmr.msra.gmra.mxu3 %v1256_v4 }
 0x2e6   :  { %1437 = vmatpush.bf16.msra.mxu0 %v8716_v7  ;;  %1450 = vmatpush.bf16.msra.mxu1 %v8718_v11 }
 0x2e7   :  { %1463 = vmatpush.bf16.msra.mxu2 %v8720_v12  ;;  %1476 = vmatpush.bf16.msra.mxu3 %v8723_v15 }
 0x2ea   :  { %1438 = vmatpush.bf16.msra.mxu0 %v8728_v19  ;;  %1451 = vmatpush.bf16.msra.mxu1 %v8730_v23 }
 0x2eb   :  { %1464 = vmatpush.bf16.msra.mxu2 %v8732_v24  ;;  %1477 = vmatpush.bf16.msra.mxu3 %v8735_v27 }
 0x2ee   :  { %1439 = vmatpush.bf16.msra.mxu0 %v8740_v31  ;;  %1452 = vmatpush.bf16.msra.mxu1 %v8742_v35 }
 0x2ef   :  { %1465 = vmatpush.bf16.msra.mxu2 %v8744_v36  ;;  %1478 = vmatpush.bf16.msra.mxu3 %v8747_v39 }
 0x2f2   :  { %1440 = vmatpush.bf16.msra.mxu0 %v8752_v43  ;;  %1453 = vmatpush.bf16.msra.mxu1 %v8754_v47 }
 0x2f3   :  { %1466 = vmatpush.bf16.msra.mxu2 %v8756_v48  ;;  %1479 = vmatpush.bf16.msra.mxu3 %v8759_v51 }
 0x2f4   :  { %1325 = vmatmul.bf16.vlgmr.msrb.gmra.mxu0 %v1256_v4  ;;  %1338 = vmatmul.bf16.vlgmr.msrb.gmra.mxu1 %v1256_v4 }
 0x2f5   :  { %1351 = vmatmul.bf16.vlgmr.msrb.gmra.mxu2 %v1256_v4  ;;  %1364 = vmatmul.bf16.vlgmr.msrb.gmra.mxu3 %v1256_v4  ;;  %v12140_v4 = vld [vmem:[#allocation47_spill] sm:$0xff] }
 0x2f6   :  { %1441 = vmatpush.bf16.msra.mxu0 %v8764_v55  ;;  %1454 = vmatpush.bf16.msra.mxu1 %v8766_v59 }
 0x2f7   :  { %1467 = vmatpush.bf16.msra.mxu2 %v8768_v60  ;;  %1480 = vmatpush.bf16.msra.mxu3 %v8781_v1 }
 0x2fa   :  { %1442 = vmatpush.bf16.msra.mxu0 %v8786_v5  ;;  %1455 = vmatpush.bf16.msra.mxu1 %v8791_v13 }
 0x2fb   :  { %1468 = vmatpush.bf16.msra.mxu2 %v8793_v14  ;;  %1481 = vmatpush.bf16.msra.mxu3 %v8805_v22 }
 0x2fe   :  { %1443 = vmatpush.bf16.msra.mxu0 %v8810_v29  ;;  %1456 = vmatpush.bf16.msra.mxu1 %v8818_v38 }
 0x2ff   :  { %1469 = vmatpush.bf16.msra.mxu2 %v8820_v40  ;;  %1482 = vmatpush.bf16.msra.mxu3 %v8825_v45 }
 0x302   :  { %1444 = vmatpush.bf16.msra.mxu0 %v8836_v56  ;;  %1457 = vmatpush.bf16.msra.mxu1 %v8842_v9 }
 0x303   :  { %1470 = vmatpush.bf16.msra.mxu2 %v8844_v16  ;;  %1483 = vmatpush.bf16.msra.mxu3 %v8846_v17 }
 0x306   :  { %1497 = vmatpush.bf16.msrb.mxu0 %v8850_v41  ;;  %1510 = vmatpush.bf16.msrb.mxu1 %v12006_v20 }
 0x307   :  { %1523 = vmatpush.bf16.msrb.mxu2 %v12007_v6  ;;  %1536 = vmatpush.bf16.msrb.mxu3 %v12008_v21 }
 0x30a   :  { %1498 = vmatpush.bf16.msrb.mxu0 %v12039_v28  ;;  %1511 = vmatpush.bf16.msrb.mxu1 %v12040_v42 }
 0x30b   :  { %1524 = vmatpush.bf16.msrb.mxu2 %v12116_v46  ;;  %1537 = vmatpush.bf16.msrb.mxu3 %v12117_v30 }
 0x30e   :  { %1499 = vmatpush.bf16.msrb.mxu0 %v12118_v2  ;;  %1512 = vmatpush.bf16.msrb.mxu1 %v12119_v58 }
 0x30f   :  { %1525 = vmatpush.bf16.msrb.mxu2 %v12120_v61  ;;  %1538 = vmatpush.bf16.msrb.mxu3 %v12121_v34  ;;  %v12150_v34 = vld [vmem:[#allocation12_spill] sm:$0xff] }
 0x312   :  { %1500 = vmatpush.bf16.msrb.mxu0 %v12122_v37  ;;  %1513 = vmatpush.bf16.msrb.mxu1 %v12123_v25 }
 0x313   :  { %1526 = vmatpush.bf16.msrb.mxu2 %v12124_v44  ;;  %1539 = vmatpush.bf16.msrb.mxu3 %v12125_v0 }
 0x316   :  { %1501 = vmatpush.bf16.msrb.mxu0 %v12126_v53  ;;  %1514 = vmatpush.bf16.msrb.mxu1 %v12127_v8 }
 0x317   :  { %1527 = vmatpush.bf16.msrb.mxu2 %v12128_v10  ;;  %1540 = vmatpush.bf16.msrb.mxu3 %v12129_v50 }
 0x31a   :  { %1502 = vmatpush.bf16.msrb.mxu0 %v12130_v33  ;;  %1515 = vmatpush.bf16.msrb.mxu1 %v12131_v32  ;;  %v12141_v33 = vld [vmem:[#allocation48_spill] sm:$0xff] }
 0x31b   :  { %1528 = vmatpush.bf16.msrb.mxu2 %v12132_v49  ;;  %1541 = vmatpush.bf16.msrb.mxu3 %v12133_v3 }
 0x31e   :  { %1503 = vmatpush.bf16.msrb.mxu0 %v12134_v52  ;;  %1516 = vmatpush.bf16.msrb.mxu1 %v12135_v18 }
 0x31f   :  { %1529 = vmatpush.bf16.msrb.mxu2 %v12136_v57  ;;  %1542 = vmatpush.bf16.msrb.mxu3 %v12137_v63  ;;  %v12146_v63 = vld [vmem:[#allocation10_spill] sm:$0xff] }
 0x322   :  { %1504 = vmatpush.bf16.msrb.mxu0 %v12138_v62  ;;  %1517 = vmatpush.bf16.msrb.mxu1 %v12139_v54  ;;  %v12147_v62 = vld [vmem:[#allocation11_spill] sm:$0xff]  ;;  %v12148_v54 = vld [vmem:[#allocation13_spill] sm:$0xff] }
 0x323   :  { %1530 = vmatpush.bf16.msrb.mxu2 %v12140_v4  ;;  %1543 = vmatpush.bf16.msrb.mxu3 %v12141_v33  ;;  %v12149_v4 = vld [vmem:[#allocation14_spill] sm:$0xff] }
 0x325   :  { %v90_v3 = vpop.permute.xlu2 %89 }
 0x326   :  { %v132_v10 = vmul.f32 %v12146_v63, %v90_v3  ;;  %v133_v8 = vmul.f32 %v12147_v62, %v90_v3 }
 0x328   :  { %v206_v53 = vadd.f32 %v12148_v54, %v132_v10  ;;  %v207_v0 = vadd.f32 %v12149_v4, %v133_v8 }
 0x361   :  { %v9365_v32 = vpop.f32.mrf.mxu0  ;;  %v9367_v49 = vpop.f32.mrf.mxu1 }
 0x362   :  { %12142 = vst [vmem:[#allocation57_spill] sm:$0xff] %v9365_v32 }
 0x363   :  { %12143 = vst [vmem:[#allocation58_spill] sm:$0xff] %v9367_v49 }
 0x368   :  { %v9369_v52 = vpop.f32.mrf.mxu2  ;;  %v9371_v18 = vpop.f32.mrf.mxu3 }
 0x369   :  { %12144 = vst [vmem:[#allocation59_spill] sm:$0xff] %v9369_v52  ;;  %v1268_v57 = vpop.f32.mrf.mxu0  ;;  %v1281_v50 = vpop.f32.mrf.mxu1  ;;  %v134_v52 = vmul.f32 %v12150_v34, %v90_v3 }
 0x36a   :  { %12145 = vst [vmem:[#allocation60_spill] sm:$0xff] %v9371_v18  ;;  %v12151_v50 = vld [vmem:[#allocation15_spill] sm:$0xff] }
 0x36b   :  { %v208_v57 = vadd.f32 %v12151_v50, %v134_v52 }
 0x370   :  { %v1294_v33 = vpop.f32.mrf.mxu2  ;;  %v1307_v44 = vpop.f32.mrf.mxu3 }
 0x371   :  { %v1326_v32 = vpop.f32.mrf.mxu0  ;;  %v1339_v25 = vpop.f32.mrf.mxu1 }
 0x372   :  { %v1369_v49 = vadd.f32 %v1326_v32, %v206_v53  ;;  %v1370_v37 = vadd.f32 %v1339_v25, %v207_v0  ;;  %v12152_v25 = vld [vmem:[#allocation26_spill] sm:$0xff] }
 0x373   :  { %v135_v0 = vmul.f32 %v12152_v25, %v90_v3 }
 0x374   :  { %v7090_v61 = vmul.f32 -1.442695, %v1369_v49  ;;  %v7091_v18 = vmul.f32 -1.442695, %v1370_v37  ;;  %v12153_v49 = vld [vmem:[#allocation29_spill] sm:$0xff] }
 0x375   :  { %v209_v52 = vadd.f32 %v12153_v49, %v135_v0 }
 0x376   :  { %8163 = vpow2.f32 %v7090_v61 }
 0x377   :  { %8165 = vpow2.f32 %v7091_v18 }
 0x378   :  { %v1352_v63 = vpop.f32.mrf.mxu2  ;;  %v1365_v62 = vpop.f32.mrf.mxu3 }
 0x379   :  { %v1371_v58 = vadd.f32 %v1352_v63, %v208_v57  ;;  %v1328_v10 = vpop.f32.mrf.mxu0  ;;  %v1341_v54 = vpop.f32.mrf.mxu1  ;;  %v1372_v63 = vadd.f32 %v1365_v62, %v209_v52 }
 0x37b   :  { %v7092_v8 = vmul.f32 -1.442695, %v1371_v58 }
 0x37c   :  { %v8164_v33 = vpop.eup %8163 }
 0x37d   :  { %v8166_v44 = vpop.eup %8165  ;;  %v1382_v4 = vadd.f32 1.0, %v8164_v33  ;;  %8167 = vpow2.f32 %v7092_v8 }
 0x37e   :  { %v1383_v53 = vadd.f32 1.0, %v8166_v44 }
 0x37f   :  { %8169 = vrcp.f32 %v1382_v4  ;;  %v1396_v8 = vand.u32 2147483648, %v1382_v4  ;;  %v1394_v3 = vand.u32 2147483647, %v1382_v4  ;;  %vm1390_vm10 = vweird.f32 %v1382_v4 }
 0x380   :  { %8171 = vrcp.f32 %v1383_v53  ;;  %v1354_v37 = vpop.f32.mrf.mxu2  ;;  %v1367_v61 = vpop.f32.mrf.mxu3  ;;  %v1411_v44 = vand.u32 2147483648, %v1383_v53  ;;  %vm1405_vm11 = vweird.f32 %v1383_v53 }
 0x381   :  { %v1409_v61 = vand.u32 2147483647, %v1383_v53  ;;  %vm1395_vm14 = vcmp.eq.f32.partialorder %v1394_v3, 8.507059e+37 }
 0x383   :  { %v8168_v32 = vpop.eup %8167  ;;  %vm1410_vm15 = vcmp.eq.f32.partialorder %v1409_v61, 8.507059e+37 }
 0x384   :  { %v1384_v18 = vadd.f32 1.0, %v8168_v32  ;;  %v1397_v32 = vor.u32 1.1754944e-38, %v1396_v8 }
 0x385   :  { %v8170_v50 = vpop.eup %8169 }
 0x386   :  { %v8172_v57 = vpop.eup %8171  ;;  %v1386_v54 = vmul.f32 %v8170_v50, %v1382_v4  ;;  %8173 = vrcp.f32 %v1384_v18  ;;  %vm1391_vm8 = vweird.f32 %v8170_v50  ;;  %v1426_v8 = vand.u32 2147483648, %v1384_v18 }
 0x387   :  { %v1401_v58 = vmul.f32 %v8172_v57, %v1383_v53  ;;  %8175 = vtanh.f32 %v1372_v63  ;;  %vm1406_vm9 = vweird.f32 %v8172_v57  ;;  %vm1392_vm12 = vmor %vm1390_vm10, %vm1391_vm8  ;;  %vm1420_vm1 = vweird.f32 %v1384_v18 }
 0x388   :  { %v1387_v10 = vsub.f32 1.0, %v1386_v54  ;;  %vm1407_vm13 = vmor %vm1405_vm11, %vm1406_vm9  ;;  %v1412_v54 = vor.u32 1.1754944e-38, %v1411_v44  ;;  %v1427_v3 = vor.u32 1.1754944e-38, %v1426_v8  ;;  %v12171_v8 = vld [vmem:[#allocation40_spill] sm:$0xff] }
 0x389   :  { %v1402_v33 = vsub.f32 1.0, %v1401_v58 }
 0x38a   :  { %v1388_v34 = vmul.f32 %v8170_v50, %v1387_v10 }
 0x38b   :  { %v1403_v37 = vmul.f32 %v8172_v57, %v1402_v33 }
 0x38c   :  { %v8174_v25 = vpop.eup %8173  ;;  %v1389_v0 = vadd.f32 %v8170_v50, %v1388_v34 }
 0x38d   :  { %v1416_v62 = vmul.f32 %v8174_v25, %v1384_v18  ;;  %v1404_v52 = vadd.f32 %v8172_v57, %v1403_v37  ;;  %v8176_v63 = vpop.eup %8175  ;;  %vm1421_vm0 = vweird.f32 %v8174_v25 }
 0x38e   :  { %v1393_v58 = vsel %vm1392_vm12, %v8170_v50, %v1389_v0  ;;  %v1424_v50 = vand.u32 2147483647, %v1384_v18  ;;  %vm1422_vm2 = vmor %vm1420_vm1, %vm1421_vm0  ;;  %v12159_v18 = vld [vmem:[#allocation27_spill] sm:$0xff]  ;;  %v12160_v0 = vld [vmem:[#allocation28_spill] sm:$0xff] }
 0x38f   :  { %v1417_v49 = vsub.f32 1.0, %v1416_v62  ;;  %v1398_v10 = vsel %vm1395_vm14, %v1397_v32, %v1393_v58  ;;  %v1408_v2 = vsel %vm1407_vm13, %v8172_v57, %v1404_v52  ;;  %v12161_v62 = vld [vmem:[#allocation30_spill] sm:$0xff]  ;;  %v12162_v32 = vld [vmem:[#allocation31_spill] sm:$0xff]  ;;  %v12163_v52 = vld [vmem:[#allocation32_spill] sm:$0xff] }
 0x390   :  { %v1413_v33 = vsel %vm1410_vm15, %v1412_v54, %v1408_v2  ;;  %v1432_v30 = vmul.f32 %v8176_v63, %v1398_v10  ;;  %vm1425_vm3 = vcmp.eq.f32.partialorder %v1424_v50, 8.507059e+37  ;;  %v12164_v54 = vld [vmem:[#allocation33_spill] sm:$0xff]  ;;  %v12165_v58 = vld [vmem:[#allocation34_spill] sm:$0xff]  ;;  %v12166_v63 = vld [vmem:[#allocation35_spill] sm:$0xff] }
 0x391   :  { %v1418_v46 = vmul.f32 %v8174_v25, %v1417_v49  ;;  %v1431_v34 = vmul.f32 %v1413_v33, %v9295_v26  ;;  %v12154_v26 = vld [vmem:[#allocation21_spill] sm:$0xff]  ;;  %v12167_v10 = vld [vmem:[#allocation36_spill] sm:$0xff] }
 0x392   :  { %v12158_v49 = vld [vmem:[#allocation25_spill] sm:$0xff] }
 0x393   :  { %v9382_v4 = vadd.f32 %v1432_v30, %v1431_v34  ;;  %v1419_v53 = vadd.f32 %v8174_v25, %v1418_v46  ;;  %v12155_v46 = vld [vmem:[#allocation22_spill] sm:$0xff]  ;;  %v12156_v30 = vld [vmem:[#allocation23_spill] sm:$0xff]  ;;  %v12168_v33 = vld [vmem:[#allocation37_spill] sm:$0xff] }
 0x394   :  { %v12169_v34 = vld [vmem:[#allocation38_spill] sm:$0xff]  ;;  %v12172_v50 = vld [vmem:[#allocation41_spill] sm:$0xff] }
 0x395   :  { %8177 = vtanh.f32 %v9382_v4  ;;  %v1423_v44 = vsel %vm1422_vm2, %v8174_v25, %v1419_v53  ;;  %v12157_v25 = vld [vmem:[#allocation24_spill] sm:$0xff]  ;;  %v12170_v53 = vld [vmem:[#allocation39_spill] sm:$0xff] }
 0x396   :  { %v1428_v37 = vsel %vm1425_vm3, %v1427_v3, %v1423_v44  ;;  %v12173_v44 = vld [vmem:[#allocation42_spill] sm:$0xff]  ;;  %v12174_v3 = vld [vmem:[#allocation43_spill] sm:$0xff] }
 0x39b   :  { %v8178_v57 = vpop.eup %8177 }
 0x39c   :  { %v1435_v2 = vmul.f32 %v8178_v57, %v1428_v37  ;;  %v12175_v57 = vld [vmem:[#allocation44_spill] sm:$0xff]  ;;  %v12176_v37 = vld [vmem:[#allocation45_spill] sm:$0xff] }
 0x39e   :  { %v1436_v61 = vpack.c.bf16 %v1435_v2, %v1435_v2  ;;  %v12177_v2 = vld [vmem:[#allocation46_spill] sm:$0xff] }
 0x3a0   :  { %1445 = vmatmul.bf16.vlgmr.msra.gmra.mxu0 %v1436_v61  ;;  %1458 = vmatmul.bf16.vlgmr.msra.gmra.mxu1 %v1436_v61 }
 0x3a1   :  { %1471 = vmatmul.bf16.vlgmr.msra.gmra.mxu2 %v1436_v61  ;;  %1484 = vmatmul.bf16.vlgmr.msra.gmra.mxu3 %v1436_v61 }
 0x3a2   :  { %1617 = vmatpush.bf16.msra.mxu0 %v8716_v7  ;;  %1630 = vmatpush.bf16.msra.mxu1 %v8718_v11 }
 0x3a3   :  { %1643 = vmatpush.bf16.msra.mxu2 %v8720_v12  ;;  %1656 = vmatpush.bf16.msra.mxu3 %v8723_v15 }
 0x3a6   :  { %1618 = vmatpush.bf16.msra.mxu0 %v8728_v19  ;;  %1631 = vmatpush.bf16.msra.mxu1 %v8730_v23 }
 0x3a7   :  { %1644 = vmatpush.bf16.msra.mxu2 %v8732_v24  ;;  %1657 = vmatpush.bf16.msra.mxu3 %v8735_v27 }
 0x3aa   :  { %1619 = vmatpush.bf16.msra.mxu0 %v8740_v31  ;;  %1632 = vmatpush.bf16.msra.mxu1 %v8742_v35 }
 0x3ab   :  { %1645 = vmatpush.bf16.msra.mxu2 %v8744_v36  ;;  %1658 = vmatpush.bf16.msra.mxu3 %v8747_v39 }
 0x3ae   :  { %1620 = vmatpush.bf16.msra.mxu0 %v8752_v43  ;;  %1633 = vmatpush.bf16.msra.mxu1 %v8754_v47 }
 0x3af   :  { %1646 = vmatpush.bf16.msra.mxu2 %v8756_v48  ;;  %1659 = vmatpush.bf16.msra.mxu3 %v8759_v51 }
 0x3b0   :  { %1505 = vmatmul.bf16.vlgmr.msrb.gmra.mxu0 %v1436_v61  ;;  %1518 = vmatmul.bf16.vlgmr.msrb.gmra.mxu1 %v1436_v61 }
 0x3b1   :  { %1531 = vmatmul.bf16.vlgmr.msrb.gmra.mxu2 %v1436_v61  ;;  %1544 = vmatmul.bf16.vlgmr.msrb.gmra.mxu3 %v1436_v61  ;;  %v12178_v61 = vld [vmem:[#allocation47_spill] sm:$0xff] }
 0x3b2   :  { %1621 = vmatpush.bf16.msra.mxu0 %v8764_v55  ;;  %1634 = vmatpush.bf16.msra.mxu1 %v8766_v59 }
 0x3b3   :  { %1647 = vmatpush.bf16.msra.mxu2 %v8768_v60  ;;  %1660 = vmatpush.bf16.msra.mxu3 %v8781_v1 }
 0x3b6   :  { %1622 = vmatpush.bf16.msra.mxu0 %v8786_v5  ;;  %1635 = vmatpush.bf16.msra.mxu1 %v8791_v13 }
 0x3b7   :  { %1648 = vmatpush.bf16.msra.mxu2 %v8793_v14  ;;  %1661 = vmatpush.bf16.msra.mxu3 %v8805_v22 }
 0x3ba   :  { %1623 = vmatpush.bf16.msra.mxu0 %v8810_v29  ;;  %1636 = vmatpush.bf16.msra.mxu1 %v8818_v38 }
 0x3bb   :  { %1649 = vmatpush.bf16.msra.mxu2 %v8820_v40  ;;  %1662 = vmatpush.bf16.msra.mxu3 %v8825_v45 }
 0x3be   :  { %1624 = vmatpush.bf16.msra.mxu0 %v8836_v56  ;;  %1637 = vmatpush.bf16.msra.mxu1 %v8842_v9 }
 0x3bf   :  { %1650 = vmatpush.bf16.msra.mxu2 %v8844_v16  ;;  %1663 = vmatpush.bf16.msra.mxu3 %v8846_v17 }
 0x3c2   :  { %1677 = vmatpush.bf16.msrb.mxu0 %v8850_v41  ;;  %1690 = vmatpush.bf16.msrb.mxu1 %v12006_v20 }
 0x3c3   :  { %1703 = vmatpush.bf16.msrb.mxu2 %v12007_v6  ;;  %1716 = vmatpush.bf16.msrb.mxu3 %v12008_v21 }
 0x3c6   :  { %1678 = vmatpush.bf16.msrb.mxu0 %v12039_v28  ;;  %1691 = vmatpush.bf16.msrb.mxu1 %v12040_v42 }
 0x3c7   :  { %1704 = vmatpush.bf16.msrb.mxu2 %v12154_v26  ;;  %1717 = vmatpush.bf16.msrb.mxu3 %v12155_v46 }
 0x3ca   :  { %1679 = vmatpush.bf16.msrb.mxu0 %v12156_v30  ;;  %1692 = vmatpush.bf16.msrb.mxu1 %v12157_v25 }
 0x3cb   :  { %1705 = vmatpush.bf16.msrb.mxu2 %v12158_v49  ;;  %1718 = vmatpush.bf16.msrb.mxu3 %v12159_v18  ;;  %v12188_v18 = vld [vmem:[#allocation12_spill] sm:$0xff] }
 0x3ce   :  { %1680 = vmatpush.bf16.msrb.mxu0 %v12160_v0  ;;  %1693 = vmatpush.bf16.msrb.mxu1 %v12161_v62 }
 0x3cf   :  { %1706 = vmatpush.bf16.msrb.mxu2 %v12162_v32  ;;  %1719 = vmatpush.bf16.msrb.mxu3 %v12163_v52 }
 0x3d2   :  { %1681 = vmatpush.bf16.msrb.mxu0 %v12164_v54  ;;  %1694 = vmatpush.bf16.msrb.mxu1 %v12165_v58 }
 0x3d3   :  { %1707 = vmatpush.bf16.msrb.mxu2 %v12166_v63  ;;  %1720 = vmatpush.bf16.msrb.mxu3 %v12167_v10 }
 0x3d6   :  { %1682 = vmatpush.bf16.msrb.mxu0 %v12168_v33  ;;  %1695 = vmatpush.bf16.msrb.mxu1 %v12169_v34  ;;  %v12179_v33 = vld [vmem:[#allocation48_spill] sm:$0xff] }
 0x3d7   :  { %1708 = vmatpush.bf16.msrb.mxu2 %v12170_v53  ;;  %1721 = vmatpush.bf16.msrb.mxu3 %v12171_v8  ;;  %v95_v8 = vpop.permute.xlu2 %94 }
 0x3da   :  { %1683 = vmatpush.bf16.msrb.mxu0 %v12172_v50  ;;  %1696 = vmatpush.bf16.msrb.mxu1 %v12173_v44 }
 0x3db   :  { %1709 = vmatpush.bf16.msrb.mxu2 %v12174_v3  ;;  %1722 = vmatpush.bf16.msrb.mxu3 %v12175_v57  ;;  %v12184_v57 = vld [vmem:[#allocation10_spill] sm:$0xff] }
 0x3dc   :  { %v136_v63 = vmul.f32 %v12184_v57, %v95_v8 }
 0x3de   :  { %1684 = vmatpush.bf16.msrb.mxu0 %v12176_v37  ;;  %1697 = vmatpush.bf16.msrb.mxu1 %v12177_v2  ;;  %v12185_v37 = vld [vmem:[#allocation11_spill] sm:$0xff] }
 0x3df   :  { %1710 = vmatpush.bf16.msrb.mxu2 %v12178_v61  ;;  %1723 = vmatpush.bf16.msrb.mxu3 %v12179_v33  ;;  %v137_v58 = vmul.f32 %v12185_v37, %v95_v8  ;;  %v12186_v61 = vld [vmem:[#allocation13_spill] sm:$0xff]  ;;  %v12187_v33 = vld [vmem:[#allocation14_spill] sm:$0xff] }
 0x3e0   :  { %v210_v52 = vadd.f32 %v12186_v61, %v136_v63 }
 0x3e1   :  { %v211_v32 = vadd.f32 %v12187_v33, %v137_v58 }
 0x41d   :  { %v9449_v34 = vpop.f32.mrf.mxu0  ;;  %v9451_v53 = vpop.f32.mrf.mxu1 }
 0x41e   :  { %12180 = vst [vmem:[#allocation61_spill] sm:$0xff] %v9449_v34 }
 0x41f   :  { %12181 = vst [vmem:[#allocation62_spill] sm:$0xff] %v9451_v53 }
 0x424   :  { %v9453_v50 = vpop.f32.mrf.mxu2  ;;  %v9455_v44 = vpop.f32.mrf.mxu3 }
 0x425   :  { %12182 = vst [vmem:[#allocation63_spill] sm:$0xff] %v9453_v50  ;;  %v1448_v3 = vpop.f32.mrf.mxu0  ;;  %v1461_v10 = vpop.f32.mrf.mxu1  ;;  %v138_v50 = vmul.f32 %v12188_v18, %v95_v8 }
 0x426   :  { %12183 = vst [vmem:[#allocation64_spill] sm:$0xff] %v9455_v44  ;;  %v12189_v10 = vld [vmem:[#allocation15_spill] sm:$0xff] }
 0x427   :  { %v212_v3 = vadd.f32 %v12189_v10, %v138_v50 }
 0x42c   :  { %v1474_v2 = vpop.f32.mrf.mxu2  ;;  %v1487_v54 = vpop.f32.mrf.mxu3 }
 0x42d   :  { %v1506_v34 = vpop.f32.mrf.mxu0  ;;  %v1519_v62 = vpop.f32.mrf.mxu1 }
 0x42e   :  { %v1549_v53 = vadd.f32 %v1506_v34, %v210_v52  ;;  %v1550_v0 = vadd.f32 %v1519_v62, %v211_v32  ;;  %v12190_v62 = vld [vmem:[#allocation26_spill] sm:$0xff] }
 0x42f   :  { %v139_v32 = vmul.f32 %v12190_v62, %v95_v8 }
 0x430   :  { %v7093_v49 = vmul.f32 -1.442695, %v1549_v53  ;;  %v7094_v44 = vmul.f32 -1.442695, %v1550_v0  ;;  %v12191_v53 = vld [vmem:[#allocation29_spill] sm:$0xff] }
 0x431   :  { %v213_v50 = vadd.f32 %v12191_v53, %v139_v32 }
 0x432   :  { %8179 = vpow2.f32 %v7093_v49 }
 0x433   :  { %8181 = vpow2.f32 %v7094_v44 }
 0x434   :  { %v1532_v57 = vpop.f32.mrf.mxu2  ;;  %v1545_v37 = vpop.f32.mrf.mxu3 }
 0x435   :  { %v1551_v2 = vadd.f32 %v1532_v57, %v212_v3  ;;  %v1508_v54 = vpop.f32.mrf.mxu0  ;;  %v1521_v25 = vpop.f32.mrf.mxu1  ;;  %v1552_v57 = vadd.f32 %v1545_v37, %v213_v50 }
 0x437   :  { %v7095_v63 = vmul.f32 -1.442695, %v1551_v2 }
 0x438   :  { %v8180_v61 = vpop.eup %8179 }
 0x439   :  { %v8182_v58 = vpop.eup %8181  ;;  %v1562_v33 = vadd.f32 1.0, %v8180_v61  ;;  %8183 = vpow2.f32 %v7095_v63 }
 0x43a   :  { %v1563_v52 = vadd.f32 1.0, %v8182_v58 }
 0x43b   :  { %8185 = vrcp.f32 %v1562_v33  ;;  %v1576_v63 = vand.u32 2147483648, %v1562_v33  ;;  %v1574_v62 = vand.u32 2147483647, %v1562_v33  ;;  %vm1570_vm6 = vweird.f32 %v1562_v33 }
 0x43c   :  { %8187 = vrcp.f32 %v1563_v52  ;;  %v1534_v0 = vpop.f32.mrf.mxu2  ;;  %v1547_v49 = vpop.f32.mrf.mxu3  ;;  %v1591_v58 = vand.u32 2147483648, %v1563_v52  ;;  %vm1585_vm7 = vweird.f32 %v1563_v52 }
 0x43d   :  { %v1589_v49 = vand.u32 2147483647, %v1563_v52  ;;  %vm1575_vm10 = vcmp.eq.f32.partialorder %v1574_v62, 8.507059e+37 }
 0x43f   :  { %v8184_v34 = vpop.eup %8183  ;;  %vm1590_vm11 = vcmp.eq.f32.partialorder %v1589_v49, 8.507059e+37 }
 0x440   :  { %v1564_v44 = vadd.f32 1.0, %v8184_v34  ;;  %v1577_v34 = vor.u32 1.1754944e-38, %v1576_v63 }
 0x441   :  { %v8186_v10 = vpop.eup %8185 }
 0x442   :  { %v8188_v3 = vpop.eup %8187  ;;  %v1566_v25 = vmul.f32 %v8186_v10, %v1562_v33  ;;  %8189 = vrcp.f32 %v1564_v44  ;;  %vm1571_vm4 = vweird.f32 %v8186_v10  ;;  %v1606_v63 = vand.u32 2147483648, %v1564_v44 }
 0x443   :  { %v1581_v2 = vmul.f32 %v8188_v3, %v1563_v52  ;;  %8191 = vtanh.f32 %v1552_v57  ;;  %vm1586_vm5 = vweird.f32 %v8188_v3  ;;  %vm1572_vm8 = vmor %vm1570_vm6, %vm1571_vm4  ;;  %vm1600_vm13 = vweird.f32 %v1564_v44 }
 0x444   :  { %v1567_v54 = vsub.f32 1.0, %v1566_v25  ;;  %vm1587_vm9 = vmor %vm1585_vm7, %vm1586_vm5  ;;  %v1592_v25 = vor.u32 1.1754944e-38, %v1591_v58  ;;  %v1607_v58 = vor.u32 1.1754944e-38, %v1606_v63  ;;  %v12215_v63 = vld [vmem:[#allocation46_spill] sm:$0xff] }
 0x445   :  { %v1582_v61 = vsub.f32 1.0, %v1581_v2 }
 0x446   :  { %v1568_v8 = vmul.f32 %v8186_v10, %v1567_v54 }
 0x447   :  { %v1583_v0 = vmul.f32 %v8188_v3, %v1582_v61 }
 0x448   :  { %v8190_v18 = vpop.eup %8189  ;;  %v1569_v32 = vadd.f32 %v8186_v10, %v1568_v8 }
 0x449   :  { %v1596_v37 = vmul.f32 %v8190_v18, %v1564_v44  ;;  %v1584_v50 = vadd.f32 %v8188_v3, %v1583_v0  ;;  %v8192_v57 = vpop.eup %8191  ;;  %vm1601_vm12 = vweird.f32 %v8190_v18 }
 0x44a   :  { %v1573_v2 = vsel %vm1572_vm8, %v8186_v10, %v1569_v32  ;;  %v1604_v10 = vand.u32 2147483647, %v1564_v44  ;;  %vm1602_vm14 = vmor %vm1600_vm13, %vm1601_vm12  ;;  %v12203_v44 = vld [vmem:[#allocation34_spill] sm:$0xff]  ;;  %v12204_v32 = vld [vmem:[#allocation35_spill] sm:$0xff] }
 0x44b   :  { %v1597_v53 = vsub.f32 1.0, %v1596_v37  ;;  %v1578_v54 = vsel %vm1575_vm10, %v1577_v34, %v1573_v2  ;;  %v1588_v30 = vsel %vm1587_vm9, %v8188_v3, %v1584_v50  ;;  %v12205_v37 = vld [vmem:[#allocation36_spill] sm:$0xff]  ;;  %v12206_v34 = vld [vmem:[#allocation37_spill] sm:$0xff]  ;;  %v12207_v50 = vld [vmem:[#allocation38_spill] sm:$0xff] }
 0x44c   :  { %v1593_v61 = vsel %vm1590_vm11, %v1592_v25, %v1588_v30  ;;  %v1612_v46 = vmul.f32 %v8192_v57, %v1578_v54  ;;  %vm1605_vm15 = vcmp.eq.f32.partialorder %v1604_v10, 8.507059e+37  ;;  %v12208_v25 = vld [vmem:[#allocation39_spill] sm:$0xff]  ;;  %v12209_v2 = vld [vmem:[#allocation40_spill] sm:$0xff]  ;;  %v12210_v57 = vld [vmem:[#allocation41_spill] sm:$0xff] }
 0x44d   :  { %v1598_v26 = vmul.f32 %v8190_v18, %v1597_v53  ;;  %v1611_v8 = vmul.f32 %v1593_v61, %v9382_v4  ;;  %v12192_v4 = vld [vmem:[#allocation21_spill] sm:$0xff]  ;;  %v12211_v54 = vld [vmem:[#allocation42_spill] sm:$0xff]  ;;  %v12212_v61 = vld [vmem:[#allocation43_spill] sm:$0xff] }
 0x44e   :  { %v12196_v53 = vld [vmem:[#allocation25_spill] sm:$0xff]  ;;  %v12216_v10 = vld [vmem:[#allocation47_spill] sm:$0xff] }
 0x44f   :  { %v9466_v33 = vadd.f32 %v1612_v46, %v1611_v8  ;;  %v1599_v52 = vadd.f32 %v8190_v18, %v1598_v26  ;;  %v12193_v26 = vld [vmem:[#allocation22_spill] sm:$0xff]  ;;  %v12194_v46 = vld [vmem:[#allocation23_spill] sm:$0xff]  ;;  %v12213_v8 = vld [vmem:[#allocation44_spill] sm:$0xff] }
 0x451   :  { %8193 = vtanh.f32 %v9466_v33  ;;  %v1603_v62 = vsel %vm1602_vm14, %v8190_v18, %v1599_v52  ;;  %v12195_v18 = vld [vmem:[#allocation24_spill] sm:$0xff]  ;;  %v12214_v52 = vld [vmem:[#allocation45_spill] sm:$0xff] }
 0x452   :  { %v1608_v0 = vsel %vm1605_vm15, %v1607_v58, %v1603_v62  ;;  %v12217_v62 = vld [vmem:[#allocation48_spill] sm:$0xff] }
 0x457   :  { %v8194_v3 = vpop.eup %8193 }
 0x458   :  { %v1615_v30 = vmul.f32 %v8194_v3, %v1608_v0  ;;  %v100_v0 = vpop.permute.xlu0 %99 }
 0x45a   :  { %v1616_v49 = vpack.c.bf16 %v1615_v30, %v1615_v30 }
 0x45c   :  { %1625 = vmatmul.bf16.vlgmr.msra.gmra.mxu0 %v1616_v49  ;;  %1638 = vmatmul.bf16.vlgmr.msra.gmra.mxu1 %v1616_v49 }
 0x45d   :  { %1651 = vmatmul.bf16.vlgmr.msra.gmra.mxu2 %v1616_v49  ;;  %1664 = vmatmul.bf16.vlgmr.msra.gmra.mxu3 %v1616_v49 }
 0x45e   :  { %1797 = vmatpush.bf16.msra.mxu0 %v8716_v7  ;;  %1810 = vmatpush.bf16.msra.mxu1 %v8718_v11 }
 0x45f   :  { %1823 = vmatpush.bf16.msra.mxu2 %v8720_v12  ;;  %1836 = vmatpush.bf16.msra.mxu3 %v8723_v15 }
 0x462   :  { %1798 = vmatpush.bf16.msra.mxu0 %v8728_v19  ;;  %1811 = vmatpush.bf16.msra.mxu1 %v8730_v23 }
 0x463   :  { %1824 = vmatpush.bf16.msra.mxu2 %v8732_v24  ;;  %1837 = vmatpush.bf16.msra.mxu3 %v8735_v27 }
 0x466   :  { %1799 = vmatpush.bf16.msra.mxu0 %v8740_v31  ;;  %1812 = vmatpush.bf16.msra.mxu1 %v8742_v35 }
 0x467   :  { %1825 = vmatpush.bf16.msra.mxu2 %v8744_v36  ;;  %1838 = vmatpush.bf16.msra.mxu3 %v8747_v39 }
 0x46a   :  { %1800 = vmatpush.bf16.msra.mxu0 %v8752_v43  ;;  %1813 = vmatpush.bf16.msra.mxu1 %v8754_v47 }
 0x46b   :  { %1826 = vmatpush.bf16.msra.mxu2 %v8756_v48  ;;  %1839 = vmatpush.bf16.msra.mxu3 %v8759_v51 }
 0x46c   :  { %1685 = vmatmul.bf16.vlgmr.msrb.gmra.mxu0 %v1616_v49  ;;  %1698 = vmatmul.bf16.vlgmr.msrb.gmra.mxu1 %v1616_v49 }
 0x46d   :  { %1711 = vmatmul.bf16.vlgmr.msrb.gmra.mxu2 %v1616_v49  ;;  %1724 = vmatmul.bf16.vlgmr.msrb.gmra.mxu3 %v1616_v49 }
 0x46e   :  { %1801 = vmatpush.bf16.msra.mxu0 %v8764_v55  ;;  %1814 = vmatpush.bf16.msra.mxu1 %v8766_v59 }
 0x46f   :  { %1827 = vmatpush.bf16.msra.mxu2 %v8768_v60  ;;  %1840 = vmatpush.bf16.msra.mxu3 %v8781_v1 }
 0x472   :  { %1802 = vmatpush.bf16.msra.mxu0 %v8786_v5  ;;  %1815 = vmatpush.bf16.msra.mxu1 %v8791_v13 }
 0x473   :  { %1828 = vmatpush.bf16.msra.mxu2 %v8793_v14  ;;  %1841 = vmatpush.bf16.msra.mxu3 %v8805_v22 }
 0x476   :  { %1803 = vmatpush.bf16.msra.mxu0 %v8810_v29  ;;  %1816 = vmatpush.bf16.msra.mxu1 %v8818_v38 }
 0x477   :  { %1829 = vmatpush.bf16.msra.mxu2 %v8820_v40  ;;  %1842 = vmatpush.bf16.msra.mxu3 %v8825_v45 }
 0x47a   :  { %1804 = vmatpush.bf16.msra.mxu0 %v8836_v56  ;;  %1817 = vmatpush.bf16.msra.mxu1 %v8842_v9 }
 0x47b   :  { %1830 = vmatpush.bf16.msra.mxu2 %v8844_v16  ;;  %1843 = vmatpush.bf16.msra.mxu3 %v8846_v17 }
 0x47e   :  { %1857 = vmatpush.bf16.msrb.mxu0 %v8850_v41  ;;  %1870 = vmatpush.bf16.msrb.mxu1 %v12006_v20  ;;  %v12197_v41 = vld [vmem:[#allocation27_spill] sm:$0xff]  ;;  %v12198_v20 = vld [vmem:[#allocation28_spill] sm:$0xff] }
 0x47f   :  { %1883 = vmatpush.bf16.msrb.mxu2 %v12007_v6  ;;  %1896 = vmatpush.bf16.msrb.mxu3 %v12008_v21  ;;  %v12199_v6 = vld [vmem:[#allocation30_spill] sm:$0xff]  ;;  %v12200_v21 = vld [vmem:[#allocation31_spill] sm:$0xff] }
 0x482   :  { %1858 = vmatpush.bf16.msrb.mxu0 %v12039_v28  ;;  %1871 = vmatpush.bf16.msrb.mxu1 %v12040_v42  ;;  %v12201_v28 = vld [vmem:[#allocation32_spill] sm:$0xff]  ;;  %v12202_v42 = vld [vmem:[#allocation33_spill] sm:$0xff] }
 0x483   :  { %1884 = vmatpush.bf16.msrb.mxu2 %v12192_v4  ;;  %1897 = vmatpush.bf16.msrb.mxu3 %v12193_v26 }
 0x486   :  { %1859 = vmatpush.bf16.msrb.mxu0 %v12194_v46  ;;  %1872 = vmatpush.bf16.msrb.mxu1 %v12195_v18  ;;  %v12222_v46 = vld [vmem:[#allocation10_spill] sm:$0xff] }
 0x487   :  { %1885 = vmatpush.bf16.msrb.mxu2 %v12196_v53  ;;  %1898 = vmatpush.bf16.msrb.mxu3 %v12197_v41  ;;  %v140_v18 = vmul.f32 %v12222_v46, %v100_v0  ;;  %v12223_v53 = vld [vmem:[#allocation11_spill] sm:$0xff] }
 0x488   :  { %v141_v41 = vmul.f32 %v12223_v53, %v100_v0 }
 0x48a   :  { %1860 = vmatpush.bf16.msrb.mxu0 %v12198_v20  ;;  %1873 = vmatpush.bf16.msrb.mxu1 %v12199_v6 }
 0x48b   :  { %1886 = vmatpush.bf16.msrb.mxu2 %v12200_v21  ;;  %1899 = vmatpush.bf16.msrb.mxu3 %v12201_v28  ;;  %v12224_v21 = vld [vmem:[#allocation13_spill] sm:$0xff] }
 0x48c   :  { %v214_v28 = vadd.f32 %v12224_v21, %v140_v18 }
 0x48e   :  { %1861 = vmatpush.bf16.msrb.mxu0 %v12202_v42  ;;  %1874 = vmatpush.bf16.msrb.mxu1 %v12203_v44  ;;  %v12225_v42 = vld [vmem:[#allocation14_spill] sm:$0xff] }
 0x48f   :  { %1887 = vmatpush.bf16.msrb.mxu2 %v12204_v32  ;;  %1900 = vmatpush.bf16.msrb.mxu3 %v12205_v37  ;;  %v215_v44 = vadd.f32 %v12225_v42, %v141_v41 }
 0x492   :  { %1862 = vmatpush.bf16.msrb.mxu0 %v12206_v34  ;;  %1875 = vmatpush.bf16.msrb.mxu1 %v12207_v50 }
 0x493   :  { %1888 = vmatpush.bf16.msrb.mxu2 %v12208_v25  ;;  %1901 = vmatpush.bf16.msrb.mxu3 %v12209_v2  ;;  %v12226_v25 = vld [vmem:[#allocation12_spill] sm:$0xff] }
 0x494   :  { %v142_v2 = vmul.f32 %v12226_v25, %v100_v0 }
 0x496   :  { %1863 = vmatpush.bf16.msrb.mxu0 %v12210_v57  ;;  %1876 = vmatpush.bf16.msrb.mxu1 %v12211_v54 }
 0x497   :  { %1889 = vmatpush.bf16.msrb.mxu2 %v12212_v61  ;;  %1902 = vmatpush.bf16.msrb.mxu3 %v12213_v8  ;;  %v12227_v61 = vld [vmem:[#allocation15_spill] sm:$0xff] }
 0x498   :  { %v216_v8 = vadd.f32 %v12227_v61, %v142_v2 }
 0x49a   :  { %1864 = vmatpush.bf16.msrb.mxu0 %v12214_v52  ;;  %1877 = vmatpush.bf16.msrb.mxu1 %v12215_v63 }
 0x49b   :  { %1890 = vmatpush.bf16.msrb.mxu2 %v12216_v10  ;;  %1903 = vmatpush.bf16.msrb.mxu3 %v12217_v62 }
 0x4d9   :  { %v9533_v58 = vpop.f32.mrf.mxu0  ;;  %v9535_v3 = vpop.f32.mrf.mxu1 }
 0x4da   :  { %12218 = vst [vmem:[#allocation21_spill] sm:$0xff] %v9533_v58 }
 0x4db   :  { %12219 = vst [vmem:[#allocation22_spill] sm:$0xff] %v9535_v3 }
 0x4e0   :  { %v9537_v30 = vpop.f32.mrf.mxu2  ;;  %v9539_v49 = vpop.f32.mrf.mxu3 }
 0x4e1   :  { %12220 = vst [vmem:[#allocation23_spill] sm:$0xff] %v9537_v30  ;;  %v1628_v4 = vpop.f32.mrf.mxu0  ;;  %v1641_v26 = vpop.f32.mrf.mxu1 }
 0x4e2   :  { %12221 = vst [vmem:[#allocation24_spill] sm:$0xff] %v9539_v49 }
 0x4e8   :  { %v1654_v20 = vpop.f32.mrf.mxu2  ;;  %v1667_v6 = vpop.f32.mrf.mxu3 }
 0x4e9   :  { %v1686_v32 = vpop.f32.mrf.mxu0  ;;  %v1699_v37 = vpop.f32.mrf.mxu1 }
 0x4ea   :  { %v1729_v34 = vadd.f32 %v1686_v32, %v214_v28  ;;  %v1730_v50 = vadd.f32 %v1699_v37, %v215_v44  ;;  %v12228_v28 = vld [vmem:[#allocation26_spill] sm:$0xff] }
 0x4eb   :  { %v143_v44 = vmul.f32 %v12228_v28, %v100_v0 }
 0x4ec   :  { %v7096_v57 = vmul.f32 -1.442695, %v1729_v34  ;;  %v7097_v54 = vmul.f32 -1.442695, %v1730_v50  ;;  %v12229_v50 = vld [vmem:[#allocation29_spill] sm:$0xff] }
 0x4ed   :  { %v217_v2 = vadd.f32 %v12229_v50, %v143_v44 }
 0x4ee   :  { %8195 = vpow2.f32 %v7096_v57 }
 0x4ef   :  { %8197 = vpow2.f32 %v7097_v54 }
 0x4f0   :  { %v1712_v52 = vpop.f32.mrf.mxu2  ;;  %v1725_v63 = vpop.f32.mrf.mxu3 }
 0x4f1   :  { %v1731_v10 = vadd.f32 %v1712_v52, %v216_v8  ;;  %v1688_v62 = vpop.f32.mrf.mxu0  ;;  %v1701_v4 = vpop.f32.mrf.mxu1  ;;  %v1732_v8 = vadd.f32 %v1725_v63, %v217_v2 }
 0x4f3   :  { %v7098_v26 = vmul.f32 -1.442695, %v1731_v10 }
 0x4f4   :  { %v8196_v18 = vpop.eup %8195 }
 0x4f5   :  { %v8198_v41 = vpop.eup %8197  ;;  %v1742_v20 = vadd.f32 1.0, %v8196_v18  ;;  %8199 = vpow2.f32 %v7098_v26 }
 0x4f6   :  { %v1743_v6 = vadd.f32 1.0, %v8198_v41 }
 0x4f7   :  { %8201 = vrcp.f32 %v1742_v20  ;;  %v1756_v26 = vand.u32 2147483648, %v1742_v20  ;;  %v1754_v49 = vand.u32 2147483647, %v1742_v20  ;;  %vm1750_vm2 = vweird.f32 %v1742_v20 }
 0x4f8   :  { %8203 = vrcp.f32 %v1743_v6  ;;  %v1714_v32 = vpop.f32.mrf.mxu2  ;;  %v1727_v37 = vpop.f32.mrf.mxu3  ;;  %v1771_v41 = vand.u32 2147483648, %v1743_v6  ;;  %vm1765_vm3 = vweird.f32 %v1743_v6 }
 0x4f9   :  { %v1769_v37 = vand.u32 2147483647, %v1743_v6  ;;  %vm1755_vm6 = vcmp.eq.f32.partialorder %v1754_v49, 8.507059e+37 }
 0x4fb   :  { %v8200_v34 = vpop.eup %8199  ;;  %vm1770_vm7 = vcmp.eq.f32.partialorder %v1769_v37, 8.507059e+37 }
 0x4fc   :  { %v1744_v57 = vadd.f32 1.0, %v8200_v34  ;;  %v1757_v34 = vor.u32 1.1754944e-38, %v1756_v26 }
 0x4fd   :  { %v8202_v54 = vpop.eup %8201 }
 0x4fe   :  { %v8204_v52 = vpop.eup %8203  ;;  %v1746_v62 = vmul.f32 %v8202_v54, %v1742_v20  ;;  %8205 = vrcp.f32 %v1744_v57  ;;  %vm1751_vm0 = vweird.f32 %v8202_v54  ;;  %v1786_v26 = vand.u32 2147483648, %v1744_v57 }
 0x4ff   :  { %v1761_v10 = vmul.f32 %v8204_v52, %v1743_v6  ;;  %8207 = vtanh.f32 %v1732_v8  ;;  %vm1766_vm1 = vweird.f32 %v8204_v52  ;;  %vm1752_vm4 = vmor %vm1750_vm2, %vm1751_vm0  ;;  %vm1780_vm9 = vweird.f32 %v1744_v57 }
 0x500   :  { %v1747_v4 = vsub.f32 1.0, %v1746_v62  ;;  %vm1767_vm5 = vmor %vm1765_vm3, %vm1766_vm1  ;;  %v1772_v62 = vor.u32 1.1754944e-38, %v1771_v41  ;;  %v1787_v41 = vor.u32 1.1754944e-38, %v1786_v26  ;;  %v7963_v26 = vld [vmem:[#allocation4 + $0x194] sm:$0xf0] }
 0x501   :  { %v1762_v18 = vsub.f32 1.0, %v1761_v10 }
 0x502   :  { %v1748_v0 = vmul.f32 %v8202_v54, %v1747_v4 }
 0x503   :  { %v1763_v32 = vmul.f32 %v8204_v52, %v1762_v18 }
 0x504   :  { %v8206_v30 = vpop.eup %8205  ;;  %v1749_v44 = vadd.f32 %v8202_v54, %v1748_v0 }
 0x505   :  { %v1776_v63 = vmul.f32 %v8206_v30, %v1744_v57  ;;  %v1764_v2 = vadd.f32 %v8204_v52, %v1763_v32  ;;  %v8208_v8 = vpop.eup %8207  ;;  %vm1781_vm8 = vweird.f32 %v8206_v30 }
 0x506   :  { %v1753_v10 = vsel %vm1752_vm4, %v8202_v54, %v1749_v44  ;;  %v1784_v54 = vand.u32 2147483647, %v1744_v57  ;;  %vm1782_vm10 = vmor %vm1780_vm9, %vm1781_vm8  ;;  %v7967_v57 = vld [vmem:[#allocation4 + $0x1b4] sm:$0xf0] }
 0x507   :  { %v1777_v3 = vsub.f32 1.0, %v1776_v63  ;;  %v1758_v4 = vsel %vm1755_vm6, %v1757_v34, %v1753_v10  ;;  %v1768_v58 = vsel %vm1767_vm5, %v8204_v52, %v1764_v2  ;;  %v7198_v10 = vld [vmem:[#allocation4 + $0x1b8] sm:$0xf0] }
 0x508   :  { %v1773_v18 = vsel %vm1770_vm7, %v1772_v62, %v1768_v58  ;;  %v1792_v50 = vmul.f32 %v8208_v8, %v1758_v4  ;;  %vm1785_vm11 = vcmp.eq.f32.partialorder %v1784_v54, 8.507059e+37  ;;  %v7965_v62 = vld [vmem:[#allocation4 + $0x1ac] sm:$0xf]  ;;  %v7172_v4 = vld [vmem:[#allocation4 + $0x180] sm:$0xf] }
 0x509   :  { %v1778_v28 = vmul.f32 %v8206_v30, %v1777_v3  ;;  %v1791_v0 = vmul.f32 %v1773_v18, %v9466_v33  ;;  %v7966_v33 = vld [vmem:[#allocation4 + $0x1ac] sm:$0xf0]  ;;  %v7964_v3 = vld [vmem:[#allocation4 + $0x1a4] sm:$0xf]  ;;  %v9630_v8 = vor.u32 %v7965_v62, %v7198_v10  ;;  %v7142_v62 = vld [vmem:[#allocation4 + $0x150] sm:$0xf0] }
 0x50a   :  { %v7962_v18 = vld [vmem:[#allocation4 + $0x18c] sm:$0xf0]  ;;  %v7148_v10 = vld [vmem:[#allocation4 + $0x148] sm:$0xf] }
 0x50b   :  { %v9550_v20 = vadd.f32 %v1792_v50, %v1791_v0  ;;  %v1779_v6 = vadd.f32 %v8206_v30, %v1778_v28  ;;  %v7190_v28 = vld [vmem:[#allocation4 + $0x1b0] sm:$0xf0]  ;;  %v7196_v50 = vld [vmem:[#allocation4 + $0x1a8] sm:$0xf] }
 0x50c   :  { %v9625_v34 = vor.u32 %v7964_v3, %v7190_v28  ;;  %v9627_v2 = vor.u32 %v7967_v57, %v7196_v50  ;;  %v7174_v0 = vld [vmem:[#allocation4 + $0x190] sm:$0xf0]  ;;  %v7140_v3 = vld [vmem:[#allocation4 + $0x140] sm:$0xf]  ;;  %v7954_v28 = vld [vmem:[#allocation4 + $0x14c] sm:$0xf0] }
 0x50d   :  { %8209 = vtanh.f32 %v9550_v20  ;;  %v1783_v49 = vsel %vm1782_vm10, %v8206_v30, %v1779_v6  ;;  %v7180_v6 = vld [vmem:[#allocation4 + $0x188] sm:$0xf] }
 0x50e   :  { %v1788_v32 = vsel %vm1785_vm11, %v1787_v41, %v1783_v49 }
 0x513   :  { %v8210_v52 = vpop.eup %8209 }
 0x514   :  { %v1795_v58 = vmul.f32 %v8210_v52, %v1788_v32 }
 0x516   :  { %v1796_v37 = vpack.c.bf16 %v1795_v58, %v1795_v58  ;;  %v9641_v58 = vor.u32 %v7963_v26, %v7180_v6  ;;  %v7150_v6 = vld [vmem:[#allocation4 + $0x158] sm:$0xf0] }
 0x518   :  { %1805 = vmatmul.bf16.vlgmr.msra.gmra.mxu0 %v1796_v37  ;;  %1818 = vmatmul.bf16.vlgmr.msra.gmra.mxu1 %v1796_v37 }
 0x519   :  { %1831 = vmatmul.bf16.vlgmr.msra.gmra.mxu2 %v1796_v37  ;;  %1844 = vmatmul.bf16.vlgmr.msra.gmra.mxu3 %v1796_v37 }
 0x51a   :  { %1977 = vmatpush.bf16.msra.mxu0 %v8716_v7  ;;  %1990 = vmatpush.bf16.msra.mxu1 %v8718_v11 }
 0x51b   :  { %2003 = vmatpush.bf16.msra.mxu2 %v8720_v12  ;;  %2016 = vmatpush.bf16.msra.mxu3 %v8723_v15  ;;  %v7220_v12 = vld [vmem:[#allocation4 + $0x1e0] sm:$0xf]  ;;  %v7974_v15 = vld [vmem:[#allocation4 + $0x1ec] sm:$0xf0] }
 0x51e   :  { %1978 = vmatpush.bf16.msra.mxu0 %v8728_v19  ;;  %1991 = vmatpush.bf16.msra.mxu1 %v8730_v23  ;;  %v7972_v19 = vld [vmem:[#allocation4 + $0x1e4] sm:$0xf]  ;;  %v9589_v23 = vor.u32 %v7974_v15, %v7220_v12  ;;  %v7182_v12 = vld [vmem:[#allocation4 + $0x198] sm:$0xf0] }
 0x51f   :  { %2004 = vmatpush.bf16.msra.mxu2 %v8732_v24  ;;  %2017 = vmatpush.bf16.msra.mxu3 %v8735_v27  ;;  %v7222_v24 = vld [vmem:[#allocation4 + $0x1f0] sm:$0xf0]  ;;  %v7228_v27 = vld [vmem:[#allocation4 + $0x1e8] sm:$0xf]  ;;  %v8601_v15 = vld [vmem:[%s11746_s4 + $0x4] sm:$0xf] }
 0x522   :  { %1979 = vmatpush.bf16.msra.mxu0 %v8740_v31  ;;  %1992 = vmatpush.bf16.msra.mxu1 %v8742_v35  ;;  %v7975_v31 = vld [vmem:[#allocation4 + $0x1f4] sm:$0xf0]  ;;  %v9591_v35 = vor.u32 %v7972_v19, %v7222_v24  ;;  %v9646_v19 = vperm.slane %v8601_v15, 2 }
 0x523   :  { %2005 = vmatpush.bf16.msra.mxu2 %v8744_v36  ;;  %2018 = vmatpush.bf16.msra.mxu3 %v8747_v39  ;;  %v9593_v36 = vor.u32 %v7975_v31, %v7228_v27  ;;  %v7973_v39 = vld [vmem:[#allocation4 + $0x1ec] sm:$0xf] }
 0x524   :  { %12234 = vst [vmem:[#allocation31_spill] sm:$0xff] %v9646_v19 }
 0x526   :  { %1980 = vmatpush.bf16.msra.mxu0 %v8752_v43  ;;  %1993 = vmatpush.bf16.msra.mxu1 %v8754_v47  ;;  %v7230_v43 = vld [vmem:[#allocation4 + $0x1f8] sm:$0xf0] }
 0x527   :  { %2006 = vmatpush.bf16.msra.mxu2 %v8756_v48  ;;  %2019 = vmatpush.bf16.msra.mxu3 %v8759_v51  ;;  %v9596_v47 = vor.u32 %v7973_v39, %v7230_v43  ;;  %v7204_v48 = vld [vmem:[#allocation4 + $0x1c0] sm:$0xf]  ;;  %v7970_v51 = vld [vmem:[#allocation4 + $0x1cc] sm:$0xf0] }
 0x528   :  { %1865 = vmatmul.bf16.vlgmr.msrb.gmra.mxu0 %v1796_v37  ;;  %1878 = vmatmul.bf16.vlgmr.msrb.gmra.mxu1 %v1796_v37  ;;  %v7156_v39 = vld [vmem:[#allocation4 + $0x160] sm:$0xf]  ;;  %v7958_v43 = vld [vmem:[#allocation4 + $0x16c] sm:$0xf0] }
 0x529   :  { %1891 = vmatmul.bf16.vlgmr.msrb.gmra.mxu2 %v1796_v37  ;;  %1904 = vmatmul.bf16.vlgmr.msrb.gmra.mxu3 %v1796_v37  ;;  %v7961_v37 = vld [vmem:[#allocation4 + $0x18c] sm:$0xf] }
 0x52a   :  { %1981 = vmatpush.bf16.msra.mxu0 %v8764_v55  ;;  %1994 = vmatpush.bf16.msra.mxu1 %v8766_v59  ;;  %v7968_v55 = vld [vmem:[#allocation4 + $0x1c4] sm:$0xf]  ;;  %v9600_v59 = vpop.permute.xlu1 %104  ;;  %v9649_v31 = vor.u32 %v7961_v37, %v7182_v12  ;;  %v7950_v37 = vld [vmem:[#allocation4 + $0x12c] sm:$0xf0] }
 0x52b   :  { %2007 = vmatpush.bf16.msra.mxu2 %v8768_v60  ;;  %2020 = vmatpush.bf16.msra.mxu3 %v8781_v1  ;;  %v9603_v60 = vor.u32 %v7970_v51, %v7204_v48  ;;  %v7206_v1 = vld [vmem:[#allocation4 + $0x1d0] sm:$0xf0]  ;;  %v144_v44 = vmul.f32 %v12222_v46, %v9600_v59  ;;  %v145_v63 = vmul.f32 %v12223_v53, %v9600_v59  ;;  %v7960_v46 = vld [vmem:[#allocation4 + $0x184] sm:$0xf] }
 0x52c   :  { %v9635_v53 = vor.u32 %v7962_v18, %v7172_v4  ;;  %v9639_v32 = vor.u32 %v7960_v46, %v7174_v0  ;;  %v7956_v48 = vld [vmem:[#allocation4 + $0x164] sm:$0xf]  ;;  %v146_v51 = vmul.f32 %v12226_v25, %v9600_v59  ;;  %v7955_v46 = vld [vmem:[#allocation4 + $0x154] sm:$0xf0]  ;;  %v7953_v0 = vld [vmem:[#allocation4 + $0x14c] sm:$0xf] }
 0x52d   :  { %v218_v41 = vadd.f32 %v12224_v21, %v144_v44  ;;  %v219_v52 = vadd.f32 %v12225_v42, %v145_v63  ;;  %v12235_v25 = vld [vmem:[#allocation18_spill] sm:$0xff]  ;;  %v9669_v44 = vor.u32 %v7954_v28, %v7140_v3 }
 0x52e   :  { %1982 = vmatpush.bf16.msra.mxu0 %v8786_v5  ;;  %1995 = vmatpush.bf16.msra.mxu1 %v8791_v13  ;;  %v7212_v5 = vld [vmem:[#allocation4 + $0x1c8] sm:$0xf]  ;;  %v7971_v13 = vld [vmem:[#allocation4 + $0x1d4] sm:$0xf0]  ;;  %v593_v50 = vadd.f32 %v12235_v25, %v9646_v19  ;;  %v7952_v63 = vld [vmem:[#allocation4 + $0x144] sm:$0xf]  ;;  %v220_v4 = vadd.f32 %v12227_v61, %v146_v51 }
 0x52f   :  { %2008 = vmatpush.bf16.msra.mxu2 %v8793_v14  ;;  %2021 = vmatpush.bf16.msra.mxu3 %v8805_v22  ;;  %v9672_v18 = vor.u32 %v7952_v63, %v7142_v62  ;;  %v7948_v12 = vld [vmem:[#allocation4 + $0x124] sm:$0xf]  ;;  %v7108_v28 = vld [vmem:[#allocation4 + $0x100] sm:$0xf]  ;;  %v7946_v25 = vld [vmem:[#allocation4 + $0x10c] sm:$0xf0] }
 0x530   :  { %v7944_v62 = vld [vmem:[#allocation4 + $0x104] sm:$0xf] }
 0x532   :  { %1983 = vmatpush.bf16.msra.mxu0 %v8810_v29  ;;  %1996 = vmatpush.bf16.msra.mxu1 %v8818_v38  ;;  %v9609_v29 = vor.u32 %v7968_v55, %v7206_v1  ;;  %v9611_v38 = vor.u32 %v7971_v13, %v7212_v5  ;;  %v9656_v55 = vor.u32 %v7958_v43, %v7156_v39  ;;  %v7158_v1 = vld [vmem:[#allocation4 + $0x170] sm:$0xf0]  ;;  %v7164_v5 = vld [vmem:[#allocation4 + $0x168] sm:$0xf]  ;;  %v7959_v13 = vld [vmem:[#allocation4 + $0x174] sm:$0xf0] }
 0x533   :  { %2009 = vmatpush.bf16.msra.mxu2 %v8820_v40  ;;  %2022 = vmatpush.bf16.msra.mxu3 %v8825_v45  ;;  %v7969_v40 = vld [vmem:[#allocation4 + $0x1cc] sm:$0xf]  ;;  %v7214_v45 = vld [vmem:[#allocation4 + $0x1d8] sm:$0xf0]  ;;  %v7951_v39 = vld [vmem:[#allocation4 + $0x134] sm:$0xf0] }
 0x534   :  { %v7105_v43 = vmul.f32 -1.442695, %v593_v50  ;;  %v12236_v50 = vld [vmem:[#allocation26_spill] sm:$0xff] }
 0x535   :  { %v147_v63 = vmul.f32 %v12236_v50, %v9600_v59  ;;  %v7118_v59 = vld [vmem:[#allocation4 + $0x118] sm:$0xf0] }
 0x536   :  { %1984 = vmatpush.bf16.msra.mxu0 %v8836_v56  ;;  %1997 = vmatpush.bf16.msra.mxu1 %v8842_v9 }
 0x537   :  { %2010 = vmatpush.bf16.msra.mxu2 %v8844_v16  ;;  %2023 = vmatpush.bf16.msra.mxu3 %v8846_v17  ;;  %v9614_v16 = vor.u32 %v7969_v40, %v7214_v45  ;;  %v7188_v17 = vld [vmem:[#allocation4 + $0x1a0] sm:$0xf] }
 0x538   :  { %v9619_v30 = vor.u32 %v7966_v33, %v7188_v17  ;;  %v7957_v17 = vld [vmem:[#allocation4 + $0x16c] sm:$0xf]  ;;  %v7166_v33 = vld [vmem:[#allocation4 + $0x178] sm:$0xf0] }
 0x539   :  { %v9667_v57 = vor.u32 %v7957_v17, %v7166_v33 }
 0x53a   :  { %2338 = vmatpush.bf16.msrb.mxu0 %v9589_v23  ;;  %2351 = vmatpush.bf16.msrb.mxu1 %v9591_v35 }
 0x53b   :  { %2364 = vmatpush.bf16.msrb.mxu2 %v9593_v36  ;;  %2377 = vmatpush.bf16.msrb.mxu3 %v9596_v47 }
 0x53e   :  { %2339 = vmatpush.bf16.msrb.mxu0 %v9603_v60  ;;  %2352 = vmatpush.bf16.msrb.mxu1 %v9609_v29 }
 0x53f   :  { %2365 = vmatpush.bf16.msrb.mxu2 %v9611_v38  ;;  %2378 = vmatpush.bf16.msrb.mxu3 %v9614_v16 }
 0x542   :  { %2340 = vmatpush.bf16.msrb.mxu0 %v9619_v30  ;;  %2353 = vmatpush.bf16.msrb.mxu1 %v9625_v34 }
 0x543   :  { %2366 = vmatpush.bf16.msrb.mxu2 %v9627_v2  ;;  %2379 = vmatpush.bf16.msrb.mxu3 %v9630_v8 }
 0x546   :  { %2341 = vmatpush.bf16.msrb.mxu0 %v9635_v53  ;;  %2354 = vmatpush.bf16.msrb.mxu1 %v9639_v32 }
 0x547   :  { %2367 = vmatpush.bf16.msrb.mxu2 %v9641_v58  ;;  %2380 = vmatpush.bf16.msrb.mxu3 %v9649_v31 }
 0x54a   :  { %2342 = vmatpush.bf16.msrb.mxu0 %v9656_v55 }
 0x54b   :  { %2381 = vmatpush.bf16.msrb.mxu3 %v9667_v57 }
 0x54e   :  { %2343 = vmatpush.bf16.msrb.mxu0 %v9669_v44 }
 0x595   :  { %v9585_v7 = vpop.f32.mrf.mxu0  ;;  %v9587_v11 = vpop.f32.mrf.mxu1 }
 0x596   :  { %12230 = vst [vmem:[#allocation25_spill] sm:$0xff] %v9585_v7  ;;  %v7931_v7 = vld [vmem:[#allocation6 + $0x194] sm:$0xf0] }
 0x597   :  { %12231 = vst [vmem:[#allocation27_spill] sm:$0xff] %v9587_v11 }
 0x59c   :  { %v9605_v14 = vpop.f32.mrf.mxu2  ;;  %v9607_v22 = vpop.f32.mrf.mxu3 }
 0x59d   :  { %12232 = vst [vmem:[#allocation28_spill] sm:$0xff] %v9605_v14  ;;  %v1808_v56 = vpop.f32.mrf.mxu0  ;;  %v1821_v9 = vpop.f32.mrf.mxu1  ;;  %v7930_v14 = vld [vmem:[#allocation6 + $0x18c] sm:$0xf0] }
 0x59e   :  { %12233 = vst [vmem:[#allocation30_spill] sm:$0xff] %v9607_v22  ;;  %v9658_v56 = vor.u32 %v7956_v48, %v7158_v1  ;;  %v9660_v9 = vor.u32 %v7959_v13, %v7164_v5  ;;  %v7949_v1 = vld [vmem:[#allocation4 + $0x12c] sm:$0xf]  ;;  %v7134_v5 = vld [vmem:[#allocation4 + $0x138] sm:$0xf0] }
 0x59f   :  { %v7935_v22 = vld [vmem:[#allocation6 + $0x1b4] sm:$0xf0] }
 0x5a0   :  { %2355 = vmatpush.bf16.msrb.mxu1 %v9658_v56  ;;  %2368 = vmatpush.bf16.msrb.mxu2 %v9660_v9 }
 0x5a4   :  { %v1834_v54 = vpop.f32.mrf.mxu2  ;;  %v1847_v49 = vpop.f32.mrf.mxu3  ;;  %2356 = vmatpush.bf16.msrb.mxu1 %v9672_v18 }
 0x5a5   :  { %v1866_v24 = vpop.f32.mrf.mxu0  ;;  %v1879_v27 = vpop.f32.mrf.mxu1  ;;  %v9675_v49 = vor.u32 %v7955_v46, %v7148_v10  ;;  %v7110_v46 = vld [vmem:[#allocation4 + $0x110] sm:$0xf0] }
 0x5a6   :  { %v1909_v21 = vadd.f32 %v1866_v24, %v218_v41  ;;  %v1910_v42 = vadd.f32 %v1879_v27, %v219_v52  ;;  %v9677_v41 = vor.u32 %v7953_v0, %v7150_v6  ;;  %v7124_v52 = vld [vmem:[#allocation4 + $0x120] sm:$0xf]  ;;  %v9703_v0 = vor.u32 %v7946_v25, %v7108_v28 }
 0x5a7   :  { %v9680_v61 = vor.u32 %v7950_v37, %v7124_v52  ;;  %2369 = vmatpush.bf16.msrb.mxu2 %v9675_v49  ;;  %v9705_v6 = vor.u32 %v7944_v62, %v7110_v46  ;;  %v7947_v52 = vld [vmem:[#allocation4 + $0x114] sm:$0xf0] }
 0x5a8   :  { %v7099_v40 = vmul.f32 -1.442695, %v1909_v21  ;;  %v7100_v45 = vmul.f32 -1.442695, %v1910_v42  ;;  %v7126_v21 = vld [vmem:[#allocation4 + $0x130] sm:$0xf0]  ;;  %2382 = vmatpush.bf16.msrb.mxu3 %v9677_v41 }
 0x5a9   :  { %v7132_v42 = vld [vmem:[#allocation4 + $0x128] sm:$0xf]  ;;  %v9684_v48 = vor.u32 %v7948_v12, %v7126_v21  ;;  %2344 = vmatpush.bf16.msrb.mxu0 %v9680_v61  ;;  %v7945_v12 = vld [vmem:[#allocation4 + $0x10c] sm:$0xf] }
 0x5aa   :  { %8211 = vpow2.f32 %v7099_v40  ;;  %v9686_v51 = vor.u32 %v7951_v39, %v7132_v42  ;;  %v9712_v21 = vor.u32 %v7945_v12, %v7118_v59 }
 0x5ab   :  { %8213 = vpow2.f32 %v7100_v45  ;;  %v9689_v45 = vor.u32 %v7949_v1, %v7134_v5  ;;  %2357 = vmatpush.bf16.msrb.mxu1 %v9684_v48 }
 0x5ac   :  { %v1892_v26 = vpop.f32.mrf.mxu2  ;;  %v1905_v54 = vpop.f32.mrf.mxu3  ;;  %2370 = vmatpush.bf16.msrb.mxu2 %v9686_v51 }
 0x5ad   :  { %v1911_v15 = vadd.f32 %v1892_v26, %v220_v4  ;;  %v1868_v24 = vpop.f32.mrf.mxu0  ;;  %v1881_v27 = vpop.f32.mrf.mxu1  ;;  %2383 = vmatpush.bf16.msrb.mxu3 %v9689_v45  ;;  %v7116_v26 = vld [vmem:[#allocation4 + $0x108] sm:$0xf]  ;;  %2345 = vmatpush.bf16.msrb.mxu0 %v9703_v0 }
 0x5ae   :  { %v9707_v37 = vor.u32 %v7947_v52, %v7116_v26  ;;  %v12237_v24 = vld [vmem:[#allocation29_spill] sm:$0xff] }
 0x5af   :  { %v7101_v13 = vmul.f32 -1.442695, %v1911_v15  ;;  %v221_v27 = vadd.f32 %v12237_v24, %v147_v63  ;;  %2358 = vmatpush.bf16.msrb.mxu1 %v9705_v6 }
 0x5b0   :  { %v8212_v40 = vpop.eup %8211  ;;  %2371 = vmatpush.bf16.msrb.mxu2 %v9707_v37 }
 0x5b1   :  { %v8214_v17 = vpop.eup %8213  ;;  %v9691_v33 = vadd.f32 1.0, %v8212_v40  ;;  %8215 = vpow2.f32 %v7101_v13  ;;  %v1912_v1 = vadd.f32 %v1905_v54, %v221_v27  ;;  %2384 = vmatpush.bf16.msrb.mxu3 %v9712_v21 }
 0x5b2   :  { %8217 = vpow2.f32 %v7105_v43  ;;  %v9694_v3 = vadd.f32 1.0, %v8214_v17 }
 0x5b3   :  { %8219 = vrcp.f32 %v9691_v33  ;;  %v1936_v50 = vand.u32 2147483648, %v9691_v33  ;;  %v1934_v54 = vand.u32 2147483647, %v9691_v33  ;;  %vm1930_vm14 = vweird.f32 %v9691_v33 }
 0x5b4   :  { %8221 = vrcp.f32 %v9694_v3  ;;  %v1894_v10 = vpop.f32.mrf.mxu2  ;;  %v1907_v4 = vpop.f32.mrf.mxu3  ;;  %v1951_v63 = vand.u32 2147483648, %v9694_v3  ;;  %vm1945_vm15 = vweird.f32 %v9694_v3 }
 0x5b5   :  { %v1949_v4 = vand.u32 2147483647, %v9694_v3  ;;  %v1937_v12 = vor.u32 1.1754944e-38, %v1936_v50  ;;  %vm1935_vm2 = vcmp.eq.f32.partialorder %v1934_v54, 8.507059e+37 }
 0x5b7   :  { %v8216_v15 = vpop.eup %8215  ;;  %vm1950_vm3 = vcmp.eq.f32.partialorder %v1949_v4, 8.507059e+37 }
 0x5b8   :  { %v8218_v42 = vpop.eup %8217  ;;  %v1924_v39 = vadd.f32 1.0, %v8216_v15  ;;  %v1952_v15 = vor.u32 1.1754944e-38, %v1951_v63 }
 0x5b9   :  { %v8220_v43 = vpop.eup %8219  ;;  %v9718_v17 = vadd.f32 1.0, %v8218_v42 }
 0x5ba   :  { %v8222_v5 = vpop.eup %8221  ;;  %v1926_v13 = vmul.f32 %v8220_v43, %v9691_v33  ;;  %8223 = vrcp.f32 %v1924_v39  ;;  %vm1931_vm12 = vweird.f32 %v8220_v43  ;;  %vm1960_vm5 = vweird.f32 %v1924_v39 }
 0x5bb   :  { %v1941_v40 = vmul.f32 %v8222_v5, %v9694_v3  ;;  %8225 = vtanh.f32 %v1912_v1  ;;  %vm1946_vm13 = vweird.f32 %v8222_v5  ;;  %vm1932_vm0 = vmor %vm1930_vm14, %vm1931_vm12  ;;  %v1964_v63 = vand.u32 2147483647, %v1924_v39 }
 0x5bc   :  { %v1927_v28 = vsub.f32 1.0, %v1926_v13  ;;  %8227 = vrcp.f32 %v9718_v17  ;;  %vm1947_vm1 = vmor %vm1945_vm15, %vm1946_vm13  ;;  %vm2161_vm9 = vweird.f32 %v9718_v17 }
 0x5bd   :  { %v1942_v25 = vsub.f32 1.0, %v1941_v40  ;;  %vm1965_vm7 = vcmp.eq.f32.partialorder %v1964_v63, 8.507059e+37  ;;  %v7340_v63 = vld [vmem:[#allocation6 + $0x1c8] sm:$0xf] }
 0x5be   :  { %v1928_v62 = vmul.f32 %v8220_v43, %v1927_v28 }
 0x5bf   :  { %v1943_v10 = vmul.f32 %v8222_v5, %v1942_v25 }
 0x5c0   :  { %v8224_v46 = vpop.eup %8223  ;;  %v1929_v26 = vadd.f32 %v8220_v43, %v1928_v62 }
 0x5c1   :  { %v1956_v52 = vmul.f32 %v8224_v46, %v1924_v39  ;;  %v1944_v59 = vadd.f32 %v8222_v5, %v1943_v10  ;;  %v8226_v27 = vpop.eup %8225  ;;  %vm1961_vm4 = vweird.f32 %v8224_v46  ;;  %v1966_v10 = vand.u32 2147483648, %v1924_v39 }
 0x5c2   :  { %v1933_v24 = vsel %vm1932_vm0, %v8220_v43, %v1929_v26  ;;  %v9728_v62 = vpop.eup %8227  ;;  %vm1962_vm6 = vmor %vm1960_vm5, %vm1961_vm4  ;;  %v7348_v26 = vld [vmem:[#allocation6 + $0x1e0] sm:$0xf] }
 0x5c3   :  { %v1957_v42 = vsub.f32 1.0, %v1956_v52  ;;  %v1938_v1 = vsel %vm1935_vm2, %v1937_v12, %v1933_v24  ;;  %v1948_v13 = vsel %vm1947_vm1, %v8222_v5, %v1944_v59  ;;  %v2157_v43 = vmul.f32 %v9728_v62, %v9718_v17  ;;  %v7942_v52 = vld [vmem:[#allocation6 + $0x1ec] sm:$0xf0]  ;;  %v7940_v59 = vld [vmem:[#allocation6 + $0x1e4] sm:$0xf] }
 0x5c4   :  { %v1953_v40 = vsel %vm1950_vm3, %v1952_v15, %v1948_v13  ;;  %v1972_v28 = vmul.f32 %v8226_v27, %v1938_v1  ;;  %v1967_v54 = vor.u32 1.1754944e-38, %v1966_v10  ;;  %v7350_v15 = vld [vmem:[#allocation6 + $0x1f0] sm:$0xf0]  ;;  %v7356_v24 = vld [vmem:[#allocation6 + $0x1e8] sm:$0xf]  ;;  %v9733_v39 = vor.u32 %v7942_v52, %v7348_v26  ;;  %v12238_v52 = vld [vmem:[#allocation50_spill] sm:$0xff] }
 0x5c5   :  { %v1958_v25 = vmul.f32 %v8224_v46, %v1957_v42  ;;  %v1971_v33 = vmul.f32 %v1953_v40, %v9550_v20  ;;  %v2158_v4 = vsub.f32 1.0, %v2157_v43  ;;  %v7943_v42 = vld [vmem:[#allocation6 + $0x1f4] sm:$0xf0]  ;;  %v7941_v1 = vld [vmem:[#allocation6 + $0x1ec] sm:$0xf]  ;;  %v2167_v26 = vand.u32 2147483648, %v9718_v17 }
 0x5c6   :  { %v7358_v13 = vld [vmem:[#allocation6 + $0x1f8] sm:$0xf0]  ;;  %v7936_v10 = vld [vmem:[#allocation6 + $0x1c4] sm:$0xf]  ;;  %v7334_v43 = vld [vmem:[#allocation6 + $0x1d0] sm:$0xf0]  ;;  %vm2162_vm8 = vweird.f32 %v9728_v62 }
 0x5c7   :  { %v1973_v3 = vadd.f32 %v1972_v28, %v1971_v33  ;;  %v1959_v50 = vadd.f32 %v8224_v46, %v1958_v25  ;;  %v2159_v40 = vmul.f32 %v9728_v62, %v2158_v4  ;;  %v7332_v25 = vld [vmem:[#allocation6 + $0x1c0] sm:$0xf]  ;;  %v7938_v33 = vld [vmem:[#allocation6 + $0x1cc] sm:$0xf0]  ;;  %v2165_v4 = vand.u32 2147483647, %v9718_v17  ;;  %vm9761_vm10 = vmor %vm2161_vm9, %vm2162_vm8 }
 0x5c9   :  { %8229 = vtanh.f32 %v1973_v3  ;;  %v1963_v5 = vsel %vm1962_vm6, %v8224_v46, %v1959_v50  ;;  %v9735_v46 = vor.u32 %v7940_v59, %v7350_v15  ;;  %v9737_v3 = vor.u32 %v7943_v42, %v7356_v24  ;;  %v7316_v24 = vld [vmem:[#allocation6 + $0x1a0] sm:$0xf] }
 0x5ca   :  { %v1968_v12 = vsel %vm1965_vm7, %v1967_v54, %v1963_v5  ;;  %v9739_v50 = vor.u32 %v7941_v1, %v7358_v13  ;;  %v7939_v5 = vld [vmem:[#allocation6 + $0x1d4] sm:$0xf0]  ;;  %v7937_v54 = vld [vmem:[#allocation6 + $0x1cc] sm:$0xf]  ;;  %8231 = vtanh.f32 %v12238_v52  ;;  %v9748_v59 = vor.u32 %v7938_v33, %v7332_v25  ;;  %v7932_v13 = vld [vmem:[#allocation6 + $0x1a4] sm:$0xf] }
 0x5cb   :  { %v9750_v15 = vor.u32 %v7936_v10, %v7334_v43  ;;  %v9754_v42 = vor.u32 %v7939_v5, %v7340_v63  ;;  %v7933_v25 = vld [vmem:[#allocation6 + $0x1ac] sm:$0xf]  ;;  %v7326_v33 = vld [vmem:[#allocation6 + $0x1b8] sm:$0xf0]  ;;  %vm9765_vm11 = vcmp.eq.f32.partialorder %v2165_v4, 8.507059e+37  ;;  %v2168_v5 = vor.u32 1.1754944e-38, %v2167_v26 }
 0x5cc   :  { %v9782_v10 = vor.u32 %v7933_v25, %v7326_v33  ;;  %v7302_v26 = vld [vmem:[#allocation6 + $0x190] sm:$0xf0]  ;;  %v7929_v52 = vld [vmem:[#allocation6 + $0x18c] sm:$0xf]  ;;  %v7926_v25 = vld [vmem:[#allocation6 + $0x16c] sm:$0xf0] }
 0x5cd   :  { %12239 = vst [vmem:[#allocation32_spill] sm:$0xff] %v9750_v15  ;;  %v7924_v43 = vld [vmem:[#allocation6 + $0x164] sm:$0xf] }
 0x5ce   :  { %12240 = vst [vmem:[#allocation33_spill] sm:$0xff] %v9754_v42 }
 0x5cf   :  { %v8230_v20 = vpop.eup %8229  ;;  %12249 = vst [vmem:[#allocation38_spill] sm:$0xff] %v9782_v10 }
 0x5d0   :  { %v1975_v27 = vmul.f32 %v8230_v20, %v1968_v12  ;;  %v7342_v20 = vld [vmem:[#allocation6 + $0x1d8] sm:$0xf0]  ;;  %v2160_v12 = vadd.f32 %v9728_v62, %v2159_v40  ;;  %v7318_v40 = vld [vmem:[#allocation6 + $0x1b0] sm:$0xf0]  ;;  %v8232_v11 = vpop.eup %8231 }
 0x5d1   :  { %v9756_v1 = vor.u32 %v7937_v54, %v7342_v20  ;;  %v9776_v54 = vor.u32 %v7932_v13, %v7318_v40  ;;  %v7300_v20 = vld [vmem:[#allocation6 + $0x180] sm:$0xf] }
 0x5d2   :  { %v1976_v28 = vpack.c.bf16 %v1975_v27, %v1975_v27  ;;  %v7934_v27 = vld [vmem:[#allocation6 + $0x1ac] sm:$0xf0]  ;;  %v2164_v63 = vsel %vm9761_vm10, %v9728_v62, %v2160_v12  ;;  %v7928_v62 = vld [vmem:[#allocation6 + $0x184] sm:$0xf]  ;;  %v7308_v12 = vld [vmem:[#allocation6 + $0x188] sm:$0xf]  ;;  %v9788_v40 = vor.u32 %v7930_v14, %v7300_v20 }
 0x5d3   :  { %12241 = vst [vmem:[#allocation34_spill] sm:$0xff] %v9756_v1  ;;  %v9774_v17 = vor.u32 %v7934_v27, %v7316_v24  ;;  %v7310_v24 = vld [vmem:[#allocation6 + $0x198] sm:$0xf0]  ;;  %v2169_v27 = vsel %vm9765_vm11, %v2168_v5, %v2164_v63  ;;  %v9794_v33 = vor.u32 %v7931_v7, %v7308_v12  ;;  %v7292_v63 = vld [vmem:[#allocation6 + $0x168] sm:$0xf] }
 0x5d4   :  { %1985 = vmatmul.bf16.vlgmr.msra.gmra.mxu0 %v1976_v28  ;;  %1998 = vmatmul.bf16.vlgmr.msra.gmra.mxu1 %v1976_v28  ;;  %12247 = vst [vmem:[#allocation36_spill] sm:$0xff] %v9776_v54  ;;  %v2176_v13 = vmul.f32 %v8232_v11, %v2169_v27  ;;  %v9796_v19 = vor.u32 %v7929_v52, %v7310_v24  ;;  %v7286_v11 = vld [vmem:[#allocation6 + $0x170] sm:$0xf0]  ;;  %v7927_v5 = vld [vmem:[#allocation6 + $0x174] sm:$0xf0] }
 0x5d5   :  { %2011 = vmatmul.bf16.vlgmr.msra.gmra.mxu2 %v1976_v28  ;;  %2024 = vmatmul.bf16.vlgmr.msra.gmra.mxu3 %v1976_v28  ;;  %v7324_v28 = vld [vmem:[#allocation6 + $0x1a8] sm:$0xf]  ;;  %12246 = vst [vmem:[#allocation35_spill] sm:$0xff] %v9774_v17  ;;  %v7925_v27 = vld [vmem:[#allocation6 + $0x16c] sm:$0xf]  ;;  %v9808_v52 = vor.u32 %v7927_v5, %v7292_v63 }
 0x5d6   :  { %2558 = vmatpush.bf16.msra.mxu0 %v9733_v39  ;;  %2571 = vmatpush.bf16.msra.mxu1 %v9735_v46  ;;  %v9780_v4 = vor.u32 %v7935_v22, %v7324_v28  ;;  %12250 = vst [vmem:[#allocation39_spill] sm:$0xff] %v9788_v40  ;;  %v9790_v22 = vor.u32 %v7928_v62, %v7302_v26  ;;  %v7284_v28 = vld [vmem:[#allocation6 + $0x160] sm:$0xf]  ;;  %v7922_v26 = vld [vmem:[#allocation6 + $0x14c] sm:$0xf0] }
 0x5d7   :  { %2584 = vmatpush.bf16.msra.mxu2 %v9737_v3  ;;  %2597 = vmatpush.bf16.msra.mxu3 %v9739_v50  ;;  %12252 = vst [vmem:[#allocation41_spill] sm:$0xff] %v9794_v33  ;;  %v9798_v14 = vpack.c.bf16 %v2176_v13, %v2176_v13  ;;  %v9802_v20 = vor.u32 %v7926_v25, %v7284_v28  ;;  %v7268_v7 = vld [vmem:[#allocation6 + $0x140] sm:$0xf]  ;;  %v7920_v24 = vld [vmem:[#allocation6 + $0x144] sm:$0xf] }
 0x5d8   :  { %12248 = vst [vmem:[#allocation37_spill] sm:$0xff] %v9780_v4  ;;  %v9804_v62 = vor.u32 %v7924_v43, %v7286_v11  ;;  %v7270_v13 = vld [vmem:[#allocation6 + $0x150] sm:$0xf0]  ;;  %v7923_v28 = vld [vmem:[#allocation6 + $0x154] sm:$0xf0] }
 0x5d9   :  { %12251 = vst [vmem:[#allocation40_spill] sm:$0xff] %v9790_v22  ;;  %v7921_v25 = vld [vmem:[#allocation6 + $0x14c] sm:$0xf]  ;;  %v7278_v43 = vld [vmem:[#allocation6 + $0x158] sm:$0xf0]  ;;  %v9820_v11 = vor.u32 %v7920_v24, %v7270_v13 }
 0x5da   :  { %2559 = vmatpush.bf16.msra.mxu0 %v9748_v59  ;;  %2572 = vmatpush.bf16.msra.mxu1 %v9750_v15  ;;  %12253 = vst [vmem:[#allocation42_spill] sm:$0xff] %v9796_v19  ;;  %v7252_v63 = vld [vmem:[#allocation6 + $0x120] sm:$0xf]  ;;  %v7918_v5 = vld [vmem:[#allocation6 + $0x12c] sm:$0xf0] }
 0x5db   :  { %2585 = vmatpush.bf16.msra.mxu2 %v9754_v42  ;;  %2598 = vmatpush.bf16.msra.mxu3 %v9756_v1  ;;  %12254 = vst [vmem:[#allocation43_spill] sm:$0xff] %v9802_v20  ;;  %v7236_v24 = vld [vmem:[#allocation6 + $0x100] sm:$0xf]  ;;  %v7914_v13 = vld [vmem:[#allocation6 + $0x10c] sm:$0xf0] }
 0x5dc   :  { %12255 = vst [vmem:[#allocation44_spill] sm:$0xff] %v9804_v62 }
 0x5dd   :  { %12256 = vst [vmem:[#allocation45_spill] sm:$0xff] %v9808_v52 }
 0x5de   :  { %2560 = vmatpush.bf16.msra.mxu0 %v9774_v17  ;;  %2573 = vmatpush.bf16.msra.mxu1 %v9776_v54  ;;  %v7294_v54 = vld [vmem:[#allocation6 + $0x178] sm:$0xf0]  ;;  %12259 = vst [vmem:[#allocation48_spill] sm:$0xff] %v9820_v11 }
 0x5df   :  { %2586 = vmatpush.bf16.msra.mxu2 %v9780_v4  ;;  %2599 = vmatpush.bf16.msra.mxu3 %v9782_v10  ;;  %v9810_v12 = vor.u32 %v7925_v27, %v7294_v54  ;;  %v7276_v10 = vld [vmem:[#allocation6 + $0x148] sm:$0xf]  ;;  %v9818_v54 = vor.u32 %v7922_v26, %v7268_v7  ;;  %v7917_v4 = vld [vmem:[#allocation6 + $0x12c] sm:$0xf]  ;;  %v9830_v7 = vor.u32 %v7918_v5, %v7252_v63 }
 0x5e0   :  { %v9824_v27 = vor.u32 %v7923_v28, %v7276_v10 }
 0x5e1   :  { %12257 = vst [vmem:[#allocation46_spill] sm:$0xff] %v9810_v12 }
 0x5e2   :  { %2561 = vmatpush.bf16.msra.mxu0 %v9788_v40  ;;  %2574 = vmatpush.bf16.msra.mxu1 %v9790_v22  ;;  %12258 = vst [vmem:[#allocation47_spill] sm:$0xff] %v9818_v54  ;;  %v7254_v22 = vld [vmem:[#allocation6 + $0x130] sm:$0xf0]  ;;  %v7260_v40 = vld [vmem:[#allocation6 + $0x128] sm:$0xf] }
 0x5e3   :  { %2587 = vmatpush.bf16.msra.mxu2 %v9794_v33  ;;  %2600 = vmatpush.bf16.msra.mxu3 %v9796_v19  ;;  %12260 = vst [vmem:[#allocation10_spill] sm:$0xff] %v9824_v27  ;;  %v9826_v19 = vor.u32 %v7921_v25, %v7278_v43  ;;  %v7916_v33 = vld [vmem:[#allocation6 + $0x124] sm:$0xf]  ;;  %v7238_v43 = vld [vmem:[#allocation6 + $0x110] sm:$0xf0]  ;;  %v12277_v63 = vld [vmem:[#allocation43_spill] sm:$0xff] }
 0x5e4   :  { %2346 = vmatmul.bf16.vlgmr.msrb.gmra.mxu0 %v9798_v14  ;;  %2359 = vmatmul.bf16.vlgmr.msrb.gmra.mxu1 %v9798_v14  ;;  %12262 = vst [vmem:[#allocation13_spill] sm:$0xff] %v9830_v7  ;;  %v9832_v26 = vor.u32 %v7916_v33, %v7254_v22  ;;  %v7912_v25 = vld [vmem:[#allocation6 + $0x104] sm:$0xf]  ;;  %v9842_v22 = vor.u32 %v7914_v13, %v7236_v24  ;;  %v12278_v5 = vld [vmem:[#allocation44_spill] sm:$0xff]  ;;  %v12279_v24 = vld [vmem:[#allocation45_spill] sm:$0xff] }
 0x5e5   :  { %2372 = vmatmul.bf16.vlgmr.msrb.gmra.mxu2 %v9798_v14  ;;  %2385 = vmatmul.bf16.vlgmr.msrb.gmra.mxu3 %v9798_v14  ;;  %12261 = vst [vmem:[#allocation11_spill] sm:$0xff] %v9826_v19  ;;  %v9844_v33 = vor.u32 %v7912_v25, %v7238_v43  ;;  %v12282_v43 = vld [vmem:[#allocation48_spill] sm:$0xff] }
 0x5e6   :  { %2562 = vmatpush.bf16.msra.mxu0 %v9802_v20  ;;  %2575 = vmatpush.bf16.msra.mxu1 %v9804_v62  ;;  %v7919_v20 = vld [vmem:[#allocation6 + $0x134] sm:$0xf0]  ;;  %v7262_v62 = vld [vmem:[#allocation6 + $0x138] sm:$0xf0]  ;;  %12263 = vst [vmem:[#allocation14_spill] sm:$0xff] %v9832_v26 }
 0x5e7   :  { %2588 = vmatpush.bf16.msra.mxu2 %v9808_v52  ;;  %2601 = vmatpush.bf16.msra.mxu3 %v9810_v12  ;;  %v9836_v10 = vor.u32 %v7919_v20, %v7260_v40  ;;  %v9838_v28 = vor.u32 %v7917_v4, %v7262_v62  ;;  %v7244_v12 = vld [vmem:[#allocation6 + $0x108] sm:$0xf]  ;;  %v7913_v52 = vld [vmem:[#allocation6 + $0x10c] sm:$0xf]  ;;  %12266 = vst [vmem:[#allocation18_spill] sm:$0xff] %v9842_v22  ;;  %v12271_v20 = vld [vmem:[#allocation37_spill] sm:$0xff] }
 0x5e8   :  { %12267 = vst [vmem:[#allocation26_spill] sm:$0xff] %v9844_v33  ;;  %v12272_v62 = vld [vmem:[#allocation38_spill] sm:$0xff] }
 0x5e9   :  { %12264 = vst [vmem:[#allocation12_spill] sm:$0xff] %v9836_v10  ;;  %v12280_v13 = vld [vmem:[#allocation46_spill] sm:$0xff]  ;;  %v12281_v25 = vld [vmem:[#allocation47_spill] sm:$0xff] }
 0x5ea   :  { %2563 = vmatpush.bf16.msra.mxu0 %v9818_v54  ;;  %2576 = vmatpush.bf16.msra.mxu1 %v9820_v11  ;;  %12265 = vst [vmem:[#allocation15_spill] sm:$0xff] %v9838_v28  ;;  %v7915_v54 = vld [vmem:[#allocation6 + $0x114] sm:$0xf0]  ;;  %v7246_v11 = vld [vmem:[#allocation6 + $0x118] sm:$0xf0] }
 0x5eb   :  { %2589 = vmatpush.bf16.msra.mxu2 %v9824_v27  ;;  %2602 = vmatpush.bf16.msra.mxu3 %v9826_v19  ;;  %v9848_v4 = vor.u32 %v7915_v54, %v7244_v12  ;;  %v9850_v40 = vor.u32 %v7913_v52, %v7246_v11  ;;  %v12273_v52 = vld [vmem:[#allocation39_spill] sm:$0xff]  ;;  %v12274_v12 = vld [vmem:[#allocation40_spill] sm:$0xff]  ;;  %v12275_v54 = vld [vmem:[#allocation41_spill] sm:$0xff] }
 0x5ec   :  { %v12276_v11 = vld [vmem:[#allocation42_spill] sm:$0xff] }
 0x5ed   :  { %12268 = vst [vmem:[#allocation29_spill] sm:$0xff] %v9848_v4 }
 0x5ee   :  { %2564 = vmatpush.bf16.msra.mxu0 %v9830_v7  ;;  %2577 = vmatpush.bf16.msra.mxu1 %v9832_v26  ;;  %12269 = vst [vmem:[#allocation65_spill] sm:$0xff] %v9850_v40 }
 0x5ef   :  { %2590 = vmatpush.bf16.msra.mxu2 %v9836_v10  ;;  %2603 = vmatpush.bf16.msra.mxu3 %v9838_v28 }
 0x5f2   :  { %2565 = vmatpush.bf16.msra.mxu0 %v9842_v22  ;;  %2578 = vmatpush.bf16.msra.mxu1 %v9844_v33 }
 0x5f3   :  { %2591 = vmatpush.bf16.msra.mxu2 %v9848_v4  ;;  %2604 = vmatpush.bf16.msra.mxu3 %v9850_v40 }
 0x5f5   :  { %2566 = vmatmul.bf16.vlgmr.msra.gmra.mxu0 %v9798_v14  ;;  %2579 = vmatmul.bf16.vlgmr.msra.gmra.mxu1 %v9798_v14 }
 0x5f6   :  { %2678 = vmatpush.bf16.msrb.mxu0 %v9589_v23  ;;  %2691 = vmatpush.bf16.msrb.mxu1 %v9591_v35 }
 0x5f7   :  { %2592 = vmatmul.bf16.vlgmr.msra.gmra.mxu2 %v9798_v14  ;;  %2605 = vmatmul.bf16.vlgmr.msra.gmra.mxu3 %v9798_v14  ;;  %v12270_v14 = vld [vmem:[#allocation36_spill] sm:$0xff] }
 0x5f8   :  { %2704 = vmatpush.bf16.msrb.mxu2 %v9593_v36  ;;  %2717 = vmatpush.bf16.msrb.mxu3 %v9596_v47 }
 0x5fa   :  { %2679 = vmatpush.bf16.msrb.mxu0 %v9603_v60  ;;  %2692 = vmatpush.bf16.msrb.mxu1 %v9609_v29 }
 0x5fc   :  { %2705 = vmatpush.bf16.msrb.mxu2 %v9611_v38  ;;  %2718 = vmatpush.bf16.msrb.mxu3 %v9614_v16 }
 0x5fe   :  { %2680 = vmatpush.bf16.msrb.mxu0 %v9619_v30  ;;  %2693 = vmatpush.bf16.msrb.mxu1 %v9625_v34 }
 0x600   :  { %2706 = vmatpush.bf16.msrb.mxu2 %v9627_v2  ;;  %2719 = vmatpush.bf16.msrb.mxu3 %v9630_v8 }
 0x602   :  { %2681 = vmatpush.bf16.msrb.mxu0 %v9635_v53  ;;  %2694 = vmatpush.bf16.msrb.mxu1 %v9639_v32 }
 0x604   :  { %2707 = vmatpush.bf16.msrb.mxu2 %v9641_v58  ;;  %2720 = vmatpush.bf16.msrb.mxu3 %v9649_v31 }
 0x606   :  { %2682 = vmatpush.bf16.msrb.mxu0 %v9656_v55  ;;  %2695 = vmatpush.bf16.msrb.mxu1 %v9658_v56 }
 0x608   :  { %2708 = vmatpush.bf16.msrb.mxu2 %v9660_v9  ;;  %2721 = vmatpush.bf16.msrb.mxu3 %v9667_v57 }
 0x60a   :  { %2683 = vmatpush.bf16.msrb.mxu0 %v9669_v44  ;;  %2696 = vmatpush.bf16.msrb.mxu1 %v9672_v18 }
 0x60c   :  { %2709 = vmatpush.bf16.msrb.mxu2 %v9675_v49  ;;  %2722 = vmatpush.bf16.msrb.mxu3 %v9677_v41 }
 0x60e   :  { %2684 = vmatpush.bf16.msrb.mxu0 %v9680_v61  ;;  %2697 = vmatpush.bf16.msrb.mxu1 %v9684_v48 }
 0x610   :  { %2710 = vmatpush.bf16.msrb.mxu2 %v9686_v51  ;;  %2723 = vmatpush.bf16.msrb.mxu3 %v9689_v45 }
 0x612   :  { %2685 = vmatpush.bf16.msrb.mxu0 %v9703_v0  ;;  %2698 = vmatpush.bf16.msrb.mxu1 %v9705_v6 }
 0x614   :  { %2711 = vmatpush.bf16.msrb.mxu2 %v9707_v37  ;;  %2724 = vmatpush.bf16.msrb.mxu3 %v9712_v21 }
 0x616   :  { %2738 = vmatpush.bf16.msra.mxu0 %v9733_v39  ;;  %2751 = vmatpush.bf16.msra.mxu1 %v9735_v46 }
 0x618   :  { %2764 = vmatpush.bf16.msra.mxu2 %v9737_v3  ;;  %2777 = vmatpush.bf16.msra.mxu3 %v9739_v50 }
 0x61a   :  { %2739 = vmatpush.bf16.msra.mxu0 %v9748_v59  ;;  %2752 = vmatpush.bf16.msra.mxu1 %v9750_v15 }
 0x61c   :  { %2765 = vmatpush.bf16.msra.mxu2 %v9754_v42  ;;  %2778 = vmatpush.bf16.msra.mxu3 %v9756_v1 }
 0x61e   :  { %2740 = vmatpush.bf16.msra.mxu0 %v9774_v17  ;;  %2753 = vmatpush.bf16.msra.mxu1 %v12270_v14 }
 0x620   :  { %2766 = vmatpush.bf16.msra.mxu2 %v12271_v20  ;;  %2779 = vmatpush.bf16.msra.mxu3 %v12272_v62 }
 0x622   :  { %2741 = vmatpush.bf16.msra.mxu0 %v12273_v52  ;;  %2754 = vmatpush.bf16.msra.mxu1 %v12274_v12 }
 0x624   :  { %2767 = vmatpush.bf16.msra.mxu2 %v12275_v54  ;;  %2780 = vmatpush.bf16.msra.mxu3 %v12276_v11 }
 0x626   :  { %2742 = vmatpush.bf16.msra.mxu0 %v12277_v63  ;;  %2755 = vmatpush.bf16.msra.mxu1 %v12278_v5 }
 0x628   :  { %2768 = vmatpush.bf16.msra.mxu2 %v12279_v24  ;;  %2781 = vmatpush.bf16.msra.mxu3 %v12280_v13 }
 0x62a   :  { %2743 = vmatpush.bf16.msra.mxu0 %v12281_v25  ;;  %2756 = vmatpush.bf16.msra.mxu1 %v12282_v43 }
 0x62c   :  { %2769 = vmatpush.bf16.msra.mxu2 %v9824_v27  ;;  %2782 = vmatpush.bf16.msra.mxu3 %v9826_v19 }
 0x62e   :  { %2744 = vmatpush.bf16.msra.mxu0 %v9830_v7  ;;  %2757 = vmatpush.bf16.msra.mxu1 %v9832_v26 }
 0x630   :  { %2770 = vmatpush.bf16.msra.mxu2 %v9836_v10  ;;  %2783 = vmatpush.bf16.msra.mxu3 %v9838_v28 }
 0x632   :  { %2745 = vmatpush.bf16.msra.mxu0 %v9842_v22  ;;  %2758 = vmatpush.bf16.msra.mxu1 %v9844_v33  ;;  %v7102_v22 = vld [vmem:[%s11746_s4 + $0x8] sm:$0xf] }
 0x633   :  { %v9935_v28 = vperm.slane %v7102_v22, 0  ;;  %v9937_v33 = vperm.slane %v7102_v22, 1 }
 0x634   :  { %2771 = vmatpush.bf16.msra.mxu2 %v9848_v4  ;;  %2784 = vmatpush.bf16.msra.mxu3 %v9850_v40 }
 0x635   :  { %12287 = vst [vmem:[#allocation70_spill] sm:$0xff] %v9935_v28 }
 0x636   :  { %12288 = vst [vmem:[#allocation71_spill] sm:$0xff] %v9937_v33 }
 0x651   :  { %v9924_v43 = vpop.f32.mrf.mxu0  ;;  %v9926_v27 = vpop.f32.mrf.mxu1 }
 0x652   :  { %12283 = vst [vmem:[#allocation66_spill] sm:$0xff] %v9924_v43 }
 0x653   :  { %12284 = vst [vmem:[#allocation67_spill] sm:$0xff] %v9926_v27 }
 0x658   :  { %v9928_v19 = vpop.f32.mrf.mxu2  ;;  %v9930_v7 = vpop.f32.mrf.mxu3 }
 0x659   :  { %12285 = vst [vmem:[#allocation68_spill] sm:$0xff] %v9928_v19  ;;  %v1988_v26 = vpop.f32.mrf.mxu0  ;;  %v2001_v10 = vpop.f32.mrf.mxu1 }
 0x65a   :  { %12286 = vst [vmem:[#allocation69_spill] sm:$0xff] %v9930_v7 }
 0x660   :  { %v2014_v4 = vpop.f32.mrf.mxu2  ;;  %v2027_v40 = vpop.f32.mrf.mxu3 }
 0x661   :  { %v2347_v25 = vpop.f32.mrf.mxu0  ;;  %v2360_v43 = vpop.f32.mrf.mxu1  ;;  %v9943_v40 = vperm.slane %v7102_v22, 3 }
 0x662   :  { %v2348_v27 = vadd.f32 %v2347_v25, %v9935_v28  ;;  %v2361_v19 = vadd.f32 %v2360_v43, %v9937_v33  ;;  %v12291_v43 = vld [vmem:[#allocation16_spill] sm:$0xff] }
 0x663   :  { %12290 = vst [vmem:[#allocation73_spill] sm:$0xff] %v9943_v40 }
 0x664   :  { %v7384_v13 = vmul.f32 -1.442695, %v2348_v27  ;;  %v7385_v7 = vmul.f32 -1.442695, %v2361_v19  ;;  %v12292_v27 = vld [vmem:[#allocation19_spill] sm:$0xff] }
 0x665   :  { %v907_v19 = vadd.f32 %v12292_v27, %v12291_v43 }
 0x666   :  { %8233 = vpow2.f32 %v7384_v13  ;;  %v12293_v13 = vld [vmem:[#allocation17_spill] sm:$0xff] }
 0x667   :  { %8235 = vpow2.f32 %v7385_v7  ;;  %v12294_v7 = vld [vmem:[#allocation20_spill] sm:$0xff] }
 0x668   :  { %v9941_v26 = vpop.f32.mrf.mxu2  ;;  %v2386_v10 = vpop.f32.mrf.mxu3  ;;  %v920_v33 = vadd.f32 %v12294_v7, %v12293_v13 }
 0x669   :  { %12289 = vst [vmem:[#allocation72_spill] sm:$0xff] %v9941_v26  ;;  %v2349_v24 = vpop.f32.mrf.mxu0  ;;  %v2362_v5 = vpop.f32.mrf.mxu1 }
 0x66a   :  { %v2387_v5 = vadd.f32 %v2386_v10, %v9943_v40 }
 0x66c   :  { %v8234_v63 = vpop.eup %8233 }
 0x66d   :  { %v8236_v11 = vpop.eup %8235  ;;  %v3904_v54 = vadd.f32 1.0, %v8234_v63 }
 0x66e   :  { %v3905_v4 = vadd.f32 1.0, %v8236_v11 }
 0x66f   :  { %8237 = vrcp.f32 %v3904_v54  ;;  %v3916_v7 = vand.u32 2147483647, %v3904_v54  ;;  %v3918_v13 = vand.u32 2147483648, %v3904_v54  ;;  %vm3912_vm14 = vweird.f32 %v3904_v54 }
 0x670   :  { %8239 = vrcp.f32 %v3905_v4  ;;  %v2375_v25 = vpop.f32.mrf.mxu2  ;;  %v2388_v28 = vpop.f32.mrf.mxu3  ;;  %vm3927_vm15 = vweird.f32 %v3905_v4 }
 0x671   :  { %8241 = vtanh.f32 %v2387_v5  ;;  %v12295_v28 = vld [vmem:[#allocation31_spill] sm:$0xff]  ;;  %v3931_v5 = vand.u32 2147483647, %v3905_v4  ;;  %vm3917_vm1 = vcmp.eq.f32.partialorder %v3916_v7, 8.507059e+37 }
 0x672   :  { %v2567_v26 = vpop.f32.mrf.mxu0  ;;  %v2580_v12 = vpop.f32.mrf.mxu1  ;;  %v12296_v25 = vld [vmem:[#allocation51_spill] sm:$0xff] }
 0x673   :  { %v2610_v24 = vadd.f32 %v2567_v26, %v907_v19  ;;  %v2611_v52 = vadd.f32 %v2580_v12, %v920_v33  ;;  %v933_v17 = vadd.f32 %v12296_v25, %v12295_v28  ;;  %v3933_v26 = vand.u32 2147483648, %v3905_v4 }
 0x674   :  { %vm3932_vm3 = vcmp.eq.f32.partialorder %v3931_v5, 8.507059e+37 }
 0x675   :  { %v8238_v63 = vpop.eup %8237  ;;  %v7362_v11 = vmul.f32 -1.442695, %v2610_v24  ;;  %v7363_v62 = vmul.f32 -1.442695, %v2611_v52  ;;  %v3934_v28 = vor.u32 1.1754944e-38, %v3933_v26 }
 0x676   :  { %v8240_v22 = vpop.eup %8239  ;;  %v3908_v20 = vmul.f32 %v8238_v63, %v3904_v54  ;;  %vm3913_vm12 = vweird.f32 %v8238_v63 }
 0x677   :  { %v3923_v14 = vmul.f32 %v8240_v22, %v3905_v4  ;;  %8243 = vpow2.f32 %v7362_v11  ;;  %vm3928_vm13 = vweird.f32 %v8240_v22  ;;  %vm3914_vm0 = vmor %vm3912_vm14, %vm3913_vm12 }
 0x678   :  { %v3909_v27 = vsub.f32 1.0, %v3908_v20  ;;  %8245 = vpow2.f32 %v7363_v62  ;;  %v8242_v20 = vpop.eup %8241  ;;  %vm3929_vm2 = vmor %vm3927_vm15, %vm3928_vm13 }
 0x679   :  { %v3924_v43 = vsub.f32 1.0, %v3923_v14  ;;  %v3919_v14 = vor.u32 1.1754944e-38, %v3918_v13 }
 0x67a   :  { %v2593_v1 = vpop.f32.mrf.mxu2  ;;  %v2606_v10 = vpop.f32.mrf.mxu3  ;;  %v3910_v33 = vmul.f32 %v8238_v63, %v3909_v27 }
 0x67b   :  { %v2612_v12 = vadd.f32 %v2593_v1, %v933_v17  ;;  %v2569_v52 = vpop.f32.mrf.mxu0  ;;  %v2582_v19 = vpop.f32.mrf.mxu1  ;;  %v3925_v24 = vmul.f32 %v8240_v22, %v3924_v43 }
 0x67c   :  { %v3911_v40 = vadd.f32 %v8238_v63, %v3910_v33 }
 0x67d   :  { %v7364_v25 = vmul.f32 -1.442695, %v2612_v12  ;;  %v3926_v11 = vadd.f32 %v8240_v22, %v3925_v24  ;;  %v8244_v62 = vpop.eup %8243 }
 0x67e   :  { %v3915_v42 = vsel %vm3914_vm0, %v8238_v63, %v3911_v40  ;;  %v8246_v1 = vpop.eup %8245  ;;  %v2623_v43 = vadd.f32 1.0, %v8244_v62  ;;  %v12298_v40 = vld [vmem:[#allocation49_spill] sm:$0xff]  ;;  %v12299_v63 = vld [vmem:[#allocation52_spill] sm:$0xff] }
 0x67f   :  { %8247 = vpow2.f32 %v7364_v25  ;;  %v3920_v17 = vsel %vm3917_vm1, %v3919_v14, %v3915_v42  ;;  %v3930_v27 = vsel %vm3929_vm2, %v8240_v22, %v3926_v11  ;;  %v2624_v54 = vadd.f32 1.0, %v8246_v1 }
 0x680   :  { %v3935_v52 = vsel %vm3932_vm3, %v3934_v28, %v3930_v27  ;;  %v3954_v33 = vmul.f32 %v8242_v20, %v3920_v17  ;;  %8249 = vrcp.f32 %v2623_v43  ;;  %v946_v7 = vadd.f32 %v12299_v63, %v12298_v40  ;;  %v12300_v40 = vld [vmem:[#allocation50_spill] sm:$0xff] }
 0x681   :  { %v3953_v12 = vmul.f32 0.0, %v3935_v52  ;;  %8251 = vrcp.f32 %v2624_v54  ;;  %v2637_v11 = vand.u32 2147483648, %v2623_v43  ;;  %v2652_v62 = vand.u32 2147483648, %v2624_v54 }
 0x682   :  { %v2595_v4 = vpop.f32.mrf.mxu2  ;;  %v2608_v19 = vpop.f32.mrf.mxu3  ;;  %v2613_v42 = vadd.f32 %v2606_v10, %v946_v7  ;;  %v2635_v17 = vand.u32 2147483647, %v2623_v43  ;;  %vm2631_vm6 = vweird.f32 %v2623_v43  ;;  %vm2646_vm7 = vweird.f32 %v2624_v54 }
 0x683   :  { %v9952_v13 = vadd.f32 %v3954_v33, %v3953_v12  ;;  %v2650_v33 = vand.u32 2147483647, %v2624_v54  ;;  %v2638_v10 = vor.u32 1.1754944e-38, %v2637_v11 }
 0x684   :  { %vm2636_vm10 = vcmp.eq.f32.partialorder %v2635_v17, 8.507059e+37 }
 0x685   :  { %12297 = vst [vmem:[#allocation19_spill] sm:$0xff] %v9952_v13  ;;  %v8248_v26 = vpop.eup %8247  ;;  %vm2651_vm11 = vcmp.eq.f32.partialorder %v2650_v33, 8.507059e+37 }
 0x686   :  { %v2625_v24 = vadd.f32 1.0, %v8248_v26  ;;  %v8250_v25 = vpop.eup %8249  ;;  %v2653_v26 = vor.u32 1.1754944e-38, %v2652_v62 }
 0x687   :  { %v8252_v22 = vpop.eup %8251  ;;  %v2627_v5 = vmul.f32 %v8250_v25, %v2623_v43  ;;  %vm2632_vm4 = vweird.f32 %v8250_v25 }
 0x688   :  { %8253 = vrcp.f32 %v2625_v24  ;;  %v2642_v28 = vmul.f32 %v8252_v22, %v2624_v54  ;;  %vm2647_vm5 = vweird.f32 %v8252_v22  ;;  %vm2633_vm8 = vmor %vm2631_vm6, %vm2632_vm4  ;;  %v2667_v54 = vand.u32 2147483648, %v2625_v24 }
 0x689   :  { %v2628_v20 = vsub.f32 1.0, %v2627_v5  ;;  %8255 = vtanh.f32 %v2613_v42  ;;  %vm2648_vm9 = vmor %vm2646_vm7, %vm2647_vm5  ;;  %vm2661_vm13 = vweird.f32 %v2625_v24  ;;  %v2665_v11 = vand.u32 2147483647, %v2625_v24 }
 0x68a   :  { %v2643_v14 = vsub.f32 1.0, %v2642_v28  ;;  %v2668_v62 = vor.u32 1.1754944e-38, %v2667_v54  ;;  %v12319_v54 = vld [vmem:[#allocation11_spill] sm:$0xff] }
 0x68b   :  { %v2629_v1 = vmul.f32 %v8250_v25, %v2628_v20  ;;  %vm2666_vm15 = vcmp.eq.f32.partialorder %v2665_v11, 8.507059e+37  ;;  %v12320_v11 = vld [vmem:[#allocation13_spill] sm:$0xff] }
 0x68c   :  { %v2644_v52 = vmul.f32 %v8252_v22, %v2643_v14 }
 0x68d   :  { %v2630_v4 = vadd.f32 %v8250_v25, %v2629_v1 }
 0x68e   :  { %v8254_v27 = vpop.eup %8253  ;;  %v2645_v19 = vadd.f32 %v8252_v22, %v2644_v52 }
 0x68f   :  { %v2657_v12 = vmul.f32 %v8254_v27, %v2625_v24  ;;  %v2634_v7 = vsel %vm2633_vm8, %v8250_v25, %v2630_v4  ;;  %v8256_v42 = vpop.eup %8255  ;;  %vm2662_vm12 = vweird.f32 %v8254_v27  ;;  %v12304_v24 = vld [vmem:[#allocation35_spill] sm:$0xff]  ;;  %v12307_v4 = vld [vmem:[#allocation38_spill] sm:$0xff] }
 0x690   :  { %v2639_v5 = vsel %vm2636_vm10, %v2638_v10, %v2634_v7  ;;  %v2649_v28 = vsel %vm2648_vm9, %v8252_v22, %v2645_v19  ;;  %vm2663_vm14 = vmor %vm2661_vm13, %vm2662_vm12  ;;  %v12308_v10 = vld [vmem:[#allocation39_spill] sm:$0xff]  ;;  %v12309_v19 = vld [vmem:[#allocation40_spill] sm:$0xff] }
 0x691   :  { %v2658_v63 = vsub.f32 1.0, %v2657_v12  ;;  %v2654_v14 = vsel %vm2651_vm11, %v2653_v26, %v2649_v28  ;;  %v2673_v13 = vmul.f32 %v8256_v42, %v2639_v5  ;;  %v12306_v12 = vld [vmem:[#allocation37_spill] sm:$0xff]  ;;  %v12312_v7 = vld [vmem:[#allocation43_spill] sm:$0xff]  ;;  %v12313_v42 = vld [vmem:[#allocation44_spill] sm:$0xff] }
 0x692   :  { %v2672_v15 = vmul.f32 %v2654_v14, %v12300_v40  ;;  %v12303_v40 = vld [vmem:[#allocation34_spill] sm:$0xff]  ;;  %v12310_v26 = vld [vmem:[#allocation41_spill] sm:$0xff]  ;;  %v12317_v14 = vld [vmem:[#allocation48_spill] sm:$0xff] }
 0x693   :  { %v2659_v20 = vmul.f32 %v8254_v27, %v2658_v63  ;;  %v12311_v63 = vld [vmem:[#allocation42_spill] sm:$0xff]  ;;  %v12314_v5 = vld [vmem:[#allocation45_spill] sm:$0xff] }
 0x694   :  { %v9957_v1 = vadd.f32 %v2673_v13, %v2672_v15  ;;  %v12301_v15 = vld [vmem:[#allocation32_spill] sm:$0xff]  ;;  %v12302_v13 = vld [vmem:[#allocation33_spill] sm:$0xff]  ;;  %v12315_v28 = vld [vmem:[#allocation46_spill] sm:$0xff] }
 0x695   :  { %v2660_v43 = vadd.f32 %v8254_v27, %v2659_v20  ;;  %v12316_v20 = vld [vmem:[#allocation47_spill] sm:$0xff] }
 0x696   :  { %8257 = vtanh.f32 %v9957_v1 }
 0x697   :  { %v2664_v25 = vsel %vm2663_vm14, %v8254_v27, %v2660_v43  ;;  %v12305_v27 = vld [vmem:[#allocation36_spill] sm:$0xff]  ;;  %v12318_v43 = vld [vmem:[#allocation10_spill] sm:$0xff] }
 0x698   :  { %v2669_v17 = vsel %vm2666_vm15, %v2668_v62, %v2664_v25  ;;  %v12321_v25 = vld [vmem:[#allocation14_spill] sm:$0xff]  ;;  %v12322_v62 = vld [vmem:[#allocation12_spill] sm:$0xff] }
 0x69c   :  { %v8258_v22 = vpop.eup %8257 }
 0x69d   :  { %v2676_v52 = vmul.f32 %v8258_v22, %v2669_v17  ;;  %v12323_v22 = vld [vmem:[#allocation15_spill] sm:$0xff]  ;;  %v12324_v17 = vld [vmem:[#allocation18_spill] sm:$0xff] }
 0x69f   :  { %v2677_v33 = vpack.c.bf16 %v2676_v52, %v2676_v52  ;;  %v12325_v52 = vld [vmem:[#allocation26_spill] sm:$0xff] }
 0x6a1   :  { %2686 = vmatmul.bf16.vlgmr.msrb.gmra.mxu0 %v2677_v33  ;;  %2699 = vmatmul.bf16.vlgmr.msrb.gmra.mxu1 %v2677_v33 }
 0x6a2   :  { %2712 = vmatmul.bf16.vlgmr.msrb.gmra.mxu2 %v2677_v33  ;;  %2725 = vmatmul.bf16.vlgmr.msrb.gmra.mxu3 %v2677_v33 }
 0x6a3   :  { %2858 = vmatpush.bf16.msrb.mxu0 %v9589_v23  ;;  %2871 = vmatpush.bf16.msrb.mxu1 %v9591_v35 }
 0x6a4   :  { %2884 = vmatpush.bf16.msrb.mxu2 %v9593_v36  ;;  %2897 = vmatpush.bf16.msrb.mxu3 %v9596_v47 }
 0x6a7   :  { %2859 = vmatpush.bf16.msrb.mxu0 %v9603_v60  ;;  %2872 = vmatpush.bf16.msrb.mxu1 %v9609_v29 }
 0x6a8   :  { %2885 = vmatpush.bf16.msrb.mxu2 %v9611_v38  ;;  %2898 = vmatpush.bf16.msrb.mxu3 %v9614_v16 }
 0x6ab   :  { %2860 = vmatpush.bf16.msrb.mxu0 %v9619_v30  ;;  %2873 = vmatpush.bf16.msrb.mxu1 %v9625_v34 }
 0x6ac   :  { %2886 = vmatpush.bf16.msrb.mxu2 %v9627_v2  ;;  %2899 = vmatpush.bf16.msrb.mxu3 %v9630_v8 }
 0x6af   :  { %2861 = vmatpush.bf16.msrb.mxu0 %v9635_v53  ;;  %2874 = vmatpush.bf16.msrb.mxu1 %v9639_v32 }
 0x6b0   :  { %2887 = vmatpush.bf16.msrb.mxu2 %v9641_v58  ;;  %2900 = vmatpush.bf16.msrb.mxu3 %v9649_v31 }
 0x6b1   :  { %2746 = vmatmul.bf16.vlgmr.msra.gmra.mxu0 %v2677_v33  ;;  %2759 = vmatmul.bf16.vlgmr.msra.gmra.mxu1 %v2677_v33 }
 0x6b2   :  { %2772 = vmatmul.bf16.vlgmr.msra.gmra.mxu2 %v2677_v33  ;;  %2785 = vmatmul.bf16.vlgmr.msra.gmra.mxu3 %v2677_v33  ;;  %v12326_v33 = vld [vmem:[#allocation29_spill] sm:$0xff] }
 0x6b3   :  { %2862 = vmatpush.bf16.msrb.mxu0 %v9656_v55  ;;  %2875 = vmatpush.bf16.msrb.mxu1 %v9658_v56 }
 0x6b4   :  { %2888 = vmatpush.bf16.msrb.mxu2 %v9660_v9  ;;  %2901 = vmatpush.bf16.msrb.mxu3 %v9667_v57 }
 0x6b7   :  { %2863 = vmatpush.bf16.msrb.mxu0 %v9669_v44  ;;  %2876 = vmatpush.bf16.msrb.mxu1 %v9672_v18 }
 0x6b8   :  { %2889 = vmatpush.bf16.msrb.mxu2 %v9675_v49  ;;  %2902 = vmatpush.bf16.msrb.mxu3 %v9677_v41 }
 0x6bb   :  { %2864 = vmatpush.bf16.msrb.mxu0 %v9680_v61  ;;  %2877 = vmatpush.bf16.msrb.mxu1 %v9684_v48 }
 0x6bc   :  { %2890 = vmatpush.bf16.msrb.mxu2 %v9686_v51  ;;  %2903 = vmatpush.bf16.msrb.mxu3 %v9689_v45 }
 0x6bf   :  { %2865 = vmatpush.bf16.msrb.mxu0 %v9703_v0  ;;  %2878 = vmatpush.bf16.msrb.mxu1 %v9705_v6 }
 0x6c0   :  { %2891 = vmatpush.bf16.msrb.mxu2 %v9707_v37  ;;  %2904 = vmatpush.bf16.msrb.mxu3 %v9712_v21 }
 0x6c3   :  { %2918 = vmatpush.bf16.msra.mxu0 %v9733_v39  ;;  %2931 = vmatpush.bf16.msra.mxu1 %v9735_v46 }
 0x6c4   :  { %2944 = vmatpush.bf16.msra.mxu2 %v9737_v3  ;;  %2957 = vmatpush.bf16.msra.mxu3 %v9739_v50 }
 0x6c7   :  { %2919 = vmatpush.bf16.msra.mxu0 %v9748_v59  ;;  %2932 = vmatpush.bf16.msra.mxu1 %v12301_v15 }
 0x6c8   :  { %2945 = vmatpush.bf16.msra.mxu2 %v12302_v13  ;;  %2958 = vmatpush.bf16.msra.mxu3 %v12303_v40 }
 0x6cb   :  { %2920 = vmatpush.bf16.msra.mxu0 %v12304_v24  ;;  %2933 = vmatpush.bf16.msra.mxu1 %v12305_v27 }
 0x6cc   :  { %2946 = vmatpush.bf16.msra.mxu2 %v12306_v12  ;;  %2959 = vmatpush.bf16.msra.mxu3 %v12307_v4 }
 0x6cf   :  { %2921 = vmatpush.bf16.msra.mxu0 %v12308_v10  ;;  %2934 = vmatpush.bf16.msra.mxu1 %v12309_v19  ;;  %v12337_v10 = vld [vmem:[#allocation55_spill] sm:$0xff] }
 0x6d0   :  { %2947 = vmatpush.bf16.msra.mxu2 %v12310_v26  ;;  %2960 = vmatpush.bf16.msra.mxu3 %v12311_v63 }
 0x6d3   :  { %2922 = vmatpush.bf16.msra.mxu0 %v12312_v7  ;;  %2935 = vmatpush.bf16.msra.mxu1 %v12313_v42  ;;  %v12335_v42 = vld [vmem:[#allocation54_spill] sm:$0xff] }
 0x6d4   :  { %2948 = vmatpush.bf16.msra.mxu2 %v12314_v5  ;;  %2961 = vmatpush.bf16.msra.mxu3 %v12315_v28  ;;  %v12332_v28 = vld [vmem:[#allocation16_spill] sm:$0xff] }
 0x6d7   :  { %2923 = vmatpush.bf16.msra.mxu0 %v12316_v20  ;;  %2936 = vmatpush.bf16.msra.mxu1 %v12317_v14  ;;  %v12327_v20 = vld [vmem:[#allocation65_spill] sm:$0xff] }
 0x6d8   :  { %2949 = vmatpush.bf16.msra.mxu2 %v12318_v43  ;;  %2962 = vmatpush.bf16.msra.mxu3 %v12319_v54 }
 0x6db   :  { %2924 = vmatpush.bf16.msra.mxu0 %v12320_v11  ;;  %2937 = vmatpush.bf16.msra.mxu1 %v12321_v25 }
 0x6dc   :  { %2950 = vmatpush.bf16.msra.mxu2 %v12322_v62  ;;  %2963 = vmatpush.bf16.msra.mxu3 %v12323_v22  ;;  %v12333_v22 = vld [vmem:[#allocation53_spill] sm:$0xff] }
 0x6dd   :  { %v1087_v5 = vadd.f32 %v12333_v22, %v12332_v28 }
 0x6df   :  { %2925 = vmatpush.bf16.msra.mxu0 %v12324_v17  ;;  %2938 = vmatpush.bf16.msra.mxu1 %v12325_v52  ;;  %v12334_v17 = vld [vmem:[#allocation17_spill] sm:$0xff] }
 0x6e0   :  { %2951 = vmatpush.bf16.msra.mxu2 %v12326_v33  ;;  %2964 = vmatpush.bf16.msra.mxu3 %v12327_v20  ;;  %v1100_v52 = vadd.f32 %v12335_v42, %v12334_v17 }
 0x71e   :  { %v10024_v14 = vpop.f32.mrf.mxu0  ;;  %v10026_v43 = vpop.f32.mrf.mxu1 }
 0x71f   :  { %12328 = vst [vmem:[#allocation20_spill] sm:$0xff] %v10024_v14 }
 0x720   :  { %12329 = vst [vmem:[#allocation51_spill] sm:$0xff] %v10026_v43 }
 0x725   :  { %v10028_v54 = vpop.f32.mrf.mxu2  ;;  %v10030_v11 = vpop.f32.mrf.mxu3 }
 0x726   :  { %12330 = vst [vmem:[#allocation52_spill] sm:$0xff] %v10028_v54  ;;  %v2689_v25 = vpop.f32.mrf.mxu0  ;;  %v2702_v62 = vpop.f32.mrf.mxu1  ;;  %v12336_v54 = vld [vmem:[#allocation31_spill] sm:$0xff] }
 0x727   :  { %12331 = vst [vmem:[#allocation50_spill] sm:$0xff] %v10030_v11  ;;  %v1113_v11 = vadd.f32 %v12337_v10, %v12336_v54 }
 0x72d   :  { %v2715_v7 = vpop.f32.mrf.mxu2  ;;  %v2728_v33 = vpop.f32.mrf.mxu3 }
 0x72e   :  { %v2747_v63 = vpop.f32.mrf.mxu0  ;;  %v2760_v20 = vpop.f32.mrf.mxu1 }
 0x72f   :  { %v2790_v26 = vadd.f32 %v2747_v63, %v1087_v5  ;;  %v2791_v14 = vadd.f32 %v2760_v20, %v1100_v52  ;;  %v12338_v5 = vld [vmem:[#allocation49_spill] sm:$0xff]  ;;  %v12339_v20 = vld [vmem:[#allocation56_spill] sm:$0xff] }
 0x730   :  { %v1126_v10 = vadd.f32 %v12339_v20, %v12338_v5 }
 0x731   :  { %v7365_v19 = vmul.f32 -1.442695, %v2790_v26  ;;  %v7366_v43 = vmul.f32 -1.442695, %v2791_v14 }
 0x733   :  { %8259 = vpow2.f32 %v7365_v19 }
 0x734   :  { %8261 = vpow2.f32 %v7366_v43 }
 0x735   :  { %v2773_v25 = vpop.f32.mrf.mxu2  ;;  %v2786_v62 = vpop.f32.mrf.mxu3 }
 0x736   :  { %v2792_v4 = vadd.f32 %v2773_v25, %v1113_v11  ;;  %v2749_v22 = vpop.f32.mrf.mxu0  ;;  %v2762_v28 = vpop.f32.mrf.mxu1  ;;  %v2793_v52 = vadd.f32 %v2786_v62, %v1126_v10 }
 0x738   :  { %v7367_v12 = vmul.f32 -1.442695, %v2792_v4 }
 0x739   :  { %v8260_v42 = vpop.eup %8259 }
 0x73a   :  { %v8262_v7 = vpop.eup %8261  ;;  %v2803_v33 = vadd.f32 1.0, %v8260_v42  ;;  %8263 = vpow2.f32 %v7367_v12 }
 0x73b   :  { %v2804_v17 = vadd.f32 1.0, %v8262_v7 }
 0x73c   :  { %8265 = vrcp.f32 %v2803_v33  ;;  %v2817_v42 = vand.u32 2147483648, %v2803_v33  ;;  %vm2811_vm2 = vweird.f32 %v2803_v33 }
 0x73d   :  { %8267 = vrcp.f32 %v2804_v17  ;;  %v2775_v26 = vpop.f32.mrf.mxu2  ;;  %v2788_v63 = vpop.f32.mrf.mxu3  ;;  %v2832_v12 = vand.u32 2147483648, %v2804_v17  ;;  %v2830_v54 = vand.u32 2147483647, %v2804_v17  ;;  %vm2826_vm3 = vweird.f32 %v2804_v17 }
 0x73e   :  { %v2815_v26 = vand.u32 2147483647, %v2803_v33 }
 0x73f   :  { %vm2831_vm7 = vcmp.eq.f32.partialorder %v2830_v54, 8.507059e+37 }
 0x740   :  { %v8264_v19 = vpop.eup %8263  ;;  %vm2816_vm6 = vcmp.eq.f32.partialorder %v2815_v26, 8.507059e+37 }
 0x741   :  { %v2805_v14 = vadd.f32 1.0, %v8264_v19  ;;  %v2818_v19 = vor.u32 1.1754944e-38, %v2817_v42 }
 0x742   :  { %v8266_v43 = vpop.eup %8265 }
 0x743   :  { %v8268_v11 = vpop.eup %8267  ;;  %v2807_v25 = vmul.f32 %v8266_v43, %v2803_v33  ;;  %8269 = vrcp.f32 %v2805_v14  ;;  %vm2812_vm0 = vweird.f32 %v8266_v43  ;;  %v2847_v42 = vand.u32 2147483648, %v2805_v14 }
 0x744   :  { %v2822_v4 = vmul.f32 %v8268_v11, %v2804_v17  ;;  %8271 = vtanh.f32 %v2793_v52  ;;  %vm2827_vm1 = vweird.f32 %v8268_v11  ;;  %vm2813_vm4 = vmor %vm2811_vm2, %vm2812_vm0  ;;  %vm2841_vm9 = vweird.f32 %v2805_v14 }
 0x745   :  { %v2808_v28 = vsub.f32 1.0, %v2807_v25  ;;  %vm2828_vm5 = vmor %vm2826_vm3, %vm2827_vm1  ;;  %v2833_v25 = vor.u32 1.1754944e-38, %v2832_v12  ;;  %v2848_v26 = vor.u32 1.1754944e-38, %v2847_v42  ;;  %v12357_v42 = vld [vmem:[#allocation11_spill] sm:$0xff] }
 0x746   :  { %v2823_v22 = vsub.f32 1.0, %v2822_v4 }
 0x747   :  { %v2809_v7 = vmul.f32 %v8266_v43, %v2808_v28 }
 0x748   :  { %v2824_v63 = vmul.f32 %v8268_v11, %v2823_v22 }
 0x749   :  { %v8270_v27 = vpop.eup %8269  ;;  %v2810_v20 = vadd.f32 %v8266_v43, %v2809_v7 }
 0x74a   :  { %v2837_v62 = vmul.f32 %v8270_v27, %v2805_v14  ;;  %v2825_v10 = vadd.f32 %v8268_v11, %v2824_v63  ;;  %v8272_v52 = vpop.eup %8271  ;;  %vm2842_vm8 = vweird.f32 %v8270_v27 }
 0x74b   :  { %v2814_v4 = vsel %vm2813_vm4, %v8266_v43, %v2810_v20  ;;  %v2845_v43 = vand.u32 2147483647, %v2805_v14  ;;  %vm2843_vm10 = vmor %vm2841_vm9, %vm2842_vm8  ;;  %v12345_v14 = vld [vmem:[#allocation38_spill] sm:$0xff]  ;;  %v12346_v20 = vld [vmem:[#allocation39_spill] sm:$0xff] }
 0x74c   :  { %v2838_v5 = vsub.f32 1.0, %v2837_v62  ;;  %v2819_v28 = vsel %vm2816_vm6, %v2818_v19, %v2814_v4  ;;  %v2829_v24 = vsel %vm2828_vm5, %v8268_v11, %v2825_v10  ;;  %v12347_v62 = vld [vmem:[#allocation40_spill] sm:$0xff]  ;;  %v12348_v19 = vld [vmem:[#allocation41_spill] sm:$0xff]  ;;  %v12349_v10 = vld [vmem:[#allocation42_spill] sm:$0xff] }
 0x74d   :  { %v2834_v22 = vsel %vm2831_vm7, %v2833_v25, %v2829_v24  ;;  %v2853_v40 = vmul.f32 %v8272_v52, %v2819_v28  ;;  %vm2846_vm11 = vcmp.eq.f32.partialorder %v2845_v43, 8.507059e+37  ;;  %v12350_v25 = vld [vmem:[#allocation43_spill] sm:$0xff]  ;;  %v12351_v4 = vld [vmem:[#allocation44_spill] sm:$0xff]  ;;  %v12352_v52 = vld [vmem:[#allocation45_spill] sm:$0xff] }
 0x74e   :  { %v2839_v13 = vmul.f32 %v8270_v27, %v2838_v5  ;;  %v2852_v7 = vmul.f32 %v2834_v22, %v9957_v1  ;;  %v12340_v1 = vld [vmem:[#allocation33_spill] sm:$0xff]  ;;  %v12353_v28 = vld [vmem:[#allocation46_spill] sm:$0xff]  ;;  %v12354_v22 = vld [vmem:[#allocation47_spill] sm:$0xff] }
 0x74f   :  { %v12344_v5 = vld [vmem:[#allocation37_spill] sm:$0xff] }
 0x750   :  { %v10041_v33 = vadd.f32 %v2853_v40, %v2852_v7  ;;  %v2840_v17 = vadd.f32 %v8270_v27, %v2839_v13  ;;  %v12341_v13 = vld [vmem:[#allocation34_spill] sm:$0xff]  ;;  %v12342_v40 = vld [vmem:[#allocation35_spill] sm:$0xff]  ;;  %v12355_v7 = vld [vmem:[#allocation48_spill] sm:$0xff] }
 0x751   :  { %v12358_v43 = vld [vmem:[#allocation13_spill] sm:$0xff] }
 0x752   :  { %8273 = vtanh.f32 %v10041_v33  ;;  %v2844_v12 = vsel %vm2843_vm10, %v8270_v27, %v2840_v17  ;;  %v12343_v27 = vld [vmem:[#allocation36_spill] sm:$0xff]  ;;  %v12356_v17 = vld [vmem:[#allocation10_spill] sm:$0xff] }
 0x753   :  { %v2849_v54 = vsel %vm2846_vm11, %v2848_v26, %v2844_v12  ;;  %v12359_v12 = vld [vmem:[#allocation14_spill] sm:$0xff]  ;;  %v12360_v26 = vld [vmem:[#allocation12_spill] sm:$0xff] }
 0x758   :  { %v8274_v11 = vpop.eup %8273 }
 0x759   :  { %v2856_v24 = vmul.f32 %v8274_v11, %v2849_v54  ;;  %v12361_v11 = vld [vmem:[#allocation15_spill] sm:$0xff]  ;;  %v12362_v54 = vld [vmem:[#allocation18_spill] sm:$0xff] }
 0x75b   :  { %v2857_v63 = vpack.c.bf16 %v2856_v24, %v2856_v24  ;;  %v12363_v24 = vld [vmem:[#allocation26_spill] sm:$0xff] }
 0x75d   :  { %2866 = vmatmul.bf16.vlgmr.msrb.gmra.mxu0 %v2857_v63  ;;  %2879 = vmatmul.bf16.vlgmr.msrb.gmra.mxu1 %v2857_v63 }
 0x75e   :  { %2892 = vmatmul.bf16.vlgmr.msrb.gmra.mxu2 %v2857_v63  ;;  %2905 = vmatmul.bf16.vlgmr.msrb.gmra.mxu3 %v2857_v63 }
 0x75f   :  { %3038 = vmatpush.bf16.msrb.mxu0 %v9589_v23  ;;  %3051 = vmatpush.bf16.msrb.mxu1 %v9591_v35 }
 0x760   :  { %3064 = vmatpush.bf16.msrb.mxu2 %v9593_v36  ;;  %3077 = vmatpush.bf16.msrb.mxu3 %v9596_v47 }
 0x763   :  { %3039 = vmatpush.bf16.msrb.mxu0 %v9603_v60  ;;  %3052 = vmatpush.bf16.msrb.mxu1 %v9609_v29 }
 0x764   :  { %3065 = vmatpush.bf16.msrb.mxu2 %v9611_v38  ;;  %3078 = vmatpush.bf16.msrb.mxu3 %v9614_v16 }
 0x767   :  { %3040 = vmatpush.bf16.msrb.mxu0 %v9619_v30  ;;  %3053 = vmatpush.bf16.msrb.mxu1 %v9625_v34 }
 0x768   :  { %3066 = vmatpush.bf16.msrb.mxu2 %v9627_v2  ;;  %3079 = vmatpush.bf16.msrb.mxu3 %v9630_v8 }
 0x76b   :  { %3041 = vmatpush.bf16.msrb.mxu0 %v9635_v53  ;;  %3054 = vmatpush.bf16.msrb.mxu1 %v9639_v32 }
 0x76c   :  { %3067 = vmatpush.bf16.msrb.mxu2 %v9641_v58  ;;  %3080 = vmatpush.bf16.msrb.mxu3 %v9649_v31 }
 0x76d   :  { %2926 = vmatmul.bf16.vlgmr.msra.gmra.mxu0 %v2857_v63  ;;  %2939 = vmatmul.bf16.vlgmr.msra.gmra.mxu1 %v2857_v63 }
 0x76e   :  { %2952 = vmatmul.bf16.vlgmr.msra.gmra.mxu2 %v2857_v63  ;;  %2965 = vmatmul.bf16.vlgmr.msra.gmra.mxu3 %v2857_v63  ;;  %v12364_v63 = vld [vmem:[#allocation29_spill] sm:$0xff] }
 0x76f   :  { %3042 = vmatpush.bf16.msrb.mxu0 %v9656_v55  ;;  %3055 = vmatpush.bf16.msrb.mxu1 %v9658_v56 }
 0x770   :  { %3068 = vmatpush.bf16.msrb.mxu2 %v9660_v9  ;;  %3081 = vmatpush.bf16.msrb.mxu3 %v9667_v57 }
 0x773   :  { %3043 = vmatpush.bf16.msrb.mxu0 %v9669_v44  ;;  %3056 = vmatpush.bf16.msrb.mxu1 %v9672_v18 }
 0x774   :  { %3069 = vmatpush.bf16.msrb.mxu2 %v9675_v49  ;;  %3082 = vmatpush.bf16.msrb.mxu3 %v9677_v41 }
 0x777   :  { %3044 = vmatpush.bf16.msrb.mxu0 %v9680_v61  ;;  %3057 = vmatpush.bf16.msrb.mxu1 %v9684_v48 }
 0x778   :  { %3070 = vmatpush.bf16.msrb.mxu2 %v9686_v51  ;;  %3083 = vmatpush.bf16.msrb.mxu3 %v9689_v45 }
 0x77b   :  { %3045 = vmatpush.bf16.msrb.mxu0 %v9703_v0  ;;  %3058 = vmatpush.bf16.msrb.mxu1 %v9705_v6 }
 0x77c   :  { %3071 = vmatpush.bf16.msrb.mxu2 %v9707_v37  ;;  %3084 = vmatpush.bf16.msrb.mxu3 %v9712_v21 }
 0x77f   :  { %3098 = vmatpush.bf16.msra.mxu0 %v9733_v39  ;;  %3111 = vmatpush.bf16.msra.mxu1 %v9735_v46 }
 0x780   :  { %3124 = vmatpush.bf16.msra.mxu2 %v9737_v3  ;;  %3137 = vmatpush.bf16.msra.mxu3 %v9739_v50 }
 0x783   :  { %3099 = vmatpush.bf16.msra.mxu0 %v9748_v59  ;;  %3112 = vmatpush.bf16.msra.mxu1 %v12301_v15 }
 0x784   :  { %3125 = vmatpush.bf16.msra.mxu2 %v12340_v1  ;;  %3138 = vmatpush.bf16.msra.mxu3 %v12341_v13 }
 0x787   :  { %3100 = vmatpush.bf16.msra.mxu0 %v12342_v40  ;;  %3113 = vmatpush.bf16.msra.mxu1 %v12343_v27 }
 0x788   :  { %3126 = vmatpush.bf16.msra.mxu2 %v12344_v5  ;;  %3139 = vmatpush.bf16.msra.mxu3 %v12345_v14 }
 0x78b   :  { %3101 = vmatpush.bf16.msra.mxu0 %v12346_v20  ;;  %3114 = vmatpush.bf16.msra.mxu1 %v12347_v62  ;;  %v12375_v20 = vld [vmem:[#allocation59_spill] sm:$0xff] }
 0x78c   :  { %3127 = vmatpush.bf16.msra.mxu2 %v12348_v19  ;;  %3140 = vmatpush.bf16.msra.mxu3 %v12349_v10 }
 0x78f   :  { %3102 = vmatpush.bf16.msra.mxu0 %v12350_v25  ;;  %3115 = vmatpush.bf16.msra.mxu1 %v12351_v4  ;;  %v12373_v4 = vld [vmem:[#allocation58_spill] sm:$0xff] }
 0x790   :  { %3128 = vmatpush.bf16.msra.mxu2 %v12352_v52  ;;  %3141 = vmatpush.bf16.msra.mxu3 %v12353_v28  ;;  %v12370_v28 = vld [vmem:[#allocation16_spill] sm:$0xff] }
 0x793   :  { %3103 = vmatpush.bf16.msra.mxu0 %v12354_v22  ;;  %3116 = vmatpush.bf16.msra.mxu1 %v12355_v7  ;;  %v12365_v22 = vld [vmem:[#allocation65_spill] sm:$0xff] }
 0x794   :  { %3129 = vmatpush.bf16.msra.mxu2 %v12356_v17  ;;  %3142 = vmatpush.bf16.msra.mxu3 %v12357_v42 }
 0x797   :  { %3104 = vmatpush.bf16.msra.mxu0 %v12358_v43  ;;  %3117 = vmatpush.bf16.msra.mxu1 %v12359_v12 }
 0x798   :  { %3130 = vmatpush.bf16.msra.mxu2 %v12360_v26  ;;  %3143 = vmatpush.bf16.msra.mxu3 %v12361_v11  ;;  %v12371_v11 = vld [vmem:[#allocation57_spill] sm:$0xff] }
 0x799   :  { %v1267_v52 = vadd.f32 %v12371_v11, %v12370_v28 }
 0x79b   :  { %3105 = vmatpush.bf16.msra.mxu0 %v12362_v54  ;;  %3118 = vmatpush.bf16.msra.mxu1 %v12363_v24  ;;  %v12372_v54 = vld [vmem:[#allocation17_spill] sm:$0xff] }
 0x79c   :  { %3131 = vmatpush.bf16.msra.mxu2 %v12364_v63  ;;  %3144 = vmatpush.bf16.msra.mxu3 %v12365_v22  ;;  %v1280_v24 = vadd.f32 %v12373_v4, %v12372_v54 }
 0x7da   :  { %v10108_v7 = vpop.f32.mrf.mxu0  ;;  %v10110_v17 = vpop.f32.mrf.mxu1 }
 0x7db   :  { %12366 = vst [vmem:[#allocation32_spill] sm:$0xff] %v10108_v7 }
 0x7dc   :  { %12367 = vst [vmem:[#allocation53_spill] sm:$0xff] %v10110_v17 }
 0x7e1   :  { %v10112_v42 = vpop.f32.mrf.mxu2  ;;  %v10114_v43 = vpop.f32.mrf.mxu3 }
 0x7e2   :  { %12368 = vst [vmem:[#allocation54_spill] sm:$0xff] %v10112_v42  ;;  %v2869_v12 = vpop.f32.mrf.mxu0  ;;  %v2882_v26 = vpop.f32.mrf.mxu1  ;;  %v12374_v42 = vld [vmem:[#allocation31_spill] sm:$0xff] }
 0x7e3   :  { %12369 = vst [vmem:[#allocation55_spill] sm:$0xff] %v10114_v43  ;;  %v1293_v43 = vadd.f32 %v12375_v20, %v12374_v42 }
 0x7e9   :  { %v2895_v25 = vpop.f32.mrf.mxu2  ;;  %v2908_v63 = vpop.f32.mrf.mxu3 }
 0x7ea   :  { %v2927_v10 = vpop.f32.mrf.mxu0  ;;  %v2940_v22 = vpop.f32.mrf.mxu1 }
 0x7eb   :  { %v2970_v19 = vadd.f32 %v2927_v10, %v1267_v52  ;;  %v2971_v7 = vadd.f32 %v2940_v22, %v1280_v24  ;;  %v12376_v52 = vld [vmem:[#allocation49_spill] sm:$0xff]  ;;  %v12377_v22 = vld [vmem:[#allocation60_spill] sm:$0xff] }
 0x7ec   :  { %v1306_v20 = vadd.f32 %v12377_v22, %v12376_v52 }
 0x7ed   :  { %v7368_v62 = vmul.f32 -1.442695, %v2970_v19  ;;  %v7369_v17 = vmul.f32 -1.442695, %v2971_v7 }
 0x7ef   :  { %8275 = vpow2.f32 %v7368_v62 }
 0x7f0   :  { %8277 = vpow2.f32 %v7369_v17 }
 0x7f1   :  { %v2953_v12 = vpop.f32.mrf.mxu2  ;;  %v2966_v26 = vpop.f32.mrf.mxu3 }
 0x7f2   :  { %v2972_v14 = vadd.f32 %v2953_v12, %v1293_v43  ;;  %v2929_v11 = vpop.f32.mrf.mxu0  ;;  %v2942_v28 = vpop.f32.mrf.mxu1  ;;  %v2973_v24 = vadd.f32 %v2966_v26, %v1306_v20 }
 0x7f4   :  { %v7370_v5 = vmul.f32 -1.442695, %v2972_v14 }
 0x7f5   :  { %v8276_v4 = vpop.eup %8275 }
 0x7f6   :  { %v8278_v25 = vpop.eup %8277  ;;  %v2983_v63 = vadd.f32 1.0, %v8276_v4  ;;  %8279 = vpow2.f32 %v7370_v5 }
 0x7f7   :  { %v2984_v54 = vadd.f32 1.0, %v8278_v25 }
 0x7f8   :  { %8281 = vrcp.f32 %v2983_v63  ;;  %v2997_v4 = vand.u32 2147483648, %v2983_v63  ;;  %vm2991_vm14 = vweird.f32 %v2983_v63 }
 0x7f9   :  { %8283 = vrcp.f32 %v2984_v54  ;;  %v2955_v19 = vpop.f32.mrf.mxu2  ;;  %v2968_v10 = vpop.f32.mrf.mxu3  ;;  %v3012_v5 = vand.u32 2147483648, %v2984_v54  ;;  %v3010_v42 = vand.u32 2147483647, %v2984_v54  ;;  %vm3006_vm15 = vweird.f32 %v2984_v54 }
 0x7fa   :  { %v2995_v19 = vand.u32 2147483647, %v2983_v63 }
 0x7fb   :  { %vm3011_vm3 = vcmp.eq.f32.partialorder %v3010_v42, 8.507059e+37 }
 0x7fc   :  { %v8280_v62 = vpop.eup %8279  ;;  %vm2996_vm2 = vcmp.eq.f32.partialorder %v2995_v19, 8.507059e+37 }
 0x7fd   :  { %v2985_v7 = vadd.f32 1.0, %v8280_v62  ;;  %v2998_v62 = vor.u32 1.1754944e-38, %v2997_v4 }
 0x7fe   :  { %v8282_v17 = vpop.eup %8281 }
 0x7ff   :  { %v8284_v43 = vpop.eup %8283  ;;  %v2987_v12 = vmul.f32 %v8282_v17, %v2983_v63  ;;  %8285 = vrcp.f32 %v2985_v7  ;;  %vm2992_vm12 = vweird.f32 %v8282_v17  ;;  %v3027_v4 = vand.u32 2147483648, %v2985_v7 }
 0x800   :  { %v3002_v14 = vmul.f32 %v8284_v43, %v2984_v54  ;;  %8287 = vtanh.f32 %v2973_v24  ;;  %vm3007_vm13 = vweird.f32 %v8284_v43  ;;  %vm2993_vm0 = vmor %vm2991_vm14, %vm2992_vm12  ;;  %vm3021_vm5 = vweird.f32 %v2985_v7 }
 0x801   :  { %v2988_v28 = vsub.f32 1.0, %v2987_v12  ;;  %vm3008_vm1 = vmor %vm3006_vm15, %vm3007_vm13  ;;  %v3013_v12 = vor.u32 1.1754944e-38, %v3012_v5  ;;  %v3028_v19 = vor.u32 1.1754944e-38, %v3027_v4  ;;  %v12395_v4 = vld [vmem:[#allocation11_spill] sm:$0xff] }
 0x802   :  { %v3003_v11 = vsub.f32 1.0, %v3002_v14 }
 0x803   :  { %v2989_v25 = vmul.f32 %v8282_v17, %v2988_v28 }
 0x804   :  { %v3004_v10 = vmul.f32 %v8284_v43, %v3003_v11 }
 0x805   :  { %v8286_v27 = vpop.eup %8285  ;;  %v2990_v22 = vadd.f32 %v8282_v17, %v2989_v25 }
 0x806   :  { %v3017_v26 = vmul.f32 %v8286_v27, %v2985_v7  ;;  %v3005_v20 = vadd.f32 %v8284_v43, %v3004_v10  ;;  %v8288_v24 = vpop.eup %8287  ;;  %vm3022_vm4 = vweird.f32 %v8286_v27 }
 0x807   :  { %v2994_v14 = vsel %vm2993_vm0, %v8282_v17, %v2990_v22  ;;  %v3025_v17 = vand.u32 2147483647, %v2985_v7  ;;  %vm3023_vm6 = vmor %vm3021_vm5, %vm3022_vm4  ;;  %v12383_v7 = vld [vmem:[#allocation38_spill] sm:$0xff]  ;;  %v12384_v22 = vld [vmem:[#allocation39_spill] sm:$0xff] }
 0x808   :  { %v3018_v52 = vsub.f32 1.0, %v3017_v26  ;;  %v2999_v28 = vsel %vm2996_vm2, %v2998_v62, %v2994_v14  ;;  %v3009_v40 = vsel %vm3008_vm1, %v8284_v43, %v3005_v20  ;;  %v12385_v26 = vld [vmem:[#allocation40_spill] sm:$0xff]  ;;  %v12386_v62 = vld [vmem:[#allocation41_spill] sm:$0xff]  ;;  %v12387_v20 = vld [vmem:[#allocation42_spill] sm:$0xff] }
 0x809   :  { %v3014_v11 = vsel %vm3011_vm3, %v3013_v12, %v3009_v40  ;;  %v3033_v13 = vmul.f32 %v8288_v24, %v2999_v28  ;;  %vm3026_vm7 = vcmp.eq.f32.partialorder %v3025_v17, 8.507059e+37  ;;  %v12388_v12 = vld [vmem:[#allocation43_spill] sm:$0xff]  ;;  %v12389_v14 = vld [vmem:[#allocation44_spill] sm:$0xff]  ;;  %v12390_v24 = vld [vmem:[#allocation45_spill] sm:$0xff] }
 0x80a   :  { %v3019_v1 = vmul.f32 %v8286_v27, %v3018_v52  ;;  %v3032_v25 = vmul.f32 %v3014_v11, %v10041_v33  ;;  %v12378_v33 = vld [vmem:[#allocation33_spill] sm:$0xff]  ;;  %v12391_v28 = vld [vmem:[#allocation46_spill] sm:$0xff]  ;;  %v12392_v11 = vld [vmem:[#allocation47_spill] sm:$0xff] }
 0x80b   :  { %v12382_v52 = vld [vmem:[#allocation37_spill] sm:$0xff] }
 0x80c   :  { %v10125_v63 = vadd.f32 %v3033_v13, %v3032_v25  ;;  %v3020_v54 = vadd.f32 %v8286_v27, %v3019_v1  ;;  %v12379_v1 = vld [vmem:[#allocation34_spill] sm:$0xff]  ;;  %v12380_v13 = vld [vmem:[#allocation35_spill] sm:$0xff]  ;;  %v12393_v25 = vld [vmem:[#allocation48_spill] sm:$0xff] }
 0x80d   :  { %v12396_v17 = vld [vmem:[#allocation13_spill] sm:$0xff] }
 0x80e   :  { %8289 = vtanh.f32 %v10125_v63  ;;  %v3024_v5 = vsel %vm3023_vm6, %v8286_v27, %v3020_v54  ;;  %v12381_v27 = vld [vmem:[#allocation36_spill] sm:$0xff]  ;;  %v12394_v54 = vld [vmem:[#allocation10_spill] sm:$0xff] }
 0x80f   :  { %v3029_v42 = vsel %vm3026_vm7, %v3028_v19, %v3024_v5  ;;  %v12397_v5 = vld [vmem:[#allocation14_spill] sm:$0xff]  ;;  %v12398_v19 = vld [vmem:[#allocation12_spill] sm:$0xff] }
 0x814   :  { %v8290_v43 = vpop.eup %8289 }
 0x815   :  { %v3036_v40 = vmul.f32 %v8290_v43, %v3029_v42  ;;  %v12399_v43 = vld [vmem:[#allocation15_spill] sm:$0xff]  ;;  %v12400_v42 = vld [vmem:[#allocation18_spill] sm:$0xff] }
 0x817   :  { %v3037_v10 = vpack.c.bf16 %v3036_v40, %v3036_v40  ;;  %v12401_v40 = vld [vmem:[#allocation26_spill] sm:$0xff] }
 0x819   :  { %3046 = vmatmul.bf16.vlgmr.msrb.gmra.mxu0 %v3037_v10  ;;  %3059 = vmatmul.bf16.vlgmr.msrb.gmra.mxu1 %v3037_v10 }
 0x81a   :  { %3072 = vmatmul.bf16.vlgmr.msrb.gmra.mxu2 %v3037_v10  ;;  %3085 = vmatmul.bf16.vlgmr.msrb.gmra.mxu3 %v3037_v10 }
 0x81b   :  { %3218 = vmatpush.bf16.msrb.mxu0 %v9589_v23  ;;  %3231 = vmatpush.bf16.msrb.mxu1 %v9591_v35 }
 0x81c   :  { %3244 = vmatpush.bf16.msrb.mxu2 %v9593_v36  ;;  %3257 = vmatpush.bf16.msrb.mxu3 %v9596_v47 }
 0x81f   :  { %3219 = vmatpush.bf16.msrb.mxu0 %v9603_v60  ;;  %3232 = vmatpush.bf16.msrb.mxu1 %v9609_v29 }
 0x820   :  { %3245 = vmatpush.bf16.msrb.mxu2 %v9611_v38  ;;  %3258 = vmatpush.bf16.msrb.mxu3 %v9614_v16 }
 0x823   :  { %3220 = vmatpush.bf16.msrb.mxu0 %v9619_v30  ;;  %3233 = vmatpush.bf16.msrb.mxu1 %v9625_v34 }
 0x824   :  { %3246 = vmatpush.bf16.msrb.mxu2 %v9627_v2  ;;  %3259 = vmatpush.bf16.msrb.mxu3 %v9630_v8 }
 0x827   :  { %3221 = vmatpush.bf16.msrb.mxu0 %v9635_v53  ;;  %3234 = vmatpush.bf16.msrb.mxu1 %v9639_v32 }
 0x828   :  { %3247 = vmatpush.bf16.msrb.mxu2 %v9641_v58  ;;  %3260 = vmatpush.bf16.msrb.mxu3 %v9649_v31 }
 0x829   :  { %3106 = vmatmul.bf16.vlgmr.msra.gmra.mxu0 %v3037_v10  ;;  %3119 = vmatmul.bf16.vlgmr.msra.gmra.mxu1 %v3037_v10 }
 0x82a   :  { %3132 = vmatmul.bf16.vlgmr.msra.gmra.mxu2 %v3037_v10  ;;  %3145 = vmatmul.bf16.vlgmr.msra.gmra.mxu3 %v3037_v10  ;;  %v12402_v10 = vld [vmem:[#allocation29_spill] sm:$0xff] }
 0x82b   :  { %3222 = vmatpush.bf16.msrb.mxu0 %v9656_v55  ;;  %3235 = vmatpush.bf16.msrb.mxu1 %v9658_v56 }
 0x82c   :  { %3248 = vmatpush.bf16.msrb.mxu2 %v9660_v9  ;;  %3261 = vmatpush.bf16.msrb.mxu3 %v9667_v57 }
 0x82f   :  { %3223 = vmatpush.bf16.msrb.mxu0 %v9669_v44  ;;  %3236 = vmatpush.bf16.msrb.mxu1 %v9672_v18 }
 0x830   :  { %3249 = vmatpush.bf16.msrb.mxu2 %v9675_v49  ;;  %3262 = vmatpush.bf16.msrb.mxu3 %v9677_v41 }
 0x833   :  { %3224 = vmatpush.bf16.msrb.mxu0 %v9680_v61  ;;  %3237 = vmatpush.bf16.msrb.mxu1 %v9684_v48 }
 0x834   :  { %3250 = vmatpush.bf16.msrb.mxu2 %v9686_v51  ;;  %3263 = vmatpush.bf16.msrb.mxu3 %v9689_v45 }
 0x837   :  { %3225 = vmatpush.bf16.msrb.mxu0 %v9703_v0  ;;  %3238 = vmatpush.bf16.msrb.mxu1 %v9705_v6 }
 0x838   :  { %3251 = vmatpush.bf16.msrb.mxu2 %v9707_v37  ;;  %3264 = vmatpush.bf16.msrb.mxu3 %v9712_v21 }
 0x83b   :  { %3278 = vmatpush.bf16.msra.mxu0 %v9733_v39  ;;  %3291 = vmatpush.bf16.msra.mxu1 %v9735_v46 }
 0x83c   :  { %3304 = vmatpush.bf16.msra.mxu2 %v9737_v3  ;;  %3317 = vmatpush.bf16.msra.mxu3 %v9739_v50 }
 0x83f   :  { %3279 = vmatpush.bf16.msra.mxu0 %v9748_v59  ;;  %3292 = vmatpush.bf16.msra.mxu1 %v12301_v15 }
 0x840   :  { %3305 = vmatpush.bf16.msra.mxu2 %v12378_v33  ;;  %3318 = vmatpush.bf16.msra.mxu3 %v12379_v1 }
 0x843   :  { %3280 = vmatpush.bf16.msra.mxu0 %v12380_v13  ;;  %3293 = vmatpush.bf16.msra.mxu1 %v12381_v27 }
 0x844   :  { %3306 = vmatpush.bf16.msra.mxu2 %v12382_v52  ;;  %3319 = vmatpush.bf16.msra.mxu3 %v12383_v7 }
 0x847   :  { %3281 = vmatpush.bf16.msra.mxu0 %v12384_v22  ;;  %3294 = vmatpush.bf16.msra.mxu1 %v12385_v26  ;;  %v12413_v22 = vld [vmem:[#allocation63_spill] sm:$0xff] }
 0x848   :  { %3307 = vmatpush.bf16.msra.mxu2 %v12386_v62  ;;  %3320 = vmatpush.bf16.msra.mxu3 %v12387_v20 }
 0x84b   :  { %3282 = vmatpush.bf16.msra.mxu0 %v12388_v12  ;;  %3295 = vmatpush.bf16.msra.mxu1 %v12389_v14  ;;  %v12411_v14 = vld [vmem:[#allocation62_spill] sm:$0xff] }
 0x84c   :  { %3308 = vmatpush.bf16.msra.mxu2 %v12390_v24  ;;  %3321 = vmatpush.bf16.msra.mxu3 %v12391_v28  ;;  %v12408_v28 = vld [vmem:[#allocation16_spill] sm:$0xff] }
 0x84f   :  { %3283 = vmatpush.bf16.msra.mxu0 %v12392_v11  ;;  %3296 = vmatpush.bf16.msra.mxu1 %v12393_v25  ;;  %v12403_v11 = vld [vmem:[#allocation65_spill] sm:$0xff] }
 0x850   :  { %3309 = vmatpush.bf16.msra.mxu2 %v12394_v54  ;;  %3322 = vmatpush.bf16.msra.mxu3 %v12395_v4 }
 0x853   :  { %3284 = vmatpush.bf16.msra.mxu0 %v12396_v17  ;;  %3297 = vmatpush.bf16.msra.mxu1 %v12397_v5 }
 0x854   :  { %3310 = vmatpush.bf16.msra.mxu2 %v12398_v19  ;;  %3323 = vmatpush.bf16.msra.mxu3 %v12399_v43  ;;  %v12409_v43 = vld [vmem:[#allocation61_spill] sm:$0xff] }
 0x855   :  { %v1447_v24 = vadd.f32 %v12409_v43, %v12408_v28 }
 0x857   :  { %3285 = vmatpush.bf16.msra.mxu0 %v12400_v42  ;;  %3298 = vmatpush.bf16.msra.mxu1 %v12401_v40  ;;  %v12410_v42 = vld [vmem:[#allocation17_spill] sm:$0xff] }
 0x858   :  { %3311 = vmatpush.bf16.msra.mxu2 %v12402_v10  ;;  %3324 = vmatpush.bf16.msra.mxu3 %v12403_v11  ;;  %v1460_v40 = vadd.f32 %v12411_v14, %v12410_v42 }
 0x896   :  { %v10192_v25 = vpop.f32.mrf.mxu0  ;;  %v10194_v54 = vpop.f32.mrf.mxu1 }
 0x897   :  { %12404 = vst [vmem:[#allocation56_spill] sm:$0xff] %v10192_v25 }
 0x898   :  { %12405 = vst [vmem:[#allocation57_spill] sm:$0xff] %v10194_v54 }
 0x89d   :  { %v10196_v4 = vpop.f32.mrf.mxu2  ;;  %v10198_v17 = vpop.f32.mrf.mxu3 }
 0x89e   :  { %12406 = vst [vmem:[#allocation58_spill] sm:$0xff] %v10196_v4  ;;  %v3049_v5 = vpop.f32.mrf.mxu0  ;;  %v3062_v19 = vpop.f32.mrf.mxu1  ;;  %v12412_v4 = vld [vmem:[#allocation31_spill] sm:$0xff] }
 0x89f   :  { %12407 = vst [vmem:[#allocation59_spill] sm:$0xff] %v10198_v17  ;;  %v1473_v17 = vadd.f32 %v12413_v22, %v12412_v4 }
 0x8a5   :  { %v3075_v12 = vpop.f32.mrf.mxu2  ;;  %v3088_v10 = vpop.f32.mrf.mxu3 }
 0x8a6   :  { %v3107_v20 = vpop.f32.mrf.mxu0  ;;  %v3120_v11 = vpop.f32.mrf.mxu1 }
 0x8a7   :  { %v3150_v62 = vadd.f32 %v3107_v20, %v1447_v24  ;;  %v3151_v25 = vadd.f32 %v3120_v11, %v1460_v40  ;;  %v12414_v24 = vld [vmem:[#allocation49_spill] sm:$0xff]  ;;  %v12415_v11 = vld [vmem:[#allocation64_spill] sm:$0xff] }
 0x8a8   :  { %v1486_v22 = vadd.f32 %v12415_v11, %v12414_v24 }
 0x8a9   :  { %v7371_v26 = vmul.f32 -1.442695, %v3150_v62  ;;  %v7372_v54 = vmul.f32 -1.442695, %v3151_v25 }
 0x8ab   :  { %8291 = vpow2.f32 %v7371_v26 }
 0x8ac   :  { %8293 = vpow2.f32 %v7372_v54 }
 0x8ad   :  { %v3133_v5 = vpop.f32.mrf.mxu2  ;;  %v3146_v19 = vpop.f32.mrf.mxu3 }
 0x8ae   :  { %v3152_v7 = vadd.f32 %v3133_v5, %v1473_v17  ;;  %v3109_v43 = vpop.f32.mrf.mxu0  ;;  %v3122_v28 = vpop.f32.mrf.mxu1  ;;  %v3153_v40 = vadd.f32 %v3146_v19, %v1486_v22 }
 0x8b0   :  { %v7373_v52 = vmul.f32 -1.442695, %v3152_v7 }
 0x8b1   :  { %v8292_v14 = vpop.eup %8291 }
 0x8b2   :  { %v8294_v12 = vpop.eup %8293  ;;  %v3163_v10 = vadd.f32 1.0, %v8292_v14  ;;  %8295 = vpow2.f32 %v7373_v52 }
 0x8b3   :  { %v3164_v42 = vadd.f32 1.0, %v8294_v12 }
 0x8b4   :  { %8297 = vrcp.f32 %v3163_v10  ;;  %v3177_v14 = vand.u32 2147483648, %v3163_v10  ;;  %vm3171_vm10 = vweird.f32 %v3163_v10 }
 0x8b5   :  { %8299 = vrcp.f32 %v3164_v42  ;;  %v3135_v62 = vpop.f32.mrf.mxu2  ;;  %v3148_v20 = vpop.f32.mrf.mxu3  ;;  %v3192_v52 = vand.u32 2147483648, %v3164_v42  ;;  %v3190_v4 = vand.u32 2147483647, %v3164_v42  ;;  %vm3186_vm11 = vweird.f32 %v3164_v42 }
 0x8b6   :  { %v3175_v62 = vand.u32 2147483647, %v3163_v10 }
 0x8b7   :  { %vm3191_vm15 = vcmp.eq.f32.partialorder %v3190_v4, 8.507059e+37 }
 0x8b8   :  { %v8296_v26 = vpop.eup %8295  ;;  %vm3176_vm14 = vcmp.eq.f32.partialorder %v3175_v62, 8.507059e+37 }
 0x8b9   :  { %v3165_v25 = vadd.f32 1.0, %v8296_v26  ;;  %v3178_v26 = vor.u32 1.1754944e-38, %v3177_v14 }
 0x8ba   :  { %v8298_v54 = vpop.eup %8297 }
 0x8bb   :  { %v8300_v17 = vpop.eup %8299  ;;  %v3167_v5 = vmul.f32 %v8298_v54, %v3163_v10  ;;  %8301 = vrcp.f32 %v3165_v25  ;;  %vm3172_vm8 = vweird.f32 %v8298_v54  ;;  %v3207_v14 = vand.u32 2147483648, %v3165_v25 }
 0x8bc   :  { %v3182_v7 = vmul.f32 %v8300_v17, %v3164_v42  ;;  %8303 = vtanh.f32 %v3153_v40  ;;  %vm3187_vm9 = vweird.f32 %v8300_v17  ;;  %vm3173_vm12 = vmor %vm3171_vm10, %vm3172_vm8  ;;  %vm3201_vm1 = vweird.f32 %v3165_v25 }
 0x8bd   :  { %v3168_v28 = vsub.f32 1.0, %v3167_v5  ;;  %vm3188_vm13 = vmor %vm3186_vm11, %vm3187_vm9  ;;  %v3193_v5 = vor.u32 1.1754944e-38, %v3192_v52  ;;  %v3208_v62 = vor.u32 1.1754944e-38, %v3207_v14  ;;  %v12433_v14 = vld [vmem:[#allocation11_spill] sm:$0xff] }
 0x8be   :  { %v3183_v43 = vsub.f32 1.0, %v3182_v7 }
 0x8bf   :  { %v3169_v12 = vmul.f32 %v8298_v54, %v3168_v28 }
 0x8c0   :  { %v3184_v20 = vmul.f32 %v8300_v17, %v3183_v43 }
 0x8c1   :  { %v8302_v27 = vpop.eup %8301  ;;  %v3170_v11 = vadd.f32 %v8298_v54, %v3169_v12 }
 0x8c2   :  { %v3197_v19 = vmul.f32 %v8302_v27, %v3165_v25  ;;  %v3185_v22 = vadd.f32 %v8300_v17, %v3184_v20  ;;  %v8304_v40 = vpop.eup %8303  ;;  %vm3202_vm0 = vweird.f32 %v8302_v27 }
 0x8c3   :  { %v3174_v7 = vsel %vm3173_vm12, %v8298_v54, %v3170_v11  ;;  %v3205_v54 = vand.u32 2147483647, %v3165_v25  ;;  %vm3203_vm2 = vmor %vm3201_vm1, %vm3202_vm0  ;;  %v12421_v25 = vld [vmem:[#allocation38_spill] sm:$0xff]  ;;  %v12422_v11 = vld [vmem:[#allocation39_spill] sm:$0xff] }
 0x8c4   :  { %v3198_v24 = vsub.f32 1.0, %v3197_v19  ;;  %v3179_v28 = vsel %vm3176_vm14, %v3178_v26, %v3174_v7  ;;  %v3189_v13 = vsel %vm3188_vm13, %v8300_v17, %v3185_v22  ;;  %v12423_v19 = vld [vmem:[#allocation40_spill] sm:$0xff]  ;;  %v12424_v26 = vld [vmem:[#allocation41_spill] sm:$0xff]  ;;  %v12425_v22 = vld [vmem:[#allocation42_spill] sm:$0xff] }
 0x8c5   :  { %v3194_v43 = vsel %vm3191_vm15, %v3193_v5, %v3189_v13  ;;  %v3213_v1 = vmul.f32 %v8304_v40, %v3179_v28  ;;  %vm3206_vm3 = vcmp.eq.f32.partialorder %v3205_v54, 8.507059e+37  ;;  %v12426_v5 = vld [vmem:[#allocation43_spill] sm:$0xff]  ;;  %v12427_v7 = vld [vmem:[#allocation44_spill] sm:$0xff]  ;;  %v12428_v40 = vld [vmem:[#allocation45_spill] sm:$0xff] }
 0x8c6   :  { %v3199_v33 = vmul.f32 %v8302_v27, %v3198_v24  ;;  %v3212_v12 = vmul.f32 %v3194_v43, %v10125_v63  ;;  %v12416_v63 = vld [vmem:[#allocation33_spill] sm:$0xff]  ;;  %v12429_v28 = vld [vmem:[#allocation46_spill] sm:$0xff]  ;;  %v12430_v43 = vld [vmem:[#allocation47_spill] sm:$0xff] }
 0x8c7   :  { %v12420_v24 = vld [vmem:[#allocation37_spill] sm:$0xff] }
 0x8c8   :  { %v10209_v10 = vadd.f32 %v3213_v1, %v3212_v12  ;;  %v3200_v42 = vadd.f32 %v8302_v27, %v3199_v33  ;;  %v12417_v33 = vld [vmem:[#allocation34_spill] sm:$0xff]  ;;  %v12418_v1 = vld [vmem:[#allocation35_spill] sm:$0xff]  ;;  %v12431_v12 = vld [vmem:[#allocation48_spill] sm:$0xff] }
 0x8c9   :  { %v12434_v54 = vld [vmem:[#allocation13_spill] sm:$0xff] }
 0x8ca   :  { %8305 = vtanh.f32 %v10209_v10  ;;  %v3204_v52 = vsel %vm3203_vm2, %v8302_v27, %v3200_v42  ;;  %v12419_v27 = vld [vmem:[#allocation36_spill] sm:$0xff]  ;;  %v12432_v42 = vld [vmem:[#allocation10_spill] sm:$0xff] }
 0x8cb   :  { %v3209_v4 = vsel %vm3206_vm3, %v3208_v62, %v3204_v52  ;;  %v12435_v52 = vld [vmem:[#allocation14_spill] sm:$0xff]  ;;  %v12436_v62 = vld [vmem:[#allocation12_spill] sm:$0xff] }
 0x8d0   :  { %v8306_v17 = vpop.eup %8305 }
 0x8d1   :  { %v3216_v13 = vmul.f32 %v8306_v17, %v3209_v4  ;;  %v12437_v17 = vld [vmem:[#allocation15_spill] sm:$0xff]  ;;  %v12438_v4 = vld [vmem:[#allocation18_spill] sm:$0xff] }
 0x8d3   :  { %v3217_v20 = vpack.c.bf16 %v3216_v13, %v3216_v13  ;;  %v12439_v13 = vld [vmem:[#allocation26_spill] sm:$0xff] }
 0x8d5   :  { %3226 = vmatmul.bf16.vlgmr.msrb.gmra.mxu0 %v3217_v20  ;;  %3239 = vmatmul.bf16.vlgmr.msrb.gmra.mxu1 %v3217_v20 }
 0x8d6   :  { %3252 = vmatmul.bf16.vlgmr.msrb.gmra.mxu2 %v3217_v20  ;;  %3265 = vmatmul.bf16.vlgmr.msrb.gmra.mxu3 %v3217_v20 }
 0x8d7   :  { %3398 = vmatpush.bf16.msrb.mxu0 %v9589_v23  ;;  %3411 = vmatpush.bf16.msrb.mxu1 %v9591_v35 }
 0x8d8   :  { %3424 = vmatpush.bf16.msrb.mxu2 %v9593_v36  ;;  %3437 = vmatpush.bf16.msrb.mxu3 %v9596_v47 }
 0x8db   :  { %3399 = vmatpush.bf16.msrb.mxu0 %v9603_v60  ;;  %3412 = vmatpush.bf16.msrb.mxu1 %v9609_v29 }
 0x8dc   :  { %3425 = vmatpush.bf16.msrb.mxu2 %v9611_v38  ;;  %3438 = vmatpush.bf16.msrb.mxu3 %v9614_v16 }
 0x8df   :  { %3400 = vmatpush.bf16.msrb.mxu0 %v9619_v30  ;;  %3413 = vmatpush.bf16.msrb.mxu1 %v9625_v34 }
 0x8e0   :  { %3426 = vmatpush.bf16.msrb.mxu2 %v9627_v2  ;;  %3439 = vmatpush.bf16.msrb.mxu3 %v9630_v8 }
 0x8e3   :  { %3401 = vmatpush.bf16.msrb.mxu0 %v9635_v53  ;;  %3414 = vmatpush.bf16.msrb.mxu1 %v9639_v32 }
 0x8e4   :  { %3427 = vmatpush.bf16.msrb.mxu2 %v9641_v58  ;;  %3440 = vmatpush.bf16.msrb.mxu3 %v9649_v31 }
 0x8e5   :  { %3286 = vmatmul.bf16.vlgmr.msra.gmra.mxu0 %v3217_v20  ;;  %3299 = vmatmul.bf16.vlgmr.msra.gmra.mxu1 %v3217_v20 }
 0x8e6   :  { %3312 = vmatmul.bf16.vlgmr.msra.gmra.mxu2 %v3217_v20  ;;  %3325 = vmatmul.bf16.vlgmr.msra.gmra.mxu3 %v3217_v20  ;;  %v12440_v20 = vld [vmem:[#allocation29_spill] sm:$0xff] }
 0x8e7   :  { %3402 = vmatpush.bf16.msrb.mxu0 %v9656_v55  ;;  %3415 = vmatpush.bf16.msrb.mxu1 %v9658_v56 }
 0x8e8   :  { %3428 = vmatpush.bf16.msrb.mxu2 %v9660_v9  ;;  %3441 = vmatpush.bf16.msrb.mxu3 %v9667_v57 }
 0x8eb   :  { %3403 = vmatpush.bf16.msrb.mxu0 %v9669_v44  ;;  %3416 = vmatpush.bf16.msrb.mxu1 %v9672_v18 }
 0x8ec   :  { %3429 = vmatpush.bf16.msrb.mxu2 %v9675_v49  ;;  %3442 = vmatpush.bf16.msrb.mxu3 %v9677_v41 }
 0x8ef   :  { %3404 = vmatpush.bf16.msrb.mxu0 %v9680_v61  ;;  %3417 = vmatpush.bf16.msrb.mxu1 %v9684_v48 }
 0x8f0   :  { %3430 = vmatpush.bf16.msrb.mxu2 %v9686_v51  ;;  %3443 = vmatpush.bf16.msrb.mxu3 %v9689_v45 }
 0x8f3   :  { %3405 = vmatpush.bf16.msrb.mxu0 %v9703_v0  ;;  %3418 = vmatpush.bf16.msrb.mxu1 %v9705_v6 }
 0x8f4   :  { %3431 = vmatpush.bf16.msrb.mxu2 %v9707_v37  ;;  %3444 = vmatpush.bf16.msrb.mxu3 %v9712_v21 }
 0x8f7   :  { %3458 = vmatpush.bf16.msra.mxu0 %v9733_v39  ;;  %3471 = vmatpush.bf16.msra.mxu1 %v9735_v46 }
 0x8f8   :  { %3484 = vmatpush.bf16.msra.mxu2 %v9737_v3  ;;  %3497 = vmatpush.bf16.msra.mxu3 %v9739_v50 }
 0x8fb   :  { %3459 = vmatpush.bf16.msra.mxu0 %v9748_v59  ;;  %3472 = vmatpush.bf16.msra.mxu1 %v12301_v15 }
 0x8fc   :  { %3485 = vmatpush.bf16.msra.mxu2 %v12416_v63  ;;  %3498 = vmatpush.bf16.msra.mxu3 %v12417_v33 }
 0x8ff   :  { %3460 = vmatpush.bf16.msra.mxu0 %v12418_v1  ;;  %3473 = vmatpush.bf16.msra.mxu1 %v12419_v27 }
 0x900   :  { %3486 = vmatpush.bf16.msra.mxu2 %v12420_v24  ;;  %3499 = vmatpush.bf16.msra.mxu3 %v12421_v25 }
 0x903   :  { %3461 = vmatpush.bf16.msra.mxu0 %v12422_v11  ;;  %3474 = vmatpush.bf16.msra.mxu1 %v12423_v19  ;;  %v12451_v11 = vld [vmem:[#allocation23_spill] sm:$0xff] }
 0x904   :  { %3487 = vmatpush.bf16.msra.mxu2 %v12424_v26  ;;  %3500 = vmatpush.bf16.msra.mxu3 %v12425_v22 }
 0x907   :  { %3462 = vmatpush.bf16.msra.mxu0 %v12426_v5  ;;  %3475 = vmatpush.bf16.msra.mxu1 %v12427_v7  ;;  %v12449_v7 = vld [vmem:[#allocation22_spill] sm:$0xff] }
 0x908   :  { %3488 = vmatpush.bf16.msra.mxu2 %v12428_v40  ;;  %3501 = vmatpush.bf16.msra.mxu3 %v12429_v28  ;;  %v12446_v28 = vld [vmem:[#allocation16_spill] sm:$0xff] }
 0x90b   :  { %3463 = vmatpush.bf16.msra.mxu0 %v12430_v43  ;;  %3476 = vmatpush.bf16.msra.mxu1 %v12431_v12  ;;  %v12441_v43 = vld [vmem:[#allocation65_spill] sm:$0xff] }
 0x90c   :  { %3489 = vmatpush.bf16.msra.mxu2 %v12432_v42  ;;  %3502 = vmatpush.bf16.msra.mxu3 %v12433_v14 }
 0x90f   :  { %3464 = vmatpush.bf16.msra.mxu0 %v12434_v54  ;;  %3477 = vmatpush.bf16.msra.mxu1 %v12435_v52 }
 0x910   :  { %3490 = vmatpush.bf16.msra.mxu2 %v12436_v62  ;;  %3503 = vmatpush.bf16.msra.mxu3 %v12437_v17  ;;  %v12447_v17 = vld [vmem:[#allocation21_spill] sm:$0xff] }
 0x911   :  { %v1627_v40 = vadd.f32 %v12447_v17, %v12446_v28 }
 0x913   :  { %3465 = vmatpush.bf16.msra.mxu0 %v12438_v4  ;;  %3478 = vmatpush.bf16.msra.mxu1 %v12439_v13  ;;  %v12448_v4 = vld [vmem:[#allocation17_spill] sm:$0xff] }
 0x914   :  { %3491 = vmatpush.bf16.msra.mxu2 %v12440_v20  ;;  %3504 = vmatpush.bf16.msra.mxu3 %v12441_v43  ;;  %v1640_v13 = vadd.f32 %v12449_v7, %v12448_v4 }
 0x952   :  { %v10276_v12 = vpop.f32.mrf.mxu0  ;;  %v10278_v42 = vpop.f32.mrf.mxu1 }
 0x953   :  { %12442 = vst [vmem:[#allocation60_spill] sm:$0xff] %v10276_v12 }
 0x954   :  { %12443 = vst [vmem:[#allocation61_spill] sm:$0xff] %v10278_v42 }
 0x959   :  { %v10280_v14 = vpop.f32.mrf.mxu2  ;;  %v10282_v54 = vpop.f32.mrf.mxu3 }
 0x95a   :  { %12444 = vst [vmem:[#allocation62_spill] sm:$0xff] %v10280_v14  ;;  %v3229_v52 = vpop.f32.mrf.mxu0  ;;  %v3242_v62 = vpop.f32.mrf.mxu1  ;;  %v12450_v14 = vld [vmem:[#allocation31_spill] sm:$0xff] }
 0x95b   :  { %12445 = vst [vmem:[#allocation63_spill] sm:$0xff] %v10282_v54  ;;  %v1653_v54 = vadd.f32 %v12451_v11, %v12450_v14 }
 0x961   :  { %v3255_v5 = vpop.f32.mrf.mxu2  ;;  %v3268_v20 = vpop.f32.mrf.mxu3 }
 0x962   :  { %v3287_v22 = vpop.f32.mrf.mxu0  ;;  %v3300_v43 = vpop.f32.mrf.mxu1 }
 0x963   :  { %v3330_v26 = vadd.f32 %v3287_v22, %v1627_v40  ;;  %v3331_v12 = vadd.f32 %v3300_v43, %v1640_v13  ;;  %v12452_v40 = vld [vmem:[#allocation49_spill] sm:$0xff]  ;;  %v12453_v43 = vld [vmem:[#allocation24_spill] sm:$0xff] }
 0x964   :  { %v1666_v11 = vadd.f32 %v12453_v43, %v12452_v40 }
 0x965   :  { %v7374_v19 = vmul.f32 -1.442695, %v3330_v26  ;;  %v7375_v42 = vmul.f32 -1.442695, %v3331_v12 }
 0x967   :  { %8307 = vpow2.f32 %v7374_v19 }
 0x968   :  { %8309 = vpow2.f32 %v7375_v42 }
 0x969   :  { %v3313_v52 = vpop.f32.mrf.mxu2  ;;  %v3326_v62 = vpop.f32.mrf.mxu3 }
 0x96a   :  { %v3332_v25 = vadd.f32 %v3313_v52, %v1653_v54  ;;  %v3289_v17 = vpop.f32.mrf.mxu0  ;;  %v3302_v28 = vpop.f32.mrf.mxu1  ;;  %v3333_v13 = vadd.f32 %v3326_v62, %v1666_v11 }
 0x96c   :  { %v7376_v24 = vmul.f32 -1.442695, %v3332_v25 }
 0x96d   :  { %v8308_v7 = vpop.eup %8307 }
 0x96e   :  { %v8310_v5 = vpop.eup %8309  ;;  %v3343_v20 = vadd.f32 1.0, %v8308_v7  ;;  %8311 = vpow2.f32 %v7376_v24 }
 0x96f   :  { %v3344_v4 = vadd.f32 1.0, %v8310_v5 }
 0x970   :  { %8313 = vrcp.f32 %v3343_v20  ;;  %v3357_v7 = vand.u32 2147483648, %v3343_v20  ;;  %vm3351_vm6 = vweird.f32 %v3343_v20 }
 0x971   :  { %8315 = vrcp.f32 %v3344_v4  ;;  %v3315_v26 = vpop.f32.mrf.mxu2  ;;  %v3328_v22 = vpop.f32.mrf.mxu3  ;;  %v3372_v24 = vand.u32 2147483648, %v3344_v4  ;;  %v3370_v14 = vand.u32 2147483647, %v3344_v4  ;;  %vm3366_vm7 = vweird.f32 %v3344_v4 }
 0x972   :  { %v3355_v26 = vand.u32 2147483647, %v3343_v20 }
 0x973   :  { %vm3371_vm11 = vcmp.eq.f32.partialorder %v3370_v14, 8.507059e+37 }
 0x974   :  { %v8312_v19 = vpop.eup %8311  ;;  %vm3356_vm10 = vcmp.eq.f32.partialorder %v3355_v26, 8.507059e+37 }
 0x975   :  { %v3345_v12 = vadd.f32 1.0, %v8312_v19  ;;  %v3358_v19 = vor.u32 1.1754944e-38, %v3357_v7 }
 0x976   :  { %v8314_v42 = vpop.eup %8313 }
 0x977   :  { %v8316_v54 = vpop.eup %8315  ;;  %v3347_v52 = vmul.f32 %v8314_v42, %v3343_v20  ;;  %8317 = vrcp.f32 %v3345_v12  ;;  %vm3352_vm4 = vweird.f32 %v8314_v42  ;;  %v3387_v7 = vand.u32 2147483648, %v3345_v12 }
 0x978   :  { %v3362_v25 = vmul.f32 %v8316_v54, %v3344_v4  ;;  %8319 = vtanh.f32 %v3333_v13  ;;  %vm3367_vm5 = vweird.f32 %v8316_v54  ;;  %vm3353_vm8 = vmor %vm3351_vm6, %vm3352_vm4  ;;  %vm3381_vm13 = vweird.f32 %v3345_v12 }
 0x979   :  { %v3348_v28 = vsub.f32 1.0, %v3347_v52  ;;  %vm3368_vm9 = vmor %vm3366_vm7, %vm3367_vm5  ;;  %v3373_v52 = vor.u32 1.1754944e-38, %v3372_v24  ;;  %v3388_v26 = vor.u32 1.1754944e-38, %v3387_v7  ;;  %v12477_v7 = vld [vmem:[#allocation26_spill] sm:$0xff] }
 0x97a   :  { %v3363_v17 = vsub.f32 1.0, %v3362_v25 }
 0x97b   :  { %v3349_v5 = vmul.f32 %v8314_v42, %v3348_v28 }
 0x97c   :  { %v3364_v22 = vmul.f32 %v8316_v54, %v3363_v17 }
 0x97d   :  { %v8318_v27 = vpop.eup %8317  ;;  %v3350_v43 = vadd.f32 %v8314_v42, %v3349_v5 }
 0x97e   :  { %v3377_v62 = vmul.f32 %v8318_v27, %v3345_v12  ;;  %v3365_v11 = vadd.f32 %v8316_v54, %v3364_v22  ;;  %v8320_v13 = vpop.eup %8319  ;;  %vm3382_vm12 = vweird.f32 %v8318_v27 }
 0x97f   :  { %v3354_v25 = vsel %vm3353_vm8, %v8314_v42, %v3350_v43  ;;  %v3385_v42 = vand.u32 2147483647, %v3345_v12  ;;  %vm3383_vm14 = vmor %vm3381_vm13, %vm3382_vm12  ;;  %v12465_v12 = vld [vmem:[#allocation44_spill] sm:$0xff]  ;;  %v12466_v43 = vld [vmem:[#allocation45_spill] sm:$0xff] }
 0x980   :  { %v3378_v40 = vsub.f32 1.0, %v3377_v62  ;;  %v3359_v28 = vsel %vm3356_vm10, %v3358_v19, %v3354_v25  ;;  %v3369_v1 = vsel %vm3368_vm9, %v8316_v54, %v3365_v11  ;;  %v12467_v62 = vld [vmem:[#allocation46_spill] sm:$0xff]  ;;  %v12468_v19 = vld [vmem:[#allocation47_spill] sm:$0xff]  ;;  %v12469_v11 = vld [vmem:[#allocation48_spill] sm:$0xff] }
 0x981   :  { %v3374_v17 = vsel %vm3371_vm11, %v3373_v52, %v3369_v1  ;;  %v3393_v33 = vmul.f32 %v8320_v13, %v3359_v28  ;;  %vm3386_vm15 = vcmp.eq.f32.partialorder %v3385_v42, 8.507059e+37  ;;  %v12470_v52 = vld [vmem:[#allocation10_spill] sm:$0xff]  ;;  %v12471_v25 = vld [vmem:[#allocation11_spill] sm:$0xff]  ;;  %v12472_v13 = vld [vmem:[#allocation13_spill] sm:$0xff] }
 0x982   :  { %v3379_v63 = vmul.f32 %v8318_v27, %v3378_v40  ;;  %v3392_v5 = vmul.f32 %v3374_v17, %v10209_v10  ;;  %v12454_v10 = vld [vmem:[#allocation33_spill] sm:$0xff]  ;;  %v12473_v28 = vld [vmem:[#allocation14_spill] sm:$0xff]  ;;  %v12474_v17 = vld [vmem:[#allocation12_spill] sm:$0xff] }
 0x983   :  { %v12458_v40 = vld [vmem:[#allocation37_spill] sm:$0xff] }
 0x984   :  { %v10293_v20 = vadd.f32 %v3393_v33, %v3392_v5  ;;  %v3380_v4 = vadd.f32 %v8318_v27, %v3379_v63  ;;  %v12455_v63 = vld [vmem:[#allocation34_spill] sm:$0xff]  ;;  %v12456_v33 = vld [vmem:[#allocation35_spill] sm:$0xff]  ;;  %v12478_v42 = vld [vmem:[#allocation29_spill] sm:$0xff] }
 0x985   :  { %v12475_v5 = vld [vmem:[#allocation15_spill] sm:$0xff] }
 0x986   :  { %8321 = vtanh.f32 %v10293_v20  ;;  %v3384_v24 = vsel %vm3383_vm14, %v8318_v27, %v3380_v4  ;;  %v12457_v27 = vld [vmem:[#allocation36_spill] sm:$0xff]  ;;  %v12476_v4 = vld [vmem:[#allocation18_spill] sm:$0xff] }
 0x987   :  { %v3389_v14 = vsel %vm3386_vm15, %v3388_v26, %v3384_v24  ;;  %v12479_v24 = vld [vmem:[#allocation65_spill] sm:$0xff] }
 0x98c   :  { %v8322_v54 = vpop.eup %8321 }
 0x98d   :  { %v3396_v1 = vmul.f32 %v8322_v54, %v3389_v14 }
 0x98f   :  { %v3397_v22 = vpack.c.bf16 %v3396_v1, %v3396_v1 }
 0x991   :  { %3406 = vmatmul.bf16.vlgmr.msrb.gmra.mxu0 %v3397_v22  ;;  %3419 = vmatmul.bf16.vlgmr.msrb.gmra.mxu1 %v3397_v22 }
 0x992   :  { %3432 = vmatmul.bf16.vlgmr.msrb.gmra.mxu2 %v3397_v22  ;;  %3445 = vmatmul.bf16.vlgmr.msrb.gmra.mxu3 %v3397_v22 }
 0x993   :  { %3578 = vmatpush.bf16.msrb.mxu0 %v9589_v23  ;;  %3591 = vmatpush.bf16.msrb.mxu1 %v9591_v35 }
 0x994   :  { %3604 = vmatpush.bf16.msrb.mxu2 %v9593_v36  ;;  %3617 = vmatpush.bf16.msrb.mxu3 %v9596_v47 }
 0x997   :  { %3579 = vmatpush.bf16.msrb.mxu0 %v9603_v60  ;;  %3592 = vmatpush.bf16.msrb.mxu1 %v9609_v29 }
 0x998   :  { %3605 = vmatpush.bf16.msrb.mxu2 %v9611_v38  ;;  %3618 = vmatpush.bf16.msrb.mxu3 %v9614_v16 }
 0x99b   :  { %3580 = vmatpush.bf16.msrb.mxu0 %v9619_v30  ;;  %3593 = vmatpush.bf16.msrb.mxu1 %v9625_v34 }
 0x99c   :  { %3606 = vmatpush.bf16.msrb.mxu2 %v9627_v2  ;;  %3619 = vmatpush.bf16.msrb.mxu3 %v9630_v8 }
 0x99f   :  { %3581 = vmatpush.bf16.msrb.mxu0 %v9635_v53  ;;  %3594 = vmatpush.bf16.msrb.mxu1 %v9639_v32 }
 0x9a0   :  { %3607 = vmatpush.bf16.msrb.mxu2 %v9641_v58  ;;  %3620 = vmatpush.bf16.msrb.mxu3 %v9649_v31 }
 0x9a1   :  { %3466 = vmatmul.bf16.vlgmr.msra.gmra.mxu0 %v3397_v22  ;;  %3479 = vmatmul.bf16.vlgmr.msra.gmra.mxu1 %v3397_v22 }
 0x9a2   :  { %3492 = vmatmul.bf16.vlgmr.msra.gmra.mxu2 %v3397_v22  ;;  %3505 = vmatmul.bf16.vlgmr.msra.gmra.mxu3 %v3397_v22 }
 0x9a3   :  { %3582 = vmatpush.bf16.msrb.mxu0 %v9656_v55  ;;  %3595 = vmatpush.bf16.msrb.mxu1 %v9658_v56 }
 0x9a4   :  { %3608 = vmatpush.bf16.msrb.mxu2 %v9660_v9  ;;  %3621 = vmatpush.bf16.msrb.mxu3 %v9667_v57 }
 0x9a7   :  { %3583 = vmatpush.bf16.msrb.mxu0 %v9669_v44  ;;  %3596 = vmatpush.bf16.msrb.mxu1 %v9672_v18 }
 0x9a8   :  { %3609 = vmatpush.bf16.msrb.mxu2 %v9675_v49  ;;  %3622 = vmatpush.bf16.msrb.mxu3 %v9677_v41 }
 0x9ab   :  { %3584 = vmatpush.bf16.msrb.mxu0 %v9680_v61  ;;  %3597 = vmatpush.bf16.msrb.mxu1 %v9684_v48 }
 0x9ac   :  { %3610 = vmatpush.bf16.msrb.mxu2 %v9686_v51  ;;  %3623 = vmatpush.bf16.msrb.mxu3 %v9689_v45 }
 0x9af   :  { %3585 = vmatpush.bf16.msrb.mxu0 %v9703_v0  ;;  %3598 = vmatpush.bf16.msrb.mxu1 %v9705_v6 }
 0x9b0   :  { %3611 = vmatpush.bf16.msrb.mxu2 %v9707_v37  ;;  %3624 = vmatpush.bf16.msrb.mxu3 %v9712_v21 }
 0x9b3   :  { %3638 = vmatpush.bf16.msra.mxu0 %v9733_v39  ;;  %3651 = vmatpush.bf16.msra.mxu1 %v9735_v46  ;;  %v12459_v39 = vld [vmem:[#allocation38_spill] sm:$0xff]  ;;  %v12460_v46 = vld [vmem:[#allocation39_spill] sm:$0xff] }
 0x9b4   :  { %3664 = vmatpush.bf16.msra.mxu2 %v9737_v3  ;;  %3677 = vmatpush.bf16.msra.mxu3 %v9739_v50  ;;  %v12461_v3 = vld [vmem:[#allocation40_spill] sm:$0xff]  ;;  %v12462_v50 = vld [vmem:[#allocation41_spill] sm:$0xff] }
 0x9b7   :  { %3639 = vmatpush.bf16.msra.mxu0 %v9748_v59  ;;  %3652 = vmatpush.bf16.msra.mxu1 %v12301_v15  ;;  %v12463_v59 = vld [vmem:[#allocation42_spill] sm:$0xff]  ;;  %v12464_v15 = vld [vmem:[#allocation43_spill] sm:$0xff] }
 0x9b8   :  { %3665 = vmatpush.bf16.msra.mxu2 %v12454_v10  ;;  %3678 = vmatpush.bf16.msra.mxu3 %v12455_v63  ;;  %v12484_v63 = vld [vmem:[#allocation16_spill] sm:$0xff] }
 0x9bb   :  { %3640 = vmatpush.bf16.msra.mxu0 %v12456_v33  ;;  %3653 = vmatpush.bf16.msra.mxu1 %v12457_v27  ;;  %v12485_v33 = vld [vmem:[#allocation25_spill] sm:$0xff] }
 0x9bc   :  { %3666 = vmatpush.bf16.msra.mxu2 %v12458_v40  ;;  %3679 = vmatpush.bf16.msra.mxu3 %v12459_v39  ;;  %v1807_v27 = vadd.f32 %v12485_v33, %v12484_v63  ;;  %v12486_v40 = vld [vmem:[#allocation17_spill] sm:$0xff]  ;;  %v12487_v39 = vld [vmem:[#allocation27_spill] sm:$0xff] }
 0x9bf   :  { %3641 = vmatpush.bf16.msra.mxu0 %v12460_v46  ;;  %3654 = vmatpush.bf16.msra.mxu1 %v12461_v3  ;;  %v1820_v46 = vadd.f32 %v12487_v39, %v12486_v40 }
 0x9c0   :  { %3667 = vmatpush.bf16.msra.mxu2 %v12462_v50  ;;  %3680 = vmatpush.bf16.msra.mxu3 %v12463_v59 }
 0x9c3   :  { %3642 = vmatpush.bf16.msra.mxu0 %v12464_v15  ;;  %3655 = vmatpush.bf16.msra.mxu1 %v12465_v12 }
 0x9c4   :  { %3668 = vmatpush.bf16.msra.mxu2 %v12466_v43  ;;  %3681 = vmatpush.bf16.msra.mxu3 %v12467_v62 }
 0x9c7   :  { %3643 = vmatpush.bf16.msra.mxu0 %v12468_v19  ;;  %3656 = vmatpush.bf16.msra.mxu1 %v12469_v11  ;;  %v12488_v11 = vld [vmem:[#allocation31_spill] sm:$0xff] }
 0x9c8   :  { %3669 = vmatpush.bf16.msra.mxu2 %v12470_v52  ;;  %3682 = vmatpush.bf16.msra.mxu3 %v12471_v25  ;;  %v12489_v52 = vld [vmem:[#allocation28_spill] sm:$0xff] }
 0x9c9   :  { %v1833_v25 = vadd.f32 %v12489_v52, %v12488_v11 }
 0x9cb   :  { %3644 = vmatpush.bf16.msra.mxu0 %v12472_v13  ;;  %3657 = vmatpush.bf16.msra.mxu1 %v12473_v28 }
 0x9cc   :  { %3670 = vmatpush.bf16.msra.mxu2 %v12474_v17  ;;  %3683 = vmatpush.bf16.msra.mxu3 %v12475_v5 }
 0x9cf   :  { %3645 = vmatpush.bf16.msra.mxu0 %v12476_v4  ;;  %3658 = vmatpush.bf16.msra.mxu1 %v12477_v7 }
 0x9d0   :  { %3671 = vmatpush.bf16.msra.mxu2 %v12478_v42  ;;  %3684 = vmatpush.bf16.msra.mxu3 %v12479_v24 }
 0xa0e   :  { %v10360_v26 = vpop.f32.mrf.mxu0  ;;  %v10362_v54 = vpop.f32.mrf.mxu1 }
 0xa0f   :  { %12480 = vst [vmem:[#allocation64_spill] sm:$0xff] %v10360_v26  ;;  %v7995_v26 = vld [vmem:[#allocation6 + $0x294] sm:$0xf0] }
 0xa10   :  { %12481 = vst [vmem:[#allocation21_spill] sm:$0xff] %v10362_v54 }
 0xa15   :  { %v10364_v14 = vpop.f32.mrf.mxu2  ;;  %v10366_v1 = vpop.f32.mrf.mxu3 }
 0xa16   :  { %12482 = vst [vmem:[#allocation22_spill] sm:$0xff] %v10364_v14  ;;  %v3409_v22 = vpop.f32.mrf.mxu0  ;;  %v3422_v10 = vpop.f32.mrf.mxu1 }
 0xa17   :  { %12483 = vst [vmem:[#allocation23_spill] sm:$0xff] %v10366_v1 }
 0xa1d   :  { %v3435_v3 = vpop.f32.mrf.mxu2  ;;  %v3448_v50 = vpop.f32.mrf.mxu3 }
 0xa1e   :  { %v3467_v59 = vpop.f32.mrf.mxu0  ;;  %v3480_v15 = vpop.f32.mrf.mxu1  ;;  %v12491_v3 = vld [vmem:[#allocation30_spill] sm:$0xff] }
 0xa1f   :  { %v3510_v12 = vadd.f32 %v3467_v59, %v1807_v27  ;;  %v3511_v43 = vadd.f32 %v3480_v15, %v1820_v46  ;;  %v12490_v46 = vld [vmem:[#allocation49_spill] sm:$0xff] }
 0xa20   :  { %v1846_v50 = vadd.f32 %v12491_v3, %v12490_v46 }
 0xa21   :  { %v7377_v62 = vmul.f32 -1.442695, %v3510_v12  ;;  %v7378_v19 = vmul.f32 -1.442695, %v3511_v43 }
 0xa23   :  { %8323 = vpow2.f32 %v7377_v62 }
 0xa24   :  { %8325 = vpow2.f32 %v7378_v19 }
 0xa25   :  { %v3493_v13 = vpop.f32.mrf.mxu2  ;;  %v3506_v28 = vpop.f32.mrf.mxu3 }
 0xa26   :  { %v3512_v17 = vadd.f32 %v3493_v13, %v1833_v25  ;;  %v3469_v5 = vpop.f32.mrf.mxu0  ;;  %v3482_v4 = vpop.f32.mrf.mxu1  ;;  %v3513_v12 = vadd.f32 %v3506_v28, %v1846_v50 }
 0xa28   :  { %v7379_v7 = vmul.f32 -1.442695, %v3512_v17 }
 0xa29   :  { %v8324_v42 = vpop.eup %8323 }
 0xa2a   :  { %v8326_v24 = vpop.eup %8325  ;;  %v3523_v22 = vadd.f32 1.0, %v8324_v42  ;;  %8327 = vpow2.f32 %v7379_v7 }
 0xa2b   :  { %v3524_v10 = vadd.f32 1.0, %v8326_v24 }
 0xa2c   :  { %8329 = vrcp.f32 %v3523_v22  ;;  %v3537_v13 = vand.u32 2147483648, %v3523_v22  ;;  %v3535_v4 = vand.u32 2147483647, %v3523_v22  ;;  %vm3531_vm2 = vweird.f32 %v3523_v22 }
 0xa2d   :  { %8331 = vrcp.f32 %v3524_v10  ;;  %v3495_v33 = vpop.f32.mrf.mxu2  ;;  %v3508_v27 = vpop.f32.mrf.mxu3  ;;  %v3552_v17 = vand.u32 2147483648, %v3524_v10  ;;  %v3550_v42 = vand.u32 2147483647, %v3524_v10  ;;  %vm3546_vm3 = vweird.f32 %v3524_v10 }
 0xa2e   :  { %v3538_v27 = vor.u32 1.1754944e-38, %v3537_v13  ;;  %vm3536_vm6 = vcmp.eq.f32.partialorder %v3535_v4, 8.507059e+37 }
 0xa2f   :  { %v3553_v3 = vor.u32 1.1754944e-38, %v3552_v17  ;;  %vm3551_vm7 = vcmp.eq.f32.partialorder %v3550_v42, 8.507059e+37 }
 0xa30   :  { %v8328_v39 = vpop.eup %8327 }
 0xa31   :  { %v3525_v59 = vadd.f32 1.0, %v8328_v39 }
 0xa32   :  { %v8330_v15 = vpop.eup %8329 }
 0xa33   :  { %v8332_v43 = vpop.eup %8331  ;;  %v3527_v62 = vmul.f32 %v8330_v15, %v3523_v22  ;;  %8333 = vrcp.f32 %v3525_v59  ;;  %vm3532_vm0 = vweird.f32 %v8330_v15  ;;  %v3567_v13 = vand.u32 2147483648, %v3525_v59 }
 0xa34   :  { %v3542_v19 = vmul.f32 %v8332_v43, %v3524_v10  ;;  %8335 = vtanh.f32 %v3513_v12  ;;  %vm3547_vm1 = vweird.f32 %v8332_v43  ;;  %vm3533_vm4 = vmor %vm3531_vm2, %vm3532_vm0  ;;  %vm3561_vm9 = vweird.f32 %v3525_v59 }
 0xa35   :  { %v3528_v52 = vsub.f32 1.0, %v3527_v62  ;;  %vm3548_vm5 = vmor %vm3546_vm3, %vm3547_vm1  ;;  %v3568_v4 = vor.u32 1.1754944e-38, %v3567_v13  ;;  %v12496_v13 = vld [vmem:[#allocation66_spill] sm:$0xff] }
 0xa36   :  { %v3543_v25 = vsub.f32 1.0, %v3542_v19 }
 0xa37   :  { %v3529_v5 = vmul.f32 %v8330_v15, %v3528_v52 }
 0xa38   :  { %v3544_v7 = vmul.f32 %v8332_v43, %v3543_v25 }
 0xa39   :  { %v8334_v24 = vpop.eup %8333  ;;  %v3530_v33 = vadd.f32 %v8330_v15, %v3529_v5 }
 0xa3a   :  { %v3557_v28 = vmul.f32 %v8334_v24, %v3525_v59  ;;  %v3545_v39 = vadd.f32 %v8332_v43, %v3544_v7  ;;  %v8336_v12 = vpop.eup %8335  ;;  %vm3562_vm8 = vweird.f32 %v8334_v24 }
 0xa3b   :  { %v3534_v50 = vsel %vm3533_vm4, %v8330_v15, %v3530_v33  ;;  %v3565_v15 = vand.u32 2147483647, %v3525_v59  ;;  %vm3563_vm10 = vmor %vm3561_vm9, %vm3562_vm8  ;;  %v7477_v59 = vld [vmem:[#allocation4 + $0x2a8] sm:$0xf] }
 0xa3c   :  { %v3558_v62 = vsub.f32 1.0, %v3557_v28  ;;  %v3539_v19 = vsel %vm3536_vm6, %v3538_v27, %v3534_v50  ;;  %v3549_v52 = vsel %vm3548_vm5, %v8332_v43, %v3545_v39  ;;  %v8029_v39 = vld [vmem:[#allocation4 + $0x2ac] sm:$0xf] }
 0xa3d   :  { %v3554_v25 = vsel %vm3551_vm7, %v3553_v3, %v3549_v52  ;;  %v3573_v1 = vmul.f32 %v8336_v12, %v3539_v19  ;;  %vm3566_vm11 = vcmp.eq.f32.partialorder %v3565_v15, 8.507059e+37  ;;  %v7479_v3 = vld [vmem:[#allocation4 + $0x2b8] sm:$0xf0]  ;;  %v7453_v12 = vld [vmem:[#allocation4 + $0x280] sm:$0xf]  ;;  %v1987_v15 = vadd.f32 %v12496_v13, %v12484_v63 }
 0xa3e   :  { %v3559_v14 = vmul.f32 %v8334_v24, %v3558_v62  ;;  %v3572_v5 = vmul.f32 %v3554_v25, %v10293_v20  ;;  %v8028_v20 = vld [vmem:[#allocation4 + $0x2a4] sm:$0xf]  ;;  %v10451_v50 = vor.u32 %v8029_v39, %v7479_v3  ;;  %v8026_v62 = vld [vmem:[#allocation4 + $0x28c] sm:$0xf0]  ;;  %v7455_v25 = vld [vmem:[#allocation4 + $0x290] sm:$0xf0] }
 0xa3f   :  { %v8024_v19 = vld [vmem:[#allocation4 + $0x284] sm:$0xf]  ;;  %v10456_v52 = vor.u32 %v8026_v62, %v7453_v12  ;;  %v7423_v62 = vld [vmem:[#allocation4 + $0x250] sm:$0xf0]  ;;  %v8019_v13 = vld [vmem:[#allocation4 + $0x254] sm:$0xf0] }
 0xa40   :  { %v10377_v22 = vadd.f32 %v3573_v1, %v3572_v5  ;;  %v3560_v10 = vadd.f32 %v8334_v24, %v3559_v14  ;;  %v7471_v1 = vld [vmem:[#allocation4 + $0x2b0] sm:$0xf0]  ;;  %v7461_v5 = vld [vmem:[#allocation4 + $0x288] sm:$0xf]  ;;  %v8016_v12 = vld [vmem:[#allocation4 + $0x244] sm:$0xf] }
 0xa41   :  { %v10446_v28 = vor.u32 %v8028_v20, %v7471_v1  ;;  %v7421_v20 = vld [vmem:[#allocation4 + $0x240] sm:$0xf]  ;;  %v8018_v1 = vld [vmem:[#allocation4 + $0x24c] sm:$0xf0] }
 0xa42   :  { %8337 = vtanh.f32 %v10377_v22  ;;  %v3564_v17 = vsel %vm3563_vm10, %v8334_v24, %v3560_v10  ;;  %v8031_v24 = vld [vmem:[#allocation4 + $0x2b4] sm:$0xf0]  ;;  %v10490_v3 = vor.u32 %v8018_v1, %v7421_v20 }
 0xa43   :  { %v3569_v7 = vsel %vm3566_vm11, %v3568_v4, %v3564_v17  ;;  %v10448_v27 = vor.u32 %v8031_v24, %v7477_v59  ;;  %v8027_v10 = vld [vmem:[#allocation4 + $0x294] sm:$0xf0]  ;;  %v12497_v17 = vld [vmem:[#allocation67_spill] sm:$0xff]  ;;  %v12499_v59 = vld [vmem:[#allocation72_spill] sm:$0xff] }
 0xa44   :  { %v2000_v4 = vadd.f32 %v12497_v17, %v12486_v40  ;;  %v7431_v17 = vld [vmem:[#allocation4 + $0x258] sm:$0xf0] }
 0xa48   :  { %v8338_v43 = vpop.eup %8337 }
 0xa49   :  { %v3576_v42 = vmul.f32 %v8338_v43, %v3569_v7 }
 0xa4b   :  { %v3577_v33 = vpack.c.bf16 %v3576_v42, %v3576_v42  ;;  %v10462_v42 = vor.u32 %v8024_v19, %v7455_v25  ;;  %v7429_v19 = vld [vmem:[#allocation4 + $0x248] sm:$0xf]  ;;  %v12500_v25 = vld [vmem:[#allocation68_spill] sm:$0xff] }
 0xa4d   :  { %3586 = vmatmul.bf16.vlgmr.msrb.gmra.mxu0 %v3577_v33  ;;  %3599 = vmatmul.bf16.vlgmr.msrb.gmra.mxu1 %v3577_v33 }
 0xa4e   :  { %3612 = vmatmul.bf16.vlgmr.msrb.gmra.mxu2 %v3577_v33  ;;  %3625 = vmatmul.bf16.vlgmr.msrb.gmra.mxu3 %v3577_v33 }
 0xa4f   :  { %3758 = vmatpush.bf16.msrb.mxu0 %v9589_v23  ;;  %3771 = vmatpush.bf16.msrb.mxu1 %v9591_v35 }
 0xa50   :  { %3784 = vmatpush.bf16.msrb.mxu2 %v9593_v36  ;;  %3797 = vmatpush.bf16.msrb.mxu3 %v9596_v47  ;;  %v7501_v36 = vld [vmem:[#allocation4 + $0x2e0] sm:$0xf]  ;;  %v8038_v47 = vld [vmem:[#allocation4 + $0x2ec] sm:$0xf0] }
 0xa53   :  { %3759 = vmatpush.bf16.msrb.mxu0 %v9603_v60  ;;  %3772 = vmatpush.bf16.msrb.mxu1 %v9609_v29  ;;  %v8036_v60 = vld [vmem:[#allocation4 + $0x2e4] sm:$0xf]  ;;  %v10416_v29 = vor.u32 %v8038_v47, %v7501_v36  ;;  %v8025_v36 = vld [vmem:[#allocation4 + $0x28c] sm:$0xf]  ;;  %v7463_v47 = vld [vmem:[#allocation4 + $0x298] sm:$0xf0] }
 0xa54   :  { %3785 = vmatpush.bf16.msrb.mxu2 %v9611_v38  ;;  %3798 = vmatpush.bf16.msrb.mxu3 %v9614_v16  ;;  %v7503_v38 = vld [vmem:[#allocation4 + $0x2f0] sm:$0xf0]  ;;  %v7509_v16 = vld [vmem:[#allocation4 + $0x2e8] sm:$0xf]  ;;  %v10472_v63 = vor.u32 %v8025_v36, %v7463_v47  ;;  %v7405_v47 = vld [vmem:[#allocation4 + $0x220] sm:$0xf] }
 0xa57   :  { %3760 = vmatpush.bf16.msrb.mxu0 %v9619_v30  ;;  %3773 = vmatpush.bf16.msrb.mxu1 %v9625_v34  ;;  %v8039_v30 = vld [vmem:[#allocation4 + $0x2f4] sm:$0xf0]  ;;  %v10418_v34 = vor.u32 %v8036_v60, %v7503_v38  ;;  %v8602_v60 = vld [vmem:[%s11746_s4 + $0x8] sm:$0xf] }
 0xa58   :  { %3786 = vmatpush.bf16.msrb.mxu2 %v9627_v2  ;;  %3799 = vmatpush.bf16.msrb.mxu3 %v9630_v8  ;;  %v10420_v2 = vor.u32 %v8039_v30, %v7509_v16  ;;  %v8037_v8 = vld [vmem:[#allocation4 + $0x2ec] sm:$0xf]  ;;  %v10469_v38 = vperm.slane %v8602_v60, 2  ;;  %v8014_v60 = vld [vmem:[#allocation4 + $0x22c] sm:$0xf0] }
 0xa5a   :  { %12498 = vst [vmem:[#allocation36_spill] sm:$0xff] %v10469_v38  ;;  %v2374_v24 = vadd.f32 %v12499_v59, %v10469_v38 }
 0xa5b   :  { %3761 = vmatpush.bf16.msrb.mxu0 %v9635_v53  ;;  %3774 = vmatpush.bf16.msrb.mxu1 %v9639_v32  ;;  %v7511_v53 = vld [vmem:[#allocation4 + $0x2f8] sm:$0xf0] }
 0xa5c   :  { %3787 = vmatpush.bf16.msrb.mxu2 %v9641_v58  ;;  %3800 = vmatpush.bf16.msrb.mxu3 %v9649_v31  ;;  %v10423_v32 = vor.u32 %v8037_v8, %v7511_v53  ;;  %v7485_v58 = vld [vmem:[#allocation4 + $0x2c0] sm:$0xf]  ;;  %v8034_v31 = vld [vmem:[#allocation4 + $0x2cc] sm:$0xf0] }
 0xa5d   :  { %3646 = vmatmul.bf16.vlgmr.msra.gmra.mxu0 %v3577_v33  ;;  %3659 = vmatmul.bf16.vlgmr.msra.gmra.mxu1 %v3577_v33  ;;  %v7437_v53 = vld [vmem:[#allocation4 + $0x260] sm:$0xf] }
 0xa5e   :  { %3672 = vmatmul.bf16.vlgmr.msra.gmra.mxu2 %v3577_v33  ;;  %3685 = vmatmul.bf16.vlgmr.msra.gmra.mxu3 %v3577_v33  ;;  %v10464_v33 = vor.u32 %v8027_v10, %v7461_v5  ;;  %v2013_v5 = vadd.f32 %v12500_v25, %v12488_v11  ;;  %v10494_v10 = vor.u32 %v8016_v12, %v7423_v62  ;;  %v7389_v12 = vld [vmem:[#allocation4 + $0x200] sm:$0xf]  ;;  %v8010_v62 = vld [vmem:[#allocation4 + $0x20c] sm:$0xf0] }
 0xa5f   :  { %3762 = vmatpush.bf16.msrb.mxu0 %v9656_v55  ;;  %3775 = vmatpush.bf16.msrb.mxu1 %v9658_v56  ;;  %v8032_v55 = vld [vmem:[#allocation4 + $0x2c4] sm:$0xf]  ;;  %v10428_v56 = vor.u32 %v8034_v31, %v7485_v58  ;;  %v8022_v58 = vld [vmem:[#allocation4 + $0x26c] sm:$0xf0] }
 0xa60   :  { %3788 = vmatpush.bf16.msrb.mxu2 %v9660_v9  ;;  %3801 = vmatpush.bf16.msrb.mxu3 %v9667_v57  ;;  %v7487_v9 = vld [vmem:[#allocation4 + $0x2d0] sm:$0xf0]  ;;  %v7493_v57 = vld [vmem:[#allocation4 + $0x2c8] sm:$0xf]  ;;  %v8020_v31 = vld [vmem:[#allocation4 + $0x264] sm:$0xf] }
 0xa63   :  { %3763 = vmatpush.bf16.msrb.mxu0 %v9669_v44  ;;  %3776 = vmatpush.bf16.msrb.mxu1 %v9672_v18  ;;  %v8035_v44 = vld [vmem:[#allocation4 + $0x2d4] sm:$0xf0] }
 0xa64   :  { %3789 = vmatpush.bf16.msrb.mxu2 %v9675_v49  ;;  %3802 = vmatpush.bf16.msrb.mxu3 %v9677_v41  ;;  %v10434_v41 = vor.u32 %v8032_v55, %v7487_v9  ;;  %v10477_v55 = vor.u32 %v8022_v58, %v7437_v53  ;;  %v7439_v9 = vld [vmem:[#allocation4 + $0x270] sm:$0xf0]  ;;  %v7413_v58 = vld [vmem:[#allocation4 + $0x228] sm:$0xf] }
 0xa65   :  { %v7407_v53 = vld [vmem:[#allocation4 + $0x230] sm:$0xf0] }
 0xa67   :  { %3764 = vmatpush.bf16.msrb.mxu0 %v9680_v61  ;;  %3777 = vmatpush.bf16.msrb.mxu1 %v9684_v48  ;;  %v10436_v61 = vor.u32 %v8035_v44, %v7493_v57  ;;  %v8033_v48 = vld [vmem:[#allocation4 + $0x2cc] sm:$0xf]  ;;  %v7445_v57 = vld [vmem:[#allocation4 + $0x268] sm:$0xf]  ;;  %v8023_v44 = vld [vmem:[#allocation4 + $0x274] sm:$0xf0] }
 0xa68   :  { %3790 = vmatpush.bf16.msrb.mxu2 %v9686_v51  ;;  %3803 = vmatpush.bf16.msrb.mxu3 %v9689_v45  ;;  %v7495_v51 = vld [vmem:[#allocation4 + $0x2d8] sm:$0xf0] }
 0xa6b   :  { %3765 = vmatpush.bf16.msrb.mxu0 %v9703_v0  ;;  %3778 = vmatpush.bf16.msrb.mxu1 %v9705_v6  ;;  %v10439_v6 = vor.u32 %v8033_v48, %v7495_v51 }
 0xa6c   :  { %3791 = vmatpush.bf16.msrb.mxu2 %v9707_v37  ;;  %3804 = vmatpush.bf16.msrb.mxu3 %v9712_v21  ;;  %v7469_v37 = vld [vmem:[#allocation4 + $0x2a0] sm:$0xf]  ;;  %v8030_v21 = vld [vmem:[#allocation4 + $0x2ac] sm:$0xf0] }
 0xa6d   :  { %v10444_v14 = vor.u32 %v8030_v21, %v7469_v37  ;;  %v8021_v37 = vld [vmem:[#allocation4 + $0x26c] sm:$0xf]  ;;  %v7447_v21 = vld [vmem:[#allocation4 + $0x278] sm:$0xf0] }
 0xa6e   :  { %v10488_v39 = vor.u32 %v8021_v37, %v7447_v21 }
 0xa6f   :  { %4119 = vmatpush.bf16.msra.mxu0 %v10416_v29  ;;  %4132 = vmatpush.bf16.msra.mxu1 %v10418_v34 }
 0xa70   :  { %4145 = vmatpush.bf16.msra.mxu2 %v10420_v2  ;;  %4158 = vmatpush.bf16.msra.mxu3 %v10423_v32 }
 0xa73   :  { %4120 = vmatpush.bf16.msra.mxu0 %v10428_v56  ;;  %4133 = vmatpush.bf16.msra.mxu1 %v10434_v41 }
 0xa74   :  { %4146 = vmatpush.bf16.msra.mxu2 %v10436_v61  ;;  %4159 = vmatpush.bf16.msra.mxu3 %v10439_v6 }
 0xa77   :  { %4121 = vmatpush.bf16.msra.mxu0 %v10444_v14  ;;  %4134 = vmatpush.bf16.msra.mxu1 %v10446_v28 }
 0xa78   :  { %4147 = vmatpush.bf16.msra.mxu2 %v10448_v27  ;;  %4160 = vmatpush.bf16.msra.mxu3 %v10451_v50 }
 0xa7b   :  { %4122 = vmatpush.bf16.msra.mxu0 %v10456_v52  ;;  %4135 = vmatpush.bf16.msra.mxu1 %v10462_v42 }
 0xa7c   :  { %4148 = vmatpush.bf16.msra.mxu2 %v10464_v33  ;;  %4161 = vmatpush.bf16.msra.mxu3 %v10472_v63 }
 0xa7f   :  { %4123 = vmatpush.bf16.msra.mxu0 %v10477_v55 }
 0xa80   :  { %4162 = vmatpush.bf16.msra.mxu3 %v10488_v39 }
 0xa83   :  { %4124 = vmatpush.bf16.msra.mxu0 %v10490_v3 }
 0xaca   :  { %v10412_v23 = vpop.f32.mrf.mxu0  ;;  %v10414_v35 = vpop.f32.mrf.mxu1 }
 0xacb   :  { %12492 = vst [vmem:[#allocation24_spill] sm:$0xff] %v10412_v23  ;;  %v7994_v23 = vld [vmem:[#allocation6 + $0x28c] sm:$0xf0] }
 0xacc   :  { %12493 = vst [vmem:[#allocation33_spill] sm:$0xff] %v10414_v35  ;;  %v7999_v35 = vld [vmem:[#allocation6 + $0x2b4] sm:$0xf0] }
 0xad1   :  { %v10430_v18 = vpop.f32.mrf.mxu2  ;;  %v10432_v49 = vpop.f32.mrf.mxu3 }
 0xad2   :  { %12494 = vst [vmem:[#allocation34_spill] sm:$0xff] %v10430_v18  ;;  %v3589_v45 = vpop.f32.mrf.mxu0  ;;  %v3602_v0 = vpop.f32.mrf.mxu1 }
 0xad3   :  { %12495 = vst [vmem:[#allocation35_spill] sm:$0xff] %v10432_v49  ;;  %v10479_v45 = vor.u32 %v8020_v31, %v7439_v9  ;;  %v10481_v0 = vor.u32 %v8023_v44, %v7445_v57  ;;  %v8015_v31 = vld [vmem:[#allocation4 + $0x234] sm:$0xf0]  ;;  %v7386_v9 = vmul.f32 -1.442695, %v2374_v24 }
 0xad4   :  { %v10508_v44 = vor.u32 %v8015_v31, %v7413_v58 }
 0xad5   :  { %4136 = vmatpush.bf16.msra.mxu1 %v10479_v45  ;;  %4149 = vmatpush.bf16.msra.mxu2 %v10481_v0 }
 0xad9   :  { %v3615_v43 = vpop.f32.mrf.mxu2  ;;  %v3628_v7 = vpop.f32.mrf.mxu3  ;;  %4137 = vmatpush.bf16.msra.mxu1 %v10494_v10 }
 0xada   :  { %v3647_v16 = vpop.f32.mrf.mxu0  ;;  %v3660_v30 = vpop.f32.mrf.mxu1  ;;  %v10497_v7 = vor.u32 %v8019_v13, %v7429_v19  ;;  %v8008_v19 = vld [vmem:[#allocation4 + $0x204] sm:$0xf]  ;;  %v7391_v13 = vld [vmem:[#allocation4 + $0x210] sm:$0xf0] }
 0xadb   :  { %v3690_v40 = vadd.f32 %v3647_v16, %v1987_v15  ;;  %v3691_v8 = vadd.f32 %v3660_v30, %v2000_v4  ;;  %v8017_v15 = vld [vmem:[#allocation4 + $0x24c] sm:$0xf]  ;;  %v8012_v16 = vld [vmem:[#allocation4 + $0x224] sm:$0xf] }
 0xadc   :  { %v10499_v36 = vor.u32 %v8017_v15, %v7431_v17  ;;  %4150 = vmatpush.bf16.msra.mxu2 %v10497_v7  ;;  %v10506_v57 = vor.u32 %v8012_v16, %v7407_v53  ;;  %v10523_v15 = vor.u32 %v8010_v62, %v7389_v12  ;;  %v10525_v17 = vor.u32 %v8008_v19, %v7391_v13  ;;  %v8009_v16 = vld [vmem:[#allocation4 + $0x20c] sm:$0xf] }
 0xadd   :  { %v7380_v48 = vmul.f32 -1.442695, %v3690_v40  ;;  %v7381_v51 = vmul.f32 -1.442695, %v3691_v8  ;;  %v10502_v8 = vor.u32 %v8014_v60, %v7405_v47  ;;  %v8011_v47 = vld [vmem:[#allocation4 + $0x214] sm:$0xf0] }
 0xade   :  { %4163 = vmatpush.bf16.msra.mxu3 %v10499_v36  ;;  %4138 = vmatpush.bf16.msra.mxu1 %v10506_v57 }
 0xadf   :  { %8339 = vpow2.f32 %v7380_v48  ;;  %v8013_v48 = vld [vmem:[#allocation4 + $0x22c] sm:$0xf]  ;;  %4125 = vmatpush.bf16.msra.mxu0 %v10502_v8 }
 0xae0   :  { %8341 = vpow2.f32 %v7381_v51  ;;  %v7415_v51 = vld [vmem:[#allocation4 + $0x238] sm:$0xf0]  ;;  %4151 = vmatpush.bf16.msra.mxu2 %v10508_v44 }
 0xae1   :  { %v3673_v4 = vpop.f32.mrf.mxu2  ;;  %v3686_v43 = vpop.f32.mrf.mxu3  ;;  %v10511_v20 = vor.u32 %v8013_v48, %v7415_v51 }
 0xae2   :  { %v3692_v30 = vadd.f32 %v3673_v4, %v2013_v5  ;;  %v3649_v40 = vpop.f32.mrf.mxu0  ;;  %v3662_v11 = vpop.f32.mrf.mxu1  ;;  %v7397_v4 = vld [vmem:[#allocation4 + $0x208] sm:$0xf]  ;;  %4139 = vmatpush.bf16.msra.mxu1 %v10525_v17 }
 0xae3   :  { %4164 = vmatpush.bf16.msra.mxu3 %v10511_v20  ;;  %v10527_v60 = vor.u32 %v8011_v47, %v7397_v4  ;;  %v12501_v11 = vld [vmem:[#allocation69_spill] sm:$0xff]  ;;  %4126 = vmatpush.bf16.msra.mxu0 %v10523_v15 }
 0xae4   :  { %v7382_v37 = vmul.f32 -1.442695, %v3692_v30  ;;  %v7399_v30 = vld [vmem:[#allocation4 + $0x218] sm:$0xf0]  ;;  %v2026_v53 = vadd.f32 %v12501_v11, %v12490_v46 }
 0xae5   :  { %v8340_v21 = vpop.eup %8339  ;;  %v10533_v58 = vor.u32 %v8009_v16, %v7399_v30  ;;  %4152 = vmatpush.bf16.msra.mxu2 %v10527_v60 }
 0xae6   :  { %v8342_v1 = vpop.eup %8341  ;;  %v10513_v59 = vadd.f32 1.0, %v8340_v21  ;;  %8343 = vpow2.f32 %v7382_v37  ;;  %v3693_v51 = vadd.f32 %v3686_v43, %v2026_v53 }
 0xae7   :  { %8345 = vpow2.f32 %v7386_v9  ;;  %v10516_v24 = vadd.f32 1.0, %v8342_v1  ;;  %4165 = vmatpush.bf16.msra.mxu3 %v10533_v58 }
 0xae8   :  { %8347 = vrcp.f32 %v10513_v59  ;;  %v3717_v19 = vand.u32 2147483648, %v10513_v59  ;;  %v3715_v43 = vand.u32 2147483647, %v10513_v59  ;;  %vm3711_vm14 = vweird.f32 %v10513_v59 }
 0xae9   :  { %8349 = vrcp.f32 %v10516_v24  ;;  %v3675_v25 = vpop.f32.mrf.mxu2  ;;  %v3688_v5 = vpop.f32.mrf.mxu3  ;;  %v3730_v4 = vand.u32 2147483647, %v10516_v24  ;;  %vm3726_vm15 = vweird.f32 %v10516_v24 }
 0xaea   :  { %v3732_v25 = vand.u32 2147483648, %v10516_v24  ;;  %vm3716_vm2 = vcmp.eq.f32.partialorder %v3715_v43, 8.507059e+37 }
 0xaeb   :  { %vm3731_vm3 = vcmp.eq.f32.partialorder %v3730_v4, 8.507059e+37 }
 0xaec   :  { %v8344_v40 = vpop.eup %8343  ;;  %v3733_v53 = vor.u32 1.1754944e-38, %v3732_v25 }
 0xaed   :  { %v8346_v31 = vpop.eup %8345  ;;  %v3705_v9 = vadd.f32 1.0, %v8344_v40  ;;  %v3718_v40 = vor.u32 1.1754944e-38, %v3717_v19 }
 0xaee   :  { %v8348_v48 = vpop.eup %8347  ;;  %v10539_v1 = vadd.f32 1.0, %v8346_v31 }
 0xaef   :  { %v8350_v37 = vpop.eup %8349  ;;  %v3707_v21 = vmul.f32 %v8348_v48, %v10513_v59  ;;  %8351 = vrcp.f32 %v3705_v9  ;;  %vm3712_vm12 = vweird.f32 %v8348_v48  ;;  %vm3741_vm5 = vweird.f32 %v3705_v9 }
 0xaf0   :  { %v3722_v46 = vmul.f32 %v8350_v37, %v10516_v24  ;;  %8353 = vtanh.f32 %v3693_v51  ;;  %vm3727_vm13 = vweird.f32 %v8350_v37  ;;  %vm3713_vm0 = vmor %vm3711_vm14, %vm3712_vm12  ;;  %v3745_v25 = vand.u32 2147483647, %v3705_v9 }
 0xaf1   :  { %v3708_v12 = vsub.f32 1.0, %v3707_v21  ;;  %8355 = vrcp.f32 %v10539_v1  ;;  %vm3728_vm1 = vmor %vm3726_vm15, %vm3727_vm13  ;;  %vm3942_vm9 = vweird.f32 %v10539_v1 }
 0xaf2   :  { %v3723_v62 = vsub.f32 1.0, %v3722_v46  ;;  %vm3746_vm7 = vcmp.eq.f32.partialorder %v3745_v25, 8.507059e+37  ;;  %v7621_v25 = vld [vmem:[#allocation6 + $0x2c8] sm:$0xf] }
 0xaf3   :  { %v3709_v5 = vmul.f32 %v8348_v48, %v3708_v12 }
 0xaf4   :  { %v3724_v13 = vmul.f32 %v8350_v37, %v3723_v62 }
 0xaf5   :  { %v8352_v47 = vpop.eup %8351  ;;  %v3710_v16 = vadd.f32 %v8348_v48, %v3709_v5 }
 0xaf6   :  { %v3737_v30 = vmul.f32 %v8352_v47, %v3705_v9  ;;  %v3725_v11 = vadd.f32 %v8350_v37, %v3724_v13  ;;  %v8354_v51 = vpop.eup %8353  ;;  %vm3742_vm4 = vweird.f32 %v8352_v47  ;;  %v3747_v13 = vand.u32 2147483648, %v3705_v9 }
 0xaf7   :  { %v3714_v31 = vsel %vm3713_vm0, %v8348_v48, %v3710_v16  ;;  %v10549_v18 = vpop.eup %8355  ;;  %vm3743_vm6 = vmor %vm3741_vm5, %vm3742_vm4  ;;  %v7629_v16 = vld [vmem:[#allocation6 + $0x2e0] sm:$0xf] }
 0xaf8   :  { %v3738_v21 = vsub.f32 1.0, %v3737_v30  ;;  %v3719_v46 = vsel %vm3716_vm2, %v3718_v40, %v3714_v31  ;;  %v3729_v12 = vsel %vm3728_vm1, %v8350_v37, %v3725_v11  ;;  %v3938_v48 = vmul.f32 %v10549_v18, %v10539_v1  ;;  %v8006_v30 = vld [vmem:[#allocation6 + $0x2ec] sm:$0xf0]  ;;  %v8004_v11 = vld [vmem:[#allocation6 + $0x2e4] sm:$0xf] }
 0xaf9   :  { %v3734_v62 = vsel %vm3731_vm3, %v3733_v53, %v3729_v12  ;;  %v3753_v49 = vmul.f32 %v8354_v51, %v3719_v46  ;;  %v3748_v43 = vor.u32 1.1754944e-38, %v3747_v13  ;;  %v7637_v53 = vld [vmem:[#allocation6 + $0x2e8] sm:$0xf]  ;;  %v8007_v51 = vld [vmem:[#allocation6 + $0x2f4] sm:$0xf0]  ;;  %v10554_v9 = vor.u32 %v8006_v30, %v7629_v16 }
 0xafa   :  { %v3739_v5 = vmul.f32 %v8352_v47, %v3738_v21  ;;  %v3752_v59 = vmul.f32 %v3734_v62, %v10377_v22  ;;  %v3939_v4 = vsub.f32 1.0, %v3938_v48  ;;  %v8005_v21 = vld [vmem:[#allocation6 + $0x2ec] sm:$0xf]  ;;  %v7639_v46 = vld [vmem:[#allocation6 + $0x2f8] sm:$0xf0]  ;;  %v3948_v16 = vand.u32 2147483648, %v10539_v1 }
 0xafb   :  { %v8000_v13 = vld [vmem:[#allocation6 + $0x2c4] sm:$0xf]  ;;  %v7615_v48 = vld [vmem:[#allocation6 + $0x2d0] sm:$0xf0]  ;;  %v12502_v30 = vld [vmem:[#allocation19_spill] sm:$0xff]  ;;  %vm3943_vm8 = vweird.f32 %v10549_v18 }
 0xafc   :  { %v3754_v24 = vadd.f32 %v3753_v49, %v3752_v59  ;;  %v3740_v19 = vadd.f32 %v8352_v47, %v3739_v5  ;;  %v7631_v49 = vld [vmem:[#allocation6 + $0x2f0] sm:$0xf0]  ;;  %v3940_v12 = vmul.f32 %v10549_v18, %v3939_v4  ;;  %v7613_v5 = vld [vmem:[#allocation6 + $0x2c0] sm:$0xf]  ;;  %v8002_v59 = vld [vmem:[#allocation6 + $0x2cc] sm:$0xf0] }
 0xafd   :  { %v3946_v4 = vand.u32 2147483647, %v10539_v1  ;;  %vm10582_vm10 = vmor %vm3942_vm9, %vm3943_vm8 }
 0xafe   :  { %8357 = vtanh.f32 %v3754_v24  ;;  %v3744_v37 = vsel %vm3743_vm6, %v8352_v47, %v3740_v19  ;;  %v10556_v47 = vor.u32 %v8004_v11, %v7631_v49  ;;  %v10558_v24 = vor.u32 %v8007_v51, %v7637_v53  ;;  %v7597_v53 = vld [vmem:[#allocation6 + $0x2a0] sm:$0xf] }
 0xaff   :  { %v3749_v40 = vsel %vm3746_vm7, %v3748_v43, %v3744_v37  ;;  %v10560_v19 = vor.u32 %v8005_v21, %v7639_v46  ;;  %v8003_v37 = vld [vmem:[#allocation6 + $0x2d4] sm:$0xf0]  ;;  %v8001_v43 = vld [vmem:[#allocation6 + $0x2cc] sm:$0xf]  ;;  %8359 = vtanh.f32 %v12502_v30  ;;  %v10569_v11 = vor.u32 %v8002_v59, %v7613_v5  ;;  %v7996_v46 = vld [vmem:[#allocation6 + $0x2a4] sm:$0xf] }
 0xb00   :  { %v10571_v49 = vor.u32 %v8000_v13, %v7615_v48  ;;  %v10575_v51 = vor.u32 %v8003_v37, %v7621_v25  ;;  %v7997_v5 = vld [vmem:[#allocation6 + $0x2ac] sm:$0xf]  ;;  %v7607_v59 = vld [vmem:[#allocation6 + $0x2b8] sm:$0xf0]  ;;  %vm10586_vm11 = vcmp.eq.f32.partialorder %v3946_v4, 8.507059e+37  ;;  %v3949_v37 = vor.u32 1.1754944e-38, %v3948_v16 }
 0xb01   :  { %v10603_v13 = vor.u32 %v7997_v5, %v7607_v59  ;;  %v7583_v16 = vld [vmem:[#allocation6 + $0x290] sm:$0xf0]  ;;  %v7993_v30 = vld [vmem:[#allocation6 + $0x28c] sm:$0xf]  ;;  %v7990_v5 = vld [vmem:[#allocation6 + $0x26c] sm:$0xf0] }
 0xb02   :  { %12503 = vst [vmem:[#allocation37_spill] sm:$0xff] %v10571_v49  ;;  %v7988_v48 = vld [vmem:[#allocation6 + $0x264] sm:$0xf] }
 0xb03   :  { %12504 = vst [vmem:[#allocation38_spill] sm:$0xff] %v10575_v51 }
 0xb04   :  { %v8358_v22 = vpop.eup %8357  ;;  %12513 = vst [vmem:[#allocation43_spill] sm:$0xff] %v10603_v13 }
 0xb05   :  { %v3756_v31 = vmul.f32 %v8358_v22, %v3749_v40  ;;  %v7623_v22 = vld [vmem:[#allocation6 + $0x2d8] sm:$0xf0]  ;;  %v3941_v40 = vadd.f32 %v10549_v18, %v3940_v12  ;;  %v7599_v12 = vld [vmem:[#allocation6 + $0x2b0] sm:$0xf0]  ;;  %v8360_v54 = vpop.eup %8359 }
 0xb06   :  { %v10577_v21 = vor.u32 %v8001_v43, %v7623_v22  ;;  %v10597_v43 = vor.u32 %v7996_v46, %v7599_v12  ;;  %v7581_v22 = vld [vmem:[#allocation6 + $0x280] sm:$0xf] }
 0xb07   :  { %v3757_v62 = vpack.c.bf16 %v3756_v31, %v3756_v31  ;;  %v7998_v31 = vld [vmem:[#allocation6 + $0x2ac] sm:$0xf0]  ;;  %v3945_v25 = vsel %vm10582_vm10, %v10549_v18, %v3941_v40  ;;  %v7992_v18 = vld [vmem:[#allocation6 + $0x284] sm:$0xf]  ;;  %v7589_v40 = vld [vmem:[#allocation6 + $0x288] sm:$0xf]  ;;  %v10609_v12 = vor.u32 %v7994_v23, %v7581_v22 }
 0xb08   :  { %12505 = vst [vmem:[#allocation39_spill] sm:$0xff] %v10577_v21  ;;  %v10595_v1 = vor.u32 %v7998_v31, %v7597_v53  ;;  %v7591_v53 = vld [vmem:[#allocation6 + $0x298] sm:$0xf0]  ;;  %v3950_v31 = vsel %vm10586_vm11, %v3949_v37, %v3945_v25  ;;  %v10615_v59 = vor.u32 %v7995_v26, %v7589_v40  ;;  %v7573_v25 = vld [vmem:[#allocation6 + $0x268] sm:$0xf] }
 0xb09   :  { %3766 = vmatmul.bf16.vlgmr.msrb.gmra.mxu0 %v3757_v62  ;;  %3779 = vmatmul.bf16.vlgmr.msrb.gmra.mxu1 %v3757_v62  ;;  %12511 = vst [vmem:[#allocation41_spill] sm:$0xff] %v10597_v43  ;;  %v3957_v46 = vmul.f32 %v8360_v54, %v3950_v31  ;;  %v10617_v38 = vor.u32 %v7993_v30, %v7591_v53  ;;  %v7567_v54 = vld [vmem:[#allocation6 + $0x270] sm:$0xf0]  ;;  %v7991_v37 = vld [vmem:[#allocation6 + $0x274] sm:$0xf0] }
 0xb0a   :  { %3792 = vmatmul.bf16.vlgmr.msrb.gmra.mxu2 %v3757_v62  ;;  %3805 = vmatmul.bf16.vlgmr.msrb.gmra.mxu3 %v3757_v62  ;;  %v7605_v62 = vld [vmem:[#allocation6 + $0x2a8] sm:$0xf]  ;;  %12510 = vst [vmem:[#allocation40_spill] sm:$0xff] %v10595_v1  ;;  %v7989_v31 = vld [vmem:[#allocation6 + $0x26c] sm:$0xf]  ;;  %v10629_v30 = vor.u32 %v7991_v37, %v7573_v25 }
 0xb0b   :  { %4339 = vmatpush.bf16.msrb.mxu0 %v10554_v9  ;;  %4352 = vmatpush.bf16.msrb.mxu1 %v10556_v47  ;;  %v10601_v4 = vor.u32 %v7999_v35, %v7605_v62  ;;  %12514 = vst [vmem:[#allocation44_spill] sm:$0xff] %v10609_v12  ;;  %v10611_v35 = vor.u32 %v7992_v18, %v7583_v16  ;;  %v7565_v62 = vld [vmem:[#allocation6 + $0x260] sm:$0xf]  ;;  %v7986_v16 = vld [vmem:[#allocation6 + $0x24c] sm:$0xf0] }
 0xb0c   :  { %4365 = vmatpush.bf16.msrb.mxu2 %v10558_v24  ;;  %4378 = vmatpush.bf16.msrb.mxu3 %v10560_v19  ;;  %12516 = vst [vmem:[#allocation46_spill] sm:$0xff] %v10615_v59  ;;  %v10619_v23 = vpack.c.bf16 %v3957_v46, %v3957_v46  ;;  %v10623_v22 = vor.u32 %v7990_v5, %v7565_v62  ;;  %v7549_v26 = vld [vmem:[#allocation6 + $0x240] sm:$0xf]  ;;  %v7984_v53 = vld [vmem:[#allocation6 + $0x244] sm:$0xf] }
 0xb0d   :  { %12512 = vst [vmem:[#allocation42_spill] sm:$0xff] %v10601_v4  ;;  %v10625_v18 = vor.u32 %v7988_v48, %v7567_v54  ;;  %v7551_v46 = vld [vmem:[#allocation6 + $0x250] sm:$0xf0]  ;;  %v7987_v62 = vld [vmem:[#allocation6 + $0x254] sm:$0xf0] }
 0xb0e   :  { %12515 = vst [vmem:[#allocation45_spill] sm:$0xff] %v10611_v35  ;;  %v7985_v5 = vld [vmem:[#allocation6 + $0x24c] sm:$0xf]  ;;  %v7559_v48 = vld [vmem:[#allocation6 + $0x258] sm:$0xf0]  ;;  %v10641_v54 = vor.u32 %v7984_v53, %v7551_v46 }
 0xb0f   :  { %4340 = vmatpush.bf16.msrb.mxu0 %v10569_v11  ;;  %4353 = vmatpush.bf16.msrb.mxu1 %v10571_v49  ;;  %12517 = vst [vmem:[#allocation47_spill] sm:$0xff] %v10617_v38  ;;  %v7533_v25 = vld [vmem:[#allocation6 + $0x220] sm:$0xf]  ;;  %v7982_v37 = vld [vmem:[#allocation6 + $0x22c] sm:$0xf0] }
 0xb10   :  { %4366 = vmatpush.bf16.msrb.mxu2 %v10575_v51  ;;  %4379 = vmatpush.bf16.msrb.mxu3 %v10577_v21  ;;  %12518 = vst [vmem:[#allocation48_spill] sm:$0xff] %v10623_v22  ;;  %v7517_v53 = vld [vmem:[#allocation6 + $0x200] sm:$0xf]  ;;  %v7978_v46 = vld [vmem:[#allocation6 + $0x20c] sm:$0xf0] }
 0xb11   :  { %12519 = vst [vmem:[#allocation10_spill] sm:$0xff] %v10625_v18 }
 0xb12   :  { %12520 = vst [vmem:[#allocation11_spill] sm:$0xff] %v10629_v30 }
 0xb13   :  { %4341 = vmatpush.bf16.msrb.mxu0 %v10595_v1  ;;  %4354 = vmatpush.bf16.msrb.mxu1 %v10597_v43  ;;  %v7575_v43 = vld [vmem:[#allocation6 + $0x278] sm:$0xf0]  ;;  %12523 = vst [vmem:[#allocation12_spill] sm:$0xff] %v10641_v54 }
 0xb14   :  { %4367 = vmatpush.bf16.msrb.mxu2 %v10601_v4  ;;  %4380 = vmatpush.bf16.msrb.mxu3 %v10603_v13  ;;  %v10631_v40 = vor.u32 %v7989_v31, %v7575_v43  ;;  %v7557_v13 = vld [vmem:[#allocation6 + $0x248] sm:$0xf]  ;;  %v10639_v43 = vor.u32 %v7986_v16, %v7549_v26  ;;  %v7981_v4 = vld [vmem:[#allocation6 + $0x22c] sm:$0xf]  ;;  %v10651_v26 = vor.u32 %v7982_v37, %v7533_v25 }
 0xb15   :  { %v10645_v31 = vor.u32 %v7987_v62, %v7557_v13 }
 0xb16   :  { %12521 = vst [vmem:[#allocation13_spill] sm:$0xff] %v10631_v40 }
 0xb17   :  { %4342 = vmatpush.bf16.msrb.mxu0 %v10609_v12  ;;  %4355 = vmatpush.bf16.msrb.mxu1 %v10611_v35  ;;  %12522 = vst [vmem:[#allocation14_spill] sm:$0xff] %v10639_v43  ;;  %v7535_v35 = vld [vmem:[#allocation6 + $0x230] sm:$0xf0]  ;;  %v7541_v12 = vld [vmem:[#allocation6 + $0x228] sm:$0xf] }
 0xb18   :  { %4368 = vmatpush.bf16.msrb.mxu2 %v10615_v59  ;;  %4381 = vmatpush.bf16.msrb.mxu3 %v10617_v38  ;;  %12524 = vst [vmem:[#allocation15_spill] sm:$0xff] %v10645_v31  ;;  %v10647_v38 = vor.u32 %v7985_v5, %v7559_v48  ;;  %v7980_v59 = vld [vmem:[#allocation6 + $0x224] sm:$0xf]  ;;  %v7519_v48 = vld [vmem:[#allocation6 + $0x210] sm:$0xf0] }
 0xb19   :  { %4127 = vmatmul.bf16.vlgmr.msra.gmra.mxu0 %v10619_v23  ;;  %4140 = vmatmul.bf16.vlgmr.msra.gmra.mxu1 %v10619_v23  ;;  %12526 = vst [vmem:[#allocation26_spill] sm:$0xff] %v10651_v26  ;;  %v10653_v16 = vor.u32 %v7980_v59, %v7535_v35  ;;  %v7976_v5 = vld [vmem:[#allocation6 + $0x204] sm:$0xf]  ;;  %v10663_v35 = vor.u32 %v7978_v46, %v7517_v53  ;;  %v12541_v25 = vld [vmem:[#allocation48_spill] sm:$0xff]  ;;  %v12543_v53 = vld [vmem:[#allocation11_spill] sm:$0xff] }
 0xb1a   :  { %4153 = vmatmul.bf16.vlgmr.msra.gmra.mxu2 %v10619_v23  ;;  %4166 = vmatmul.bf16.vlgmr.msra.gmra.mxu3 %v10619_v23  ;;  %12525 = vst [vmem:[#allocation18_spill] sm:$0xff] %v10647_v38  ;;  %v10665_v59 = vor.u32 %v7976_v5, %v7519_v48  ;;  %v12542_v37 = vld [vmem:[#allocation10_spill] sm:$0xff]  ;;  %v12546_v48 = vld [vmem:[#allocation12_spill] sm:$0xff] }
 0xb1b   :  { %4343 = vmatpush.bf16.msrb.mxu0 %v10623_v22  ;;  %4356 = vmatpush.bf16.msrb.mxu1 %v10625_v18  ;;  %v7983_v22 = vld [vmem:[#allocation6 + $0x234] sm:$0xf0]  ;;  %v7543_v18 = vld [vmem:[#allocation6 + $0x238] sm:$0xf0]  ;;  %12527 = vst [vmem:[#allocation29_spill] sm:$0xff] %v10653_v16 }
 0xb1c   :  { %4369 = vmatpush.bf16.msrb.mxu2 %v10629_v30  ;;  %4382 = vmatpush.bf16.msrb.mxu3 %v10631_v40  ;;  %v10657_v13 = vor.u32 %v7983_v22, %v7541_v12  ;;  %v10659_v62 = vor.u32 %v7981_v4, %v7543_v18  ;;  %v7525_v40 = vld [vmem:[#allocation6 + $0x208] sm:$0xf]  ;;  %v7977_v30 = vld [vmem:[#allocation6 + $0x20c] sm:$0xf]  ;;  %12530 = vst [vmem:[#allocation25_spill] sm:$0xff] %v10663_v35  ;;  %v12535_v22 = vld [vmem:[#allocation42_spill] sm:$0xff] }
 0xb1d   :  { %12531 = vst [vmem:[#allocation17_spill] sm:$0xff] %v10665_v59  ;;  %v12536_v18 = vld [vmem:[#allocation43_spill] sm:$0xff]  ;;  %v12544_v46 = vld [vmem:[#allocation13_spill] sm:$0xff] }
 0xb1e   :  { %12528 = vst [vmem:[#allocation65_spill] sm:$0xff] %v10657_v13  ;;  %v12545_v5 = vld [vmem:[#allocation14_spill] sm:$0xff] }
 0xb1f   :  { %4344 = vmatpush.bf16.msrb.mxu0 %v10639_v43  ;;  %4357 = vmatpush.bf16.msrb.mxu1 %v10641_v54  ;;  %12529 = vst [vmem:[#allocation16_spill] sm:$0xff] %v10659_v62  ;;  %v7979_v43 = vld [vmem:[#allocation6 + $0x214] sm:$0xf0]  ;;  %v7527_v54 = vld [vmem:[#allocation6 + $0x218] sm:$0xf0] }
 0xb20   :  { %4370 = vmatpush.bf16.msrb.mxu2 %v10645_v31  ;;  %4383 = vmatpush.bf16.msrb.mxu3 %v10647_v38  ;;  %v10669_v4 = vor.u32 %v7979_v43, %v7525_v40  ;;  %v10671_v12 = vor.u32 %v7977_v30, %v7527_v54  ;;  %v12537_v30 = vld [vmem:[#allocation44_spill] sm:$0xff]  ;;  %v12538_v40 = vld [vmem:[#allocation45_spill] sm:$0xff]  ;;  %v12539_v43 = vld [vmem:[#allocation46_spill] sm:$0xff] }
 0xb21   :  { %v12540_v54 = vld [vmem:[#allocation47_spill] sm:$0xff] }
 0xb22   :  { %12532 = vst [vmem:[#allocation27_spill] sm:$0xff] %v10669_v4 }
 0xb23   :  { %4345 = vmatpush.bf16.msrb.mxu0 %v10651_v26  ;;  %4358 = vmatpush.bf16.msrb.mxu1 %v10653_v16  ;;  %12533 = vst [vmem:[#allocation31_spill] sm:$0xff] %v10671_v12 }
 0xb24   :  { %4371 = vmatpush.bf16.msrb.mxu2 %v10657_v13  ;;  %4384 = vmatpush.bf16.msrb.mxu3 %v10659_v62 }
 0xb27   :  { %4346 = vmatpush.bf16.msrb.mxu0 %v10663_v35  ;;  %4359 = vmatpush.bf16.msrb.mxu1 %v10665_v59 }
 0xb28   :  { %4372 = vmatpush.bf16.msrb.mxu2 %v10669_v4  ;;  %4385 = vmatpush.bf16.msrb.mxu3 %v10671_v12 }
 0xb2a   :  { %4347 = vmatmul.bf16.vlgmr.msrb.gmra.mxu0 %v10619_v23  ;;  %4360 = vmatmul.bf16.vlgmr.msrb.gmra.mxu1 %v10619_v23 }
 0xb2b   :  { %4459 = vmatpush.bf16.msra.mxu0 %v10416_v29  ;;  %4472 = vmatpush.bf16.msra.mxu1 %v10418_v34 }
 0xb2c   :  { %4373 = vmatmul.bf16.vlgmr.msrb.gmra.mxu2 %v10619_v23  ;;  %4386 = vmatmul.bf16.vlgmr.msrb.gmra.mxu3 %v10619_v23  ;;  %v12534_v23 = vld [vmem:[#allocation41_spill] sm:$0xff] }
 0xb2d   :  { %4485 = vmatpush.bf16.msra.mxu2 %v10420_v2  ;;  %4498 = vmatpush.bf16.msra.mxu3 %v10423_v32 }
 0xb2f   :  { %4460 = vmatpush.bf16.msra.mxu0 %v10428_v56  ;;  %4473 = vmatpush.bf16.msra.mxu1 %v10434_v41 }
 0xb31   :  { %4486 = vmatpush.bf16.msra.mxu2 %v10436_v61  ;;  %4499 = vmatpush.bf16.msra.mxu3 %v10439_v6 }
 0xb33   :  { %4461 = vmatpush.bf16.msra.mxu0 %v10444_v14  ;;  %4474 = vmatpush.bf16.msra.mxu1 %v10446_v28 }
 0xb35   :  { %4487 = vmatpush.bf16.msra.mxu2 %v10448_v27  ;;  %4500 = vmatpush.bf16.msra.mxu3 %v10451_v50 }
 0xb37   :  { %4462 = vmatpush.bf16.msra.mxu0 %v10456_v52  ;;  %4475 = vmatpush.bf16.msra.mxu1 %v10462_v42 }
 0xb39   :  { %4488 = vmatpush.bf16.msra.mxu2 %v10464_v33  ;;  %4501 = vmatpush.bf16.msra.mxu3 %v10472_v63 }
 0xb3b   :  { %4463 = vmatpush.bf16.msra.mxu0 %v10477_v55  ;;  %4476 = vmatpush.bf16.msra.mxu1 %v10479_v45 }
 0xb3d   :  { %4489 = vmatpush.bf16.msra.mxu2 %v10481_v0  ;;  %4502 = vmatpush.bf16.msra.mxu3 %v10488_v39 }
 0xb3f   :  { %4464 = vmatpush.bf16.msra.mxu0 %v10490_v3  ;;  %4477 = vmatpush.bf16.msra.mxu1 %v10494_v10 }
 0xb41   :  { %4490 = vmatpush.bf16.msra.mxu2 %v10497_v7  ;;  %4503 = vmatpush.bf16.msra.mxu3 %v10499_v36 }
 0xb43   :  { %4465 = vmatpush.bf16.msra.mxu0 %v10502_v8  ;;  %4478 = vmatpush.bf16.msra.mxu1 %v10506_v57 }
 0xb45   :  { %4491 = vmatpush.bf16.msra.mxu2 %v10508_v44  ;;  %4504 = vmatpush.bf16.msra.mxu3 %v10511_v20 }
 0xb47   :  { %4466 = vmatpush.bf16.msra.mxu0 %v10523_v15  ;;  %4479 = vmatpush.bf16.msra.mxu1 %v10525_v17 }
 0xb49   :  { %4492 = vmatpush.bf16.msra.mxu2 %v10527_v60  ;;  %4505 = vmatpush.bf16.msra.mxu3 %v10533_v58 }
 0xb4b   :  { %4519 = vmatpush.bf16.msrb.mxu0 %v10554_v9  ;;  %4532 = vmatpush.bf16.msrb.mxu1 %v10556_v47 }
 0xb4d   :  { %4545 = vmatpush.bf16.msrb.mxu2 %v10558_v24  ;;  %4558 = vmatpush.bf16.msrb.mxu3 %v10560_v19 }
 0xb4f   :  { %4520 = vmatpush.bf16.msrb.mxu0 %v10569_v11  ;;  %4533 = vmatpush.bf16.msrb.mxu1 %v10571_v49 }
 0xb51   :  { %4546 = vmatpush.bf16.msrb.mxu2 %v10575_v51  ;;  %4559 = vmatpush.bf16.msrb.mxu3 %v10577_v21 }
 0xb53   :  { %4521 = vmatpush.bf16.msrb.mxu0 %v10595_v1  ;;  %4534 = vmatpush.bf16.msrb.mxu1 %v12534_v23 }
 0xb55   :  { %4547 = vmatpush.bf16.msrb.mxu2 %v12535_v22  ;;  %4560 = vmatpush.bf16.msrb.mxu3 %v12536_v18 }
 0xb57   :  { %4522 = vmatpush.bf16.msrb.mxu0 %v12537_v30  ;;  %4535 = vmatpush.bf16.msrb.mxu1 %v12538_v40 }
 0xb59   :  { %4548 = vmatpush.bf16.msrb.mxu2 %v12539_v43  ;;  %4561 = vmatpush.bf16.msrb.mxu3 %v12540_v54 }
 0xb5b   :  { %4523 = vmatpush.bf16.msrb.mxu0 %v12541_v25  ;;  %4536 = vmatpush.bf16.msrb.mxu1 %v12542_v37 }
 0xb5d   :  { %4549 = vmatpush.bf16.msrb.mxu2 %v12543_v53  ;;  %4562 = vmatpush.bf16.msrb.mxu3 %v12544_v46 }
 0xb5f   :  { %4524 = vmatpush.bf16.msrb.mxu0 %v12545_v5  ;;  %4537 = vmatpush.bf16.msrb.mxu1 %v12546_v48 }
 0xb61   :  { %4550 = vmatpush.bf16.msrb.mxu2 %v10645_v31  ;;  %4563 = vmatpush.bf16.msrb.mxu3 %v10647_v38 }
 0xb63   :  { %4525 = vmatpush.bf16.msrb.mxu0 %v10651_v26  ;;  %4538 = vmatpush.bf16.msrb.mxu1 %v10653_v16 }
 0xb65   :  { %4551 = vmatpush.bf16.msrb.mxu2 %v10657_v13  ;;  %4564 = vmatpush.bf16.msrb.mxu3 %v10659_v62 }
 0xb67   :  { %4526 = vmatpush.bf16.msrb.mxu0 %v10663_v35  ;;  %4539 = vmatpush.bf16.msrb.mxu1 %v10665_v59  ;;  %v7383_v35 = vld [vmem:[%s11746_s4 + $0xc] sm:$0xf] }
 0xb68   :  { %v10756_v62 = vperm.slane %v7383_v35, 0  ;;  %v10758_v59 = vperm.slane %v7383_v35, 1 }
 0xb69   :  { %4552 = vmatpush.bf16.msrb.mxu2 %v10669_v4  ;;  %4565 = vmatpush.bf16.msrb.mxu3 %v10671_v12 }
 0xb6a   :  { %12551 = vst [vmem:[#allocation67_spill] sm:$0xff] %v10756_v62 }
 0xb6b   :  { %12552 = vst [vmem:[#allocation72_spill] sm:$0xff] %v10758_v59 }
 0xb86   :  { %v10745_v48 = vpop.f32.mrf.mxu0  ;;  %v10747_v31 = vpop.f32.mrf.mxu1 }
 0xb87   :  { %12547 = vst [vmem:[#allocation28_spill] sm:$0xff] %v10745_v48 }
 0xb88   :  { %12548 = vst [vmem:[#allocation49_spill] sm:$0xff] %v10747_v31 }
 0xb8d   :  { %v10749_v38 = vpop.f32.mrf.mxu2  ;;  %v10751_v26 = vpop.f32.mrf.mxu3 }
 0xb8e   :  { %12549 = vst [vmem:[#allocation30_spill] sm:$0xff] %v10749_v38  ;;  %v3769_v16 = vpop.f32.mrf.mxu0  ;;  %v3782_v13 = vpop.f32.mrf.mxu1 }
 0xb8f   :  { %12550 = vst [vmem:[#allocation66_spill] sm:$0xff] %v10751_v26 }
 0xb95   :  { %v3795_v4 = vpop.f32.mrf.mxu2  ;;  %v3808_v12 = vpop.f32.mrf.mxu3 }
 0xb96   :  { %v4128_v5 = vpop.f32.mrf.mxu0  ;;  %v4141_v48 = vpop.f32.mrf.mxu1  ;;  %v10764_v12 = vperm.slane %v7383_v35, 3 }
 0xb97   :  { %v4129_v31 = vadd.f32 %v4128_v5, %v10756_v62  ;;  %v4142_v38 = vadd.f32 %v4141_v48, %v10758_v59  ;;  %v12555_v48 = vld [vmem:[#allocation70_spill] sm:$0xff] }
 0xb98   :  { %12554 = vst [vmem:[#allocation69_spill] sm:$0xff] %v10764_v12 }
 0xb99   :  { %v7664_v46 = vmul.f32 -1.442695, %v4129_v31  ;;  %v7665_v26 = vmul.f32 -1.442695, %v4142_v38  ;;  %v12556_v31 = vld [vmem:[#allocation20_spill] sm:$0xff] }
 0xb9a   :  { %v2688_v38 = vadd.f32 %v12556_v31, %v12555_v48 }
 0xb9b   :  { %8361 = vpow2.f32 %v7664_v46  ;;  %v12557_v46 = vld [vmem:[#allocation71_spill] sm:$0xff] }
 0xb9c   :  { %8363 = vpow2.f32 %v7665_v26  ;;  %v12558_v26 = vld [vmem:[#allocation51_spill] sm:$0xff] }
 0xb9d   :  { %v10762_v16 = vpop.f32.mrf.mxu2  ;;  %v4167_v13 = vpop.f32.mrf.mxu3  ;;  %v2701_v59 = vadd.f32 %v12558_v26, %v12557_v46 }
 0xb9e   :  { %12553 = vst [vmem:[#allocation68_spill] sm:$0xff] %v10762_v16  ;;  %v4130_v53 = vpop.f32.mrf.mxu0  ;;  %v4143_v37 = vpop.f32.mrf.mxu1 }
 0xb9f   :  { %v4168_v37 = vadd.f32 %v4167_v13, %v10764_v12 }
 0xba1   :  { %v8362_v25 = vpop.eup %8361 }
 0xba2   :  { %v8364_v54 = vpop.eup %8363  ;;  %v5641_v43 = vadd.f32 1.0, %v8362_v25 }
 0xba3   :  { %v5642_v4 = vadd.f32 1.0, %v8364_v54 }
 0xba4   :  { %8365 = vrcp.f32 %v5641_v43  ;;  %v5653_v26 = vand.u32 2147483647, %v5641_v43  ;;  %v5655_v46 = vand.u32 2147483648, %v5641_v43  ;;  %vm5649_vm14 = vweird.f32 %v5641_v43 }
 0xba5   :  { %8367 = vrcp.f32 %v5642_v4  ;;  %v4156_v5 = vpop.f32.mrf.mxu2  ;;  %v4169_v62 = vpop.f32.mrf.mxu3  ;;  %vm5664_vm15 = vweird.f32 %v5642_v4 }
 0xba6   :  { %8369 = vtanh.f32 %v4168_v37  ;;  %v12559_v62 = vld [vmem:[#allocation36_spill] sm:$0xff]  ;;  %v5668_v37 = vand.u32 2147483647, %v5642_v4  ;;  %vm5654_vm1 = vcmp.eq.f32.partialorder %v5653_v26, 8.507059e+37 }
 0xba7   :  { %v4348_v16 = vpop.f32.mrf.mxu0  ;;  %v4361_v40 = vpop.f32.mrf.mxu1  ;;  %v12560_v5 = vld [vmem:[#allocation52_spill] sm:$0xff] }
 0xba8   :  { %v4391_v53 = vadd.f32 %v4348_v16, %v2688_v38  ;;  %v4392_v30 = vadd.f32 %v4361_v40, %v2701_v59  ;;  %v2714_v1 = vadd.f32 %v12560_v5, %v12559_v62  ;;  %v5670_v16 = vand.u32 2147483648, %v5642_v4 }
 0xba9   :  { %vm5669_vm3 = vcmp.eq.f32.partialorder %v5668_v37, 8.507059e+37 }
 0xbaa   :  { %v8366_v25 = vpop.eup %8365  ;;  %v7643_v54 = vmul.f32 -1.442695, %v4391_v53  ;;  %v7644_v18 = vmul.f32 -1.442695, %v4392_v30  ;;  %v5671_v62 = vor.u32 1.1754944e-38, %v5670_v16 }
 0xbab   :  { %v8368_v35 = vpop.eup %8367  ;;  %v5645_v22 = vmul.f32 %v8366_v25, %v5641_v43  ;;  %vm5650_vm12 = vweird.f32 %v8366_v25 }
 0xbac   :  { %v5660_v23 = vmul.f32 %v8368_v35, %v5642_v4  ;;  %8371 = vpow2.f32 %v7643_v54  ;;  %vm5665_vm13 = vweird.f32 %v8368_v35  ;;  %vm5651_vm0 = vmor %vm5649_vm14, %vm5650_vm12 }
 0xbad   :  { %v5646_v31 = vsub.f32 1.0, %v5645_v22  ;;  %8373 = vpow2.f32 %v7644_v18  ;;  %v8370_v22 = vpop.eup %8369  ;;  %vm5666_vm2 = vmor %vm5664_vm15, %vm5665_vm13 }
 0xbae   :  { %v5661_v48 = vsub.f32 1.0, %v5660_v23  ;;  %v5656_v23 = vor.u32 1.1754944e-38, %v5655_v46 }
 0xbaf   :  { %v4374_v21 = vpop.f32.mrf.mxu2  ;;  %v4387_v13 = vpop.f32.mrf.mxu3  ;;  %v5647_v59 = vmul.f32 %v8366_v25, %v5646_v31 }
 0xbb0   :  { %v4393_v40 = vadd.f32 %v4374_v21, %v2714_v1  ;;  %v4350_v30 = vpop.f32.mrf.mxu0  ;;  %v4363_v38 = vpop.f32.mrf.mxu1  ;;  %v5662_v53 = vmul.f32 %v8368_v35, %v5661_v48 }
 0xbb1   :  { %v5648_v12 = vadd.f32 %v8366_v25, %v5647_v59 }
 0xbb2   :  { %v7645_v5 = vmul.f32 -1.442695, %v4393_v40  ;;  %v5663_v54 = vadd.f32 %v8368_v35, %v5662_v53  ;;  %v8372_v18 = vpop.eup %8371 }
 0xbb3   :  { %v5652_v51 = vsel %vm5651_vm0, %v8366_v25, %v5648_v12  ;;  %v8374_v21 = vpop.eup %8373  ;;  %v4404_v48 = vadd.f32 1.0, %v8372_v18  ;;  %v12562_v12 = vld [vmem:[#allocation73_spill] sm:$0xff]  ;;  %v12563_v25 = vld [vmem:[#allocation50_spill] sm:$0xff] }
 0xbb4   :  { %8375 = vpow2.f32 %v7645_v5  ;;  %v5657_v1 = vsel %vm5654_vm1, %v5656_v23, %v5652_v51  ;;  %v5667_v31 = vsel %vm5666_vm2, %v8368_v35, %v5663_v54  ;;  %v4405_v43 = vadd.f32 1.0, %v8374_v21 }
 0xbb5   :  { %v5672_v30 = vsel %vm5669_vm3, %v5671_v62, %v5667_v31  ;;  %v5691_v59 = vmul.f32 %v8370_v22, %v5657_v1  ;;  %8377 = vrcp.f32 %v4404_v48  ;;  %v2727_v26 = vadd.f32 %v12563_v25, %v12562_v12  ;;  %v12564_v12 = vld [vmem:[#allocation19_spill] sm:$0xff] }
 0xbb6   :  { %v5690_v40 = vmul.f32 0.0, %v5672_v30  ;;  %8379 = vrcp.f32 %v4405_v43  ;;  %v4418_v54 = vand.u32 2147483648, %v4404_v48  ;;  %v4433_v18 = vand.u32 2147483648, %v4405_v43 }
 0xbb7   :  { %v4376_v4 = vpop.f32.mrf.mxu2  ;;  %v4389_v38 = vpop.f32.mrf.mxu3  ;;  %v4394_v51 = vadd.f32 %v4387_v13, %v2727_v26  ;;  %v4416_v1 = vand.u32 2147483647, %v4404_v48  ;;  %vm4412_vm6 = vweird.f32 %v4404_v48  ;;  %vm4427_vm7 = vweird.f32 %v4405_v43 }
 0xbb8   :  { %v10773_v46 = vadd.f32 %v5691_v59, %v5690_v40  ;;  %v4431_v59 = vand.u32 2147483647, %v4405_v43  ;;  %v4419_v13 = vor.u32 1.1754944e-38, %v4418_v54 }
 0xbb9   :  { %vm4417_vm10 = vcmp.eq.f32.partialorder %v4416_v1, 8.507059e+37 }
 0xbba   :  { %12561 = vst [vmem:[#allocation20_spill] sm:$0xff] %v10773_v46  ;;  %v8376_v16 = vpop.eup %8375  ;;  %vm4432_vm11 = vcmp.eq.f32.partialorder %v4431_v59, 8.507059e+37 }
 0xbbb   :  { %v4406_v53 = vadd.f32 1.0, %v8376_v16  ;;  %v8378_v5 = vpop.eup %8377  ;;  %v4434_v16 = vor.u32 1.1754944e-38, %v4433_v18 }
 0xbbc   :  { %v8380_v35 = vpop.eup %8379  ;;  %v4408_v37 = vmul.f32 %v8378_v5, %v4404_v48  ;;  %vm4413_vm4 = vweird.f32 %v8378_v5 }
 0xbbd   :  { %8381 = vrcp.f32 %v4406_v53  ;;  %v4423_v62 = vmul.f32 %v8380_v35, %v4405_v43  ;;  %vm4428_vm5 = vweird.f32 %v8380_v35  ;;  %vm4414_vm8 = vmor %vm4412_vm6, %vm4413_vm4  ;;  %v4448_v43 = vand.u32 2147483648, %v4406_v53 }
 0xbbe   :  { %v4409_v22 = vsub.f32 1.0, %v4408_v37  ;;  %8383 = vtanh.f32 %v4394_v51  ;;  %vm4429_vm9 = vmor %vm4427_vm7, %vm4428_vm5  ;;  %vm4442_vm13 = vweird.f32 %v4406_v53  ;;  %v4446_v54 = vand.u32 2147483647, %v4406_v53 }
 0xbbf   :  { %v4424_v23 = vsub.f32 1.0, %v4423_v62  ;;  %v4449_v18 = vor.u32 1.1754944e-38, %v4448_v43  ;;  %v12583_v43 = vld [vmem:[#allocation18_spill] sm:$0xff] }
 0xbc0   :  { %v4410_v21 = vmul.f32 %v8378_v5, %v4409_v22  ;;  %vm4447_vm15 = vcmp.eq.f32.partialorder %v4446_v54, 8.507059e+37  ;;  %v12584_v54 = vld [vmem:[#allocation26_spill] sm:$0xff] }
 0xbc1   :  { %v4425_v30 = vmul.f32 %v8380_v35, %v4424_v23 }
 0xbc2   :  { %v4411_v4 = vadd.f32 %v8378_v5, %v4410_v21 }
 0xbc3   :  { %v8382_v31 = vpop.eup %8381  ;;  %v4426_v38 = vadd.f32 %v8380_v35, %v4425_v30 }
 0xbc4   :  { %v4438_v40 = vmul.f32 %v8382_v31, %v4406_v53  ;;  %v4415_v26 = vsel %vm4414_vm8, %v8378_v5, %v4411_v4  ;;  %v8384_v51 = vpop.eup %8383  ;;  %vm4443_vm12 = vweird.f32 %v8382_v31  ;;  %v12568_v53 = vld [vmem:[#allocation40_spill] sm:$0xff]  ;;  %v12571_v4 = vld [vmem:[#allocation43_spill] sm:$0xff] }
 0xbc5   :  { %v4420_v37 = vsel %vm4417_vm10, %v4419_v13, %v4415_v26  ;;  %v4430_v62 = vsel %vm4429_vm9, %v8380_v35, %v4426_v38  ;;  %vm4444_vm14 = vmor %vm4442_vm13, %vm4443_vm12  ;;  %v12572_v13 = vld [vmem:[#allocation44_spill] sm:$0xff]  ;;  %v12573_v38 = vld [vmem:[#allocation45_spill] sm:$0xff] }
 0xbc6   :  { %v4439_v25 = vsub.f32 1.0, %v4438_v40  ;;  %v4435_v23 = vsel %vm4432_vm11, %v4434_v16, %v4430_v62  ;;  %v4454_v46 = vmul.f32 %v8384_v51, %v4420_v37  ;;  %v12570_v40 = vld [vmem:[#allocation42_spill] sm:$0xff]  ;;  %v12576_v26 = vld [vmem:[#allocation48_spill] sm:$0xff]  ;;  %v12578_v37 = vld [vmem:[#allocation11_spill] sm:$0xff] }
 0xbc7   :  { %v4453_v49 = vmul.f32 %v4435_v23, %v12564_v12  ;;  %v12567_v12 = vld [vmem:[#allocation39_spill] sm:$0xff]  ;;  %v12574_v16 = vld [vmem:[#allocation46_spill] sm:$0xff]  ;;  %v12579_v62 = vld [vmem:[#allocation13_spill] sm:$0xff] }
 0xbc8   :  { %v4440_v22 = vmul.f32 %v8382_v31, %v4439_v25  ;;  %v12575_v25 = vld [vmem:[#allocation47_spill] sm:$0xff]  ;;  %v12577_v51 = vld [vmem:[#allocation10_spill] sm:$0xff]  ;;  %v12581_v23 = vld [vmem:[#allocation12_spill] sm:$0xff] }
 0xbc9   :  { %v10778_v21 = vadd.f32 %v4454_v46, %v4453_v49  ;;  %v12565_v49 = vld [vmem:[#allocation37_spill] sm:$0xff]  ;;  %v12566_v46 = vld [vmem:[#allocation38_spill] sm:$0xff] }
 0xbca   :  { %v4441_v48 = vadd.f32 %v8382_v31, %v4440_v22  ;;  %v12580_v22 = vld [vmem:[#allocation14_spill] sm:$0xff] }
 0xbcb   :  { %8385 = vtanh.f32 %v10778_v21 }
 0xbcc   :  { %v4445_v5 = vsel %vm4444_vm14, %v8382_v31, %v4441_v48  ;;  %v12569_v31 = vld [vmem:[#allocation41_spill] sm:$0xff]  ;;  %v12582_v48 = vld [vmem:[#allocation15_spill] sm:$0xff] }
 0xbcd   :  { %v4450_v1 = vsel %vm4447_vm15, %v4449_v18, %v4445_v5  ;;  %v12585_v5 = vld [vmem:[#allocation29_spill] sm:$0xff] }
 0xbce   :  { %v12586_v18 = vld [vmem:[#allocation65_spill] sm:$0xff] }
 0xbd1   :  { %v8386_v35 = vpop.eup %8385 }
 0xbd2   :  { %v4457_v30 = vmul.f32 %v8386_v35, %v4450_v1  ;;  %v12587_v35 = vld [vmem:[#allocation16_spill] sm:$0xff]  ;;  %v12588_v1 = vld [vmem:[#allocation25_spill] sm:$0xff] }
 0xbd4   :  { %v4458_v59 = vpack.c.bf16 %v4457_v30, %v4457_v30  ;;  %v12589_v30 = vld [vmem:[#allocation17_spill] sm:$0xff] }
 0xbd6   :  { %4467 = vmatmul.bf16.vlgmr.msra.gmra.mxu0 %v4458_v59  ;;  %4480 = vmatmul.bf16.vlgmr.msra.gmra.mxu1 %v4458_v59 }
 0xbd7   :  { %4493 = vmatmul.bf16.vlgmr.msra.gmra.mxu2 %v4458_v59  ;;  %4506 = vmatmul.bf16.vlgmr.msra.gmra.mxu3 %v4458_v59 }
 0xbd8   :  { %4639 = vmatpush.bf16.msra.mxu0 %v10416_v29  ;;  %4652 = vmatpush.bf16.msra.mxu1 %v10418_v34 }
 0xbd9   :  { %4665 = vmatpush.bf16.msra.mxu2 %v10420_v2  ;;  %4678 = vmatpush.bf16.msra.mxu3 %v10423_v32 }
 0xbdc   :  { %4640 = vmatpush.bf16.msra.mxu0 %v10428_v56  ;;  %4653 = vmatpush.bf16.msra.mxu1 %v10434_v41 }
 0xbdd   :  { %4666 = vmatpush.bf16.msra.mxu2 %v10436_v61  ;;  %4679 = vmatpush.bf16.msra.mxu3 %v10439_v6 }
 0xbe0   :  { %4641 = vmatpush.bf16.msra.mxu0 %v10444_v14  ;;  %4654 = vmatpush.bf16.msra.mxu1 %v10446_v28 }
 0xbe1   :  { %4667 = vmatpush.bf16.msra.mxu2 %v10448_v27  ;;  %4680 = vmatpush.bf16.msra.mxu3 %v10451_v50 }
 0xbe4   :  { %4642 = vmatpush.bf16.msra.mxu0 %v10456_v52  ;;  %4655 = vmatpush.bf16.msra.mxu1 %v10462_v42 }
 0xbe5   :  { %4668 = vmatpush.bf16.msra.mxu2 %v10464_v33  ;;  %4681 = vmatpush.bf16.msra.mxu3 %v10472_v63 }
 0xbe6   :  { %4527 = vmatmul.bf16.vlgmr.msrb.gmra.mxu0 %v4458_v59  ;;  %4540 = vmatmul.bf16.vlgmr.msrb.gmra.mxu1 %v4458_v59 }
 0xbe7   :  { %4553 = vmatmul.bf16.vlgmr.msrb.gmra.mxu2 %v4458_v59  ;;  %4566 = vmatmul.bf16.vlgmr.msrb.gmra.mxu3 %v4458_v59  ;;  %v12590_v59 = vld [vmem:[#allocation27_spill] sm:$0xff] }
 0xbe8   :  { %4643 = vmatpush.bf16.msra.mxu0 %v10477_v55  ;;  %4656 = vmatpush.bf16.msra.mxu1 %v10479_v45 }
 0xbe9   :  { %4669 = vmatpush.bf16.msra.mxu2 %v10481_v0  ;;  %4682 = vmatpush.bf16.msra.mxu3 %v10488_v39 }
 0xbec   :  { %4644 = vmatpush.bf16.msra.mxu0 %v10490_v3  ;;  %4657 = vmatpush.bf16.msra.mxu1 %v10494_v10 }
 0xbed   :  { %4670 = vmatpush.bf16.msra.mxu2 %v10497_v7  ;;  %4683 = vmatpush.bf16.msra.mxu3 %v10499_v36 }
 0xbf0   :  { %4645 = vmatpush.bf16.msra.mxu0 %v10502_v8  ;;  %4658 = vmatpush.bf16.msra.mxu1 %v10506_v57 }
 0xbf1   :  { %4671 = vmatpush.bf16.msra.mxu2 %v10508_v44  ;;  %4684 = vmatpush.bf16.msra.mxu3 %v10511_v20 }
 0xbf4   :  { %4646 = vmatpush.bf16.msra.mxu0 %v10523_v15  ;;  %4659 = vmatpush.bf16.msra.mxu1 %v10525_v17 }
 0xbf5   :  { %4672 = vmatpush.bf16.msra.mxu2 %v10527_v60  ;;  %4685 = vmatpush.bf16.msra.mxu3 %v10533_v58 }
 0xbf8   :  { %4699 = vmatpush.bf16.msrb.mxu0 %v10554_v9  ;;  %4712 = vmatpush.bf16.msrb.mxu1 %v10556_v47 }
 0xbf9   :  { %4725 = vmatpush.bf16.msrb.mxu2 %v10558_v24  ;;  %4738 = vmatpush.bf16.msrb.mxu3 %v10560_v19 }
 0xbfc   :  { %4700 = vmatpush.bf16.msrb.mxu0 %v10569_v11  ;;  %4713 = vmatpush.bf16.msrb.mxu1 %v12565_v49 }
 0xbfd   :  { %4726 = vmatpush.bf16.msrb.mxu2 %v12566_v46  ;;  %4739 = vmatpush.bf16.msrb.mxu3 %v12567_v12 }
 0xc00   :  { %4701 = vmatpush.bf16.msrb.mxu0 %v12568_v53  ;;  %4714 = vmatpush.bf16.msrb.mxu1 %v12569_v31 }
 0xc01   :  { %4727 = vmatpush.bf16.msrb.mxu2 %v12570_v40  ;;  %4740 = vmatpush.bf16.msrb.mxu3 %v12571_v4 }
 0xc04   :  { %4702 = vmatpush.bf16.msrb.mxu0 %v12572_v13  ;;  %4715 = vmatpush.bf16.msrb.mxu1 %v12573_v38  ;;  %v12601_v13 = vld [vmem:[#allocation54_spill] sm:$0xff] }
 0xc05   :  { %4728 = vmatpush.bf16.msrb.mxu2 %v12574_v16  ;;  %4741 = vmatpush.bf16.msrb.mxu3 %v12575_v25 }
 0xc08   :  { %4703 = vmatpush.bf16.msrb.mxu0 %v12576_v26  ;;  %4716 = vmatpush.bf16.msrb.mxu1 %v12577_v51  ;;  %v12599_v51 = vld [vmem:[#allocation53_spill] sm:$0xff] }
 0xc09   :  { %4729 = vmatpush.bf16.msrb.mxu2 %v12578_v37  ;;  %4742 = vmatpush.bf16.msrb.mxu3 %v12579_v62  ;;  %v12596_v62 = vld [vmem:[#allocation70_spill] sm:$0xff] }
 0xc0c   :  { %4704 = vmatpush.bf16.msrb.mxu0 %v12580_v22  ;;  %4717 = vmatpush.bf16.msrb.mxu1 %v12581_v23  ;;  %v12591_v22 = vld [vmem:[#allocation31_spill] sm:$0xff] }
 0xc0d   :  { %4730 = vmatpush.bf16.msrb.mxu2 %v12582_v48  ;;  %4743 = vmatpush.bf16.msrb.mxu3 %v12583_v43 }
 0xc10   :  { %4705 = vmatpush.bf16.msrb.mxu0 %v12584_v54  ;;  %4718 = vmatpush.bf16.msrb.mxu1 %v12585_v5 }
 0xc11   :  { %4731 = vmatpush.bf16.msrb.mxu2 %v12586_v18  ;;  %4744 = vmatpush.bf16.msrb.mxu3 %v12587_v35  ;;  %v12597_v35 = vld [vmem:[#allocation32_spill] sm:$0xff] }
 0xc12   :  { %v2868_v37 = vadd.f32 %v12597_v35, %v12596_v62 }
 0xc14   :  { %4706 = vmatpush.bf16.msrb.mxu0 %v12588_v1  ;;  %4719 = vmatpush.bf16.msrb.mxu1 %v12589_v30  ;;  %v12598_v1 = vld [vmem:[#allocation71_spill] sm:$0xff] }
 0xc15   :  { %4732 = vmatpush.bf16.msrb.mxu2 %v12590_v59  ;;  %4745 = vmatpush.bf16.msrb.mxu3 %v12591_v22  ;;  %v2881_v30 = vadd.f32 %v12599_v51, %v12598_v1 }
 0xc53   :  { %v10845_v23 = vpop.f32.mrf.mxu0  ;;  %v10847_v48 = vpop.f32.mrf.mxu1 }
 0xc54   :  { %12592 = vst [vmem:[#allocation51_spill] sm:$0xff] %v10845_v23 }
 0xc55   :  { %12593 = vst [vmem:[#allocation52_spill] sm:$0xff] %v10847_v48 }
 0xc5a   :  { %v10849_v43 = vpop.f32.mrf.mxu2  ;;  %v10851_v54 = vpop.f32.mrf.mxu3 }
 0xc5b   :  { %12594 = vst [vmem:[#allocation50_spill] sm:$0xff] %v10849_v43  ;;  %v4470_v5 = vpop.f32.mrf.mxu0  ;;  %v4483_v18 = vpop.f32.mrf.mxu1  ;;  %v12600_v43 = vld [vmem:[#allocation36_spill] sm:$0xff] }
 0xc5c   :  { %12595 = vst [vmem:[#allocation19_spill] sm:$0xff] %v10851_v54  ;;  %v2894_v54 = vadd.f32 %v12601_v13, %v12600_v43 }
 0xc62   :  { %v4496_v26 = vpop.f32.mrf.mxu2  ;;  %v4509_v59 = vpop.f32.mrf.mxu3 }
 0xc63   :  { %v4528_v25 = vpop.f32.mrf.mxu0  ;;  %v4541_v22 = vpop.f32.mrf.mxu1 }
 0xc64   :  { %v4571_v16 = vadd.f32 %v4528_v25, %v2868_v37  ;;  %v4572_v23 = vadd.f32 %v4541_v22, %v2881_v30  ;;  %v12602_v37 = vld [vmem:[#allocation73_spill] sm:$0xff]  ;;  %v12603_v22 = vld [vmem:[#allocation55_spill] sm:$0xff] }
 0xc65   :  { %v2907_v13 = vadd.f32 %v12603_v22, %v12602_v37 }
 0xc66   :  { %v7646_v38 = vmul.f32 -1.442695, %v4571_v16  ;;  %v7647_v48 = vmul.f32 -1.442695, %v4572_v23 }
 0xc68   :  { %8387 = vpow2.f32 %v7646_v38 }
 0xc69   :  { %8389 = vpow2.f32 %v7647_v48 }
 0xc6a   :  { %v4554_v5 = vpop.f32.mrf.mxu2  ;;  %v4567_v18 = vpop.f32.mrf.mxu3 }
 0xc6b   :  { %v4573_v4 = vadd.f32 %v4554_v5, %v2894_v54  ;;  %v4530_v35 = vpop.f32.mrf.mxu0  ;;  %v4543_v62 = vpop.f32.mrf.mxu1  ;;  %v4574_v30 = vadd.f32 %v4567_v18, %v2907_v13 }
 0xc6d   :  { %v7648_v40 = vmul.f32 -1.442695, %v4573_v4 }
 0xc6e   :  { %v8388_v51 = vpop.eup %8387 }
 0xc6f   :  { %v8390_v26 = vpop.eup %8389  ;;  %v4584_v59 = vadd.f32 1.0, %v8388_v51  ;;  %8391 = vpow2.f32 %v7648_v40 }
 0xc70   :  { %v4585_v1 = vadd.f32 1.0, %v8390_v26 }
 0xc71   :  { %8393 = vrcp.f32 %v4584_v59  ;;  %v4598_v51 = vand.u32 2147483648, %v4584_v59  ;;  %vm4592_vm2 = vweird.f32 %v4584_v59 }
 0xc72   :  { %8395 = vrcp.f32 %v4585_v1  ;;  %v4556_v16 = vpop.f32.mrf.mxu2  ;;  %v4569_v25 = vpop.f32.mrf.mxu3  ;;  %v4613_v40 = vand.u32 2147483648, %v4585_v1  ;;  %v4611_v43 = vand.u32 2147483647, %v4585_v1  ;;  %vm4607_vm3 = vweird.f32 %v4585_v1 }
 0xc73   :  { %v4596_v16 = vand.u32 2147483647, %v4584_v59 }
 0xc74   :  { %vm4612_vm7 = vcmp.eq.f32.partialorder %v4611_v43, 8.507059e+37 }
 0xc75   :  { %v8392_v38 = vpop.eup %8391  ;;  %vm4597_vm6 = vcmp.eq.f32.partialorder %v4596_v16, 8.507059e+37 }
 0xc76   :  { %v4586_v23 = vadd.f32 1.0, %v8392_v38  ;;  %v4599_v38 = vor.u32 1.1754944e-38, %v4598_v51 }
 0xc77   :  { %v8394_v48 = vpop.eup %8393 }
 0xc78   :  { %v8396_v54 = vpop.eup %8395  ;;  %v4588_v5 = vmul.f32 %v8394_v48, %v4584_v59  ;;  %8397 = vrcp.f32 %v4586_v23  ;;  %vm4593_vm0 = vweird.f32 %v8394_v48  ;;  %v4628_v51 = vand.u32 2147483648, %v4586_v23 }
 0xc79   :  { %v4603_v4 = vmul.f32 %v8396_v54, %v4585_v1  ;;  %8399 = vtanh.f32 %v4574_v30  ;;  %vm4608_vm1 = vweird.f32 %v8396_v54  ;;  %vm4594_vm4 = vmor %vm4592_vm2, %vm4593_vm0  ;;  %vm4622_vm9 = vweird.f32 %v4586_v23 }
 0xc7a   :  { %v4589_v62 = vsub.f32 1.0, %v4588_v5  ;;  %vm4609_vm5 = vmor %vm4607_vm3, %vm4608_vm1  ;;  %v4614_v5 = vor.u32 1.1754944e-38, %v4613_v40  ;;  %v4629_v16 = vor.u32 1.1754944e-38, %v4628_v51  ;;  %v12621_v51 = vld [vmem:[#allocation18_spill] sm:$0xff] }
 0xc7b   :  { %v4604_v35 = vsub.f32 1.0, %v4603_v4 }
 0xc7c   :  { %v4590_v26 = vmul.f32 %v8394_v48, %v4589_v62 }
 0xc7d   :  { %v4605_v25 = vmul.f32 %v8396_v54, %v4604_v35 }
 0xc7e   :  { %v8398_v31 = vpop.eup %8397  ;;  %v4591_v22 = vadd.f32 %v8394_v48, %v4590_v26 }
 0xc7f   :  { %v4618_v18 = vmul.f32 %v8398_v31, %v4586_v23  ;;  %v4606_v13 = vadd.f32 %v8396_v54, %v4605_v25  ;;  %v8400_v30 = vpop.eup %8399  ;;  %vm4623_vm8 = vweird.f32 %v8398_v31 }
 0xc80   :  { %v4595_v4 = vsel %vm4594_vm4, %v8394_v48, %v4591_v22  ;;  %v4626_v48 = vand.u32 2147483647, %v4586_v23  ;;  %vm4624_vm10 = vmor %vm4622_vm9, %vm4623_vm8  ;;  %v12609_v23 = vld [vmem:[#allocation43_spill] sm:$0xff]  ;;  %v12610_v22 = vld [vmem:[#allocation44_spill] sm:$0xff] }
 0xc81   :  { %v4619_v37 = vsub.f32 1.0, %v4618_v18  ;;  %v4600_v62 = vsel %vm4597_vm6, %v4599_v38, %v4595_v4  ;;  %v4610_v53 = vsel %vm4609_vm5, %v8396_v54, %v4606_v13  ;;  %v12611_v18 = vld [vmem:[#allocation45_spill] sm:$0xff]  ;;  %v12612_v38 = vld [vmem:[#allocation46_spill] sm:$0xff]  ;;  %v12613_v13 = vld [vmem:[#allocation47_spill] sm:$0xff] }
 0xc82   :  { %v4615_v35 = vsel %vm4612_vm7, %v4614_v5, %v4610_v53  ;;  %v4634_v12 = vmul.f32 %v8400_v30, %v4600_v62  ;;  %vm4627_vm11 = vcmp.eq.f32.partialorder %v4626_v48, 8.507059e+37  ;;  %v12614_v5 = vld [vmem:[#allocation48_spill] sm:$0xff]  ;;  %v12615_v4 = vld [vmem:[#allocation10_spill] sm:$0xff]  ;;  %v12616_v30 = vld [vmem:[#allocation11_spill] sm:$0xff] }
 0xc83   :  { %v4620_v46 = vmul.f32 %v8398_v31, %v4619_v37  ;;  %v4633_v26 = vmul.f32 %v4615_v35, %v10778_v21  ;;  %v12604_v21 = vld [vmem:[#allocation38_spill] sm:$0xff]  ;;  %v12617_v62 = vld [vmem:[#allocation13_spill] sm:$0xff] }
 0xc84   :  { %v12608_v37 = vld [vmem:[#allocation42_spill] sm:$0xff] }
 0xc85   :  { %v10862_v59 = vadd.f32 %v4634_v12, %v4633_v26  ;;  %v4621_v1 = vadd.f32 %v8398_v31, %v4620_v46  ;;  %v12605_v46 = vld [vmem:[#allocation39_spill] sm:$0xff]  ;;  %v12606_v12 = vld [vmem:[#allocation40_spill] sm:$0xff]  ;;  %v12618_v35 = vld [vmem:[#allocation14_spill] sm:$0xff] }
 0xc86   :  { %v12619_v26 = vld [vmem:[#allocation12_spill] sm:$0xff]  ;;  %v12622_v48 = vld [vmem:[#allocation26_spill] sm:$0xff] }
 0xc87   :  { %8401 = vtanh.f32 %v10862_v59  ;;  %v4625_v40 = vsel %vm4624_vm10, %v8398_v31, %v4621_v1  ;;  %v12607_v31 = vld [vmem:[#allocation41_spill] sm:$0xff]  ;;  %v12620_v1 = vld [vmem:[#allocation15_spill] sm:$0xff] }
 0xc88   :  { %v4630_v43 = vsel %vm4627_vm11, %v4629_v16, %v4625_v40  ;;  %v12623_v40 = vld [vmem:[#allocation29_spill] sm:$0xff] }
 0xc89   :  { %v12624_v16 = vld [vmem:[#allocation65_spill] sm:$0xff] }
 0xc8d   :  { %v8402_v54 = vpop.eup %8401 }
 0xc8e   :  { %v4637_v53 = vmul.f32 %v8402_v54, %v4630_v43  ;;  %v12625_v54 = vld [vmem:[#allocation16_spill] sm:$0xff]  ;;  %v12626_v43 = vld [vmem:[#allocation25_spill] sm:$0xff] }
 0xc90   :  { %v4638_v25 = vpack.c.bf16 %v4637_v53, %v4637_v53  ;;  %v12627_v53 = vld [vmem:[#allocation17_spill] sm:$0xff] }
 0xc92   :  { %4647 = vmatmul.bf16.vlgmr.msra.gmra.mxu0 %v4638_v25  ;;  %4660 = vmatmul.bf16.vlgmr.msra.gmra.mxu1 %v4638_v25 }
 0xc93   :  { %4673 = vmatmul.bf16.vlgmr.msra.gmra.mxu2 %v4638_v25  ;;  %4686 = vmatmul.bf16.vlgmr.msra.gmra.mxu3 %v4638_v25 }
 0xc94   :  { %4819 = vmatpush.bf16.msra.mxu0 %v10416_v29  ;;  %4832 = vmatpush.bf16.msra.mxu1 %v10418_v34 }
 0xc95   :  { %4845 = vmatpush.bf16.msra.mxu2 %v10420_v2  ;;  %4858 = vmatpush.bf16.msra.mxu3 %v10423_v32 }
 0xc98   :  { %4820 = vmatpush.bf16.msra.mxu0 %v10428_v56  ;;  %4833 = vmatpush.bf16.msra.mxu1 %v10434_v41 }
 0xc99   :  { %4846 = vmatpush.bf16.msra.mxu2 %v10436_v61  ;;  %4859 = vmatpush.bf16.msra.mxu3 %v10439_v6 }
 0xc9c   :  { %4821 = vmatpush.bf16.msra.mxu0 %v10444_v14  ;;  %4834 = vmatpush.bf16.msra.mxu1 %v10446_v28 }
 0xc9d   :  { %4847 = vmatpush.bf16.msra.mxu2 %v10448_v27  ;;  %4860 = vmatpush.bf16.msra.mxu3 %v10451_v50 }
 0xca0   :  { %4822 = vmatpush.bf16.msra.mxu0 %v10456_v52  ;;  %4835 = vmatpush.bf16.msra.mxu1 %v10462_v42 }
 0xca1   :  { %4848 = vmatpush.bf16.msra.mxu2 %v10464_v33  ;;  %4861 = vmatpush.bf16.msra.mxu3 %v10472_v63 }
 0xca2   :  { %4707 = vmatmul.bf16.vlgmr.msrb.gmra.mxu0 %v4638_v25  ;;  %4720 = vmatmul.bf16.vlgmr.msrb.gmra.mxu1 %v4638_v25 }
 0xca3   :  { %4733 = vmatmul.bf16.vlgmr.msrb.gmra.mxu2 %v4638_v25  ;;  %4746 = vmatmul.bf16.vlgmr.msrb.gmra.mxu3 %v4638_v25  ;;  %v12628_v25 = vld [vmem:[#allocation27_spill] sm:$0xff] }
 0xca4   :  { %4823 = vmatpush.bf16.msra.mxu0 %v10477_v55  ;;  %4836 = vmatpush.bf16.msra.mxu1 %v10479_v45 }
 0xca5   :  { %4849 = vmatpush.bf16.msra.mxu2 %v10481_v0  ;;  %4862 = vmatpush.bf16.msra.mxu3 %v10488_v39 }
 0xca8   :  { %4824 = vmatpush.bf16.msra.mxu0 %v10490_v3  ;;  %4837 = vmatpush.bf16.msra.mxu1 %v10494_v10 }
 0xca9   :  { %4850 = vmatpush.bf16.msra.mxu2 %v10497_v7  ;;  %4863 = vmatpush.bf16.msra.mxu3 %v10499_v36 }
 0xcac   :  { %4825 = vmatpush.bf16.msra.mxu0 %v10502_v8  ;;  %4838 = vmatpush.bf16.msra.mxu1 %v10506_v57 }
 0xcad   :  { %4851 = vmatpush.bf16.msra.mxu2 %v10508_v44  ;;  %4864 = vmatpush.bf16.msra.mxu3 %v10511_v20 }
 0xcb0   :  { %4826 = vmatpush.bf16.msra.mxu0 %v10523_v15  ;;  %4839 = vmatpush.bf16.msra.mxu1 %v10525_v17 }
 0xcb1   :  { %4852 = vmatpush.bf16.msra.mxu2 %v10527_v60  ;;  %4865 = vmatpush.bf16.msra.mxu3 %v10533_v58 }
 0xcb4   :  { %4879 = vmatpush.bf16.msrb.mxu0 %v10554_v9  ;;  %4892 = vmatpush.bf16.msrb.mxu1 %v10556_v47 }
 0xcb5   :  { %4905 = vmatpush.bf16.msrb.mxu2 %v10558_v24  ;;  %4918 = vmatpush.bf16.msrb.mxu3 %v10560_v19 }
 0xcb8   :  { %4880 = vmatpush.bf16.msrb.mxu0 %v10569_v11  ;;  %4893 = vmatpush.bf16.msrb.mxu1 %v12565_v49 }
 0xcb9   :  { %4906 = vmatpush.bf16.msrb.mxu2 %v12604_v21  ;;  %4919 = vmatpush.bf16.msrb.mxu3 %v12605_v46 }
 0xcbc   :  { %4881 = vmatpush.bf16.msrb.mxu0 %v12606_v12  ;;  %4894 = vmatpush.bf16.msrb.mxu1 %v12607_v31 }
 0xcbd   :  { %4907 = vmatpush.bf16.msrb.mxu2 %v12608_v37  ;;  %4920 = vmatpush.bf16.msrb.mxu3 %v12609_v23 }
 0xcc0   :  { %4882 = vmatpush.bf16.msrb.mxu0 %v12610_v22  ;;  %4895 = vmatpush.bf16.msrb.mxu1 %v12611_v18  ;;  %v12639_v22 = vld [vmem:[#allocation58_spill] sm:$0xff] }
 0xcc1   :  { %4908 = vmatpush.bf16.msrb.mxu2 %v12612_v38  ;;  %4921 = vmatpush.bf16.msrb.mxu3 %v12613_v13 }
 0xcc4   :  { %4883 = vmatpush.bf16.msrb.mxu0 %v12614_v5  ;;  %4896 = vmatpush.bf16.msrb.mxu1 %v12615_v4  ;;  %v12637_v4 = vld [vmem:[#allocation57_spill] sm:$0xff] }
 0xcc5   :  { %4909 = vmatpush.bf16.msrb.mxu2 %v12616_v30  ;;  %4922 = vmatpush.bf16.msrb.mxu3 %v12617_v62  ;;  %v12634_v62 = vld [vmem:[#allocation70_spill] sm:$0xff] }
 0xcc8   :  { %4884 = vmatpush.bf16.msrb.mxu0 %v12618_v35  ;;  %4897 = vmatpush.bf16.msrb.mxu1 %v12619_v26  ;;  %v12629_v35 = vld [vmem:[#allocation31_spill] sm:$0xff] }
 0xcc9   :  { %4910 = vmatpush.bf16.msrb.mxu2 %v12620_v1  ;;  %4923 = vmatpush.bf16.msrb.mxu3 %v12621_v51 }
 0xccc   :  { %4885 = vmatpush.bf16.msrb.mxu0 %v12622_v48  ;;  %4898 = vmatpush.bf16.msrb.mxu1 %v12623_v40 }
 0xccd   :  { %4911 = vmatpush.bf16.msrb.mxu2 %v12624_v16  ;;  %4924 = vmatpush.bf16.msrb.mxu3 %v12625_v54  ;;  %v12635_v54 = vld [vmem:[#allocation56_spill] sm:$0xff] }
 0xcce   :  { %v3048_v30 = vadd.f32 %v12635_v54, %v12634_v62 }
 0xcd0   :  { %4886 = vmatpush.bf16.msrb.mxu0 %v12626_v43  ;;  %4899 = vmatpush.bf16.msrb.mxu1 %v12627_v53  ;;  %v12636_v43 = vld [vmem:[#allocation71_spill] sm:$0xff] }
 0xcd1   :  { %4912 = vmatpush.bf16.msrb.mxu2 %v12628_v25  ;;  %4925 = vmatpush.bf16.msrb.mxu3 %v12629_v35  ;;  %v3061_v53 = vadd.f32 %v12637_v4, %v12636_v43 }
 0xd0f   :  { %v10929_v26 = vpop.f32.mrf.mxu0  ;;  %v10931_v1 = vpop.f32.mrf.mxu1 }
 0xd10   :  { %12630 = vst [vmem:[#allocation37_spill] sm:$0xff] %v10929_v26 }
 0xd11   :  { %12631 = vst [vmem:[#allocation32_spill] sm:$0xff] %v10931_v1 }
 0xd16   :  { %v10933_v51 = vpop.f32.mrf.mxu2  ;;  %v10935_v48 = vpop.f32.mrf.mxu3 }
 0xd17   :  { %12632 = vst [vmem:[#allocation53_spill] sm:$0xff] %v10933_v51  ;;  %v4650_v40 = vpop.f32.mrf.mxu0  ;;  %v4663_v16 = vpop.f32.mrf.mxu1  ;;  %v12638_v51 = vld [vmem:[#allocation36_spill] sm:$0xff] }
 0xd18   :  { %12633 = vst [vmem:[#allocation54_spill] sm:$0xff] %v10935_v48  ;;  %v3074_v48 = vadd.f32 %v12639_v22, %v12638_v51 }
 0xd1e   :  { %v4676_v5 = vpop.f32.mrf.mxu2  ;;  %v4689_v25 = vpop.f32.mrf.mxu3 }
 0xd1f   :  { %v4708_v13 = vpop.f32.mrf.mxu0  ;;  %v4721_v35 = vpop.f32.mrf.mxu1 }
 0xd20   :  { %v4751_v38 = vadd.f32 %v4708_v13, %v3048_v30  ;;  %v4752_v26 = vadd.f32 %v4721_v35, %v3061_v53  ;;  %v12640_v30 = vld [vmem:[#allocation73_spill] sm:$0xff]  ;;  %v12641_v35 = vld [vmem:[#allocation59_spill] sm:$0xff] }
 0xd21   :  { %v3087_v22 = vadd.f32 %v12641_v35, %v12640_v30 }
 0xd22   :  { %v7649_v18 = vmul.f32 -1.442695, %v4751_v38  ;;  %v7650_v1 = vmul.f32 -1.442695, %v4752_v26 }
 0xd24   :  { %8403 = vpow2.f32 %v7649_v18 }
 0xd25   :  { %8405 = vpow2.f32 %v7650_v1 }
 0xd26   :  { %v4734_v40 = vpop.f32.mrf.mxu2  ;;  %v4747_v16 = vpop.f32.mrf.mxu3 }
 0xd27   :  { %v4753_v23 = vadd.f32 %v4734_v40, %v3074_v48  ;;  %v4710_v54 = vpop.f32.mrf.mxu0  ;;  %v4723_v62 = vpop.f32.mrf.mxu1  ;;  %v4754_v53 = vadd.f32 %v4747_v16, %v3087_v22 }
 0xd29   :  { %v7651_v37 = vmul.f32 -1.442695, %v4753_v23 }
 0xd2a   :  { %v8404_v4 = vpop.eup %8403 }
 0xd2b   :  { %v8406_v5 = vpop.eup %8405  ;;  %v4764_v25 = vadd.f32 1.0, %v8404_v4  ;;  %8407 = vpow2.f32 %v7651_v37 }
 0xd2c   :  { %v4765_v43 = vadd.f32 1.0, %v8406_v5 }
 0xd2d   :  { %8409 = vrcp.f32 %v4764_v25  ;;  %v4778_v4 = vand.u32 2147483648, %v4764_v25  ;;  %vm4772_vm14 = vweird.f32 %v4764_v25 }
 0xd2e   :  { %8411 = vrcp.f32 %v4765_v43  ;;  %v4736_v38 = vpop.f32.mrf.mxu2  ;;  %v4749_v13 = vpop.f32.mrf.mxu3  ;;  %v4793_v37 = vand.u32 2147483648, %v4765_v43  ;;  %v4791_v51 = vand.u32 2147483647, %v4765_v43  ;;  %vm4787_vm15 = vweird.f32 %v4765_v43 }
 0xd2f   :  { %v4776_v38 = vand.u32 2147483647, %v4764_v25 }
 0xd30   :  { %vm4792_vm3 = vcmp.eq.f32.partialorder %v4791_v51, 8.507059e+37 }
 0xd31   :  { %v8408_v18 = vpop.eup %8407  ;;  %vm4777_vm2 = vcmp.eq.f32.partialorder %v4776_v38, 8.507059e+37 }
 0xd32   :  { %v4766_v26 = vadd.f32 1.0, %v8408_v18  ;;  %v4779_v18 = vor.u32 1.1754944e-38, %v4778_v4 }
 0xd33   :  { %v8410_v1 = vpop.eup %8409 }
 0xd34   :  { %v8412_v48 = vpop.eup %8411  ;;  %v4768_v40 = vmul.f32 %v8410_v1, %v4764_v25  ;;  %8413 = vrcp.f32 %v4766_v26  ;;  %vm4773_vm12 = vweird.f32 %v8410_v1  ;;  %v4808_v4 = vand.u32 2147483648, %v4766_v26 }
 0xd35   :  { %v4783_v23 = vmul.f32 %v8412_v48, %v4765_v43  ;;  %8415 = vtanh.f32 %v4754_v53  ;;  %vm4788_vm13 = vweird.f32 %v8412_v48  ;;  %vm4774_vm0 = vmor %vm4772_vm14, %vm4773_vm12  ;;  %vm4802_vm5 = vweird.f32 %v4766_v26 }
 0xd36   :  { %v4769_v62 = vsub.f32 1.0, %v4768_v40  ;;  %vm4789_vm1 = vmor %vm4787_vm15, %vm4788_vm13  ;;  %v4794_v40 = vor.u32 1.1754944e-38, %v4793_v37  ;;  %v4809_v38 = vor.u32 1.1754944e-38, %v4808_v4  ;;  %v12659_v4 = vld [vmem:[#allocation18_spill] sm:$0xff] }
 0xd37   :  { %v4784_v54 = vsub.f32 1.0, %v4783_v23 }
 0xd38   :  { %v4770_v5 = vmul.f32 %v8410_v1, %v4769_v62 }
 0xd39   :  { %v4785_v13 = vmul.f32 %v8412_v48, %v4784_v54 }
 0xd3a   :  { %v8414_v31 = vpop.eup %8413  ;;  %v4771_v35 = vadd.f32 %v8410_v1, %v4770_v5 }
 0xd3b   :  { %v4798_v16 = vmul.f32 %v8414_v31, %v4766_v26  ;;  %v4786_v22 = vadd.f32 %v8412_v48, %v4785_v13  ;;  %v8416_v53 = vpop.eup %8415  ;;  %vm4803_vm4 = vweird.f32 %v8414_v31 }
 0xd3c   :  { %v4775_v23 = vsel %vm4774_vm0, %v8410_v1, %v4771_v35  ;;  %v4806_v1 = vand.u32 2147483647, %v4766_v26  ;;  %vm4804_vm6 = vmor %vm4802_vm5, %vm4803_vm4  ;;  %v12647_v26 = vld [vmem:[#allocation43_spill] sm:$0xff]  ;;  %v12648_v35 = vld [vmem:[#allocation44_spill] sm:$0xff] }
 0xd3d   :  { %v4799_v30 = vsub.f32 1.0, %v4798_v16  ;;  %v4780_v62 = vsel %vm4777_vm2, %v4779_v18, %v4775_v23  ;;  %v4790_v12 = vsel %vm4789_vm1, %v8412_v48, %v4786_v22  ;;  %v12649_v16 = vld [vmem:[#allocation45_spill] sm:$0xff]  ;;  %v12650_v18 = vld [vmem:[#allocation46_spill] sm:$0xff]  ;;  %v12651_v22 = vld [vmem:[#allocation47_spill] sm:$0xff] }
 0xd3e   :  { %v4795_v54 = vsel %vm4792_vm3, %v4794_v40, %v4790_v12  ;;  %v4814_v46 = vmul.f32 %v8416_v53, %v4780_v62  ;;  %vm4807_vm7 = vcmp.eq.f32.partialorder %v4806_v1, 8.507059e+37  ;;  %v12652_v40 = vld [vmem:[#allocation48_spill] sm:$0xff]  ;;  %v12653_v23 = vld [vmem:[#allocation10_spill] sm:$0xff]  ;;  %v12654_v53 = vld [vmem:[#allocation11_spill] sm:$0xff] }
 0xd3f   :  { %v4800_v21 = vmul.f32 %v8414_v31, %v4799_v30  ;;  %v4813_v5 = vmul.f32 %v4795_v54, %v10862_v59  ;;  %v12642_v59 = vld [vmem:[#allocation38_spill] sm:$0xff]  ;;  %v12655_v62 = vld [vmem:[#allocation13_spill] sm:$0xff] }
 0xd40   :  { %v12646_v30 = vld [vmem:[#allocation42_spill] sm:$0xff] }
 0xd41   :  { %v10946_v25 = vadd.f32 %v4814_v46, %v4813_v5  ;;  %v4801_v43 = vadd.f32 %v8414_v31, %v4800_v21  ;;  %v12643_v21 = vld [vmem:[#allocation39_spill] sm:$0xff]  ;;  %v12644_v46 = vld [vmem:[#allocation40_spill] sm:$0xff]  ;;  %v12656_v54 = vld [vmem:[#allocation14_spill] sm:$0xff] }
 0xd42   :  { %v12657_v5 = vld [vmem:[#allocation12_spill] sm:$0xff]  ;;  %v12660_v1 = vld [vmem:[#allocation26_spill] sm:$0xff] }
 0xd43   :  { %8417 = vtanh.f32 %v10946_v25  ;;  %v4805_v37 = vsel %vm4804_vm6, %v8414_v31, %v4801_v43  ;;  %v12645_v31 = vld [vmem:[#allocation41_spill] sm:$0xff]  ;;  %v12658_v43 = vld [vmem:[#allocation15_spill] sm:$0xff] }
 0xd44   :  { %v4810_v51 = vsel %vm4807_vm7, %v4809_v38, %v4805_v37  ;;  %v12661_v37 = vld [vmem:[#allocation29_spill] sm:$0xff] }
 0xd45   :  { %v12662_v38 = vld [vmem:[#allocation65_spill] sm:$0xff] }
 0xd49   :  { %v8418_v48 = vpop.eup %8417 }
 0xd4a   :  { %v4817_v12 = vmul.f32 %v8418_v48, %v4810_v51  ;;  %v12663_v48 = vld [vmem:[#allocation16_spill] sm:$0xff]  ;;  %v12664_v51 = vld [vmem:[#allocation25_spill] sm:$0xff] }
 0xd4c   :  { %v4818_v13 = vpack.c.bf16 %v4817_v12, %v4817_v12  ;;  %v12665_v12 = vld [vmem:[#allocation17_spill] sm:$0xff] }
 0xd4e   :  { %4827 = vmatmul.bf16.vlgmr.msra.gmra.mxu0 %v4818_v13  ;;  %4840 = vmatmul.bf16.vlgmr.msra.gmra.mxu1 %v4818_v13 }
 0xd4f   :  { %4853 = vmatmul.bf16.vlgmr.msra.gmra.mxu2 %v4818_v13  ;;  %4866 = vmatmul.bf16.vlgmr.msra.gmra.mxu3 %v4818_v13 }
 0xd50   :  { %4999 = vmatpush.bf16.msra.mxu0 %v10416_v29  ;;  %5012 = vmatpush.bf16.msra.mxu1 %v10418_v34 }
 0xd51   :  { %5025 = vmatpush.bf16.msra.mxu2 %v10420_v2  ;;  %5038 = vmatpush.bf16.msra.mxu3 %v10423_v32 }
 0xd54   :  { %5000 = vmatpush.bf16.msra.mxu0 %v10428_v56  ;;  %5013 = vmatpush.bf16.msra.mxu1 %v10434_v41 }
 0xd55   :  { %5026 = vmatpush.bf16.msra.mxu2 %v10436_v61  ;;  %5039 = vmatpush.bf16.msra.mxu3 %v10439_v6 }
 0xd58   :  { %5001 = vmatpush.bf16.msra.mxu0 %v10444_v14  ;;  %5014 = vmatpush.bf16.msra.mxu1 %v10446_v28 }
 0xd59   :  { %5027 = vmatpush.bf16.msra.mxu2 %v10448_v27  ;;  %5040 = vmatpush.bf16.msra.mxu3 %v10451_v50 }
 0xd5c   :  { %5002 = vmatpush.bf16.msra.mxu0 %v10456_v52  ;;  %5015 = vmatpush.bf16.msra.mxu1 %v10462_v42 }
 0xd5d   :  { %5028 = vmatpush.bf16.msra.mxu2 %v10464_v33  ;;  %5041 = vmatpush.bf16.msra.mxu3 %v10472_v63 }
 0xd5e   :  { %4887 = vmatmul.bf16.vlgmr.msrb.gmra.mxu0 %v4818_v13  ;;  %4900 = vmatmul.bf16.vlgmr.msrb.gmra.mxu1 %v4818_v13 }
 0xd5f   :  { %4913 = vmatmul.bf16.vlgmr.msrb.gmra.mxu2 %v4818_v13  ;;  %4926 = vmatmul.bf16.vlgmr.msrb.gmra.mxu3 %v4818_v13  ;;  %v12666_v13 = vld [vmem:[#allocation27_spill] sm:$0xff] }
 0xd60   :  { %5003 = vmatpush.bf16.msra.mxu0 %v10477_v55  ;;  %5016 = vmatpush.bf16.msra.mxu1 %v10479_v45 }
 0xd61   :  { %5029 = vmatpush.bf16.msra.mxu2 %v10481_v0  ;;  %5042 = vmatpush.bf16.msra.mxu3 %v10488_v39 }
 0xd64   :  { %5004 = vmatpush.bf16.msra.mxu0 %v10490_v3  ;;  %5017 = vmatpush.bf16.msra.mxu1 %v10494_v10 }
 0xd65   :  { %5030 = vmatpush.bf16.msra.mxu2 %v10497_v7  ;;  %5043 = vmatpush.bf16.msra.mxu3 %v10499_v36 }
 0xd68   :  { %5005 = vmatpush.bf16.msra.mxu0 %v10502_v8  ;;  %5018 = vmatpush.bf16.msra.mxu1 %v10506_v57 }
 0xd69   :  { %5031 = vmatpush.bf16.msra.mxu2 %v10508_v44  ;;  %5044 = vmatpush.bf16.msra.mxu3 %v10511_v20 }
 0xd6c   :  { %5006 = vmatpush.bf16.msra.mxu0 %v10523_v15  ;;  %5019 = vmatpush.bf16.msra.mxu1 %v10525_v17 }
 0xd6d   :  { %5032 = vmatpush.bf16.msra.mxu2 %v10527_v60  ;;  %5045 = vmatpush.bf16.msra.mxu3 %v10533_v58 }
 0xd70   :  { %5059 = vmatpush.bf16.msrb.mxu0 %v10554_v9  ;;  %5072 = vmatpush.bf16.msrb.mxu1 %v10556_v47 }
 0xd71   :  { %5085 = vmatpush.bf16.msrb.mxu2 %v10558_v24  ;;  %5098 = vmatpush.bf16.msrb.mxu3 %v10560_v19 }
 0xd74   :  { %5060 = vmatpush.bf16.msrb.mxu0 %v10569_v11  ;;  %5073 = vmatpush.bf16.msrb.mxu1 %v12565_v49 }
 0xd75   :  { %5086 = vmatpush.bf16.msrb.mxu2 %v12642_v59  ;;  %5099 = vmatpush.bf16.msrb.mxu3 %v12643_v21 }
 0xd78   :  { %5061 = vmatpush.bf16.msrb.mxu0 %v12644_v46  ;;  %5074 = vmatpush.bf16.msrb.mxu1 %v12645_v31 }
 0xd79   :  { %5087 = vmatpush.bf16.msrb.mxu2 %v12646_v30  ;;  %5100 = vmatpush.bf16.msrb.mxu3 %v12647_v26 }
 0xd7c   :  { %5062 = vmatpush.bf16.msrb.mxu0 %v12648_v35  ;;  %5075 = vmatpush.bf16.msrb.mxu1 %v12649_v16  ;;  %v12677_v35 = vld [vmem:[#allocation62_spill] sm:$0xff] }
 0xd7d   :  { %5088 = vmatpush.bf16.msrb.mxu2 %v12650_v18  ;;  %5101 = vmatpush.bf16.msrb.mxu3 %v12651_v22 }
 0xd80   :  { %5063 = vmatpush.bf16.msrb.mxu0 %v12652_v40  ;;  %5076 = vmatpush.bf16.msrb.mxu1 %v12653_v23  ;;  %v12675_v23 = vld [vmem:[#allocation61_spill] sm:$0xff] }
 0xd81   :  { %5089 = vmatpush.bf16.msrb.mxu2 %v12654_v53  ;;  %5102 = vmatpush.bf16.msrb.mxu3 %v12655_v62  ;;  %v12672_v62 = vld [vmem:[#allocation70_spill] sm:$0xff] }
 0xd84   :  { %5064 = vmatpush.bf16.msrb.mxu0 %v12656_v54  ;;  %5077 = vmatpush.bf16.msrb.mxu1 %v12657_v5  ;;  %v12667_v54 = vld [vmem:[#allocation31_spill] sm:$0xff] }
 0xd85   :  { %5090 = vmatpush.bf16.msrb.mxu2 %v12658_v43  ;;  %5103 = vmatpush.bf16.msrb.mxu3 %v12659_v4 }
 0xd88   :  { %5065 = vmatpush.bf16.msrb.mxu0 %v12660_v1  ;;  %5078 = vmatpush.bf16.msrb.mxu1 %v12661_v37 }
 0xd89   :  { %5091 = vmatpush.bf16.msrb.mxu2 %v12662_v38  ;;  %5104 = vmatpush.bf16.msrb.mxu3 %v12663_v48  ;;  %v12673_v48 = vld [vmem:[#allocation60_spill] sm:$0xff] }
 0xd8a   :  { %v3228_v53 = vadd.f32 %v12673_v48, %v12672_v62 }
 0xd8c   :  { %5066 = vmatpush.bf16.msrb.mxu0 %v12664_v51  ;;  %5079 = vmatpush.bf16.msrb.mxu1 %v12665_v12  ;;  %v12674_v51 = vld [vmem:[#allocation71_spill] sm:$0xff] }
 0xd8d   :  { %5092 = vmatpush.bf16.msrb.mxu2 %v12666_v13  ;;  %5105 = vmatpush.bf16.msrb.mxu3 %v12667_v54  ;;  %v3241_v12 = vadd.f32 %v12675_v23, %v12674_v51 }
 0xdcb   :  { %v11013_v5 = vpop.f32.mrf.mxu0  ;;  %v11015_v43 = vpop.f32.mrf.mxu1 }
 0xdcc   :  { %12668 = vst [vmem:[#allocation55_spill] sm:$0xff] %v11013_v5 }
 0xdcd   :  { %12669 = vst [vmem:[#allocation56_spill] sm:$0xff] %v11015_v43 }
 0xdd2   :  { %v11017_v4 = vpop.f32.mrf.mxu2  ;;  %v11019_v1 = vpop.f32.mrf.mxu3 }
 0xdd3   :  { %12670 = vst [vmem:[#allocation57_spill] sm:$0xff] %v11017_v4  ;;  %v4830_v37 = vpop.f32.mrf.mxu0  ;;  %v4843_v38 = vpop.f32.mrf.mxu1  ;;  %v12676_v4 = vld [vmem:[#allocation36_spill] sm:$0xff] }
 0xdd4   :  { %12671 = vst [vmem:[#allocation58_spill] sm:$0xff] %v11019_v1  ;;  %v3254_v1 = vadd.f32 %v12677_v35, %v12676_v4 }
 0xdda   :  { %v4856_v40 = vpop.f32.mrf.mxu2  ;;  %v4869_v13 = vpop.f32.mrf.mxu3 }
 0xddb   :  { %v4888_v22 = vpop.f32.mrf.mxu0  ;;  %v4901_v54 = vpop.f32.mrf.mxu1 }
 0xddc   :  { %v4931_v18 = vadd.f32 %v4888_v22, %v3228_v53  ;;  %v4932_v5 = vadd.f32 %v4901_v54, %v3241_v12  ;;  %v12678_v53 = vld [vmem:[#allocation73_spill] sm:$0xff]  ;;  %v12679_v54 = vld [vmem:[#allocation63_spill] sm:$0xff] }
 0xddd   :  { %v3267_v35 = vadd.f32 %v12679_v54, %v12678_v53 }
 0xdde   :  { %v7652_v16 = vmul.f32 -1.442695, %v4931_v18  ;;  %v7653_v43 = vmul.f32 -1.442695, %v4932_v5 }
 0xde0   :  { %8419 = vpow2.f32 %v7652_v16 }
 0xde1   :  { %8421 = vpow2.f32 %v7653_v43 }
 0xde2   :  { %v4914_v37 = vpop.f32.mrf.mxu2  ;;  %v4927_v38 = vpop.f32.mrf.mxu3 }
 0xde3   :  { %v4933_v26 = vadd.f32 %v4914_v37, %v3254_v1  ;;  %v4890_v48 = vpop.f32.mrf.mxu0  ;;  %v4903_v62 = vpop.f32.mrf.mxu1  ;;  %v4934_v12 = vadd.f32 %v4927_v38, %v3267_v35 }
 0xde5   :  { %v7654_v30 = vmul.f32 -1.442695, %v4933_v26 }
 0xde6   :  { %v8420_v23 = vpop.eup %8419 }
 0xde7   :  { %v8422_v40 = vpop.eup %8421  ;;  %v4944_v13 = vadd.f32 1.0, %v8420_v23  ;;  %8423 = vpow2.f32 %v7654_v30 }
 0xde8   :  { %v4945_v51 = vadd.f32 1.0, %v8422_v40 }
 0xde9   :  { %8425 = vrcp.f32 %v4944_v13  ;;  %v4958_v23 = vand.u32 2147483648, %v4944_v13  ;;  %vm4952_vm10 = vweird.f32 %v4944_v13 }
 0xdea   :  { %8427 = vrcp.f32 %v4945_v51  ;;  %v4916_v18 = vpop.f32.mrf.mxu2  ;;  %v4929_v22 = vpop.f32.mrf.mxu3  ;;  %v4973_v30 = vand.u32 2147483648, %v4945_v51  ;;  %v4971_v4 = vand.u32 2147483647, %v4945_v51  ;;  %vm4967_vm11 = vweird.f32 %v4945_v51 }
 0xdeb   :  { %v4956_v18 = vand.u32 2147483647, %v4944_v13 }
 0xdec   :  { %vm4972_vm15 = vcmp.eq.f32.partialorder %v4971_v4, 8.507059e+37 }
 0xded   :  { %v8424_v16 = vpop.eup %8423  ;;  %vm4957_vm14 = vcmp.eq.f32.partialorder %v4956_v18, 8.507059e+37 }
 0xdee   :  { %v4946_v5 = vadd.f32 1.0, %v8424_v16  ;;  %v4959_v16 = vor.u32 1.1754944e-38, %v4958_v23 }
 0xdef   :  { %v8426_v43 = vpop.eup %8425 }
 0xdf0   :  { %v8428_v1 = vpop.eup %8427  ;;  %v4948_v37 = vmul.f32 %v8426_v43, %v4944_v13  ;;  %8429 = vrcp.f32 %v4946_v5  ;;  %vm4953_vm8 = vweird.f32 %v8426_v43  ;;  %v4988_v23 = vand.u32 2147483648, %v4946_v5 }
 0xdf1   :  { %v4963_v26 = vmul.f32 %v8428_v1, %v4945_v51  ;;  %8431 = vtanh.f32 %v4934_v12  ;;  %vm4968_vm9 = vweird.f32 %v8428_v1  ;;  %vm4954_vm12 = vmor %vm4952_vm10, %vm4953_vm8  ;;  %vm4982_vm1 = vweird.f32 %v4946_v5 }
 0xdf2   :  { %v4949_v62 = vsub.f32 1.0, %v4948_v37  ;;  %vm4969_vm13 = vmor %vm4967_vm11, %vm4968_vm9  ;;  %v4974_v37 = vor.u32 1.1754944e-38, %v4973_v30  ;;  %v4989_v18 = vor.u32 1.1754944e-38, %v4988_v23  ;;  %v12697_v23 = vld [vmem:[#allocation18_spill] sm:$0xff] }
 0xdf3   :  { %v4964_v48 = vsub.f32 1.0, %v4963_v26 }
 0xdf4   :  { %v4950_v40 = vmul.f32 %v8426_v43, %v4949_v62 }
 0xdf5   :  { %v4965_v22 = vmul.f32 %v8428_v1, %v4964_v48 }
 0xdf6   :  { %v8430_v31 = vpop.eup %8429  ;;  %v4951_v54 = vadd.f32 %v8426_v43, %v4950_v40 }
 0xdf7   :  { %v4978_v38 = vmul.f32 %v8430_v31, %v4946_v5  ;;  %v4966_v35 = vadd.f32 %v8428_v1, %v4965_v22  ;;  %v8432_v12 = vpop.eup %8431  ;;  %vm4983_vm0 = vweird.f32 %v8430_v31 }
 0xdf8   :  { %v4955_v26 = vsel %vm4954_vm12, %v8426_v43, %v4951_v54  ;;  %v4986_v43 = vand.u32 2147483647, %v4946_v5  ;;  %vm4984_vm2 = vmor %vm4982_vm1, %vm4983_vm0  ;;  %v12685_v5 = vld [vmem:[#allocation43_spill] sm:$0xff]  ;;  %v12686_v54 = vld [vmem:[#allocation44_spill] sm:$0xff] }
 0xdf9   :  { %v4979_v53 = vsub.f32 1.0, %v4978_v38  ;;  %v4960_v62 = vsel %vm4957_vm14, %v4959_v16, %v4955_v26  ;;  %v4970_v46 = vsel %vm4969_vm13, %v8428_v1, %v4966_v35  ;;  %v12687_v38 = vld [vmem:[#allocation45_spill] sm:$0xff]  ;;  %v12688_v16 = vld [vmem:[#allocation46_spill] sm:$0xff]  ;;  %v12689_v35 = vld [vmem:[#allocation47_spill] sm:$0xff] }
 0xdfa   :  { %v4975_v48 = vsel %vm4972_vm15, %v4974_v37, %v4970_v46  ;;  %v4994_v21 = vmul.f32 %v8432_v12, %v4960_v62  ;;  %vm4987_vm3 = vcmp.eq.f32.partialorder %v4986_v43, 8.507059e+37  ;;  %v12690_v37 = vld [vmem:[#allocation48_spill] sm:$0xff]  ;;  %v12691_v26 = vld [vmem:[#allocation10_spill] sm:$0xff]  ;;  %v12692_v12 = vld [vmem:[#allocation11_spill] sm:$0xff] }
 0xdfb   :  { %v4980_v59 = vmul.f32 %v8430_v31, %v4979_v53  ;;  %v4993_v40 = vmul.f32 %v4975_v48, %v10946_v25  ;;  %v12680_v25 = vld [vmem:[#allocation38_spill] sm:$0xff]  ;;  %v12693_v62 = vld [vmem:[#allocation13_spill] sm:$0xff] }
 0xdfc   :  { %v12684_v53 = vld [vmem:[#allocation42_spill] sm:$0xff] }
 0xdfd   :  { %v11030_v13 = vadd.f32 %v4994_v21, %v4993_v40  ;;  %v4981_v51 = vadd.f32 %v8430_v31, %v4980_v59  ;;  %v12681_v59 = vld [vmem:[#allocation39_spill] sm:$0xff]  ;;  %v12682_v21 = vld [vmem:[#allocation40_spill] sm:$0xff]  ;;  %v12694_v48 = vld [vmem:[#allocation14_spill] sm:$0xff] }
 0xdfe   :  { %v12695_v40 = vld [vmem:[#allocation12_spill] sm:$0xff]  ;;  %v12698_v43 = vld [vmem:[#allocation26_spill] sm:$0xff] }
 0xdff   :  { %8433 = vtanh.f32 %v11030_v13  ;;  %v4985_v30 = vsel %vm4984_vm2, %v8430_v31, %v4981_v51  ;;  %v12683_v31 = vld [vmem:[#allocation41_spill] sm:$0xff]  ;;  %v12696_v51 = vld [vmem:[#allocation15_spill] sm:$0xff] }
 0xe00   :  { %v4990_v4 = vsel %vm4987_vm3, %v4989_v18, %v4985_v30  ;;  %v12699_v30 = vld [vmem:[#allocation29_spill] sm:$0xff] }
 0xe01   :  { %v12700_v18 = vld [vmem:[#allocation65_spill] sm:$0xff] }
 0xe05   :  { %v8434_v1 = vpop.eup %8433 }
 0xe06   :  { %v4997_v46 = vmul.f32 %v8434_v1, %v4990_v4  ;;  %v12701_v1 = vld [vmem:[#allocation16_spill] sm:$0xff]  ;;  %v12702_v4 = vld [vmem:[#allocation25_spill] sm:$0xff] }
 0xe08   :  { %v4998_v22 = vpack.c.bf16 %v4997_v46, %v4997_v46  ;;  %v12703_v46 = vld [vmem:[#allocation17_spill] sm:$0xff] }
 0xe0a   :  { %5007 = vmatmul.bf16.vlgmr.msra.gmra.mxu0 %v4998_v22  ;;  %5020 = vmatmul.bf16.vlgmr.msra.gmra.mxu1 %v4998_v22 }
 0xe0b   :  { %5033 = vmatmul.bf16.vlgmr.msra.gmra.mxu2 %v4998_v22  ;;  %5046 = vmatmul.bf16.vlgmr.msra.gmra.mxu3 %v4998_v22 }
 0xe0c   :  { %5179 = vmatpush.bf16.msra.mxu0 %v10416_v29  ;;  %5192 = vmatpush.bf16.msra.mxu1 %v10418_v34 }
 0xe0d   :  { %5205 = vmatpush.bf16.msra.mxu2 %v10420_v2  ;;  %5218 = vmatpush.bf16.msra.mxu3 %v10423_v32 }
 0xe10   :  { %5180 = vmatpush.bf16.msra.mxu0 %v10428_v56  ;;  %5193 = vmatpush.bf16.msra.mxu1 %v10434_v41 }
 0xe11   :  { %5206 = vmatpush.bf16.msra.mxu2 %v10436_v61  ;;  %5219 = vmatpush.bf16.msra.mxu3 %v10439_v6 }
 0xe14   :  { %5181 = vmatpush.bf16.msra.mxu0 %v10444_v14  ;;  %5194 = vmatpush.bf16.msra.mxu1 %v10446_v28 }
 0xe15   :  { %5207 = vmatpush.bf16.msra.mxu2 %v10448_v27  ;;  %5220 = vmatpush.bf16.msra.mxu3 %v10451_v50 }
 0xe18   :  { %5182 = vmatpush.bf16.msra.mxu0 %v10456_v52  ;;  %5195 = vmatpush.bf16.msra.mxu1 %v10462_v42 }
 0xe19   :  { %5208 = vmatpush.bf16.msra.mxu2 %v10464_v33  ;;  %5221 = vmatpush.bf16.msra.mxu3 %v10472_v63 }
 0xe1a   :  { %5067 = vmatmul.bf16.vlgmr.msrb.gmra.mxu0 %v4998_v22  ;;  %5080 = vmatmul.bf16.vlgmr.msrb.gmra.mxu1 %v4998_v22 }
 0xe1b   :  { %5093 = vmatmul.bf16.vlgmr.msrb.gmra.mxu2 %v4998_v22  ;;  %5106 = vmatmul.bf16.vlgmr.msrb.gmra.mxu3 %v4998_v22  ;;  %v12704_v22 = vld [vmem:[#allocation27_spill] sm:$0xff] }
 0xe1c   :  { %5183 = vmatpush.bf16.msra.mxu0 %v10477_v55  ;;  %5196 = vmatpush.bf16.msra.mxu1 %v10479_v45 }
 0xe1d   :  { %5209 = vmatpush.bf16.msra.mxu2 %v10481_v0  ;;  %5222 = vmatpush.bf16.msra.mxu3 %v10488_v39 }
 0xe20   :  { %5184 = vmatpush.bf16.msra.mxu0 %v10490_v3  ;;  %5197 = vmatpush.bf16.msra.mxu1 %v10494_v10 }
 0xe21   :  { %5210 = vmatpush.bf16.msra.mxu2 %v10497_v7  ;;  %5223 = vmatpush.bf16.msra.mxu3 %v10499_v36 }
 0xe24   :  { %5185 = vmatpush.bf16.msra.mxu0 %v10502_v8  ;;  %5198 = vmatpush.bf16.msra.mxu1 %v10506_v57 }
 0xe25   :  { %5211 = vmatpush.bf16.msra.mxu2 %v10508_v44  ;;  %5224 = vmatpush.bf16.msra.mxu3 %v10511_v20 }
 0xe28   :  { %5186 = vmatpush.bf16.msra.mxu0 %v10523_v15  ;;  %5199 = vmatpush.bf16.msra.mxu1 %v10525_v17 }
 0xe29   :  { %5212 = vmatpush.bf16.msra.mxu2 %v10527_v60  ;;  %5225 = vmatpush.bf16.msra.mxu3 %v10533_v58 }
 0xe2c   :  { %5239 = vmatpush.bf16.msrb.mxu0 %v10554_v9  ;;  %5252 = vmatpush.bf16.msrb.mxu1 %v10556_v47 }
 0xe2d   :  { %5265 = vmatpush.bf16.msrb.mxu2 %v10558_v24  ;;  %5278 = vmatpush.bf16.msrb.mxu3 %v10560_v19 }
 0xe30   :  { %5240 = vmatpush.bf16.msrb.mxu0 %v10569_v11  ;;  %5253 = vmatpush.bf16.msrb.mxu1 %v12565_v49 }
 0xe31   :  { %5266 = vmatpush.bf16.msrb.mxu2 %v12680_v25  ;;  %5279 = vmatpush.bf16.msrb.mxu3 %v12681_v59 }
 0xe34   :  { %5241 = vmatpush.bf16.msrb.mxu0 %v12682_v21  ;;  %5254 = vmatpush.bf16.msrb.mxu1 %v12683_v31 }
 0xe35   :  { %5267 = vmatpush.bf16.msrb.mxu2 %v12684_v53  ;;  %5280 = vmatpush.bf16.msrb.mxu3 %v12685_v5 }
 0xe38   :  { %5242 = vmatpush.bf16.msrb.mxu0 %v12686_v54  ;;  %5255 = vmatpush.bf16.msrb.mxu1 %v12687_v38  ;;  %v12715_v54 = vld [vmem:[#allocation22_spill] sm:$0xff] }
 0xe39   :  { %5268 = vmatpush.bf16.msrb.mxu2 %v12688_v16  ;;  %5281 = vmatpush.bf16.msrb.mxu3 %v12689_v35 }
 0xe3c   :  { %5243 = vmatpush.bf16.msrb.mxu0 %v12690_v37  ;;  %5256 = vmatpush.bf16.msrb.mxu1 %v12691_v26  ;;  %v12713_v26 = vld [vmem:[#allocation21_spill] sm:$0xff] }
 0xe3d   :  { %5269 = vmatpush.bf16.msrb.mxu2 %v12692_v12  ;;  %5282 = vmatpush.bf16.msrb.mxu3 %v12693_v62  ;;  %v12710_v62 = vld [vmem:[#allocation70_spill] sm:$0xff] }
 0xe40   :  { %5244 = vmatpush.bf16.msrb.mxu0 %v12694_v48  ;;  %5257 = vmatpush.bf16.msrb.mxu1 %v12695_v40  ;;  %v12705_v48 = vld [vmem:[#allocation31_spill] sm:$0xff] }
 0xe41   :  { %5270 = vmatpush.bf16.msrb.mxu2 %v12696_v51  ;;  %5283 = vmatpush.bf16.msrb.mxu3 %v12697_v23 }
 0xe44   :  { %5245 = vmatpush.bf16.msrb.mxu0 %v12698_v43  ;;  %5258 = vmatpush.bf16.msrb.mxu1 %v12699_v30 }
 0xe45   :  { %5271 = vmatpush.bf16.msrb.mxu2 %v12700_v18  ;;  %5284 = vmatpush.bf16.msrb.mxu3 %v12701_v1  ;;  %v12711_v1 = vld [vmem:[#allocation64_spill] sm:$0xff] }
 0xe46   :  { %v3408_v12 = vadd.f32 %v12711_v1, %v12710_v62 }
 0xe48   :  { %5246 = vmatpush.bf16.msrb.mxu0 %v12702_v4  ;;  %5259 = vmatpush.bf16.msrb.mxu1 %v12703_v46  ;;  %v12712_v4 = vld [vmem:[#allocation71_spill] sm:$0xff] }
 0xe49   :  { %5272 = vmatpush.bf16.msrb.mxu2 %v12704_v22  ;;  %5285 = vmatpush.bf16.msrb.mxu3 %v12705_v48  ;;  %v3421_v46 = vadd.f32 %v12713_v26, %v12712_v4 }
 0xe87   :  { %v11097_v40 = vpop.f32.mrf.mxu0  ;;  %v11099_v51 = vpop.f32.mrf.mxu1 }
 0xe88   :  { %12706 = vst [vmem:[#allocation59_spill] sm:$0xff] %v11097_v40 }
 0xe89   :  { %12707 = vst [vmem:[#allocation60_spill] sm:$0xff] %v11099_v51 }
 0xe8e   :  { %v11101_v23 = vpop.f32.mrf.mxu2  ;;  %v11103_v43 = vpop.f32.mrf.mxu3 }
 0xe8f   :  { %12708 = vst [vmem:[#allocation61_spill] sm:$0xff] %v11101_v23  ;;  %v5010_v30 = vpop.f32.mrf.mxu0  ;;  %v5023_v18 = vpop.f32.mrf.mxu1  ;;  %v12714_v23 = vld [vmem:[#allocation36_spill] sm:$0xff] }
 0xe90   :  { %12709 = vst [vmem:[#allocation62_spill] sm:$0xff] %v11103_v43  ;;  %v3434_v43 = vadd.f32 %v12715_v54, %v12714_v23 }
 0xe96   :  { %v5036_v37 = vpop.f32.mrf.mxu2  ;;  %v5049_v22 = vpop.f32.mrf.mxu3 }
 0xe97   :  { %v5068_v35 = vpop.f32.mrf.mxu0  ;;  %v5081_v48 = vpop.f32.mrf.mxu1 }
 0xe98   :  { %v5111_v16 = vadd.f32 %v5068_v35, %v3408_v12  ;;  %v5112_v40 = vadd.f32 %v5081_v48, %v3421_v46  ;;  %v12716_v12 = vld [vmem:[#allocation73_spill] sm:$0xff]  ;;  %v12717_v48 = vld [vmem:[#allocation23_spill] sm:$0xff] }
 0xe99   :  { %v3447_v54 = vadd.f32 %v12717_v48, %v12716_v12 }
 0xe9a   :  { %v7655_v38 = vmul.f32 -1.442695, %v5111_v16  ;;  %v7656_v51 = vmul.f32 -1.442695, %v5112_v40 }
 0xe9c   :  { %8435 = vpow2.f32 %v7655_v38 }
 0xe9d   :  { %8437 = vpow2.f32 %v7656_v51 }
 0xe9e   :  { %v5094_v30 = vpop.f32.mrf.mxu2  ;;  %v5107_v18 = vpop.f32.mrf.mxu3 }
 0xe9f   :  { %v5113_v5 = vadd.f32 %v5094_v30, %v3434_v43  ;;  %v5070_v1 = vpop.f32.mrf.mxu0  ;;  %v5083_v62 = vpop.f32.mrf.mxu1  ;;  %v5114_v46 = vadd.f32 %v5107_v18, %v3447_v54 }
 0xea1   :  { %v7657_v53 = vmul.f32 -1.442695, %v5113_v5 }
 0xea2   :  { %v8436_v26 = vpop.eup %8435 }
 0xea3   :  { %v8438_v37 = vpop.eup %8437  ;;  %v5124_v22 = vadd.f32 1.0, %v8436_v26  ;;  %8439 = vpow2.f32 %v7657_v53 }
 0xea4   :  { %v5125_v4 = vadd.f32 1.0, %v8438_v37 }
 0xea5   :  { %8441 = vrcp.f32 %v5124_v22  ;;  %v5138_v26 = vand.u32 2147483648, %v5124_v22  ;;  %vm5132_vm6 = vweird.f32 %v5124_v22 }
 0xea6   :  { %8443 = vrcp.f32 %v5125_v4  ;;  %v5096_v16 = vpop.f32.mrf.mxu2  ;;  %v5109_v35 = vpop.f32.mrf.mxu3  ;;  %v5153_v53 = vand.u32 2147483648, %v5125_v4  ;;  %v5151_v23 = vand.u32 2147483647, %v5125_v4  ;;  %vm5147_vm7 = vweird.f32 %v5125_v4 }
 0xea7   :  { %v5136_v16 = vand.u32 2147483647, %v5124_v22 }
 0xea8   :  { %vm5152_vm11 = vcmp.eq.f32.partialorder %v5151_v23, 8.507059e+37 }
 0xea9   :  { %v8440_v38 = vpop.eup %8439  ;;  %vm5137_vm10 = vcmp.eq.f32.partialorder %v5136_v16, 8.507059e+37 }
 0xeaa   :  { %v5126_v40 = vadd.f32 1.0, %v8440_v38  ;;  %v5139_v38 = vor.u32 1.1754944e-38, %v5138_v26 }
 0xeab   :  { %v8442_v51 = vpop.eup %8441 }
 0xeac   :  { %v8444_v43 = vpop.eup %8443  ;;  %v5128_v30 = vmul.f32 %v8442_v51, %v5124_v22  ;;  %8445 = vrcp.f32 %v5126_v40  ;;  %vm5133_vm4 = vweird.f32 %v8442_v51  ;;  %v5168_v26 = vand.u32 2147483648, %v5126_v40 }
 0xead   :  { %v5143_v5 = vmul.f32 %v8444_v43, %v5125_v4  ;;  %8447 = vtanh.f32 %v5114_v46  ;;  %vm5148_vm5 = vweird.f32 %v8444_v43  ;;  %vm5134_vm8 = vmor %vm5132_vm6, %vm5133_vm4  ;;  %vm5162_vm13 = vweird.f32 %v5126_v40 }
 0xeae   :  { %v5129_v62 = vsub.f32 1.0, %v5128_v30  ;;  %vm5149_vm9 = vmor %vm5147_vm7, %vm5148_vm5  ;;  %v5154_v30 = vor.u32 1.1754944e-38, %v5153_v53  ;;  %v5169_v16 = vor.u32 1.1754944e-38, %v5168_v26  ;;  %v12741_v26 = vld [vmem:[#allocation17_spill] sm:$0xff] }
 0xeaf   :  { %v5144_v1 = vsub.f32 1.0, %v5143_v5 }
 0xeb0   :  { %v5130_v37 = vmul.f32 %v8442_v51, %v5129_v62 }
 0xeb1   :  { %v5145_v35 = vmul.f32 %v8444_v43, %v5144_v1 }
 0xeb2   :  { %v8446_v31 = vpop.eup %8445  ;;  %v5131_v48 = vadd.f32 %v8442_v51, %v5130_v37 }
 0xeb3   :  { %v5158_v18 = vmul.f32 %v8446_v31, %v5126_v40  ;;  %v5146_v54 = vadd.f32 %v8444_v43, %v5145_v35  ;;  %v8448_v46 = vpop.eup %8447  ;;  %vm5163_vm12 = vweird.f32 %v8446_v31 }
 0xeb4   :  { %v5135_v5 = vsel %vm5134_vm8, %v8442_v51, %v5131_v48  ;;  %v5166_v51 = vand.u32 2147483647, %v5126_v40  ;;  %vm5164_vm14 = vmor %vm5162_vm13, %vm5163_vm12  ;;  %v12729_v40 = vld [vmem:[#allocation10_spill] sm:$0xff]  ;;  %v12730_v48 = vld [vmem:[#allocation11_spill] sm:$0xff] }
 0xeb5   :  { %v5159_v12 = vsub.f32 1.0, %v5158_v18  ;;  %v5140_v62 = vsel %vm5137_vm10, %v5139_v38, %v5135_v5  ;;  %v5150_v21 = vsel %vm5149_vm9, %v8444_v43, %v5146_v54  ;;  %v12731_v18 = vld [vmem:[#allocation13_spill] sm:$0xff]  ;;  %v12732_v38 = vld [vmem:[#allocation14_spill] sm:$0xff]  ;;  %v12733_v54 = vld [vmem:[#allocation12_spill] sm:$0xff] }
 0xeb6   :  { %v5155_v1 = vsel %vm5152_vm11, %v5154_v30, %v5150_v21  ;;  %v5174_v59 = vmul.f32 %v8448_v46, %v5140_v62  ;;  %vm5167_vm15 = vcmp.eq.f32.partialorder %v5166_v51, 8.507059e+37  ;;  %v12734_v30 = vld [vmem:[#allocation15_spill] sm:$0xff]  ;;  %v12735_v5 = vld [vmem:[#allocation18_spill] sm:$0xff]  ;;  %v12737_v62 = vld [vmem:[#allocation29_spill] sm:$0xff] }
 0xeb7   :  { %v5160_v25 = vmul.f32 %v8446_v31, %v5159_v12  ;;  %v5173_v37 = vmul.f32 %v5155_v1, %v11030_v13  ;;  %v12718_v13 = vld [vmem:[#allocation38_spill] sm:$0xff]  ;;  %v12738_v1 = vld [vmem:[#allocation65_spill] sm:$0xff]  ;;  %v12742_v51 = vld [vmem:[#allocation27_spill] sm:$0xff] }
 0xeb8   :  { %v12722_v12 = vld [vmem:[#allocation42_spill] sm:$0xff] }
 0xeb9   :  { %v11114_v22 = vadd.f32 %v5174_v59, %v5173_v37  ;;  %v5161_v4 = vadd.f32 %v8446_v31, %v5160_v25  ;;  %v12719_v25 = vld [vmem:[#allocation39_spill] sm:$0xff]  ;;  %v12720_v59 = vld [vmem:[#allocation40_spill] sm:$0xff]  ;;  %v12736_v46 = vld [vmem:[#allocation26_spill] sm:$0xff] }
 0xeba   :  { %v12739_v37 = vld [vmem:[#allocation16_spill] sm:$0xff] }
 0xebb   :  { %8449 = vtanh.f32 %v11114_v22  ;;  %v5165_v53 = vsel %vm5164_vm14, %v8446_v31, %v5161_v4  ;;  %v12721_v31 = vld [vmem:[#allocation41_spill] sm:$0xff] }
 0xebc   :  { %v5170_v23 = vsel %vm5167_vm15, %v5169_v16, %v5165_v53  ;;  %v12740_v4 = vld [vmem:[#allocation25_spill] sm:$0xff]  ;;  %v12743_v53 = vld [vmem:[#allocation31_spill] sm:$0xff] }
 0xec1   :  { %v8450_v43 = vpop.eup %8449 }
 0xec2   :  { %v5177_v21 = vmul.f32 %v8450_v43, %v5170_v23 }
 0xec4   :  { %v5178_v35 = vpack.c.bf16 %v5177_v21, %v5177_v21 }
 0xec6   :  { %5187 = vmatmul.bf16.vlgmr.msra.gmra.mxu0 %v5178_v35  ;;  %5200 = vmatmul.bf16.vlgmr.msra.gmra.mxu1 %v5178_v35 }
 0xec7   :  { %5213 = vmatmul.bf16.vlgmr.msra.gmra.mxu2 %v5178_v35  ;;  %5226 = vmatmul.bf16.vlgmr.msra.gmra.mxu3 %v5178_v35 }
 0xec8   :  { %5359 = vmatpush.bf16.msra.mxu0 %v10416_v29  ;;  %5372 = vmatpush.bf16.msra.mxu1 %v10418_v34 }
 0xec9   :  { %5385 = vmatpush.bf16.msra.mxu2 %v10420_v2  ;;  %5398 = vmatpush.bf16.msra.mxu3 %v10423_v32 }
 0xecc   :  { %5360 = vmatpush.bf16.msra.mxu0 %v10428_v56  ;;  %5373 = vmatpush.bf16.msra.mxu1 %v10434_v41 }
 0xecd   :  { %5386 = vmatpush.bf16.msra.mxu2 %v10436_v61  ;;  %5399 = vmatpush.bf16.msra.mxu3 %v10439_v6 }
 0xed0   :  { %5361 = vmatpush.bf16.msra.mxu0 %v10444_v14  ;;  %5374 = vmatpush.bf16.msra.mxu1 %v10446_v28 }
 0xed1   :  { %5387 = vmatpush.bf16.msra.mxu2 %v10448_v27  ;;  %5400 = vmatpush.bf16.msra.mxu3 %v10451_v50 }
 0xed4   :  { %5362 = vmatpush.bf16.msra.mxu0 %v10456_v52  ;;  %5375 = vmatpush.bf16.msra.mxu1 %v10462_v42 }
 0xed5   :  { %5388 = vmatpush.bf16.msra.mxu2 %v10464_v33  ;;  %5401 = vmatpush.bf16.msra.mxu3 %v10472_v63 }
 0xed6   :  { %5247 = vmatmul.bf16.vlgmr.msrb.gmra.mxu0 %v5178_v35  ;;  %5260 = vmatmul.bf16.vlgmr.msrb.gmra.mxu1 %v5178_v35 }
 0xed7   :  { %5273 = vmatmul.bf16.vlgmr.msrb.gmra.mxu2 %v5178_v35  ;;  %5286 = vmatmul.bf16.vlgmr.msrb.gmra.mxu3 %v5178_v35 }
 0xed8   :  { %5363 = vmatpush.bf16.msra.mxu0 %v10477_v55  ;;  %5376 = vmatpush.bf16.msra.mxu1 %v10479_v45 }
 0xed9   :  { %5389 = vmatpush.bf16.msra.mxu2 %v10481_v0  ;;  %5402 = vmatpush.bf16.msra.mxu3 %v10488_v39 }
 0xedc   :  { %5364 = vmatpush.bf16.msra.mxu0 %v10490_v3  ;;  %5377 = vmatpush.bf16.msra.mxu1 %v10494_v10 }
 0xedd   :  { %5390 = vmatpush.bf16.msra.mxu2 %v10497_v7  ;;  %5403 = vmatpush.bf16.msra.mxu3 %v10499_v36 }
 0xee0   :  { %5365 = vmatpush.bf16.msra.mxu0 %v10502_v8  ;;  %5378 = vmatpush.bf16.msra.mxu1 %v10506_v57 }
 0xee1   :  { %5391 = vmatpush.bf16.msra.mxu2 %v10508_v44  ;;  %5404 = vmatpush.bf16.msra.mxu3 %v10511_v20 }
 0xee4   :  { %5366 = vmatpush.bf16.msra.mxu0 %v10523_v15  ;;  %5379 = vmatpush.bf16.msra.mxu1 %v10525_v17 }
 0xee5   :  { %5392 = vmatpush.bf16.msra.mxu2 %v10527_v60  ;;  %5405 = vmatpush.bf16.msra.mxu3 %v10533_v58 }
 0xee8   :  { %5419 = vmatpush.bf16.msrb.mxu0 %v10554_v9  ;;  %5432 = vmatpush.bf16.msrb.mxu1 %v10556_v47  ;;  %v12723_v9 = vld [vmem:[#allocation43_spill] sm:$0xff]  ;;  %v12724_v47 = vld [vmem:[#allocation44_spill] sm:$0xff] }
 0xee9   :  { %5445 = vmatpush.bf16.msrb.mxu2 %v10558_v24  ;;  %5458 = vmatpush.bf16.msrb.mxu3 %v10560_v19  ;;  %v12725_v24 = vld [vmem:[#allocation45_spill] sm:$0xff]  ;;  %v12726_v19 = vld [vmem:[#allocation46_spill] sm:$0xff] }
 0xeec   :  { %5420 = vmatpush.bf16.msrb.mxu0 %v10569_v11  ;;  %5433 = vmatpush.bf16.msrb.mxu1 %v12565_v49  ;;  %v12727_v11 = vld [vmem:[#allocation47_spill] sm:$0xff]  ;;  %v12728_v49 = vld [vmem:[#allocation48_spill] sm:$0xff] }
 0xeed   :  { %5446 = vmatpush.bf16.msrb.mxu2 %v12718_v13  ;;  %5459 = vmatpush.bf16.msrb.mxu3 %v12719_v25  ;;  %v12748_v25 = vld [vmem:[#allocation70_spill] sm:$0xff] }
 0xef0   :  { %5421 = vmatpush.bf16.msrb.mxu0 %v12720_v59  ;;  %5434 = vmatpush.bf16.msrb.mxu1 %v12721_v31  ;;  %v12749_v59 = vld [vmem:[#allocation24_spill] sm:$0xff] }
 0xef1   :  { %5447 = vmatpush.bf16.msrb.mxu2 %v12722_v12  ;;  %5460 = vmatpush.bf16.msrb.mxu3 %v12723_v9  ;;  %v3588_v31 = vadd.f32 %v12749_v59, %v12748_v25  ;;  %v12750_v12 = vld [vmem:[#allocation71_spill] sm:$0xff]  ;;  %v12751_v9 = vld [vmem:[#allocation33_spill] sm:$0xff] }
 0xef4   :  { %5422 = vmatpush.bf16.msrb.mxu0 %v12724_v47  ;;  %5435 = vmatpush.bf16.msrb.mxu1 %v12725_v24  ;;  %v3601_v47 = vadd.f32 %v12751_v9, %v12750_v12 }
 0xef5   :  { %5448 = vmatpush.bf16.msrb.mxu2 %v12726_v19  ;;  %5461 = vmatpush.bf16.msrb.mxu3 %v12727_v11 }
 0xef8   :  { %5423 = vmatpush.bf16.msrb.mxu0 %v12728_v49  ;;  %5436 = vmatpush.bf16.msrb.mxu1 %v12729_v40 }
 0xef9   :  { %5449 = vmatpush.bf16.msrb.mxu2 %v12730_v48  ;;  %5462 = vmatpush.bf16.msrb.mxu3 %v12731_v18 }
 0xefc   :  { %5424 = vmatpush.bf16.msrb.mxu0 %v12732_v38  ;;  %5437 = vmatpush.bf16.msrb.mxu1 %v12733_v54  ;;  %v12752_v54 = vld [vmem:[#allocation36_spill] sm:$0xff] }
 0xefd   :  { %5450 = vmatpush.bf16.msrb.mxu2 %v12734_v30  ;;  %5463 = vmatpush.bf16.msrb.mxu3 %v12735_v5  ;;  %v12753_v30 = vld [vmem:[#allocation34_spill] sm:$0xff] }
 0xefe   :  { %v3614_v5 = vadd.f32 %v12753_v30, %v12752_v54 }
 0xf00   :  { %5425 = vmatpush.bf16.msrb.mxu0 %v12736_v46  ;;  %5438 = vmatpush.bf16.msrb.mxu1 %v12737_v62 }
 0xf01   :  { %5451 = vmatpush.bf16.msrb.mxu2 %v12738_v1  ;;  %5464 = vmatpush.bf16.msrb.mxu3 %v12739_v37 }
 0xf04   :  { %5426 = vmatpush.bf16.msrb.mxu0 %v12740_v4  ;;  %5439 = vmatpush.bf16.msrb.mxu1 %v12741_v26 }
 0xf05   :  { %5452 = vmatpush.bf16.msrb.mxu2 %v12742_v51  ;;  %5465 = vmatpush.bf16.msrb.mxu3 %v12743_v53 }
 0xf43   :  { %v11181_v16 = vpop.f32.mrf.mxu0  ;;  %v11183_v43 = vpop.f32.mrf.mxu1 }
 0xf44   :  { %12744 = vst [vmem:[#allocation63_spill] sm:$0xff] %v11181_v16 }
 0xf45   :  { %12745 = vst [vmem:[#allocation64_spill] sm:$0xff] %v11183_v43 }
 0xf4a   :  { %v11185_v23 = vpop.f32.mrf.mxu2  ;;  %v11187_v21 = vpop.f32.mrf.mxu3 }
 0xf4b   :  { %12746 = vst [vmem:[#allocation21_spill] sm:$0xff] %v11185_v23  ;;  %v5190_v35 = vpop.f32.mrf.mxu0  ;;  %v5203_v13 = vpop.f32.mrf.mxu1 }
 0xf4c   :  { %12747 = vst [vmem:[#allocation22_spill] sm:$0xff] %v11187_v21 }
 0xf52   :  { %v5216_v24 = vpop.f32.mrf.mxu2  ;;  %v5229_v19 = vpop.f32.mrf.mxu3 }
 0xf53   :  { %v5248_v11 = vpop.f32.mrf.mxu0  ;;  %v5261_v49 = vpop.f32.mrf.mxu1  ;;  %v12755_v24 = vld [vmem:[#allocation35_spill] sm:$0xff] }
 0xf54   :  { %v5291_v40 = vadd.f32 %v5248_v11, %v3588_v31  ;;  %v5292_v48 = vadd.f32 %v5261_v49, %v3601_v47  ;;  %v12754_v47 = vld [vmem:[#allocation73_spill] sm:$0xff] }
 0xf55   :  { %v3627_v19 = vadd.f32 %v12755_v24, %v12754_v47 }
 0xf56   :  { %v7658_v18 = vmul.f32 -1.442695, %v5291_v40  ;;  %v7659_v38 = vmul.f32 -1.442695, %v5292_v48 }
 0xf58   :  { %8451 = vpow2.f32 %v7658_v18 }
 0xf59   :  { %8453 = vpow2.f32 %v7659_v38 }
 0xf5a   :  { %v5274_v46 = vpop.f32.mrf.mxu2  ;;  %v5287_v62 = vpop.f32.mrf.mxu3 }
 0xf5b   :  { %v5293_v1 = vadd.f32 %v5274_v46, %v3614_v5  ;;  %v5250_v37 = vpop.f32.mrf.mxu0  ;;  %v5263_v4 = vpop.f32.mrf.mxu1  ;;  %v5294_v40 = vadd.f32 %v5287_v62, %v3627_v19 }
 0xf5d   :  { %v7660_v26 = vmul.f32 -1.442695, %v5293_v1 }
 0xf5e   :  { %v8452_v51 = vpop.eup %8451 }
 0xf5f   :  { %v8454_v53 = vpop.eup %8453  ;;  %v5304_v35 = vadd.f32 1.0, %v8452_v51  ;;  %8455 = vpow2.f32 %v7660_v26 }
 0xf60   :  { %v5305_v13 = vadd.f32 1.0, %v8454_v53 }
 0xf61   :  { %8457 = vrcp.f32 %v5304_v35  ;;  %v5318_v46 = vand.u32 2147483648, %v5304_v35  ;;  %v5316_v4 = vand.u32 2147483647, %v5304_v35  ;;  %vm5312_vm2 = vweird.f32 %v5304_v35 }
 0xf62   :  { %8459 = vrcp.f32 %v5305_v13  ;;  %v5276_v59 = vpop.f32.mrf.mxu2  ;;  %v5289_v31 = vpop.f32.mrf.mxu3  ;;  %v5333_v1 = vand.u32 2147483648, %v5305_v13  ;;  %v5331_v51 = vand.u32 2147483647, %v5305_v13  ;;  %vm5327_vm3 = vweird.f32 %v5305_v13 }
 0xf63   :  { %v5319_v31 = vor.u32 1.1754944e-38, %v5318_v46  ;;  %vm5317_vm6 = vcmp.eq.f32.partialorder %v5316_v4, 8.507059e+37 }
 0xf64   :  { %v5334_v24 = vor.u32 1.1754944e-38, %v5333_v1  ;;  %vm5332_vm7 = vcmp.eq.f32.partialorder %v5331_v51, 8.507059e+37 }
 0xf65   :  { %v8456_v9 = vpop.eup %8455 }
 0xf66   :  { %v5306_v11 = vadd.f32 1.0, %v8456_v9 }
 0xf67   :  { %v8458_v49 = vpop.eup %8457 }
 0xf68   :  { %v8460_v48 = vpop.eup %8459  ;;  %v5308_v18 = vmul.f32 %v8458_v49, %v5304_v35  ;;  %8461 = vrcp.f32 %v5306_v11  ;;  %vm5313_vm0 = vweird.f32 %v8458_v49  ;;  %v5348_v46 = vand.u32 2147483648, %v5306_v11 }
 0xf69   :  { %v5323_v38 = vmul.f32 %v8460_v48, %v5305_v13  ;;  %8463 = vtanh.f32 %v5294_v40  ;;  %vm5328_vm1 = vweird.f32 %v8460_v48  ;;  %vm5314_vm4 = vmor %vm5312_vm2, %vm5313_vm0  ;;  %vm5342_vm9 = vweird.f32 %v5306_v11 }
 0xf6a   :  { %v5309_v30 = vsub.f32 1.0, %v5308_v18  ;;  %vm5329_vm5 = vmor %vm5327_vm3, %vm5328_vm1  ;;  %v5349_v4 = vor.u32 1.1754944e-38, %v5348_v46 }
 0xf6b   :  { %v5324_v5 = vsub.f32 1.0, %v5323_v38 }
 0xf6c   :  { %v5310_v37 = vmul.f32 %v8458_v49, %v5309_v30 }
 0xf6d   :  { %v5325_v26 = vmul.f32 %v8460_v48, %v5324_v5 }
 0xf6e   :  { %v8462_v53 = vpop.eup %8461  ;;  %v5311_v59 = vadd.f32 %v8458_v49, %v5310_v37 }
 0xf6f   :  { %v5338_v62 = vmul.f32 %v8462_v53, %v5306_v11  ;;  %v5326_v9 = vadd.f32 %v8460_v48, %v5325_v26  ;;  %v8464_v40 = vpop.eup %8463  ;;  %vm5343_vm8 = vweird.f32 %v8462_v53 }
 0xf70   :  { %v5315_v19 = vsel %vm5314_vm4, %v8458_v49, %v5311_v59  ;;  %v5346_v49 = vand.u32 2147483647, %v5306_v11  ;;  %vm5344_vm10 = vmor %vm5342_vm9, %vm5343_vm8 }
 0xf71   :  { %v5339_v18 = vsub.f32 1.0, %v5338_v62  ;;  %v5320_v38 = vsel %vm5317_vm6, %v5319_v31, %v5315_v19  ;;  %v5330_v30 = vsel %vm5329_vm5, %v8460_v48, %v5326_v9  ;;  %v7767_v62 = vld [vmem:[#allocation6 + $0x3d0] sm:$0xf0]  ;;  %v7773_v9 = vld [vmem:[#allocation6 + $0x3c8] sm:$0xf] }
 0xf72   :  { %v5335_v5 = vsel %vm5332_vm7, %v5334_v24, %v5330_v30  ;;  %v5354_v21 = vmul.f32 %v8464_v40, %v5320_v38  ;;  %vm5347_vm11 = vcmp.eq.f32.partialorder %v5346_v49, 8.507059e+37  ;;  %v8067_v24 = vld [vmem:[#allocation6 + $0x3d4] sm:$0xf0]  ;;  %v8065_v19 = vld [vmem:[#allocation6 + $0x3cc] sm:$0xf] }
 0xf73   :  { %v5340_v23 = vmul.f32 %v8462_v53, %v5339_v18  ;;  %v5353_v37 = vmul.f32 %v5335_v5, %v11114_v22  ;;  %v11269_v40 = vor.u32 %v8067_v24, %v7773_v9  ;;  %v7775_v18 = vld [vmem:[#allocation6 + $0x3d8] sm:$0xf0]  ;;  %v7749_v38 = vld [vmem:[#allocation6 + $0x3a0] sm:$0xf]  ;;  %v8062_v30 = vld [vmem:[#allocation6 + $0x3ac] sm:$0xf0] }
 0xf74   :  { %v12763_v5 = vld [vmem:[#allocation30_spill] sm:$0xff]  ;;  %v11276_v46 = vor.u32 %v8062_v30, %v7749_v38  ;;  %v7719_v24 = vld [vmem:[#allocation6 + $0x370] sm:$0xf0]  ;;  %v7725_v30 = vld [vmem:[#allocation6 + $0x368] sm:$0xf] }
 0xf75   :  { %v11198_v35 = vadd.f32 %v5354_v21, %v5353_v37  ;;  %v5341_v13 = vadd.f32 %v8462_v53, %v5340_v23  ;;  %v7765_v23 = vld [vmem:[#allocation6 + $0x3c0] sm:$0xf]  ;;  %v8066_v21 = vld [vmem:[#allocation6 + $0x3cc] sm:$0xf0]  ;;  %v3794_v37 = vadd.f32 %v12763_v5, %v12752_v54  ;;  %v8060_v49 = vld [vmem:[#allocation6 + $0x3a4] sm:$0xf] }
 0xf76   :  { %v8052_v9 = vld [vmem:[#allocation6 + $0x364] sm:$0xf]  ;;  %v8055_v5 = vld [vmem:[#allocation6 + $0x374] sm:$0xf0] }
 0xf77   :  { %8465 = vtanh.f32 %v11198_v35  ;;  %v5345_v1 = vsel %vm5344_vm10, %v8462_v53, %v5341_v13  ;;  %v11264_v53 = vor.u32 %v8066_v21, %v7765_v23  ;;  %v11274_v13 = vor.u32 %v8065_v19, %v7775_v18 }
 0xf78   :  { %v5350_v26 = vsel %vm5347_vm11, %v5349_v4, %v5345_v1  ;;  %v7751_v1 = vld [vmem:[#allocation6 + $0x3b0] sm:$0xf0]  ;;  %v7757_v4 = vld [vmem:[#allocation6 + $0x3a8] sm:$0xf]  ;;  %v11313_v38 = vor.u32 %v8052_v9, %v7719_v24 }
 0xf79   :  { %v7687_v9 = vld [vmem:[#allocation6 + $0x330] sm:$0xf0] }
 0xf7d   :  { %v8466_v48 = vpop.eup %8465 }
 0xf7e   :  { %v5357_v51 = vmul.f32 %v8466_v48, %v5350_v26 }
 0xf80   :  { %v5358_v59 = vpack.c.bf16 %v5357_v51, %v5357_v51  ;;  %v11279_v51 = vor.u32 %v8060_v49, %v7751_v1  ;;  %v11316_v1 = vor.u32 %v8055_v5, %v7725_v30 }
 0xf82   :  { %5367 = vmatmul.bf16.vlgmr.msra.gmra.mxu0 %v5358_v59  ;;  %5380 = vmatmul.bf16.vlgmr.msra.gmra.mxu1 %v5358_v59 }
 0xf83   :  { %5393 = vmatmul.bf16.vlgmr.msra.gmra.mxu2 %v5358_v59  ;;  %5406 = vmatmul.bf16.vlgmr.msra.gmra.mxu3 %v5358_v59 }
 0xf84   :  { %5539 = vmatpush.bf16.msra.mxu0 %v10416_v29  ;;  %5552 = vmatpush.bf16.msra.mxu1 %v10418_v34 }
 0xf85   :  { %5565 = vmatpush.bf16.msra.mxu2 %v10420_v2  ;;  %5578 = vmatpush.bf16.msra.mxu3 %v10423_v32 }
 0xf88   :  { %5540 = vmatpush.bf16.msra.mxu0 %v10428_v56  ;;  %5553 = vmatpush.bf16.msra.mxu1 %v10434_v41 }
 0xf89   :  { %5566 = vmatpush.bf16.msra.mxu2 %v10436_v61  ;;  %5579 = vmatpush.bf16.msra.mxu3 %v10439_v6  ;;  %v8603_v61 = vld [vmem:[%s11746_s4 + $0xc] sm:$0xf] }
 0xf8a   :  { %v11244_v6 = vperm.slane %v8603_v61, 2 }
 0xf8c   :  { %5541 = vmatpush.bf16.msra.mxu0 %v10444_v14  ;;  %5554 = vmatpush.bf16.msra.mxu1 %v10446_v28  ;;  %v12760_v14 = vld [vmem:[#allocation68_spill] sm:$0xff] }
 0xf8d   :  { %5567 = vmatpush.bf16.msra.mxu2 %v10448_v27  ;;  %5580 = vmatpush.bf16.msra.mxu3 %v10451_v50  ;;  %v4155_v28 = vadd.f32 %v12760_v14, %v11244_v6  ;;  %v7781_v27 = vld [vmem:[#allocation6 + $0x3e0] sm:$0xf]  ;;  %v8070_v50 = vld [vmem:[#allocation6 + $0x3ec] sm:$0xf0] }
 0xf90   :  { %5542 = vmatpush.bf16.msra.mxu0 %v10456_v52  ;;  %5555 = vmatpush.bf16.msra.mxu1 %v10462_v42  ;;  %v8068_v52 = vld [vmem:[#allocation6 + $0x3e4] sm:$0xf]  ;;  %v12761_v42 = vld [vmem:[#allocation28_spill] sm:$0xff] }
 0xf91   :  { %5568 = vmatpush.bf16.msra.mxu2 %v10464_v33  ;;  %5581 = vmatpush.bf16.msra.mxu3 %v10472_v63  ;;  %v3768_v33 = vadd.f32 %v12761_v42, %v12748_v25  ;;  %v12762_v63 = vld [vmem:[#allocation49_spill] sm:$0xff]  ;;  %v8064_v25 = vld [vmem:[#allocation6 + $0x3c4] sm:$0xf] }
 0xf92   :  { %5427 = vmatmul.bf16.vlgmr.msrb.gmra.mxu0 %v5358_v59  ;;  %5440 = vmatmul.bf16.vlgmr.msrb.gmra.mxu1 %v5358_v59  ;;  %v11266_v31 = vor.u32 %v8064_v25, %v7767_v62  ;;  %v8056_v42 = vld [vmem:[#allocation6 + $0x384] sm:$0xf]  ;;  %v8054_v25 = vld [vmem:[#allocation6 + $0x36c] sm:$0xf0] }
 0xf93   :  { %5453 = vmatmul.bf16.vlgmr.msrb.gmra.mxu2 %v5358_v59  ;;  %5466 = vmatmul.bf16.vlgmr.msrb.gmra.mxu3 %v5358_v59  ;;  %v8063_v59 = vld [vmem:[#allocation6 + $0x3b4] sm:$0xf0] }
 0xf94   :  { %5543 = vmatpush.bf16.msra.mxu0 %v10477_v55  ;;  %5556 = vmatpush.bf16.msra.mxu1 %v10479_v45  ;;  %v3781_v55 = vadd.f32 %v12762_v63, %v12750_v12  ;;  %v7735_v63 = vld [vmem:[#allocation6 + $0x390] sm:$0xf0] }
 0xf95   :  { %5569 = vmatpush.bf16.msra.mxu2 %v10481_v0  ;;  %5582 = vmatpush.bf16.msra.mxu3 %v10488_v39  ;;  %v11252_v39 = vor.u32 %v8070_v50, %v7781_v27  ;;  %v7733_v50 = vld [vmem:[#allocation6 + $0x380] sm:$0xf] }
 0xf98   :  { %5544 = vmatpush.bf16.msra.mxu0 %v10490_v3  ;;  %5557 = vmatpush.bf16.msra.mxu1 %v10494_v10  ;;  %v7783_v3 = vld [vmem:[#allocation6 + $0x3f0] sm:$0xf0]  ;;  %v7789_v10 = vld [vmem:[#allocation6 + $0x3e8] sm:$0xf] }
 0xf99   :  { %5570 = vmatpush.bf16.msra.mxu2 %v10497_v7  ;;  %5583 = vmatpush.bf16.msra.mxu3 %v10499_v36  ;;  %v8071_v7 = vld [vmem:[#allocation6 + $0x3f4] sm:$0xf0] }
 0xf9c   :  { %5545 = vmatpush.bf16.msra.mxu0 %v10502_v8  ;;  %5558 = vmatpush.bf16.msra.mxu1 %v10506_v57  ;;  %v11254_v57 = vor.u32 %v8068_v52, %v7783_v3  ;;  %v8058_v52 = vld [vmem:[#allocation6 + $0x38c] sm:$0xf0]  ;;  %v11290_v3 = vor.u32 %v8056_v42, %v7735_v63 }
 0xf9d   :  { %5571 = vmatpush.bf16.msra.mxu2 %v10508_v44  ;;  %5584 = vmatpush.bf16.msra.mxu3 %v10511_v20  ;;  %v11256_v44 = vor.u32 %v8071_v7, %v7789_v10  ;;  %v8069_v20 = vld [vmem:[#allocation6 + $0x3ec] sm:$0xf]  ;;  %v7743_v7 = vld [vmem:[#allocation6 + $0x398] sm:$0xf0] }
 0xf9e   :  { %v8057_v10 = vld [vmem:[#allocation6 + $0x38c] sm:$0xf] }
 0xfa0   :  { %5546 = vmatpush.bf16.msra.mxu0 %v10523_v15  ;;  %5559 = vmatpush.bf16.msra.mxu1 %v10525_v17  ;;  %v7791_v15 = vld [vmem:[#allocation6 + $0x3f8] sm:$0xf0]  ;;  %v7666_v17 = vmul.f32 -1.442695, %v4155_v28  ;;  %v11282_v28 = vor.u32 %v8063_v59, %v7757_v4 }
 0xfa1   :  { %5572 = vmatpush.bf16.msra.mxu2 %v10527_v60  ;;  %5585 = vmatpush.bf16.msra.mxu3 %v10533_v58  ;;  %v11259_v22 = vor.u32 %v8069_v20, %v7791_v15  ;;  %v7727_v4 = vld [vmem:[#allocation6 + $0x378] sm:$0xf0] }
 0xfa4   :  { %5861 = vmatpush.bf16.msrb.mxu0 %v11252_v39  ;;  %5874 = vmatpush.bf16.msrb.mxu1 %v11254_v57 }
 0xfa5   :  { %5887 = vmatpush.bf16.msrb.mxu2 %v11256_v44  ;;  %5900 = vmatpush.bf16.msrb.mxu3 %v11259_v22 }
 0xfa8   :  { %5862 = vmatpush.bf16.msrb.mxu0 %v11264_v53  ;;  %5875 = vmatpush.bf16.msrb.mxu1 %v11266_v31 }
 0xfa9   :  { %5888 = vmatpush.bf16.msrb.mxu2 %v11269_v40  ;;  %5901 = vmatpush.bf16.msrb.mxu3 %v11274_v13 }
 0xfac   :  { %5863 = vmatpush.bf16.msrb.mxu0 %v11276_v46  ;;  %5876 = vmatpush.bf16.msrb.mxu1 %v11279_v51 }
 0xfad   :  { %5889 = vmatpush.bf16.msrb.mxu2 %v11282_v28 }
 0xfb0   :  { %5877 = vmatpush.bf16.msrb.mxu1 %v11290_v3 }
 0xfb4   :  { %5878 = vmatpush.bf16.msrb.mxu1 %v11313_v38 }
 0xfff   :  { %v11233_v29 = vpop.f32.mrf.mxu0  ;;  %v11235_v34 = vpop.f32.mrf.mxu1 }
0x1000   :  { %12756 = vst [vmem:[#allocation23_spill] sm:$0xff] %v11233_v29 }
0x1001   :  { %12757 = vst [vmem:[#allocation38_spill] sm:$0xff] %v11235_v34 }
0x1006   :  { %v11237_v2 = vpop.f32.mrf.mxu2  ;;  %v11239_v32 = vpop.f32.mrf.mxu3 }
0x1007   :  { %12758 = vst [vmem:[#allocation39_spill] sm:$0xff] %v11237_v2  ;;  %v5370_v56 = vpop.f32.mrf.mxu0  ;;  %v5383_v41 = vpop.f32.mrf.mxu1 }
0x1008   :  { %12759 = vst [vmem:[#allocation40_spill] sm:$0xff] %v11239_v32  ;;  %v8061_v56 = vld [vmem:[#allocation6 + $0x3ac] sm:$0xf]  ;;  %v7759_v41 = vld [vmem:[#allocation6 + $0x3b8] sm:$0xf0] }
0x1009   :  { %v11284_v27 = vor.u32 %v8061_v56, %v7759_v41  ;;  %v8050_v41 = vld [vmem:[#allocation6 + $0x34c] sm:$0xf0] }
0x100b   :  { %5902 = vmatpush.bf16.msrb.mxu3 %v11284_v27 }
0x100e   :  { %v5396_v45 = vpop.f32.mrf.mxu2  ;;  %v5409_v0 = vpop.f32.mrf.mxu3 }
0x100f   :  { %v5428_v36 = vpop.f32.mrf.mxu0  ;;  %v5441_v8 = vpop.f32.mrf.mxu1  ;;  %v8059_v45 = vld [vmem:[#allocation6 + $0x394] sm:$0xf0] }
0x1010   :  { %v5471_v60 = vadd.f32 %v5428_v36, %v3768_v33  ;;  %v5472_v58 = vadd.f32 %v5441_v8, %v3781_v55  ;;  %v11287_v33 = vor.u32 %v8058_v52, %v7733_v50  ;;  %v7741_v55 = vld [vmem:[#allocation6 + $0x388] sm:$0xf]  ;;  %v8051_v52 = vld [vmem:[#allocation6 + $0x354] sm:$0xf0] }
0x1011   :  { %v11293_v8 = vor.u32 %v8059_v45, %v7741_v55  ;;  %v7709_v50 = vld [vmem:[#allocation6 + $0x348] sm:$0xf] }
0x1012   :  { %v7661_v12 = vmul.f32 -1.442695, %v5471_v60  ;;  %v7662_v11 = vmul.f32 -1.442695, %v5472_v58  ;;  %v11298_v60 = vor.u32 %v8057_v10, %v7743_v7  ;;  %5864 = vmatpush.bf16.msrb.mxu0 %v11287_v33  ;;  %v7711_v10 = vld [vmem:[#allocation6 + $0x358] sm:$0xf0] }
0x1013   :  { %5890 = vmatpush.bf16.msrb.mxu2 %v11293_v8 }
0x1014   :  { %8467 = vpow2.f32 %v7661_v12  ;;  %v12764_v12 = vld [vmem:[#allocation66_spill] sm:$0xff]  ;;  %5903 = vmatpush.bf16.msrb.mxu3 %v11298_v60 }
0x1015   :  { %8469 = vpow2.f32 %v7662_v11  ;;  %v3807_v11 = vadd.f32 %v12764_v12, %v12754_v47  ;;  %v8053_v47 = vld [vmem:[#allocation6 + $0x36c] sm:$0xf]  ;;  %v11344_v12 = vor.u32 %v8051_v52, %v7709_v50  ;;  %v8042_v52 = vld [vmem:[#allocation6 + $0x30c] sm:$0xf0] }
0x1016   :  { %v5454_v48 = vpop.f32.mrf.mxu2  ;;  %v5467_v26 = vpop.f32.mrf.mxu3  ;;  %8471 = vpow2.f32 %v7666_v17  ;;  %v7717_v17 = vld [vmem:[#allocation6 + $0x360] sm:$0xf]  ;;  %v11321_v56 = vor.u32 %v8053_v47, %v7727_v4 }
0x1017   :  { %v5473_v54 = vadd.f32 %v5454_v48, %v3794_v37  ;;  %v5430_v61 = vpop.f32.mrf.mxu0  ;;  %v5443_v14 = vpop.f32.mrf.mxu1  ;;  %v11310_v62 = vor.u32 %v8054_v25, %v7717_v17  ;;  %v5474_v49 = vadd.f32 %v5467_v26, %v3807_v11  ;;  %v7701_v48 = vld [vmem:[#allocation6 + $0x340] sm:$0xf]  ;;  %5891 = vmatpush.bf16.msrb.mxu2 %v11316_v1  ;;  %v8046_v17 = vld [vmem:[#allocation6 + $0x32c] sm:$0xf0]  ;;  %v8044_v11 = vld [vmem:[#allocation6 + $0x324] sm:$0xf] }
0x1018   :  { %v11326_v26 = vor.u32 %v8050_v41, %v7701_v48  ;;  %v7703_v14 = vld [vmem:[#allocation6 + $0x350] sm:$0xf0]  ;;  %5904 = vmatpush.bf16.msrb.mxu3 %v11321_v56  ;;  %v11358_v4 = vor.u32 %v8044_v11, %v7687_v9  ;;  %v8045_v48 = vld [vmem:[#allocation6 + $0x32c] sm:$0xf]  ;;  %v7695_v41 = vld [vmem:[#allocation6 + $0x338] sm:$0xf0] }
0x1019   :  { %v7663_v0 = vmul.f32 -1.442695, %v5473_v54  ;;  %5865 = vmatpush.bf16.msrb.mxu0 %v11310_v62  ;;  %v8048_v54 = vld [vmem:[#allocation6 + $0x344] sm:$0xf]  ;;  %v11367_v50 = vor.u32 %v8045_v48, %v7695_v41  ;;  %v8041_v11 = vld [vmem:[#allocation6 + $0x30c] sm:$0xf] }
0x101a   :  { %v8468_v36 = vpop.eup %8467  ;;  %v11342_v25 = vor.u32 %v8048_v54, %v7703_v14  ;;  %v7669_v54 = vld [vmem:[#allocation6 + $0x300] sm:$0xf] }
0x101b   :  { %v8470_v20 = vpop.eup %8469  ;;  %v11295_v15 = vadd.f32 1.0, %v8468_v36  ;;  %8473 = vpow2.f32 %v7663_v0  ;;  %v8049_v0 = vld [vmem:[#allocation6 + $0x34c] sm:$0xf]  ;;  %5892 = vmatpush.bf16.msrb.mxu2 %v11344_v12 }
0x101c   :  { %v11300_v58 = vadd.f32 1.0, %v8470_v20  ;;  %v8472_v19 = vpop.eup %8471  ;;  %v7685_v20 = vld [vmem:[#allocation6 + $0x320] sm:$0xf]  ;;  %v11350_v30 = vor.u32 %v8049_v0, %v7711_v10  ;;  %5879 = vmatpush.bf16.msrb.mxu1 %v11342_v25  ;;  %v7671_v0 = vld [vmem:[#allocation6 + $0x310] sm:$0xf0] }
0x101d   :  { %8475 = vrcp.f32 %v11295_v15  ;;  %v5496_v18 = vand.u32 2147483647, %v11295_v15  ;;  %v11330_v63 = vadd.f32 1.0, %v8472_v19  ;;  %v5498_v45 = vand.u32 2147483648, %v11295_v15  ;;  %5866 = vmatpush.bf16.msrb.mxu0 %v11326_v26 }
0x101e   :  { %8477 = vrcp.f32 %v11300_v58  ;;  %v5456_v23 = vpop.f32.mrf.mxu2  ;;  %v5469_v21 = vpop.f32.mrf.mxu3  ;;  %v5511_v36 = vand.u32 2147483647, %v11300_v58  ;;  %v11352_v5 = vor.u32 %v8046_v17, %v7685_v20  ;;  %5905 = vmatpush.bf16.msrb.mxu3 %v11350_v30  ;;  %vm5507_vm15 = vweird.f32 %v11300_v58  ;;  %v7677_v17 = vld [vmem:[#allocation6 + $0x308] sm:$0xf] }
0x101f   :  { %v5513_v21 = vand.u32 2147483648, %v11300_v58  ;;  %vm11346_vm12 = vcmp.eq.f32.partialorder %v5496_v18, 8.507059e+37  ;;  %vm5492_vm0 = vweird.f32 %v11295_v15  ;;  %v11372_v20 = vor.u32 %v8042_v52, %v7669_v54 }
0x1020   :  { %vm5512_vm3 = vcmp.eq.f32.partialorder %v5511_v36, 8.507059e+37  ;;  %5880 = vmatpush.bf16.msrb.mxu1 %v11358_v4  ;;  %vm5679_vm9 = vweird.f32 %v11330_v63 }
0x1021   :  { %v8474_v37 = vpop.eup %8473  ;;  %5867 = vmatpush.bf16.msrb.mxu0 %v11352_v5 }
0x1022   :  { %v11318_v59 = vadd.f32 1.0, %v8474_v37  ;;  %v7693_v37 = vld [vmem:[#allocation6 + $0x328] sm:$0xf]  ;;  %5906 = vmatpush.bf16.msrb.mxu3 %v11367_v50 }
0x1023   :  { %v11323_v61 = vpop.eup %8475 }
0x1024   :  { %v11328_v42 = vpop.eup %8477  ;;  %v5488_v55 = vmul.f32 %v11323_v61, %v11295_v15  ;;  %8479 = vrcp.f32 %v11318_v59  ;;  %vm5493_vm13 = vweird.f32 %v11323_v61  ;;  %vm5522_vm5 = vweird.f32 %v11318_v59 }
0x1025   :  { %v5503_v7 = vmul.f32 %v11328_v42, %v11300_v58  ;;  %8481 = vtanh.f32 %v5474_v49  ;;  %v8047_v49 = vld [vmem:[#allocation6 + $0x334] sm:$0xf0]  ;;  %vm5508_vm14 = vweird.f32 %v11328_v42  ;;  %vm5494_vm1 = vmor %vm5492_vm0, %vm5493_vm13  ;;  %v7679_v58 = vld [vmem:[#allocation6 + $0x318] sm:$0xf0]  ;;  %5868 = vmatpush.bf16.msrb.mxu0 %v11372_v20 }
0x1026   :  { %v5489_v23 = vsub.f32 1.0, %v5488_v55  ;;  %v11360_v18 = vor.u32 %v8047_v49, %v7693_v37  ;;  %8483 = vrcp.f32 %v11330_v63  ;;  %v8040_v55 = vld [vmem:[#allocation6 + $0x304] sm:$0xf]  ;;  %v5499_v49 = vor.u32 1.1754944e-38, %v5498_v45  ;;  %vm5509_vm2 = vmor %vm5507_vm15, %vm5508_vm14 }
0x1027   :  { %v5504_v24 = vsub.f32 1.0, %v5503_v7 }
0x1028   :  { %v5490_v47 = vmul.f32 %v11323_v61, %v5489_v23  ;;  %v8043_v23 = vld [vmem:[#allocation6 + $0x314] sm:$0xf0]  ;;  %5893 = vmatpush.bf16.msrb.mxu2 %v11360_v18 }
0x1029   :  { %v5505_v14 = vmul.f32 %v11328_v42, %v5504_v24  ;;  %v5514_v24 = vor.u32 1.1754944e-38, %v5513_v21  ;;  %v11383_v21 = vor.u32 %v8040_v55, %v7671_v0  ;;  %v5528_v0 = vand.u32 2147483648, %v11318_v59 }
0x102a   :  { %v8480_v10 = vpop.eup %8479  ;;  %v5491_v7 = vadd.f32 %v11323_v61, %v5490_v47  ;;  %v11385_v47 = vor.u32 %v8043_v23, %v7677_v17  ;;  %v5526_v23 = vand.u32 2147483647, %v11318_v59 }
0x102b   :  { %v8482_v9 = vpop.eup %8481  ;;  %v5518_v37 = vmul.f32 %v8480_v10, %v11318_v59  ;;  %v5506_v48 = vadd.f32 %v11328_v42, %v5505_v14  ;;  %5881 = vmatpush.bf16.msrb.mxu1 %v11383_v21  ;;  %vm5523_vm4 = vweird.f32 %v8480_v10  ;;  %v5685_v59 = vand.u32 2147483648, %v11330_v63 }
0x102c   :  { %v5495_v15 = vsel %vm5494_vm1, %v11323_v61, %v5491_v7  ;;  %v11392_v61 = vor.u32 %v8041_v11, %v7679_v58  ;;  %v8484_v52 = vpop.eup %8483  ;;  %5894 = vmatpush.bf16.msrb.mxu2 %v11385_v47  ;;  %vm5524_vm6 = vmor %vm5522_vm5, %vm5523_vm4  ;;  %v5529_v11 = vor.u32 1.1754944e-38, %v5528_v0  ;;  %vm5527_vm7 = vcmp.eq.f32.partialorder %v5526_v23, 8.507059e+37  ;;  %v12772_v23 = vld [vmem:[#allocation67_spill] sm:$0xff] }
0x102d   :  { %v5519_v41 = vsub.f32 1.0, %v5518_v37  ;;  %v5500_v45 = vsel %vm11346_vm12, %v5499_v49, %v5495_v15  ;;  %v5510_v54 = vsel %vm5509_vm2, %v11328_v42, %v5506_v48  ;;  %v5675_v17 = vmul.f32 %v8484_v52, %v11330_v63  ;;  %v12767_v15 = vld [vmem:[#allocation20_spill] sm:$0xff] }
0x102e   :  { %v5515_v36 = vsel %vm5512_vm3, %v5514_v24, %v5510_v54  ;;  %v5534_v14 = vmul.f32 %v8482_v9, %v5500_v45  ;;  %5907 = vmatpush.bf16.msrb.mxu3 %v11392_v61  ;;  %vm5680_vm8 = vweird.f32 %v8484_v52 }
0x102f   :  { %v5520_v7 = vmul.f32 %v8480_v10, %v5519_v41  ;;  %v5533_v55 = vmul.f32 %v5515_v36, %v11198_v35  ;;  %v5676_v9 = vsub.f32 1.0, %v5675_v17  ;;  %vm5681_vm10 = vmor %vm5679_vm9, %vm5680_vm8  ;;  %v5686_v36 = vor.u32 1.1754944e-38, %v5685_v59 }
0x1031   :  { %v5535_v19 = vadd.f32 %v5534_v14, %v5533_v55  ;;  %v5521_v42 = vadd.f32 %v8480_v10, %v5520_v7  ;;  %v5677_v48 = vmul.f32 %v8484_v52, %v5676_v9  ;;  %v12774_v9 = vld [vmem:[#allocation72_spill] sm:$0xff] }
0x1033   :  { %8485 = vtanh.f32 %v5535_v19  ;;  %v5525_v35 = vsel %vm5524_vm6, %v8480_v10, %v5521_v42  ;;  %v5678_v41 = vadd.f32 %v8484_v52, %v5677_v48  ;;  %v5683_v10 = vand.u32 2147483647, %v11330_v63 }
0x1034   :  { %v5530_v37 = vsel %vm5527_vm7, %v5529_v11, %v5525_v35  ;;  %8487 = vtanh.f32 %v12767_v15  ;;  %v12773_v35 = vld [vmem:[#allocation51_spill] sm:$0xff] }
0x1035   :  { %v5682_v45 = vsel %vm5681_vm10, %v8484_v52, %v5678_v41  ;;  %vm5684_vm11 = vcmp.eq.f32.partialorder %v5683_v10, 8.507059e+37  ;;  %v4469_v11 = vadd.f32 %v12773_v35, %v12772_v23 }
0x1036   :  { %v5687_v14 = vsel %vm5684_vm11, %v5686_v36, %v5682_v45  ;;  %v12776_v36 = vld [vmem:[#allocation50_spill] sm:$0xff] }
0x1039   :  { %v8486_v24 = vpop.eup %8485 }
0x103a   :  { %v5537_v49 = vmul.f32 %v8486_v24, %v5530_v37  ;;  %v8488_v54 = vpop.eup %8487  ;;  %v12775_v24 = vld [vmem:[#allocation52_spill] sm:$0xff] }
0x103b   :  { %v11414_v7 = vmul.f32 %v8488_v54, %v5687_v14  ;;  %v4482_v37 = vadd.f32 %v12775_v24, %v12774_v9  ;;  %v4495_v14 = vadd.f32 %v12776_v36, %v11244_v6 }
0x103c   :  { %v5538_v58 = vpack.c.bf16 %v5537_v49, %v5537_v49 }
0x103d   :  { %v5695_v63 = vpack.c.bf16 %v11414_v7, %v11414_v7 }
0x103e   :  { %5547 = vmatmul.bf16.vlgmr.msra.gmra.mxu0 %v5538_v58  ;;  %5560 = vmatmul.bf16.vlgmr.msra.gmra.mxu1 %v5538_v58 }
0x103f   :  { %5573 = vmatmul.bf16.vlgmr.msra.gmra.mxu2 %v5538_v58  ;;  %5586 = vmatmul.bf16.vlgmr.msra.gmra.mxu3 %v5538_v58 }
0x1040   :  { %5986 = vmatpush.bf16.msra.mxu0 %v11252_v39  ;;  %5999 = vmatpush.bf16.msra.mxu1 %v11254_v57 }
0x1041   :  { %6012 = vmatpush.bf16.msra.mxu2 %v11256_v44  ;;  %6025 = vmatpush.bf16.msra.mxu3 %v11259_v22 }
0x1044   :  { %5987 = vmatpush.bf16.msra.mxu0 %v11264_v53  ;;  %6000 = vmatpush.bf16.msra.mxu1 %v11266_v31 }
0x1045   :  { %6013 = vmatpush.bf16.msra.mxu2 %v11269_v40  ;;  %6026 = vmatpush.bf16.msra.mxu3 %v11274_v13 }
0x1048   :  { %5988 = vmatpush.bf16.msra.mxu0 %v11276_v46  ;;  %6001 = vmatpush.bf16.msra.mxu1 %v11279_v51 }
0x1049   :  { %6014 = vmatpush.bf16.msra.mxu2 %v11282_v28  ;;  %6027 = vmatpush.bf16.msra.mxu3 %v11284_v27 }
0x104c   :  { %5989 = vmatpush.bf16.msra.mxu0 %v11287_v33  ;;  %6002 = vmatpush.bf16.msra.mxu1 %v11290_v3 }
0x104d   :  { %6015 = vmatpush.bf16.msra.mxu2 %v11293_v8  ;;  %6028 = vmatpush.bf16.msra.mxu3 %v11298_v60 }
0x104e   :  { %5869 = vmatmul.bf16.vlgmr.msrb.gmra.mxu0 %v5695_v63  ;;  %5882 = vmatmul.bf16.vlgmr.msrb.gmra.mxu1 %v5695_v63 }
0x104f   :  { %5895 = vmatmul.bf16.vlgmr.msrb.gmra.mxu2 %v5695_v63  ;;  %5908 = vmatmul.bf16.vlgmr.msrb.gmra.mxu3 %v5695_v63 }
0x1050   :  { %5990 = vmatpush.bf16.msra.mxu0 %v11310_v62  ;;  %6003 = vmatpush.bf16.msra.mxu1 %v11313_v38 }
0x1051   :  { %6016 = vmatpush.bf16.msra.mxu2 %v11316_v1  ;;  %6029 = vmatpush.bf16.msra.mxu3 %v11321_v56 }
0x1054   :  { %5991 = vmatpush.bf16.msra.mxu0 %v11326_v26  ;;  %6004 = vmatpush.bf16.msra.mxu1 %v11342_v25 }
0x1055   :  { %6017 = vmatpush.bf16.msra.mxu2 %v11344_v12  ;;  %6030 = vmatpush.bf16.msra.mxu3 %v11350_v30 }
0x1058   :  { %5992 = vmatpush.bf16.msra.mxu0 %v11352_v5  ;;  %6005 = vmatpush.bf16.msra.mxu1 %v11358_v4 }
0x1059   :  { %6018 = vmatpush.bf16.msra.mxu2 %v11360_v18  ;;  %6031 = vmatpush.bf16.msra.mxu3 %v11367_v50 }
0x105c   :  { %5993 = vmatpush.bf16.msra.mxu0 %v11372_v20  ;;  %6006 = vmatpush.bf16.msra.mxu1 %v11383_v21 }
0x105d   :  { %6019 = vmatpush.bf16.msra.mxu2 %v11385_v47  ;;  %6032 = vmatpush.bf16.msra.mxu3 %v11392_v61 }
0x1060   :  { %6111 = vmatpush.bf16.msrb.mxu0 %v11252_v39  ;;  %6124 = vmatpush.bf16.msrb.mxu1 %v11254_v57 }
0x1061   :  { %6137 = vmatpush.bf16.msrb.mxu2 %v11256_v44  ;;  %6150 = vmatpush.bf16.msrb.mxu3 %v11259_v22 }
0x1064   :  { %6112 = vmatpush.bf16.msrb.mxu0 %v11264_v53  ;;  %6125 = vmatpush.bf16.msrb.mxu1 %v11266_v31 }
0x1065   :  { %6138 = vmatpush.bf16.msrb.mxu2 %v11269_v40  ;;  %6151 = vmatpush.bf16.msrb.mxu3 %v11274_v13 }
0x1068   :  { %6113 = vmatpush.bf16.msrb.mxu0 %v11276_v46  ;;  %6126 = vmatpush.bf16.msrb.mxu1 %v11279_v51 }
0x1069   :  { %6139 = vmatpush.bf16.msrb.mxu2 %v11282_v28  ;;  %6152 = vmatpush.bf16.msrb.mxu3 %v11284_v27 }
0x106c   :  { %6114 = vmatpush.bf16.msrb.mxu0 %v11287_v33  ;;  %6127 = vmatpush.bf16.msrb.mxu1 %v11290_v3 }
0x106d   :  { %6140 = vmatpush.bf16.msrb.mxu2 %v11293_v8  ;;  %6153 = vmatpush.bf16.msrb.mxu3 %v11298_v60 }
0x1070   :  { %6115 = vmatpush.bf16.msrb.mxu0 %v11310_v62  ;;  %6128 = vmatpush.bf16.msrb.mxu1 %v11313_v38 }
0x1071   :  { %6141 = vmatpush.bf16.msrb.mxu2 %v11316_v1  ;;  %6154 = vmatpush.bf16.msrb.mxu3 %v11321_v56 }
0x1074   :  { %6116 = vmatpush.bf16.msrb.mxu0 %v11326_v26  ;;  %6129 = vmatpush.bf16.msrb.mxu1 %v11342_v25 }
0x1075   :  { %6142 = vmatpush.bf16.msrb.mxu2 %v11344_v12  ;;  %6155 = vmatpush.bf16.msrb.mxu3 %v11350_v30 }
0x1078   :  { %6117 = vmatpush.bf16.msrb.mxu0 %v11352_v5  ;;  %6130 = vmatpush.bf16.msrb.mxu1 %v11358_v4 }
0x1079   :  { %6143 = vmatpush.bf16.msrb.mxu2 %v11360_v18  ;;  %6156 = vmatpush.bf16.msrb.mxu3 %v11367_v50 }
0x107c   :  { %6118 = vmatpush.bf16.msrb.mxu0 %v11372_v20  ;;  %6131 = vmatpush.bf16.msrb.mxu1 %v11383_v21 }
0x107d   :  { %6144 = vmatpush.bf16.msrb.mxu2 %v11385_v47  ;;  %6157 = vmatpush.bf16.msrb.mxu3 %v11392_v61 }
0x10bb   :  { %v11474_v52 = vpop.f32.mrf.mxu0  ;;  %v11476_v55 = vpop.f32.mrf.mxu1 }
0x10bc   :  { %12768 = vst [vmem:[#allocation41_spill] sm:$0xff] %v11474_v52 }
0x10bd   :  { %12769 = vst [vmem:[#allocation42_spill] sm:$0xff] %v11476_v55 }
0x10c2   :  { %v11478_v19 = vpop.f32.mrf.mxu2  ;;  %v11480_v42 = vpop.f32.mrf.mxu3 }
0x10c3   :  { %12770 = vst [vmem:[#allocation43_spill] sm:$0xff] %v11478_v19  ;;  %v5550_v0 = vpop.f32.mrf.mxu0  ;;  %v5563_v17 = vpop.f32.mrf.mxu1 }
0x10c4   :  { %12771 = vst [vmem:[#allocation44_spill] sm:$0xff] %v11480_v42 }
0x10ca   :  { %v5576_v49 = vpop.f32.mrf.mxu2  ;;  %v5589_v48 = vpop.f32.mrf.mxu3 }
0x10cb   :  { %v5870_v58 = vpop.f32.mrf.mxu0  ;;  %v5883_v41 = vpop.f32.mrf.mxu1 }
0x10cc   :  { %v5913_v59 = vadd.f32 %v5870_v58, %v4469_v11  ;;  %v5914_v10 = vadd.f32 %v5883_v41, %v4482_v37  ;;  %v12777_v41 = vld [vmem:[#allocation69_spill] sm:$0xff] }
0x10ce   :  { %v7795_v45 = vmul.f32 -1.442695, %v5913_v59  ;;  %v7796_v54 = vmul.f32 -1.442695, %v5914_v10  ;;  %v12778_v59 = vld [vmem:[#allocation19_spill] sm:$0xff] }
0x10cf   :  { %v4508_v10 = vadd.f32 %v12778_v59, %v12777_v41 }
0x10d0   :  { %8489 = vpow2.f32 %v7795_v45 }
0x10d1   :  { %8491 = vpow2.f32 %v7796_v54 }
0x10d2   :  { %v5896_v63 = vpop.f32.mrf.mxu2  ;;  %v5909_v0 = vpop.f32.mrf.mxu3 }
0x10d3   :  { %v5915_v17 = vadd.f32 %v5896_v63, %v4495_v14  ;;  %v5872_v35 = vpop.f32.mrf.mxu0  ;;  %v5885_v42 = vpop.f32.mrf.mxu1  ;;  %v5916_v36 = vadd.f32 %v5909_v0, %v4508_v10 }
0x10d5   :  { %v7797_v19 = vmul.f32 -1.442695, %v5915_v17 }
0x10d6   :  { %v8490_v24 = vpop.eup %8489 }
0x10d7   :  { %v8492_v49 = vpop.eup %8491  ;;  %v5926_v48 = vadd.f32 1.0, %v8490_v24  ;;  %8493 = vpow2.f32 %v7797_v19 }
0x10d8   :  { %v5927_v55 = vadd.f32 1.0, %v8492_v49 }
0x10d9   :  { %8495 = vrcp.f32 %v5926_v48  ;;  %v5940_v24 = vand.u32 2147483648, %v5926_v48  ;;  %vm5934_vm14 = vweird.f32 %v5926_v48 }
0x10da   :  { %8497 = vrcp.f32 %v5927_v55  ;;  %v5898_v11 = vpop.f32.mrf.mxu2  ;;  %v5911_v37 = vpop.f32.mrf.mxu3  ;;  %v5955_v19 = vand.u32 2147483648, %v5927_v55  ;;  %v5953_v52 = vand.u32 2147483647, %v5927_v55  ;;  %vm5949_vm15 = vweird.f32 %v5927_v55 }
0x10db   :  { %v5938_v11 = vand.u32 2147483647, %v5926_v48 }
0x10dc   :  { %vm5954_vm3 = vcmp.eq.f32.partialorder %v5953_v52, 8.507059e+37 }
0x10dd   :  { %v8494_v58 = vpop.eup %8493  ;;  %vm5939_vm2 = vcmp.eq.f32.partialorder %v5938_v11, 8.507059e+37 }
0x10de   :  { %v5928_v45 = vadd.f32 1.0, %v8494_v58  ;;  %v5941_v58 = vor.u32 1.1754944e-38, %v5940_v24 }
0x10df   :  { %v8496_v54 = vpop.eup %8495 }
0x10e0   :  { %v8498_v14 = vpop.eup %8497  ;;  %v5930_v63 = vmul.f32 %v8496_v54, %v5926_v48  ;;  %8499 = vrcp.f32 %v5928_v45  ;;  %vm5935_vm12 = vweird.f32 %v8496_v54  ;;  %v5970_v24 = vand.u32 2147483648, %v5928_v45 }
0x10e1   :  { %v5945_v42 = vmul.f32 %v8498_v14, %v5927_v55  ;;  %8501 = vtanh.f32 %v5916_v36  ;;  %vm5950_vm13 = vweird.f32 %v8498_v14  ;;  %vm5936_vm0 = vmor %vm5934_vm14, %vm5935_vm12  ;;  %vm5964_vm5 = vweird.f32 %v5928_v45 }
0x10e2   :  { %v5931_v17 = vsub.f32 1.0, %v5930_v63  ;;  %vm5951_vm1 = vmor %vm5949_vm15, %vm5950_vm13  ;;  %v5956_v63 = vor.u32 1.1754944e-38, %v5955_v19  ;;  %v5971_v11 = vor.u32 1.1754944e-38, %v5970_v24 }
0x10e3   :  { %v5946_v35 = vsub.f32 1.0, %v5945_v42 }
0x10e4   :  { %v5932_v49 = vmul.f32 %v8496_v54, %v5931_v17 }
0x10e5   :  { %v5947_v37 = vmul.f32 %v8498_v14, %v5946_v35 }
0x10e6   :  { %v8500_v32 = vpop.eup %8499  ;;  %v5933_v59 = vadd.f32 %v8496_v54, %v5932_v49 }
0x10e7   :  { %v5960_v0 = vmul.f32 %v8500_v32, %v5928_v45  ;;  %v5948_v10 = vadd.f32 %v8498_v14, %v5947_v37  ;;  %v8502_v36 = vpop.eup %8501  ;;  %vm5965_vm4 = vweird.f32 %v8500_v32 }
0x10e8   :  { %v5937_v42 = vsel %vm5936_vm0, %v8496_v54, %v5933_v59  ;;  %v5968_v54 = vand.u32 2147483647, %v5928_v45  ;;  %vm5966_vm6 = vmor %vm5964_vm5, %vm5965_vm4 }
0x10e9   :  { %v5961_v2 = vsub.f32 1.0, %v5960_v0  ;;  %v5942_v17 = vsel %vm5939_vm2, %v5941_v58, %v5937_v42  ;;  %v5952_v34 = vsel %vm5951_vm1, %v8498_v14, %v5948_v10 }
0x10ea   :  { %v5957_v35 = vsel %vm5954_vm3, %v5956_v63, %v5952_v34  ;;  %v5976_v29 = vmul.f32 %v8502_v36, %v5942_v17  ;;  %vm5969_vm7 = vcmp.eq.f32.partialorder %v5968_v54, 8.507059e+37  ;;  %v12781_v63 = vld [vmem:[#allocation53_spill] sm:$0xff] }
0x10eb   :  { %v5962_v43 = vmul.f32 %v8500_v32, %v5961_v2  ;;  %v5975_v49 = vmul.f32 %v5957_v35, %v12767_v15  ;;  %v4675_v42 = vadd.f32 %v12781_v63, %v11244_v6 }
0x10ed   :  { %v11491_v48 = vadd.f32 %v5976_v29, %v5975_v49  ;;  %v5963_v55 = vadd.f32 %v8500_v32, %v5962_v43  ;;  %v12779_v43 = vld [vmem:[#allocation37_spill] sm:$0xff] }
0x10ee   :  { %v4649_v29 = vadd.f32 %v12779_v43, %v12772_v23 }
0x10ef   :  { %8503 = vtanh.f32 %v11491_v48  ;;  %v5967_v19 = vsel %vm5966_vm6, %v8500_v32, %v5963_v55  ;;  %v12780_v32 = vld [vmem:[#allocation32_spill] sm:$0xff] }
0x10f0   :  { %v5972_v52 = vsel %vm5969_vm7, %v5971_v11, %v5967_v19  ;;  %v4662_v15 = vadd.f32 %v12780_v32, %v12774_v9 }
0x10f5   :  { %v8504_v14 = vpop.eup %8503 }
0x10f6   :  { %v11494_v34 = vmul.f32 %v8504_v14, %v5972_v52 }
0x10f8   :  { %v5980_v2 = vpack.c.bf16 %v11494_v34, %v11494_v34 }
0x10fa   :  { %5994 = vmatmul.bf16.vlgmr.msra.gmra.mxu0 %v5980_v2  ;;  %6007 = vmatmul.bf16.vlgmr.msra.gmra.mxu1 %v5980_v2 }
0x10fb   :  { %6020 = vmatmul.bf16.vlgmr.msra.gmra.mxu2 %v5980_v2  ;;  %6033 = vmatmul.bf16.vlgmr.msra.gmra.mxu3 %v5980_v2 }
0x10fc   :  { %6236 = vmatpush.bf16.msra.mxu0 %v11252_v39  ;;  %6249 = vmatpush.bf16.msra.mxu1 %v11254_v57 }
0x10fd   :  { %6262 = vmatpush.bf16.msra.mxu2 %v11256_v44  ;;  %6275 = vmatpush.bf16.msra.mxu3 %v11259_v22 }
0x1100   :  { %6237 = vmatpush.bf16.msra.mxu0 %v11264_v53  ;;  %6250 = vmatpush.bf16.msra.mxu1 %v11266_v31 }
0x1101   :  { %6263 = vmatpush.bf16.msra.mxu2 %v11269_v40  ;;  %6276 = vmatpush.bf16.msra.mxu3 %v11274_v13 }
0x1104   :  { %6238 = vmatpush.bf16.msra.mxu0 %v11276_v46  ;;  %6251 = vmatpush.bf16.msra.mxu1 %v11279_v51 }
0x1105   :  { %6264 = vmatpush.bf16.msra.mxu2 %v11282_v28  ;;  %6277 = vmatpush.bf16.msra.mxu3 %v11284_v27 }
0x1108   :  { %6239 = vmatpush.bf16.msra.mxu0 %v11287_v33  ;;  %6252 = vmatpush.bf16.msra.mxu1 %v11290_v3 }
0x1109   :  { %6265 = vmatpush.bf16.msra.mxu2 %v11293_v8  ;;  %6278 = vmatpush.bf16.msra.mxu3 %v11298_v60 }
0x110c   :  { %6240 = vmatpush.bf16.msra.mxu0 %v11310_v62  ;;  %6253 = vmatpush.bf16.msra.mxu1 %v11313_v38 }
0x110d   :  { %6266 = vmatpush.bf16.msra.mxu2 %v11316_v1  ;;  %6279 = vmatpush.bf16.msra.mxu3 %v11321_v56 }
0x1110   :  { %6241 = vmatpush.bf16.msra.mxu0 %v11326_v26  ;;  %6254 = vmatpush.bf16.msra.mxu1 %v11342_v25 }
0x1111   :  { %6267 = vmatpush.bf16.msra.mxu2 %v11344_v12  ;;  %6280 = vmatpush.bf16.msra.mxu3 %v11350_v30 }
0x1114   :  { %6242 = vmatpush.bf16.msra.mxu0 %v11352_v5  ;;  %6255 = vmatpush.bf16.msra.mxu1 %v11358_v4 }
0x1115   :  { %6268 = vmatpush.bf16.msra.mxu2 %v11360_v18  ;;  %6281 = vmatpush.bf16.msra.mxu3 %v11367_v50 }
0x1118   :  { %6243 = vmatpush.bf16.msra.mxu0 %v11372_v20  ;;  %6256 = vmatpush.bf16.msra.mxu1 %v11383_v21 }
0x1119   :  { %6269 = vmatpush.bf16.msra.mxu2 %v11385_v47  ;;  %6282 = vmatpush.bf16.msra.mxu3 %v11392_v61 }
0x1177   :  { %v5995_v45 = vpop.f32.mrf.mxu0  ;;  %v6008_v37 = vpop.f32.mrf.mxu1 }
0x1178   :  { %v6038_v59 = vadd.f32 %v5995_v45, %v4649_v29  ;;  %v6039_v0 = vadd.f32 %v6008_v37, %v4662_v15  ;;  %v12782_v29 = vld [vmem:[#allocation54_spill] sm:$0xff] }
0x1179   :  { %v4688_v32 = vadd.f32 %v12782_v29, %v12777_v41 }
0x117a   :  { %v7798_v58 = vmul.f32 -1.442695, %v6038_v59  ;;  %v7799_v10 = vmul.f32 -1.442695, %v6039_v0 }
0x117c   :  { %8505 = vpow2.f32 %v7798_v58 }
0x117d   :  { %8507 = vpow2.f32 %v7799_v10 }
0x117e   :  { %v6021_v36 = vpop.f32.mrf.mxu2  ;;  %v6034_v17 = vpop.f32.mrf.mxu3 }
0x117f   :  { %v6040_v35 = vadd.f32 %v6021_v36, %v4675_v42  ;;  %v5997_v49 = vpop.f32.mrf.mxu0  ;;  %v6010_v55 = vpop.f32.mrf.mxu1  ;;  %v6041_v37 = vadd.f32 %v6034_v17, %v4688_v32 }
0x1181   :  { %v7800_v24 = vmul.f32 -1.442695, %v6040_v35 }
0x1182   :  { %v8506_v54 = vpop.eup %8505 }
0x1183   :  { %v8508_v19 = vpop.eup %8507  ;;  %v6051_v11 = vadd.f32 1.0, %v8506_v54  ;;  %8509 = vpow2.f32 %v7800_v24 }
0x1184   :  { %v6052_v14 = vadd.f32 1.0, %v8508_v19 }
0x1185   :  { %8511 = vrcp.f32 %v6051_v11  ;;  %v6065_v42 = vand.u32 2147483648, %v6051_v11  ;;  %v6063_v49 = vand.u32 2147483647, %v6051_v11  ;;  %vm6059_vm10 = vweird.f32 %v6051_v11 }
0x1186   :  { %8513 = vrcp.f32 %v6052_v14  ;;  %v6023_v52 = vpop.f32.mrf.mxu2  ;;  %v6036_v2 = vpop.f32.mrf.mxu3  ;;  %v6080_v36 = vand.u32 2147483648, %v6052_v14  ;;  %v6078_v24 = vand.u32 2147483647, %v6052_v14  ;;  %vm6074_vm11 = vweird.f32 %v6052_v14 }
0x1187   :  { %v6066_v52 = vor.u32 1.1754944e-38, %v6065_v42  ;;  %vm6064_vm14 = vcmp.eq.f32.partialorder %v6063_v49, 8.507059e+37 }
0x1188   :  { %vm6079_vm15 = vcmp.eq.f32.partialorder %v6078_v24, 8.507059e+37  ;;  %v5981_v24 = vadd.f32 %v11494_v34, %v11414_v7  ;;  %v12784_v34 = vld [vmem:[#allocation56_spill] sm:$0xff] }
0x1189   :  { %v8510_v43 = vpop.eup %8509 }
0x118a   :  { %v6053_v15 = vadd.f32 1.0, %v8510_v43  ;;  %v6081_v43 = vor.u32 1.1754944e-38, %v6080_v36 }
0x118b   :  { %v8512_v45 = vpop.eup %8511 }
0x118c   :  { %v8514_v59 = vpop.eup %8513  ;;  %v6055_v0 = vmul.f32 %v8512_v45, %v6051_v11  ;;  %8515 = vrcp.f32 %v6053_v15  ;;  %vm6060_vm8 = vweird.f32 %v8512_v45  ;;  %v6095_v42 = vand.u32 2147483648, %v6053_v15 }
0x118d   :  { %v6070_v58 = vmul.f32 %v8514_v59, %v6052_v14  ;;  %8517 = vtanh.f32 %v6041_v37  ;;  %vm6075_vm9 = vweird.f32 %v8514_v59  ;;  %vm6061_vm12 = vmor %vm6059_vm10, %vm6060_vm8  ;;  %vm6089_vm1 = vweird.f32 %v6053_v15 }
0x118e   :  { %v6056_v10 = vsub.f32 1.0, %v6055_v0  ;;  %vm6076_vm13 = vmor %vm6074_vm11, %vm6075_vm9  ;;  %v6096_v49 = vor.u32 1.1754944e-38, %v6095_v42 }
0x118f   :  { %v6071_v63 = vsub.f32 1.0, %v6070_v58 }
0x1190   :  { %v6057_v35 = vmul.f32 %v8512_v45, %v6056_v10 }
0x1191   :  { %v6072_v55 = vmul.f32 %v8514_v59, %v6071_v63 }
0x1192   :  { %v8516_v54 = vpop.eup %8515  ;;  %v6058_v19 = vadd.f32 %v8512_v45, %v6057_v35 }
0x1193   :  { %v6085_v17 = vmul.f32 %v8516_v54, %v6053_v15  ;;  %v6073_v2 = vadd.f32 %v8514_v59, %v6072_v55  ;;  %v8518_v32 = vpop.eup %8517  ;;  %vm6090_vm0 = vweird.f32 %v8516_v54 }
0x1194   :  { %v6062_v29 = vsel %vm6061_vm12, %v8512_v45, %v6058_v19  ;;  %v6093_v45 = vand.u32 2147483647, %v6053_v15  ;;  %vm6091_vm2 = vmor %vm6089_vm1, %vm6090_vm0  ;;  %v4842_v15 = vadd.f32 %v12784_v34, %v12774_v9 }
0x1195   :  { %v6086_v37 = vsub.f32 1.0, %v6085_v17  ;;  %v6067_v0 = vsel %vm6064_vm14, %v6066_v52, %v6062_v29  ;;  %v6077_v58 = vsel %vm6076_vm13, %v8514_v59, %v6073_v2 }
0x1196   :  { %v6082_v10 = vsel %vm6079_vm15, %v6081_v43, %v6077_v58  ;;  %v6101_v63 = vmul.f32 %v8518_v32, %v6067_v0  ;;  %vm6094_vm3 = vcmp.eq.f32.partialorder %v6093_v45, 8.507059e+37 }
0x1197   :  { %v6087_v16 = vmul.f32 %v8516_v54, %v6086_v37  ;;  %v6100_v35 = vmul.f32 %v6082_v10, %v11491_v48  ;;  %v12785_v37 = vld [vmem:[#allocation57_spill] sm:$0xff] }
0x1198   :  { %v4855_v0 = vadd.f32 %v12785_v37, %v11244_v6 }
0x1199   :  { %v11539_v11 = vadd.f32 %v6101_v63, %v6100_v35  ;;  %v6088_v14 = vadd.f32 %v8516_v54, %v6087_v16  ;;  %v12783_v16 = vld [vmem:[#allocation55_spill] sm:$0xff] }
0x119a   :  { %v4829_v7 = vadd.f32 %v12783_v16, %v12772_v23 }
0x119b   :  { %8519 = vtanh.f32 %v11539_v11  ;;  %v6092_v36 = vsel %vm6091_vm2, %v8516_v54, %v6088_v14 }
0x119c   :  { %v6097_v55 = vsel %vm6094_vm3, %v6096_v49, %v6092_v36 }
0x11a1   :  { %v8520_v59 = vpop.eup %8519 }
0x11a2   :  { %v6104_v19 = vmul.f32 %v8520_v59, %v6097_v55 }
0x11a4   :  { %v6105_v48 = vpack.c.bf16 %v6104_v19, %v6104_v19  ;;  %v11544_v17 = vadd.f32 %v6104_v19, %v5981_v24 }
0x11a6   :  { %6119 = vmatmul.bf16.vlgmr.msrb.gmra.mxu0 %v6105_v48  ;;  %6132 = vmatmul.bf16.vlgmr.msrb.gmra.mxu1 %v6105_v48 }
0x11a7   :  { %6145 = vmatmul.bf16.vlgmr.msrb.gmra.mxu2 %v6105_v48  ;;  %6158 = vmatmul.bf16.vlgmr.msrb.gmra.mxu3 %v6105_v48  ;;  %v12786_v48 = vld [vmem:[#allocation58_spill] sm:$0xff] }
0x11a8   :  { %6361 = vmatpush.bf16.msrb.mxu0 %v11252_v39  ;;  %6374 = vmatpush.bf16.msrb.mxu1 %v11254_v57  ;;  %v4868_v16 = vadd.f32 %v12786_v48, %v12777_v41 }
0x11a9   :  { %6387 = vmatpush.bf16.msrb.mxu2 %v11256_v44  ;;  %6400 = vmatpush.bf16.msrb.mxu3 %v11259_v22 }
0x11ac   :  { %6362 = vmatpush.bf16.msrb.mxu0 %v11264_v53  ;;  %6375 = vmatpush.bf16.msrb.mxu1 %v11266_v31 }
0x11ad   :  { %6388 = vmatpush.bf16.msrb.mxu2 %v11269_v40  ;;  %6401 = vmatpush.bf16.msrb.mxu3 %v11274_v13 }
0x11b0   :  { %6363 = vmatpush.bf16.msrb.mxu0 %v11276_v46  ;;  %6376 = vmatpush.bf16.msrb.mxu1 %v11279_v51 }
0x11b1   :  { %6389 = vmatpush.bf16.msrb.mxu2 %v11282_v28  ;;  %6402 = vmatpush.bf16.msrb.mxu3 %v11284_v27 }
0x11b4   :  { %6364 = vmatpush.bf16.msrb.mxu0 %v11287_v33  ;;  %6377 = vmatpush.bf16.msrb.mxu1 %v11290_v3 }
0x11b5   :  { %6390 = vmatpush.bf16.msrb.mxu2 %v11293_v8  ;;  %6403 = vmatpush.bf16.msrb.mxu3 %v11298_v60 }
0x11b8   :  { %6365 = vmatpush.bf16.msrb.mxu0 %v11310_v62  ;;  %6378 = vmatpush.bf16.msrb.mxu1 %v11313_v38 }
0x11b9   :  { %6391 = vmatpush.bf16.msrb.mxu2 %v11316_v1  ;;  %6404 = vmatpush.bf16.msrb.mxu3 %v11321_v56 }
0x11bc   :  { %6366 = vmatpush.bf16.msrb.mxu0 %v11326_v26  ;;  %6379 = vmatpush.bf16.msrb.mxu1 %v11342_v25 }
0x11bd   :  { %6392 = vmatpush.bf16.msrb.mxu2 %v11344_v12  ;;  %6405 = vmatpush.bf16.msrb.mxu3 %v11350_v30 }
0x11c0   :  { %6367 = vmatpush.bf16.msrb.mxu0 %v11352_v5  ;;  %6380 = vmatpush.bf16.msrb.mxu1 %v11358_v4 }
0x11c1   :  { %6393 = vmatpush.bf16.msrb.mxu2 %v11360_v18  ;;  %6406 = vmatpush.bf16.msrb.mxu3 %v11367_v50 }
0x11c4   :  { %6368 = vmatpush.bf16.msrb.mxu0 %v11372_v20  ;;  %6381 = vmatpush.bf16.msrb.mxu1 %v11383_v21 }
0x11c5   :  { %6394 = vmatpush.bf16.msrb.mxu2 %v11385_v47  ;;  %6407 = vmatpush.bf16.msrb.mxu3 %v11392_v61 }
0x1223   :  { %v6120_v54 = vpop.f32.mrf.mxu0  ;;  %v6133_v52 = vpop.f32.mrf.mxu1 }
0x1224   :  { %v6163_v2 = vadd.f32 %v6120_v54, %v4829_v7  ;;  %v6164_v43 = vadd.f32 %v6133_v52, %v4842_v15 }
0x1226   :  { %v7801_v29 = vmul.f32 -1.442695, %v6163_v2  ;;  %v7802_v32 = vmul.f32 -1.442695, %v6164_v43 }
0x1228   :  { %8521 = vpow2.f32 %v7801_v29 }
0x1229   :  { %8523 = vpow2.f32 %v7802_v32 }
0x122a   :  { %v6146_v58 = vpop.f32.mrf.mxu2  ;;  %v6159_v10 = vpop.f32.mrf.mxu3 }
0x122b   :  { %v6165_v63 = vadd.f32 %v6146_v58, %v4855_v0  ;;  %v6122_v35 = vpop.f32.mrf.mxu0  ;;  %v6135_v14 = vpop.f32.mrf.mxu1  ;;  %v6166_v15 = vadd.f32 %v6159_v10, %v4868_v16 }
0x122d   :  { %v7803_v42 = vmul.f32 -1.442695, %v6165_v63 }
0x122e   :  { %v8522_v45 = vpop.eup %8521 }
0x122f   :  { %v8524_v36 = vpop.eup %8523  ;;  %v6176_v49 = vadd.f32 1.0, %v8522_v45  ;;  %8525 = vpow2.f32 %v7803_v42 }
0x1230   :  { %v6177_v59 = vadd.f32 1.0, %v8524_v36 }
0x1231   :  { %8527 = vrcp.f32 %v6176_v49  ;;  %v6190_v32 = vand.u32 2147483648, %v6176_v49  ;;  %v6188_v58 = vand.u32 2147483647, %v6176_v49  ;;  %vm6184_vm6 = vweird.f32 %v6176_v49 }
0x1232   :  { %8529 = vrcp.f32 %v6177_v59  ;;  %v6148_v55 = vpop.f32.mrf.mxu2  ;;  %v6161_v24 = vpop.f32.mrf.mxu3  ;;  %v6205_v37 = vand.u32 2147483648, %v6177_v59  ;;  %v6203_v35 = vand.u32 2147483647, %v6177_v59  ;;  %vm6199_vm7 = vweird.f32 %v6177_v59 }
0x1233   :  { %v6191_v45 = vor.u32 1.1754944e-38, %v6190_v32  ;;  %vm6189_vm10 = vcmp.eq.f32.partialorder %v6188_v58, 8.507059e+37 }
0x1234   :  { %v6206_v55 = vor.u32 1.1754944e-38, %v6205_v37  ;;  %vm6204_vm11 = vcmp.eq.f32.partialorder %v6203_v35, 8.507059e+37 }
0x1235   :  { %v8526_v19 = vpop.eup %8525 }
0x1236   :  { %v6178_v7 = vadd.f32 1.0, %v8526_v19 }
0x1237   :  { %v8528_v34 = vpop.eup %8527 }
0x1238   :  { %v8530_v54 = vpop.eup %8529  ;;  %v6180_v52 = vmul.f32 %v8528_v34, %v6176_v49  ;;  %8531 = vrcp.f32 %v6178_v7  ;;  %vm6185_vm4 = vweird.f32 %v8528_v34  ;;  %v6220_v32 = vand.u32 2147483648, %v6178_v7 }
0x1239   :  { %v6195_v2 = vmul.f32 %v8530_v54, %v6177_v59  ;;  %8533 = vtanh.f32 %v6166_v15  ;;  %vm6200_vm5 = vweird.f32 %v8530_v54  ;;  %vm6186_vm8 = vmor %vm6184_vm6, %vm6185_vm4  ;;  %vm6214_vm13 = vweird.f32 %v6178_v7 }
0x123a   :  { %v6181_v43 = vsub.f32 1.0, %v6180_v52  ;;  %vm6201_vm9 = vmor %vm6199_vm7, %vm6200_vm5 }
0x123b   :  { %v6196_v29 = vsub.f32 1.0, %v6195_v2 }
0x123c   :  { %v6182_v0 = vmul.f32 %v8528_v34, %v6181_v43 }
0x123d   :  { %v6197_v63 = vmul.f32 %v8530_v54, %v6196_v29 }
0x123e   :  { %v8532_v14 = vpop.eup %8531  ;;  %v6183_v42 = vadd.f32 %v8528_v34, %v6182_v0  ;;  %v6221_v0 = vor.u32 1.1754944e-38, %v6220_v32 }
0x123f   :  { %v6210_v10 = vmul.f32 %v8532_v14, %v6178_v7  ;;  %v6198_v36 = vadd.f32 %v8530_v54, %v6197_v63  ;;  %v8534_v19 = vpop.eup %8533  ;;  %vm6215_vm12 = vweird.f32 %v8532_v14 }
0x1240   :  { %v6187_v24 = vsel %vm6186_vm8, %v8528_v34, %v6183_v42  ;;  %v6218_v34 = vand.u32 2147483647, %v6178_v7  ;;  %vm6216_vm14 = vmor %vm6214_vm13, %vm6215_vm12  ;;  %v12788_v7 = vld [vmem:[#allocation60_spill] sm:$0xff] }
0x1241   :  { %v6211_v48 = vsub.f32 1.0, %v6210_v10  ;;  %v6192_v16 = vsel %vm6189_vm10, %v6191_v45, %v6187_v24  ;;  %v6202_v15 = vsel %vm6201_vm9, %v8530_v54, %v6198_v36 }
0x1242   :  { %v6207_v52 = vsel %vm6204_vm11, %v6206_v55, %v6202_v15  ;;  %v6226_v2 = vmul.f32 %v8534_v19, %v6192_v16  ;;  %vm6219_vm15 = vcmp.eq.f32.partialorder %v6218_v34, 8.507059e+37 }
0x1243   :  { %v6212_v43 = vmul.f32 %v8532_v14, %v6211_v48  ;;  %v6225_v29 = vmul.f32 %v6207_v52, %v11539_v11  ;;  %v12787_v11 = vld [vmem:[#allocation59_spill] sm:$0xff]  ;;  %v12789_v48 = vld [vmem:[#allocation61_spill] sm:$0xff] }
0x1244   :  { %v5035_v16 = vadd.f32 %v12789_v48, %v11244_v6 }
0x1245   :  { %v11587_v49 = vadd.f32 %v6226_v2, %v6225_v29  ;;  %v6213_v59 = vadd.f32 %v8532_v14, %v6212_v43 }
0x1247   :  { %8535 = vtanh.f32 %v11587_v49  ;;  %v6217_v37 = vsel %vm6216_vm14, %v8532_v14, %v6213_v59  ;;  %v5022_v14 = vadd.f32 %v12788_v7, %v12774_v9 }
0x1248   :  { %v6222_v58 = vsel %vm6219_vm15, %v6221_v0, %v6217_v37 }
0x124d   :  { %v8536_v54 = vpop.eup %8535 }
0x124e   :  { %v6229_v63 = vmul.f32 %v8536_v54, %v6222_v58 }
0x1250   :  { %v6230_v35 = vpack.c.bf16 %v6229_v63, %v6229_v63  ;;  %v11591_v42 = vadd.f32 %v6229_v63, %v11544_v17  ;;  %v5009_v17 = vadd.f32 %v12787_v11, %v12772_v23 }
0x1252   :  { %6244 = vmatmul.bf16.vlgmr.msra.gmra.mxu0 %v6230_v35  ;;  %6257 = vmatmul.bf16.vlgmr.msra.gmra.mxu1 %v6230_v35 }
0x1253   :  { %6270 = vmatmul.bf16.vlgmr.msra.gmra.mxu2 %v6230_v35  ;;  %6283 = vmatmul.bf16.vlgmr.msra.gmra.mxu3 %v6230_v35  ;;  %v12790_v35 = vld [vmem:[#allocation62_spill] sm:$0xff] }
0x1254   :  { %6486 = vmatpush.bf16.msra.mxu0 %v11252_v39  ;;  %6499 = vmatpush.bf16.msra.mxu1 %v11254_v57  ;;  %v5048_v11 = vadd.f32 %v12790_v35, %v12777_v41 }
0x1255   :  { %6512 = vmatpush.bf16.msra.mxu2 %v11256_v44  ;;  %6525 = vmatpush.bf16.msra.mxu3 %v11259_v22 }
0x1258   :  { %6487 = vmatpush.bf16.msra.mxu0 %v11264_v53  ;;  %6500 = vmatpush.bf16.msra.mxu1 %v11266_v31 }
0x1259   :  { %6513 = vmatpush.bf16.msra.mxu2 %v11269_v40  ;;  %6526 = vmatpush.bf16.msra.mxu3 %v11274_v13 }
0x125c   :  { %6488 = vmatpush.bf16.msra.mxu0 %v11276_v46  ;;  %6501 = vmatpush.bf16.msra.mxu1 %v11279_v51 }
0x125d   :  { %6514 = vmatpush.bf16.msra.mxu2 %v11282_v28  ;;  %6527 = vmatpush.bf16.msra.mxu3 %v11284_v27 }
0x1260   :  { %6489 = vmatpush.bf16.msra.mxu0 %v11287_v33  ;;  %6502 = vmatpush.bf16.msra.mxu1 %v11290_v3 }
0x1261   :  { %6515 = vmatpush.bf16.msra.mxu2 %v11293_v8  ;;  %6528 = vmatpush.bf16.msra.mxu3 %v11298_v60 }
0x1264   :  { %6490 = vmatpush.bf16.msra.mxu0 %v11310_v62  ;;  %6503 = vmatpush.bf16.msra.mxu1 %v11313_v38 }
0x1265   :  { %6516 = vmatpush.bf16.msra.mxu2 %v11316_v1  ;;  %6529 = vmatpush.bf16.msra.mxu3 %v11321_v56 }
0x1268   :  { %6491 = vmatpush.bf16.msra.mxu0 %v11326_v26  ;;  %6504 = vmatpush.bf16.msra.mxu1 %v11342_v25 }
0x1269   :  { %6517 = vmatpush.bf16.msra.mxu2 %v11344_v12  ;;  %6530 = vmatpush.bf16.msra.mxu3 %v11350_v30 }
0x126c   :  { %6492 = vmatpush.bf16.msra.mxu0 %v11352_v5  ;;  %6505 = vmatpush.bf16.msra.mxu1 %v11358_v4 }
0x126d   :  { %6518 = vmatpush.bf16.msra.mxu2 %v11360_v18  ;;  %6531 = vmatpush.bf16.msra.mxu3 %v11367_v50 }
0x1270   :  { %6493 = vmatpush.bf16.msra.mxu0 %v11372_v20  ;;  %6506 = vmatpush.bf16.msra.mxu1 %v11383_v21 }
0x1271   :  { %6519 = vmatpush.bf16.msra.mxu2 %v11385_v47  ;;  %6532 = vmatpush.bf16.msra.mxu3 %v11392_v61 }
0x12cf   :  { %v6245_v10 = vpop.f32.mrf.mxu0  ;;  %v6258_v45 = vpop.f32.mrf.mxu1 }
0x12d0   :  { %v6288_v36 = vadd.f32 %v6245_v10, %v5009_v17  ;;  %v6289_v55 = vadd.f32 %v6258_v45, %v5022_v14 }
0x12d2   :  { %v7804_v24 = vmul.f32 -1.442695, %v6288_v36  ;;  %v7805_v19 = vmul.f32 -1.442695, %v6289_v55 }
0x12d4   :  { %8537 = vpow2.f32 %v7804_v24 }
0x12d5   :  { %8539 = vpow2.f32 %v7805_v19 }
0x12d6   :  { %v6271_v15 = vpop.f32.mrf.mxu2  ;;  %v6284_v52 = vpop.f32.mrf.mxu3 }
0x12d7   :  { %v6290_v2 = vadd.f32 %v6271_v15, %v5035_v16  ;;  %v6247_v43 = vpop.f32.mrf.mxu0  ;;  %v6260_v29 = vpop.f32.mrf.mxu1  ;;  %v6291_v14 = vadd.f32 %v6284_v52, %v5048_v11 }
0x12d9   :  { %v7806_v59 = vmul.f32 -1.442695, %v6290_v2 }
0x12da   :  { %v8538_v32 = vpop.eup %8537 }
0x12db   :  { %v8540_v34 = vpop.eup %8539  ;;  %v6301_v37 = vadd.f32 1.0, %v8538_v32  ;;  %8541 = vpow2.f32 %v7806_v59 }
0x12dc   :  { %v6302_v0 = vadd.f32 1.0, %v8540_v34 }
0x12dd   :  { %8543 = vrcp.f32 %v6301_v37  ;;  %v6315_v19 = vand.u32 2147483648, %v6301_v37  ;;  %v6313_v15 = vand.u32 2147483647, %v6301_v37  ;;  %vm6309_vm2 = vweird.f32 %v6301_v37 }
0x12de   :  { %8545 = vrcp.f32 %v6302_v0  ;;  %v6273_v54 = vpop.f32.mrf.mxu2  ;;  %v6286_v58 = vpop.f32.mrf.mxu3  ;;  %v6330_v48 = vand.u32 2147483648, %v6302_v0  ;;  %v6328_v43 = vand.u32 2147483647, %v6302_v0  ;;  %vm6324_vm3 = vweird.f32 %v6302_v0 }
0x12df   :  { %v6316_v32 = vor.u32 1.1754944e-38, %v6315_v19  ;;  %vm6314_vm6 = vcmp.eq.f32.partialorder %v6313_v15, 8.507059e+37 }
0x12e0   :  { %v6331_v54 = vor.u32 1.1754944e-38, %v6330_v48  ;;  %vm6329_vm7 = vcmp.eq.f32.partialorder %v6328_v43, 8.507059e+37 }
0x12e1   :  { %v8542_v63 = vpop.eup %8541 }
0x12e2   :  { %v6303_v17 = vadd.f32 1.0, %v8542_v63 }
0x12e3   :  { %v8544_v7 = vpop.eup %8543 }
0x12e4   :  { %v8546_v10 = vpop.eup %8545  ;;  %v6305_v45 = vmul.f32 %v8544_v7, %v6301_v37  ;;  %8547 = vrcp.f32 %v6303_v17  ;;  %vm6310_vm0 = vweird.f32 %v8544_v7  ;;  %v6345_v19 = vand.u32 2147483648, %v6303_v17 }
0x12e5   :  { %v6320_v36 = vmul.f32 %v8546_v10, %v6302_v0  ;;  %8549 = vtanh.f32 %v6291_v14  ;;  %vm6325_vm1 = vweird.f32 %v8546_v10  ;;  %vm6311_vm4 = vmor %vm6309_vm2, %vm6310_vm0  ;;  %vm6339_vm9 = vweird.f32 %v6303_v17 }
0x12e6   :  { %v6306_v55 = vsub.f32 1.0, %v6305_v45  ;;  %vm6326_vm5 = vmor %vm6324_vm3, %vm6325_vm1 }
0x12e7   :  { %v6321_v24 = vsub.f32 1.0, %v6320_v36 }
0x12e8   :  { %v6307_v16 = vmul.f32 %v8544_v7, %v6306_v55 }
0x12e9   :  { %v6322_v2 = vmul.f32 %v8546_v10, %v6321_v24 }
0x12ea   :  { %v8548_v29 = vpop.eup %8547  ;;  %v6308_v59 = vadd.f32 %v8544_v7, %v6307_v16  ;;  %v6346_v16 = vor.u32 1.1754944e-38, %v6345_v19 }
0x12eb   :  { %v6335_v52 = vmul.f32 %v8548_v29, %v6303_v17  ;;  %v6323_v34 = vadd.f32 %v8546_v10, %v6322_v2  ;;  %v8550_v63 = vpop.eup %8549  ;;  %vm6340_vm8 = vweird.f32 %v8548_v29 }
0x12ec   :  { %v6312_v58 = vsel %vm6311_vm4, %v8544_v7, %v6308_v59  ;;  %v6343_v7 = vand.u32 2147483647, %v6303_v17  ;;  %vm6341_vm10 = vmor %vm6339_vm9, %vm6340_vm8 }
0x12ed   :  { %v6336_v35 = vsub.f32 1.0, %v6335_v52  ;;  %v6317_v11 = vsel %vm6314_vm6, %v6316_v32, %v6312_v58  ;;  %v6327_v14 = vsel %vm6326_vm5, %v8546_v10, %v6323_v34 }
0x12ee   :  { %v6332_v45 = vsel %vm6329_vm7, %v6331_v54, %v6327_v14  ;;  %v6351_v36 = vmul.f32 %v8550_v63, %v6317_v11  ;;  %vm6344_vm11 = vcmp.eq.f32.partialorder %v6343_v7, 8.507059e+37 }
0x12ef   :  { %v6337_v55 = vmul.f32 %v8548_v29, %v6336_v35  ;;  %v6350_v24 = vmul.f32 %v6332_v45, %v11587_v49 }
0x12f1   :  { %v11634_v37 = vadd.f32 %v6351_v36, %v6350_v24  ;;  %v6338_v0 = vadd.f32 %v8548_v29, %v6337_v55 }
0x12f3   :  { %8551 = vtanh.f32 %v11634_v37  ;;  %v6342_v48 = vsel %vm6341_vm10, %v8548_v29, %v6338_v0 }
0x12f4   :  { %v6347_v15 = vsel %vm6344_vm11, %v6346_v16, %v6342_v48 }
0x12f9   :  { %v8552_v10 = vpop.eup %8551 }
0x12fa   :  { %v6354_v2 = vmul.f32 %v8552_v10, %v6347_v15 }
0x12fc   :  { %v6355_v43 = vpack.c.bf16 %v6354_v2, %v6354_v2  ;;  %v11638_v59 = vadd.f32 %v6354_v2, %v11591_v42 }
0x12fe   :  { %6369 = vmatmul.bf16.vlgmr.msrb.gmra.mxu0 %v6355_v43  ;;  %6382 = vmatmul.bf16.vlgmr.msrb.gmra.mxu1 %v6355_v43 }
0x12ff   :  { %6395 = vmatmul.bf16.vlgmr.msrb.gmra.mxu2 %v6355_v43  ;;  %6408 = vmatmul.bf16.vlgmr.msrb.gmra.mxu3 %v6355_v43 }
0x1300   :  { %6611 = vmatpush.bf16.msrb.mxu0 %v11252_v39  ;;  %6624 = vmatpush.bf16.msrb.mxu1 %v11254_v57  ;;  %v12791_v39 = vld [vmem:[#allocation63_spill] sm:$0xff] }
0x1301   :  { %6637 = vmatpush.bf16.msrb.mxu2 %v11256_v44  ;;  %6650 = vmatpush.bf16.msrb.mxu3 %v11259_v22  ;;  %v5189_v57 = vadd.f32 %v12791_v39, %v12772_v23  ;;  %v12792_v44 = vld [vmem:[#allocation64_spill] sm:$0xff] }
0x1302   :  { %v5202_v22 = vadd.f32 %v12792_v44, %v12774_v9 }
0x1304   :  { %6612 = vmatpush.bf16.msrb.mxu0 %v11264_v53  ;;  %6625 = vmatpush.bf16.msrb.mxu1 %v11266_v31 }
0x1305   :  { %6638 = vmatpush.bf16.msrb.mxu2 %v11269_v40  ;;  %6651 = vmatpush.bf16.msrb.mxu3 %v11274_v13 }
0x1308   :  { %6613 = vmatpush.bf16.msrb.mxu0 %v11276_v46  ;;  %6626 = vmatpush.bf16.msrb.mxu1 %v11279_v51 }
0x1309   :  { %6639 = vmatpush.bf16.msrb.mxu2 %v11282_v28  ;;  %6652 = vmatpush.bf16.msrb.mxu3 %v11284_v27  ;;  %v12793_v28 = vld [vmem:[#allocation21_spill] sm:$0xff] }
0x130a   :  { %v5215_v27 = vadd.f32 %v12793_v28, %v11244_v6  ;;  %v12796_v28 = vld [vmem:[#allocation38_spill] sm:$0xff] }
0x130c   :  { %6614 = vmatpush.bf16.msrb.mxu0 %v11287_v33  ;;  %6627 = vmatpush.bf16.msrb.mxu1 %v11290_v3 }
0x130d   :  { %6640 = vmatpush.bf16.msrb.mxu2 %v11293_v8  ;;  %6653 = vmatpush.bf16.msrb.mxu3 %v11298_v60 }
0x1310   :  { %6615 = vmatpush.bf16.msrb.mxu0 %v11310_v62  ;;  %6628 = vmatpush.bf16.msrb.mxu1 %v11313_v38 }
0x1311   :  { %6641 = vmatpush.bf16.msrb.mxu2 %v11316_v1  ;;  %6654 = vmatpush.bf16.msrb.mxu3 %v11321_v56 }
0x1314   :  { %6616 = vmatpush.bf16.msrb.mxu0 %v11326_v26  ;;  %6629 = vmatpush.bf16.msrb.mxu1 %v11342_v25 }
0x1315   :  { %6642 = vmatpush.bf16.msrb.mxu2 %v11344_v12  ;;  %6655 = vmatpush.bf16.msrb.mxu3 %v11350_v30 }
0x1318   :  { %6617 = vmatpush.bf16.msrb.mxu0 %v11352_v5  ;;  %6630 = vmatpush.bf16.msrb.mxu1 %v11358_v4  ;;  %v12794_v4 = vld [vmem:[#allocation22_spill] sm:$0xff] }
0x1319   :  { %6643 = vmatpush.bf16.msrb.mxu2 %v11360_v18  ;;  %6656 = vmatpush.bf16.msrb.mxu3 %v11367_v50  ;;  %v5228_v18 = vadd.f32 %v12794_v4, %v12777_v41 }
0x131c   :  { %6618 = vmatpush.bf16.msrb.mxu0 %v11372_v20  ;;  %6631 = vmatpush.bf16.msrb.mxu1 %v11383_v21 }
0x131d   :  { %6644 = vmatpush.bf16.msrb.mxu2 %v11385_v47  ;;  %6657 = vmatpush.bf16.msrb.mxu3 %v11392_v61 }
0x137b   :  { %v6370_v53 = vpop.f32.mrf.mxu0  ;;  %v6383_v31 = vpop.f32.mrf.mxu1 }
0x137c   :  { %v6413_v40 = vadd.f32 %v6370_v53, %v5189_v57  ;;  %v6414_v13 = vadd.f32 %v6383_v31, %v5202_v22 }
0x137e   :  { %v7807_v46 = vmul.f32 -1.442695, %v6413_v40  ;;  %v7808_v51 = vmul.f32 -1.442695, %v6414_v13 }
0x1380   :  { %8553 = vpow2.f32 %v7807_v46 }
0x1381   :  { %8555 = vpow2.f32 %v7808_v51 }
0x1382   :  { %v6396_v33 = vpop.f32.mrf.mxu2  ;;  %v6409_v3 = vpop.f32.mrf.mxu3 }
0x1383   :  { %v6415_v8 = vadd.f32 %v6396_v33, %v5215_v27  ;;  %v6372_v60 = vpop.f32.mrf.mxu0  ;;  %v6385_v62 = vpop.f32.mrf.mxu1  ;;  %v6416_v21 = vadd.f32 %v6409_v3, %v5228_v18  ;;  %v5382_v27 = vadd.f32 %v12796_v28, %v12774_v9 }
0x1385   :  { %v7809_v38 = vmul.f32 -1.442695, %v6415_v8 }
0x1386   :  { %v8554_v1 = vpop.eup %8553 }
0x1387   :  { %v8556_v56 = vpop.eup %8555  ;;  %v6426_v26 = vadd.f32 1.0, %v8554_v1  ;;  %8557 = vpow2.f32 %v7809_v38 }
0x1388   :  { %v6427_v25 = vadd.f32 1.0, %v8556_v56 }
0x1389   :  { %8559 = vrcp.f32 %v6426_v26  ;;  %v6440_v29 = vand.u32 2147483648, %v6426_v26  ;;  %v6438_v34 = vand.u32 2147483647, %v6426_v26  ;;  %vm6434_vm14 = vweird.f32 %v6426_v26 }
0x138a   :  { %8561 = vrcp.f32 %v6427_v25  ;;  %v6398_v12 = vpop.f32.mrf.mxu2  ;;  %v6411_v30 = vpop.f32.mrf.mxu3  ;;  %v6455_v52 = vand.u32 2147483648, %v6427_v25  ;;  %v6453_v58 = vand.u32 2147483647, %v6427_v25  ;;  %vm6449_vm15 = vweird.f32 %v6427_v25 }
0x138b   :  { %v6441_v14 = vor.u32 1.1754944e-38, %v6440_v29  ;;  %vm6439_vm2 = vcmp.eq.f32.partialorder %v6438_v34, 8.507059e+37 }
0x138c   :  { %v6456_v36 = vor.u32 1.1754944e-38, %v6455_v52  ;;  %vm6454_vm3 = vcmp.eq.f32.partialorder %v6453_v58, 8.507059e+37 }
0x138d   :  { %v8558_v5 = vpop.eup %8557 }
0x138e   :  { %v6428_v50 = vadd.f32 1.0, %v8558_v5 }
0x138f   :  { %v8560_v20 = vpop.eup %8559 }
0x1390   :  { %v8562_v47 = vpop.eup %8561  ;;  %v6430_v61 = vmul.f32 %v8560_v20, %v6426_v26  ;;  %8563 = vrcp.f32 %v6428_v50  ;;  %vm6435_vm12 = vweird.f32 %v8560_v20  ;;  %v6470_v39 = vand.u32 2147483648, %v6428_v50 }
0x1391   :  { %v6445_v49 = vmul.f32 %v8562_v47, %v6427_v25  ;;  %8565 = vtanh.f32 %v6416_v21  ;;  %vm6450_vm13 = vweird.f32 %v8562_v47  ;;  %vm6436_vm0 = vmor %vm6434_vm14, %vm6435_vm12  ;;  %vm6464_vm5 = vweird.f32 %v6428_v50 }
0x1392   :  { %v6431_v42 = vsub.f32 1.0, %v6430_v61  ;;  %vm6451_vm1 = vmor %vm6449_vm15, %vm6450_vm13  ;;  %v6468_v57 = vand.u32 2147483647, %v6428_v50  ;;  %v6471_v22 = vor.u32 1.1754944e-38, %v6470_v39 }
0x1393   :  { %v6446_v17 = vsub.f32 1.0, %v6445_v49  ;;  %v12798_v49 = vld [vmem:[#allocation40_spill] sm:$0xff] }
0x1394   :  { %v6432_v32 = vmul.f32 %v8560_v20, %v6431_v42  ;;  %vm6469_vm7 = vcmp.eq.f32.partialorder %v6468_v57, 8.507059e+37  ;;  %v5408_v42 = vadd.f32 %v12798_v49, %v12777_v41 }
0x1395   :  { %v6447_v54 = vmul.f32 %v8562_v47, %v6446_v17 }
0x1396   :  { %v8564_v63 = vpop.eup %8563  ;;  %v6433_v35 = vadd.f32 %v8560_v20, %v6432_v32 }
0x1397   :  { %v6460_v11 = vmul.f32 %v8564_v63, %v6428_v50  ;;  %v6448_v45 = vadd.f32 %v8562_v47, %v6447_v54  ;;  %v8566_v24 = vpop.eup %8565  ;;  %vm6465_vm4 = vweird.f32 %v8564_v63 }
0x1398   :  { %v6437_v55 = vsel %vm6436_vm0, %v8560_v20, %v6433_v35  ;;  %vm6466_vm6 = vmor %vm6464_vm5, %vm6465_vm4 }
0x1399   :  { %v6461_v0 = vsub.f32 1.0, %v6460_v11  ;;  %v6442_v19 = vsel %vm6439_vm2, %v6441_v14, %v6437_v55  ;;  %v6452_v7 = vsel %vm6451_vm1, %v8562_v47, %v6448_v45 }
0x139a   :  { %v6457_v48 = vsel %vm6454_vm3, %v6456_v36, %v6452_v7  ;;  %v6476_v16 = vmul.f32 %v8566_v24, %v6442_v19 }
0x139b   :  { %v6462_v10 = vmul.f32 %v8564_v63, %v6461_v0  ;;  %v6475_v15 = vmul.f32 %v6457_v48, %v11634_v37  ;;  %v12795_v37 = vld [vmem:[#allocation23_spill] sm:$0xff] }
0x139c   :  { %v5369_v51 = vadd.f32 %v12795_v37, %v12772_v23 }
0x139d   :  { %v11681_v2 = vadd.f32 %v6476_v16, %v6475_v15  ;;  %v6463_v43 = vadd.f32 %v8564_v63, %v6462_v10 }
0x139f   :  { %8567 = vtanh.f32 %v11681_v2  ;;  %v6467_v44 = vsel %vm6466_vm6, %v8564_v63, %v6463_v43 }
0x13a0   :  { %v6472_v31 = vsel %vm6469_vm7, %v6471_v22, %v6467_v44 }
0x13a5   :  { %v8568_v53 = vpop.eup %8567 }
0x13a6   :  { %v6479_v40 = vmul.f32 %v8568_v53, %v6472_v31 }
0x13a8   :  { %v6480_v13 = vpack.c.bf16 %v6479_v40, %v6479_v40  ;;  %v11685_v46 = vadd.f32 %v6479_v40, %v11638_v59  ;;  %v12797_v59 = vld [vmem:[#allocation39_spill] sm:$0xff] }
0x13a9   :  { %v5395_v1 = vadd.f32 %v12797_v59, %v11244_v6  ;;  %v8077_v59 = vld [vmem:[%s11747_s5 + $0x28] sm:$0xff] }
0x13aa   :  { %6494 = vmatmul.bf16.vlgmr.msra.gmra.mxu0 %v6480_v13  ;;  %6507 = vmatmul.bf16.vlgmr.msra.gmra.mxu1 %v6480_v13 }
0x13ab   :  { %6520 = vmatmul.bf16.vlgmr.msra.gmra.mxu2 %v6480_v13  ;;  %6533 = vmatmul.bf16.vlgmr.msra.gmra.mxu3 %v6480_v13 }
0x1427   :  { %v6495_v33 = vpop.f32.mrf.mxu0  ;;  %v6508_v3 = vpop.f32.mrf.mxu1 }
0x1428   :  { %v6538_v8 = vadd.f32 %v6495_v33, %v5369_v51  ;;  %v6539_v60 = vadd.f32 %v6508_v3, %v5382_v27 }
0x142a   :  { %v7810_v62 = vmul.f32 -1.442695, %v6538_v8  ;;  %v7811_v38 = vmul.f32 -1.442695, %v6539_v60 }
0x142c   :  { %8569 = vpow2.f32 %v7810_v62 }
0x142d   :  { %8571 = vpow2.f32 %v7811_v38  ;;  %v8078_v38 = vld [vmem:[%s11747_s5 + $0x30] sm:$0xff] }
0x142e   :  { %v6521_v56 = vpop.f32.mrf.mxu2  ;;  %v6534_v26 = vpop.f32.mrf.mxu3 }
0x142f   :  { %v6540_v25 = vadd.f32 %v6521_v56, %v5395_v1  ;;  %v6497_v12 = vpop.f32.mrf.mxu0  ;;  %v6510_v30 = vpop.f32.mrf.mxu1  ;;  %v6541_v52 = vadd.f32 %v6534_v26, %v5408_v42  ;;  %v12800_v56 = vld [vmem:[#allocation42_spill] sm:$0xff] }
0x1430   :  { %v5562_v26 = vadd.f32 %v12800_v56, %v12774_v9  ;;  %v12801_v9 = vld [vmem:[#allocation43_spill] sm:$0xff] }
0x1431   :  { %v7812_v5 = vmul.f32 -1.442695, %v6540_v25  ;;  %v8076_v25 = vld [vmem:[%s11747_s5 + $0x20] sm:$0xff] }
0x1432   :  { %v8570_v4 = vpop.eup %8569 }
0x1433   :  { %v8572_v18 = vpop.eup %8571  ;;  %v6551_v50 = vadd.f32 1.0, %v8570_v4  ;;  %8573 = vpow2.f32 %v7812_v5 }
0x1434   :  { %v6552_v20 = vadd.f32 1.0, %v8572_v18 }
0x1435   :  { %8575 = vrcp.f32 %v6551_v50  ;;  %v6565_v35 = vand.u32 2147483648, %v6551_v50  ;;  %v6563_v45 = vand.u32 2147483647, %v6551_v50  ;;  %vm6559_vm10 = vweird.f32 %v6551_v50 }
0x1436   :  { %8577 = vrcp.f32 %v6552_v20  ;;  %v6523_v21 = vpop.f32.mrf.mxu2  ;;  %v6536_v47 = vpop.f32.mrf.mxu3  ;;  %v6580_v11 = vand.u32 2147483648, %v6552_v20  ;;  %v6578_v55 = vand.u32 2147483647, %v6552_v20  ;;  %vm6574_vm11 = vweird.f32 %v6552_v20 }
0x1437   :  { %v6566_v7 = vor.u32 1.1754944e-38, %v6565_v35  ;;  %vm6564_vm14 = vcmp.eq.f32.partialorder %v6563_v45, 8.507059e+37  ;;  %v5575_v21 = vadd.f32 %v12801_v9, %v11244_v6  ;;  %v8072_v6 = vld [vmem:[%s11747_s5] sm:$0xff] }
0x1438   :  { %v6581_v16 = vor.u32 1.1754944e-38, %v6580_v11  ;;  %vm6579_vm15 = vcmp.eq.f32.partialorder %v6578_v55, 8.507059e+37 }
0x1439   :  { %v8574_v61 = vpop.eup %8573 }
0x143a   :  { %v6553_v17 = vadd.f32 1.0, %v8574_v61 }
0x143b   :  { %v8576_v29 = vpop.eup %8575 }
0x143c   :  { %v8578_v32 = vpop.eup %8577  ;;  %v6555_v34 = vmul.f32 %v8576_v29, %v6551_v50  ;;  %8579 = vrcp.f32 %v6553_v17  ;;  %vm6560_vm8 = vweird.f32 %v8576_v29  ;;  %v6595_v37 = vand.u32 2147483648, %v6553_v17 }
0x143d   :  { %v6570_v54 = vmul.f32 %v8578_v32, %v6552_v20  ;;  %8581 = vtanh.f32 %v6541_v52  ;;  %vm6575_vm9 = vweird.f32 %v8578_v32  ;;  %vm6561_vm12 = vmor %vm6559_vm10, %vm6560_vm8  ;;  %vm6589_vm1 = vweird.f32 %v6553_v17  ;;  %v8075_v20 = vld [vmem:[%s11747_s5 + $0x18] sm:$0xff] }
0x143e   :  { %v6556_v58 = vsub.f32 1.0, %v6555_v34  ;;  %vm6576_vm13 = vmor %vm6574_vm11, %vm6575_vm9  ;;  %v6593_v51 = vand.u32 2147483647, %v6553_v17  ;;  %v6596_v27 = vor.u32 1.1754944e-38, %v6595_v37 }
0x143f   :  { %v6571_v63 = vsub.f32 1.0, %v6570_v54 }
0x1440   :  { %v6557_v14 = vmul.f32 %v8576_v29, %v6556_v58  ;;  %vm6594_vm3 = vcmp.eq.f32.partialorder %v6593_v51, 8.507059e+37 }
0x1441   :  { %v6572_v36 = vmul.f32 %v8578_v32, %v6571_v63 }
0x1442   :  { %v8580_v24 = vpop.eup %8579  ;;  %v6558_v0 = vadd.f32 %v8576_v29, %v6557_v14  ;;  %v12802_v14 = vld [vmem:[#allocation44_spill] sm:$0xff] }
0x1443   :  { %v6585_v19 = vmul.f32 %v8580_v24, %v6553_v17  ;;  %v6573_v48 = vadd.f32 %v8578_v32, %v6572_v36  ;;  %v8582_v15 = vpop.eup %8581  ;;  %vm6590_vm0 = vweird.f32 %v8580_v24  ;;  %v5588_v45 = vadd.f32 %v12802_v14, %v12777_v41 }
0x1444   :  { %v6562_v10 = vsel %vm6561_vm12, %v8576_v29, %v6558_v0  ;;  %vm6591_vm2 = vmor %vm6589_vm1, %vm6590_vm0  ;;  %v8073_v29 = vld [vmem:[%s11747_s5 + $0x8] sm:$0xff] }
0x1445   :  { %v6586_v43 = vsub.f32 1.0, %v6585_v19  ;;  %v6567_v39 = vsel %vm6564_vm14, %v6566_v7, %v6562_v10  ;;  %v6577_v57 = vsel %vm6576_vm13, %v8578_v32, %v6573_v48 }
0x1446   :  { %v6582_v44 = vsel %vm6579_vm15, %v6581_v16, %v6577_v57  ;;  %v6601_v22 = vmul.f32 %v8582_v15, %v6567_v39 }
0x1447   :  { %v6587_v53 = vmul.f32 %v8580_v24, %v6586_v43  ;;  %v6600_v31 = vmul.f32 %v6582_v44, %v11681_v2  ;;  %v8079_v2 = vld [vmem:[%s11747_s5 + $0x38] sm:$0xff] }
0x1448   :  { %6801 = vmatpush.bf16.msra.mxu0 %v8079_v2 }
0x1449   :  { %v11696_v40 = vadd.f32 %v6601_v22, %v6600_v31  ;;  %v6588_v13 = vadd.f32 %v8580_v24, %v6587_v53 }
0x144b   :  { %8583 = vtanh.f32 %v11696_v40  ;;  %v6592_v28 = vsel %vm6591_vm2, %v8580_v24, %v6588_v13 }
0x144c   :  { %v6597_v3 = vsel %vm6594_vm3, %v6596_v27, %v6592_v28  ;;  %6802 = vmatpush.bf16.msra.mxu0 %v8078_v38 }
0x1450   :  { %6803 = vmatpush.bf16.msra.mxu0 %v8077_v59 }
0x1451   :  { %v8584_v33 = vpop.eup %8583 }
0x1452   :  { %v6604_v8 = vmul.f32 %v8584_v33, %v6597_v3 }
0x1454   :  { %v6605_v60 = vpack.c.bf16 %v6604_v8, %v6604_v8  ;;  %v11700_v62 = vadd.f32 %v6604_v8, %v11685_v46  ;;  %v12799_v46 = vld [vmem:[#allocation41_spill] sm:$0xff]  ;;  %6804 = vmatpush.bf16.msra.mxu0 %v8076_v25 }
0x1455   :  { %v5549_v1 = vadd.f32 %v12799_v46, %v12772_v23  ;;  %v8074_v23 = vld [vmem:[%s11747_s5 + $0x10] sm:$0xff] }
0x1456   :  { %6619 = vmatmul.bf16.vlgmr.msrb.gmra.mxu0 %v6605_v60  ;;  %6632 = vmatmul.bf16.vlgmr.msrb.gmra.mxu1 %v6605_v60 }
0x1457   :  { %6645 = vmatmul.bf16.vlgmr.msrb.gmra.mxu2 %v6605_v60  ;;  %6658 = vmatmul.bf16.vlgmr.msrb.gmra.mxu3 %v6605_v60 }
0x1458   :  { %6805 = vmatpush.bf16.msra.mxu0 %v8075_v20 }
0x145c   :  { %6806 = vmatpush.bf16.msra.mxu0 %v8074_v23 }
0x1460   :  { %6807 = vmatpush.bf16.msra.mxu0 %v8073_v29 }
0x1464   :  { %6808 = vmatpush.bf16.msra.mxu0 %v8072_v6 }
0x14d3   :  { %v6620_v12 = vpop.f32.mrf.mxu0  ;;  %v6633_v30 = vpop.f32.mrf.mxu1 }
0x14d4   :  { %v6663_v5 = vadd.f32 %v6620_v12, %v5549_v1  ;;  %v6664_v4 = vadd.f32 %v6633_v30, %v5562_v26 }
0x14d6   :  { %v7813_v18 = vmul.f32 -1.442695, %v6663_v5  ;;  %v7814_v50 = vmul.f32 -1.442695, %v6664_v4 }
0x14d8   :  { %8585 = vpow2.f32 %v7813_v18 }
0x14d9   :  { %8587 = vpow2.f32 %v7814_v50 }
0x14da   :  { %v6646_v47 = vpop.f32.mrf.mxu2  ;;  %v6659_v61 = vpop.f32.mrf.mxu3 }
0x14db   :  { %v6665_v49 = vadd.f32 %v6646_v47, %v5575_v21  ;;  %v6622_v42 = vpop.f32.mrf.mxu0  ;;  %v6635_v17 = vpop.f32.mrf.mxu1  ;;  %v6666_v24 = vadd.f32 %v6659_v61, %v5588_v45 }
0x14dd   :  { %v7815_v52 = vmul.f32 -1.442695, %v6665_v49 }
0x14de   :  { %v8586_v32 = vpop.eup %8585 }
0x14df   :  { %v8588_v34 = vpop.eup %8587  ;;  %v6676_v54 = vadd.f32 1.0, %v8586_v32  ;;  %8589 = vpow2.f32 %v7815_v52 }
0x14e0   :  { %v6677_v58 = vadd.f32 1.0, %v8588_v34 }
0x14e1   :  { %8591 = vrcp.f32 %v6676_v54  ;;  %v6690_v10 = vand.u32 2147483648, %v6676_v54  ;;  %v6688_v39 = vand.u32 2147483647, %v6676_v54  ;;  %vm6684_vm6 = vweird.f32 %v6676_v54 }
0x14e2   :  { %8593 = vrcp.f32 %v6677_v58  ;;  %v6648_v63 = vpop.f32.mrf.mxu2  ;;  %v6661_v35 = vpop.f32.mrf.mxu3  ;;  %v6705_v15 = vand.u32 2147483648, %v6677_v58  ;;  %v6703_v44 = vand.u32 2147483647, %v6677_v58  ;;  %vm6699_vm7 = vweird.f32 %v6677_v58 }
0x14e3   :  { %v6691_v31 = vor.u32 1.1754944e-38, %v6690_v10  ;;  %vm6689_vm10 = vcmp.eq.f32.partialorder %v6688_v39, 8.507059e+37 }
0x14e4   :  { %v6706_v37 = vor.u32 1.1754944e-38, %v6705_v15  ;;  %vm6704_vm11 = vcmp.eq.f32.partialorder %v6703_v44, 8.507059e+37 }
0x14e5   :  { %v8590_v11 = vpop.eup %8589 }
0x14e6   :  { %v6678_v36 = vadd.f32 1.0, %v8590_v11 }
0x14e7   :  { %v8592_v55 = vpop.eup %8591 }
0x14e8   :  { %v8594_v0 = vpop.eup %8593  ;;  %v6680_v19 = vmul.f32 %v8592_v55, %v6676_v54  ;;  %8595 = vrcp.f32 %v6678_v36  ;;  %vm6685_vm4 = vweird.f32 %v8592_v55  ;;  %v6720_v1 = vand.u32 2147483648, %v6678_v36 }
0x14e9   :  { %v6695_v7 = vmul.f32 %v8594_v0, %v6677_v58  ;;  %8597 = vtanh.f32 %v6666_v24  ;;  %vm6700_vm5 = vweird.f32 %v8594_v0  ;;  %vm6686_vm8 = vmor %vm6684_vm6, %vm6685_vm4  ;;  %vm6714_vm13 = vweird.f32 %v6678_v36 }
0x14ea   :  { %v6681_v48 = vsub.f32 1.0, %v6680_v19  ;;  %vm6701_vm9 = vmor %vm6699_vm7, %vm6700_vm5  ;;  %v6718_v56 = vand.u32 2147483647, %v6678_v36  ;;  %v6721_v25 = vor.u32 1.1754944e-38, %v6720_v1 }
0x14eb   :  { %v6696_v16 = vsub.f32 1.0, %v6695_v7 }
0x14ec   :  { %v6682_v43 = vmul.f32 %v8592_v55, %v6681_v48  ;;  %vm6719_vm15 = vcmp.eq.f32.partialorder %v6718_v56, 8.507059e+37 }
0x14ed   :  { %v6697_v57 = vmul.f32 %v8594_v0, %v6696_v16 }
0x14ee   :  { %v8596_v22 = vpop.eup %8595  ;;  %v6683_v41 = vadd.f32 %v8592_v55, %v6682_v43 }
0x14ef   :  { %v6710_v53 = vmul.f32 %v8596_v22, %v6678_v36  ;;  %v6698_v13 = vadd.f32 %v8594_v0, %v6697_v57  ;;  %v8598_v28 = vpop.eup %8597  ;;  %vm6715_vm12 = vweird.f32 %v8596_v22 }
0x14f0   :  { %v6687_v51 = vsel %vm6686_vm8, %v8592_v55, %v6683_v41  ;;  %vm6716_vm14 = vmor %vm6714_vm13, %vm6715_vm12 }
0x14f1   :  { %v6711_v27 = vsub.f32 1.0, %v6710_v53  ;;  %v6692_v33 = vsel %vm6689_vm10, %v6691_v31, %v6687_v51  ;;  %v6702_v3 = vsel %vm6701_vm9, %v8594_v0, %v6698_v13 }
0x14f2   :  { %v6707_v8 = vsel %vm6704_vm11, %v6706_v37, %v6702_v3  ;;  %v6726_v60 = vmul.f32 %v8598_v28, %v6692_v33 }
0x14f3   :  { %v6712_v2 = vmul.f32 %v8596_v22, %v6711_v27  ;;  %v6725_v38 = vmul.f32 %v6707_v8, %v11696_v40  ;;  %v8088_v40 = vld [vmem:[%s11748_s6] ss:$0 sm:$0xff] }
0x14f5   :  { %v6727_v59 = vadd.f32 %v6726_v60, %v6725_v38  ;;  %v6713_v46 = vadd.f32 %v8596_v22, %v6712_v2 }
0x14f7   :  { %8599 = vtanh.f32 %v6727_v59  ;;  %v6717_v26 = vsel %vm6716_vm14, %v8596_v22, %v6713_v46 }
0x14f8   :  { %v6722_v30 = vsel %vm6719_vm15, %v6721_v25, %v6717_v26 }
0x14fd   :  { %v8600_v12 = vpop.eup %8599 }
0x14fe   :  { %v6729_v5 = vmul.f32 %v8600_v12, %v6722_v30 }
0x1500   :  { %v6730_v4 = vadd.f32 %v6729_v5, %v11700_v62 }
0x1502   :  { %v6731_v18 = vmul.f32 0.125, %v6730_v4 }
0x1504   :  { %v6732_v50 = vpack.c.bf16 %v6731_v18, %v6731_v18 }
0x1506   :  { %6809 = vmatmul.bf16.vlgmr.msra.gmra.mxu0 %v6732_v50 }
0x1583   :  { %v6810_v20 = vpop.f32.mrf.mxu0 }
0x1584   :  { %v6811_v23 = vadd.f32 %v8088_v40, %v6810_v20 }
0x1586   :  { %6814 = vst [vmem:[%s11749_s7] sm:$0xff] %v6811_v23 }
0x158b   :  { %v6812_v9 = vpop.f32.mrf.mxu0 }
0x158c   :  { %6819 = vsyncpa [#allocation5], 1 }
0x158d   :  { %6820 = vsyncpa [#allocation7], 1 }

</bundles_post_ra>
